<compile_context>
chip_gen: v7x
topology: tpu7x:2x2x1
jax: 0.10.0
libtpu: 0.0.40
codegen_flags: <defaults>
</compile_context>

<pallas_src>
import numpy as np
import jax
import jax.numpy as jnp
from jax.experimental import pallas as pl
from jax.experimental.pallas import tpu as pltpu

NEG_SLOPE_ATT = 0.2    # GATv2 internal attention LeakyReLU
NEG_SLOPE_ACT = 0.01   # nn.LeakyReLU() default


# ----------------------------------------------------------------------------
# In-kernel helpers
# ----------------------------------------------------------------------------
def _leaky(x, slope):
    return jnp.where(x >= 0, x, slope * x)


def _gat_layer(h, mask_bias, e0, e1, wlr, blr, we, attA, bias, expE,
               *, concat, apply_leaky):
    """One GATv2Conv layer on a dense adjacency (operates on values, not refs)."""
    N = h.shape[0]
    HF = attA.shape[0]           # heads * out_channels
    H = attA.shape[1]            # heads

    # fused lin_l | lin_r projection (single matmul), then static lane split
    x_lr = jnp.dot(h, wlr, preferred_element_type=jnp.float32) + blr   # [N, 2*HF]
    x_l = x_lr[:, :HF]
    x_r = x_lr[:, HF:]

    # lin_edge (edge_dim == 2, bias=False): two lane-broadcast FMAs
    e_proj = (e0[:, :, None] * we[0][None, None, :]
              + e1[:, :, None] * we[1][None, None, :])                 # [Nt, Ns, HF]

    # g[t, s] = LeakyReLU_0.2( x_l[s] + x_r[t] + e_proj[t, s] )
    g = _leaky(x_l[None, :, :] + x_r[:, None, :] + e_proj, NEG_SLOPE_ATT)

    # per-head attention logits via block-diagonal att matrix [HF, H];
    # additive mask (-1e30 on non-edges) replaces select-based masking.
    score = jnp.dot(g.reshape(N * N, HF), attA,
                    preferred_element_type=jnp.float32).reshape(N, N, H)
    score = score + mask_bias[:, :, None]
    score = score - jnp.max(score, axis=1, keepdims=True)   # softmax over sources
    p = jnp.exp(score)                                       # masked -> exp(-1e30) = 0
    inv = pl.reciprocal(jnp.sum(p, axis=1, keepdims=True), approx=True)
    alpha = p * inv                                          # [Nt, Ns, H]

    if concat:
        # expand per-head alpha to per-feature columns (expE[h, h*F:(h+1)*F] = 1)
        alpha_feat = jnp.dot(alpha.reshape(N * N, H), expE,
                             preferred_element_type=jnp.float32).reshape(N, N, HF)
    else:
        alpha_feat = alpha                                   # out_channels == 1 -> HF == H
    out_flat = jnp.sum(alpha_feat * x_l[None, :, :], axis=1)  # [Nt, HF]

    if concat:
        out = out_flat + bias                                 # R == identity: skip matmul
    else:
        out = jnp.mean(out_flat, axis=-1, keepdims=True) + bias   # head mean, [Nt, 1]
    if apply_leaky:
        out = _leaky(out, NEG_SLOPE_ACT)
    return out


def _neuromusx_kernel(x_ref, mb_ref, e0_ref, e1_ref, sel_ref, expE_ref,
                      wlr0_ref, blr0_ref, we0_ref, attA0_ref, bias0_ref,
                      gamma_ref, beta_ref,
                      wlrS_ref, blrS_ref, weS_ref, attAS_ref, biasS_ref,
                      wlrH_ref, blrH_ref, weH_ref, attAH_ref, biasH_ref,
                      mus_ref, sat_ref):
    mb = mb_ref[...]            # [N, N] additive attention mask (0 / -1e30)
    e0 = e0_ref[...]            # [N, N] edge-attr plane 0
    e1 = e1_ref[...]            # [N, N] edge-attr plane 1
    expE = expE_ref[...]        # [H, HF] head -> feature expansion

    # --- gcn: GATv2Conv(2 -> 4, heads=16, concat=True) ---
    h = _gat_layer(x_ref[...], mb, e0, e1,
                   wlr0_ref[...], blr0_ref[...], we0_ref[...], attA0_ref[...],
                   bias0_ref[...], expE, concat=True, apply_leaky=False)

    # --- BatchNorm(64) (training-mode batch stats) + LeakyReLU ---
    mean = jnp.mean(h, axis=0, keepdims=True)
    var = jnp.mean(jnp.square(h - mean), axis=0, keepdims=True)
    h = (h - mean) * jax.lax.rsqrt(var + 1e-5) * gamma_ref[...] + beta_ref[...]
    h = _leaky(h, NEG_SLOPE_ACT)

    # --- 10x gcn_main: stacked weights, h stays resident on-chip ---
    def body(i, hc):
        return _gat_layer(hc, mb, e0, e1,
                          wlrS_ref[i], blrS_ref[i], weS_ref[i],
                          attAS_ref[i], biasS_ref[i],
                          expE, concat=True, apply_leaky=True)
    h = jax.lax.fori_loop(0, wlrS_ref.shape[0], body, h)

    # --- heads: sbs (index 0) and final (index 1), concat=False ---
    mus = _gat_layer(h, mb, e0, e1,
                     wlrH_ref[0], blrH_ref[0], weH_ref[0], attAH_ref[0],
                     biasH_ref[0], None, concat=False, apply_leaky=False)
    fin = _gat_layer(h, mb, e0, e1,
                     wlrH_ref[1], blrH_ref[1], weH_ref[1], attAH_ref[1],
                     biasH_ref[1], None, concat=False, apply_leaky=False)
    mus_ref[...] = mus

    # masked global mean pool: sel[g, n] = 1 iff batch[n] == g and mask[n] == 0
    sel = sel_ref[...]
    sums = jnp.dot(sel, fin, preferred_element_type=jnp.float32)   # [G, 1]
    counts = jnp.sum(sel, axis=1, keepdims=True)
    sat_ref[...] = sums * pl.reciprocal(counts, approx=True)


# ----------------------------------------------------------------------------
# Wrapper
# ----------------------------------------------------------------------------
def neuromusx_forward(data, params):
    N = data["x"].shape[0]
    G = data["sel"].shape[0]
    args = (data["x"], data["mask_bias"], data["e0"], data["e1"], data["sel"],
            params["expE"],
            params["gcn"]["wlr"], params["gcn"]["blr"], params["gcn"]["we"],
            params["gcn"]["attA"], params["gcn"]["bias"],
            params["bn_gamma"], params["bn_beta"],
            params["mainS"]["wlr"], params["mainS"]["blr"], params["mainS"]["we"],
            params["mainS"]["attA"], params["mainS"]["bias"],
            params["headS"]["wlr"], params["headS"]["blr"], params["headS"]["we"],
            params["headS"]["attA"], params["headS"]["bias"])
    vmem = lambda: pl.BlockSpec(memory_space=pltpu.MemorySpace.VMEM)
    mus, sat = pl.pallas_call(
        _neuromusx_kernel,
        out_shape=(jax.ShapeDtypeStruct((N, 1), jnp.float32),
                   jax.ShapeDtypeStruct((G, 1), jnp.float32)),
        in_specs=[vmem() for _ in range(len(args))],
        out_specs=(vmem(), vmem()),
    )(*args)
    # TODO(synk): for large N, tile over target nodes with a grid instead of the
    # monolithic no-grid call (g/score are O(N^2 * HF) in VMEM).
    return mus[:, 0], sat[:, 0]


# ----------------------------------------------------------------------------
# Parameter construction (deterministic, synthetic)
# ----------------------------------------------------------------------------
def _glorot(key, shape):
    limit = float(np.sqrt(6.0 / (shape[0] + shape[1])))
    return jax.random.uniform(key, shape, jnp.float32, -limit, limit)


def init_gat_params(key, f_in, f_out, heads, concat, edge_dim=2):
    HF = heads * f_out
    ks = jax.random.split(key, 4)
    wl = _glorot(ks[0], (f_in, HF))
    wr = _glorot(ks[1], (f_in, HF))
    we = _glorot(ks[2], (edge_dim, HF))
    att = np.asarray(_glorot(ks[3], (heads, f_out)))

    attA = np.zeros((HF, heads), np.float32)          # block-diagonal att matrix
    for h in range(heads):
        attA[h * f_out:(h + 1) * f_out, h] = att[h]
    out_dim = HF if concat else f_out

    return dict(
        wlr=jnp.concatenate([wl, wr], axis=1),        # fused lin_l | lin_r
        blr=jnp.zeros((1, 2 * HF), jnp.float32),
        we=we,
        attA=jnp.asarray(attA),
        bias=jnp.zeros((1, out_dim), jnp.float32),
    )


# ----------------------------------------------------------------------------
# Main
# ----------------------------------------------------------------------------
if __name__ == "__main__":
    N, G = 16, 2                 # 2 graphs of 8 nodes each
    F_IN, HEADS, F_HID = 2, 16, 4
    ITERATIONS = 10
    HF = HEADS * F_HID

    key = jax.random.PRNGKey(0)
    k_x, k_e, k_p = jax.random.split(key, 3)

    # node features [N, 2]
    x = jax.random.normal(k_x, (N, F_IN), jnp.float32)

    # edge_index: directed ring within each 8-node graph (both directions)
    src, dst = [], []
    for g in range(G):
        o = g * 8
        for i in range(8):
            s, t = o + i, o + (i + 1) % 8
            src += [s, t]
            dst += [t, s]
    E = len(src)
    edge_attr = np.asarray(jax.random.normal(k_e, (E, 2), jnp.float32))

    # densify: adjacency + two lane-dense edge-attribute planes [N, N]
    adj = np.zeros((N, N), np.float32)
    e0 = np.zeros((N, N), np.float32)
    e1 = np.zeros((N, N), np.float32)
    for k in range(E):
        adj[dst[k], src[k]] = 1.0
        e0[dst[k], src[k]] = edge_attr[k, 0]
        e1[dst[k], src[k]] = edge_attr[k, 1]
    # add_self_loops(fill_value='mean'): per-TARGET mean of incoming edge attrs
    for n in range(N):
        inc = [k for k in range(E) if dst[k] == n]
        fill = edge_attr[inc].mean(axis=0) if inc else np.zeros((2,), np.float32)
        adj[n, n] = 1.0
        e0[n, n] = fill[0]
        e1[n, n] = fill[1]
    mask_bias = np.where(adj > 0, 0.0, -1e30).astype(np.float32)

    # data.mask (1 = excluded from SAT pooling), data.batch (graph id per node)
    node_mask = np.zeros((N,), np.float32)
    node_mask[[3, 11]] = 1.0
    batch = np.arange(N) // 8
    sel = np.zeros((G, N), np.float32)
    for n in range(N):
        if node_mask[n] == 0:
            sel[batch[n], n] = 1.0

    data = dict(
        x=x,
        mask_bias=jnp.asarray(mask_bias),
        e0=jnp.asarray(e0),
        e1=jnp.asarray(e1),
        sel=jnp.asarray(sel),
    )

    # parameters
    ks = jax.random.split(k_p, 3 + ITERATIONS)
    gcn_p = init_gat_params(ks[0], F_IN, F_HID, HEADS, concat=True)
    main_ps = [init_gat_params(ks[3 + i], HF, F_HID, HEADS, concat=True)
               for i in range(ITERATIONS)]
    head_ps = [init_gat_params(ks[1], HF, 1, HEADS, concat=False),   # sbs
               init_gat_params(ks[2], HF, 1, HEADS, concat=False)]   # final

    expE = np.zeros((HEADS, HF), np.float32)          # head -> feature expansion
    for h in range(HEADS):
        expE[h, h * F_HID:(h + 1) * F_HID] = 1.0

    params = dict(
        gcn=gcn_p,
        mainS={k: jnp.stack([p[k] for p in main_ps]) for k in main_ps[0]},
        headS={k: jnp.stack([p[k] for p in head_ps]) for k in head_ps[0]},
        expE=jnp.asarray(expE),
        bn_gamma=jnp.ones((1, HF), jnp.float32),
        bn_beta=jnp.zeros((1, HF), jnp.float32),
    )

    x_out_mus, x_out_sat = neuromusx_forward(data, params)
    jax.block_until_ready((x_out_mus, x_out_sat))

    assert x_out_mus.shape == (N,), x_out_mus.shape
    assert x_out_sat.shape == (G,), x_out_sat.shape
    assert np.all(np.isfinite(np.asarray(x_out_mus)))
    assert np.all(np.isfinite(np.asarray(x_out_sat)))
    print("KERNEL_OK")
</pallas_src>

<mosaic_0001>
module attributes {stable_mosaic.version = 11 : i64} {
  func.func @_neuromusx_kernel(%arg0: memref<16x2xf32, #tpu.memory_space<vmem>>, %arg1: memref<16x16xf32, #tpu.memory_space<vmem>>, %arg2: memref<16x16xf32, #tpu.memory_space<vmem>>, %arg3: memref<16x16xf32, #tpu.memory_space<vmem>>, %arg4: memref<2x16xf32, #tpu.memory_space<vmem>>, %arg5: memref<16x64xf32, #tpu.memory_space<vmem>>, %arg6: memref<2x128xf32, #tpu.memory_space<vmem>>, %arg7: memref<1x128xf32, #tpu.memory_space<vmem>>, %arg8: memref<2x64xf32, #tpu.memory_space<vmem>>, %arg9: memref<64x16xf32, #tpu.memory_space<vmem>>, %arg10: memref<1x64xf32, #tpu.memory_space<vmem>>, %arg11: memref<1x64xf32, #tpu.memory_space<vmem>>, %arg12: memref<1x64xf32, #tpu.memory_space<vmem>>, %arg13: memref<10x64x128xf32, #tpu.memory_space<vmem>>, %arg14: memref<10x1x128xf32, #tpu.memory_space<vmem>>, %arg15: memref<10x2x64xf32, #tpu.memory_space<vmem>>, %arg16: memref<10x64x16xf32, #tpu.memory_space<vmem>>, %arg17: memref<10x1x64xf32, #tpu.memory_space<vmem>>, %arg18: memref<2x64x32xf32, #tpu.memory_space<vmem>>, %arg19: memref<2x1x32xf32, #tpu.memory_space<vmem>>, %arg20: memref<2x2x16xf32, #tpu.memory_space<vmem>>, %arg21: memref<2x16x16xf32, #tpu.memory_space<vmem>>, %arg22: memref<2x1x1xf32, #tpu.memory_space<vmem>>, %arg23: memref<16x1xf32, #tpu.memory_space<vmem>>, %arg24: memref<2x1xf32, #tpu.memory_space<vmem>>) attributes {dimension_semantics = [], scalar_prefetch = 0 : i64, scratch_operands = 0 : i64, tpu.core_type = #tpu.core_type<tc>} {
    %c0 = arith.constant 0 : index
    %c0_0 = arith.constant 0 : index
    %0 = vector.load %arg1[%c0, %c0_0] : memref<16x16xf32, #tpu.memory_space<vmem>>, vector<16x16xf32>
    %c0_1 = arith.constant 0 : index
    %c0_2 = arith.constant 0 : index
    %1 = vector.load %arg2[%c0_1, %c0_2] : memref<16x16xf32, #tpu.memory_space<vmem>>, vector<16x16xf32>
    %c0_3 = arith.constant 0 : index
    %c0_4 = arith.constant 0 : index
    %2 = vector.load %arg3[%c0_3, %c0_4] : memref<16x16xf32, #tpu.memory_space<vmem>>, vector<16x16xf32>
    %c0_5 = arith.constant 0 : index
    %c0_6 = arith.constant 0 : index
    %3 = vector.load %arg5[%c0_5, %c0_6] : memref<16x64xf32, #tpu.memory_space<vmem>>, vector<16x64xf32>
    %c0_7 = arith.constant 0 : index
    %c0_8 = arith.constant 0 : index
    %4 = vector.load %arg0[%c0_7, %c0_8] : memref<16x2xf32, #tpu.memory_space<vmem>>, vector<16x2xf32>
    %c0_9 = arith.constant 0 : index
    %c0_10 = arith.constant 0 : index
    %5 = vector.load %arg6[%c0_9, %c0_10] : memref<2x128xf32, #tpu.memory_space<vmem>>, vector<2x128xf32>
    %c0_11 = arith.constant 0 : index
    %c0_12 = arith.constant 0 : index
    %6 = vector.load %arg7[%c0_11, %c0_12] : memref<1x128xf32, #tpu.memory_space<vmem>>, vector<1x128xf32>
    %c0_13 = arith.constant 0 : index
    %c0_14 = arith.constant 0 : index
    %7 = vector.load %arg8[%c0_13, %c0_14] : memref<2x64xf32, #tpu.memory_space<vmem>>, vector<2x64xf32>
    %c0_15 = arith.constant 0 : index
    %c0_16 = arith.constant 0 : index
    %8 = vector.load %arg9[%c0_15, %c0_16] : memref<64x16xf32, #tpu.memory_space<vmem>>, vector<64x16xf32>
    %c0_17 = arith.constant 0 : index
    %c0_18 = arith.constant 0 : index
    %9 = vector.load %arg10[%c0_17, %c0_18] : memref<1x64xf32, #tpu.memory_space<vmem>>, vector<1x64xf32>
    %cst = arith.constant dense<0.000000e+00> : vector<16x128xf32>
    %10 = tpu.matmul %4, %5, %cst {dimension_numbers = #tpu.dot_dimension_numbers<[1], [0], [0], [1], [0, 0, 1, 1], [], []>} : vector<16x2xf32>, vector<2x128xf32>, vector<16x128xf32> -> vector<16x128xf32>
    %11 = vector.broadcast %6 : vector<1x128xf32> to vector<16x128xf32>
    %12 = arith.addf %10, %11 : vector<16x128xf32>
    %13 = vector.extract_strided_slice %12 {offsets = [0, 0], sizes = [16, 64], strides = [1, 1]} : vector<16x128xf32> to vector<16x64xf32>
    %14 = vector.extract_strided_slice %12 {offsets = [0, 64], sizes = [16, 64], strides = [1, 1]} : vector<16x128xf32> to vector<16x64xf32>
    %15 = vector.shape_cast %1 : vector<16x16xf32> to vector<16x16x1xf32>
    %16 = vector.extract_strided_slice %7 {offsets = [0, 0], sizes = [1, 64], strides = [1, 1]} : vector<2x64xf32> to vector<1x64xf32>
    %17 = vector.shape_cast %16 : vector<1x64xf32> to vector<64xf32>
    %18 = vector.shape_cast %17 : vector<64xf32> to vector<1x1x64xf32>
    %19 = vector.broadcast %15 : vector<16x16x1xf32> to vector<16x16x64xf32>
    %20 = vector.broadcast %18 : vector<1x1x64xf32> to vector<16x16x64xf32>
    %21 = arith.mulf %19, %20 : vector<16x16x64xf32>
    %22 = vector.shape_cast %2 : vector<16x16xf32> to vector<16x16x1xf32>
    %23 = vector.extract_strided_slice %7 {offsets = [1, 0], sizes = [1, 64], strides = [1, 1]} : vector<2x64xf32> to vector<1x64xf32>
    %24 = vector.shape_cast %23 : vector<1x64xf32> to vector<64xf32>
    %25 = vector.shape_cast %24 : vector<64xf32> to vector<1x1x64xf32>
    %26 = vector.broadcast %22 : vector<16x16x1xf32> to vector<16x16x64xf32>
    %27 = vector.broadcast %25 : vector<1x1x64xf32> to vector<16x16x64xf32>
    %28 = arith.mulf %26, %27 : vector<16x16x64xf32>
    %29 = arith.addf %21, %28 : vector<16x16x64xf32>
    %30 = vector.shape_cast %13 : vector<16x64xf32> to vector<1x16x64xf32>
    %31 = vector.shape_cast %14 : vector<16x64xf32> to vector<16x1x64xf32>
    %32 = vector.broadcast %30 : vector<1x16x64xf32> to vector<16x16x64xf32>
    %33 = vector.broadcast %31 : vector<16x1x64xf32> to vector<16x16x64xf32>
    %34 = arith.addf %32, %33 : vector<16x16x64xf32>
    %35 = arith.addf %34, %29 : vector<16x16x64xf32>
    %cst_19 = arith.constant 0.000000e+00 : f32
    %36 = vector.broadcast %cst_19 : f32 to vector<16x16x64xf32>
    %37 = arith.cmpf oge, %35, %36 : vector<16x16x64xf32>
    %cst_20 = arith.constant 2.000000e-01 : f32
    %38 = vector.broadcast %cst_20 : f32 to vector<16x16x64xf32>
    %39 = arith.mulf %38, %35 : vector<16x16x64xf32>
    %40 = arith.select %37, %35, %39 : vector<16x16x64xi1>, vector<16x16x64xf32>
    %41 = vector.shape_cast %40 : vector<16x16x64xf32> to vector<256x64xf32>
    %cst_21 = arith.constant dense<0.000000e+00> : vector<256x16xf32>
    %42 = tpu.matmul %41, %8, %cst_21 {dimension_numbers = #tpu.dot_dimension_numbers<[1], [0], [0], [1], [0, 0, 1, 1], [], []>} : vector<256x64xf32>, vector<64x16xf32>, vector<256x16xf32> -> vector<256x16xf32>
    %43 = vector.shape_cast %42 : vector<256x16xf32> to vector<16x16x16xf32>
    %44 = vector.shape_cast %0 : vector<16x16xf32> to vector<16x16x1xf32>
    %45 = vector.broadcast %44 : vector<16x16x1xf32> to vector<16x16x16xf32>
    %46 = arith.addf %43, %45 : vector<16x16x16xf32>
    %cst_22 = arith.constant dense<0xFF800000> : vector<16x16xf32>
    %47 = vector.multi_reduction <maximumf>, %46, %cst_22 [1] : vector<16x16x16xf32> to vector<16x16xf32>
    %48 = vector.shape_cast %47 : vector<16x16xf32> to vector<16x1x16xf32>
    %49 = vector.broadcast %48 : vector<16x1x16xf32> to vector<16x16x16xf32>
    %50 = arith.subf %46, %49 : vector<16x16x16xf32>
    %51 = math.exp %50 : vector<16x16x16xf32>
    %cst_23 = arith.constant dense<0.000000e+00> : vector<16x16xf32>
    %52 = vector.multi_reduction <add>, %51, %cst_23 [1] : vector<16x16x16xf32> to vector<16x16xf32>
    %53 = vector.shape_cast %52 : vector<16x16xf32> to vector<16x1x16xf32>
    %54 = tpu.reciprocal %53 {approx = true} : vector<16x1x16xf32> -> vector<16x1x16xf32>
    %55 = vector.broadcast %54 : vector<16x1x16xf32> to vector<16x16x16xf32>
    %56 = arith.mulf %51, %55 : vector<16x16x16xf32>
    %57 = vector.shape_cast %56 : vector<16x16x16xf32> to vector<256x16xf32>
    %cst_24 = arith.constant dense<0.000000e+00> : vector<256x64xf32>
    %58 = tpu.matmul %57, %3, %cst_24 {dimension_numbers = #tpu.dot_dimension_numbers<[1], [0], [0], [1], [0, 0, 1, 1], [], []>} : vector<256x16xf32>, vector<16x64xf32>, vector<256x64xf32> -> vector<256x64xf32>
    %59 = vector.shape_cast %58 : vector<256x64xf32> to vector<16x16x64xf32>
    %60 = vector.shape_cast %13 : vector<16x64xf32> to vector<1x16x64xf32>
    %61 = vector.broadcast %60 : vector<1x16x64xf32> to vector<16x16x64xf32>
    %62 = arith.mulf %59, %61 : vector<16x16x64xf32>
    %cst_25 = arith.constant dense<0.000000e+00> : vector<16x64xf32>
    %63 = vector.multi_reduction <add>, %62, %cst_25 [1] : vector<16x16x64xf32> to vector<16x64xf32>
    %64 = vector.broadcast %9 : vector<1x64xf32> to vector<16x64xf32>
    %65 = arith.addf %63, %64 : vector<16x64xf32>
    %cst_26 = arith.constant dense<0.000000e+00> : vector<64xf32>
    %66 = vector.multi_reduction <add>, %65, %cst_26 [0] : vector<16x64xf32> to vector<64xf32>
    %67 = vector.shape_cast %66 : vector<64xf32> to vector<1x64xf32>
    %cst_27 = arith.constant 1.600000e+01 : f32
    %68 = vector.broadcast %cst_27 : f32 to vector<1x64xf32>
    %69 = arith.divf %67, %68 : vector<1x64xf32>
    %70 = vector.broadcast %69 : vector<1x64xf32> to vector<16x64xf32>
    %71 = arith.subf %65, %70 : vector<16x64xf32>
    %72 = arith.mulf %71, %71 : vector<16x64xf32>
    %cst_28 = arith.constant dense<0.000000e+00> : vector<64xf32>
    %73 = vector.multi_reduction <add>, %72, %cst_28 [0] : vector<16x64xf32> to vector<64xf32>
    %74 = vector.shape_cast %73 : vector<64xf32> to vector<1x64xf32>
    %cst_29 = arith.constant 1.600000e+01 : f32
    %75 = vector.broadcast %cst_29 : f32 to vector<1x64xf32>
    %76 = arith.divf %74, %75 : vector<1x64xf32>
    %77 = vector.broadcast %69 : vector<1x64xf32> to vector<16x64xf32>
    %78 = arith.subf %65, %77 : vector<16x64xf32>
    %cst_30 = arith.constant 9.99999974E-6 : f32
    %79 = vector.broadcast %cst_30 : f32 to vector<1x64xf32>
    %80 = arith.addf %76, %79 : vector<1x64xf32>
    %81 = math.rsqrt %80 : vector<1x64xf32>
    %82 = vector.broadcast %81 : vector<1x64xf32> to vector<16x64xf32>
    %83 = arith.mulf %78, %82 : vector<16x64xf32>
    %c0_31 = arith.constant 0 : index
    %c0_32 = arith.constant 0 : index
    %84 = vector.load %arg11[%c0_31, %c0_32] : memref<1x64xf32, #tpu.memory_space<vmem>>, vector<1x64xf32>
    %85 = vector.broadcast %84 : vector<1x64xf32> to vector<16x64xf32>
    %86 = arith.mulf %83, %85 : vector<16x64xf32>
    %c0_33 = arith.constant 0 : index
    %c0_34 = arith.constant 0 : index
    %87 = vector.load %arg12[%c0_33, %c0_34] : memref<1x64xf32, #tpu.memory_space<vmem>>, vector<1x64xf32>
    %88 = vector.broadcast %87 : vector<1x64xf32> to vector<16x64xf32>
    %89 = arith.addf %86, %88 : vector<16x64xf32>
    %cst_35 = arith.constant 0.000000e+00 : f32
    %90 = vector.broadcast %cst_35 : f32 to vector<16x64xf32>
    %91 = arith.cmpf oge, %89, %90 : vector<16x64xf32>
    %cst_36 = arith.constant 0.00999999977 : f32
    %92 = vector.broadcast %cst_36 : f32 to vector<16x64xf32>
    %93 = arith.mulf %92, %89 : vector<16x64xf32>
    %94 = arith.select %91, %89, %93 : vector<16x64xi1>, vector<16x64xf32>
    %c0_i32 = arith.constant 0 : i32
    %c10_i32 = arith.constant 10 : i32
    %95 = arith.addi %c0_i32, %c10_i32 : i32
    %c1_i32 = arith.constant 1 : i32
    %96 = scf.for %arg25 = %c0_i32 to %95 step %c1_i32 iter_args(%arg26 = %94) -> (vector<16x64xf32>)  : i32 {
      %239 = arith.index_cast %arg25 : i32 to index
      %c0_93 = arith.constant 0 : index
      %c0_94 = arith.constant 0 : index
      %240 = vector.load %arg13[%239, %c0_93, %c0_94] : memref<10x64x128xf32, #tpu.memory_space<vmem>>, vector<1x64x128xf32>
      %241 = vector.shape_cast %240 : vector<1x64x128xf32> to vector<64x128xf32>
      %242 = arith.index_cast %arg25 : i32 to index
      %c0_95 = arith.constant 0 : index
      %c0_96 = arith.constant 0 : index
      %243 = vector.load %arg14[%242, %c0_95, %c0_96] : memref<10x1x128xf32, #tpu.memory_space<vmem>>, vector<1x1x128xf32>
      %244 = vector.shape_cast %243 : vector<1x1x128xf32> to vector<1x128xf32>
      %245 = arith.index_cast %arg25 : i32 to index
      %c0_97 = arith.constant 0 : index
      %c0_98 = arith.constant 0 : index
      %246 = vector.load %arg15[%245, %c0_97, %c0_98] : memref<10x2x64xf32, #tpu.memory_space<vmem>>, vector<1x2x64xf32>
      %247 = vector.shape_cast %246 : vector<1x2x64xf32> to vector<2x64xf32>
      %248 = arith.index_cast %arg25 : i32 to index
      %c0_99 = arith.constant 0 : index
      %c0_100 = arith.constant 0 : index
      %249 = vector.load %arg16[%248, %c0_99, %c0_100] : memref<10x64x16xf32, #tpu.memory_space<vmem>>, vector<1x64x16xf32>
      %250 = vector.shape_cast %249 : vector<1x64x16xf32> to vector<64x16xf32>
      %251 = arith.index_cast %arg25 : i32 to index
      %c0_101 = arith.constant 0 : index
      %c0_102 = arith.constant 0 : index
      %252 = vector.load %arg17[%251, %c0_101, %c0_102] : memref<10x1x64xf32, #tpu.memory_space<vmem>>, vector<1x1x64xf32>
      %253 = vector.shape_cast %252 : vector<1x1x64xf32> to vector<1x64xf32>
      %cst_103 = arith.constant dense<0.000000e+00> : vector<16x128xf32>
      %254 = tpu.matmul %arg26, %241, %cst_103 {dimension_numbers = #tpu.dot_dimension_numbers<[1], [0], [0], [1], [0, 0, 1, 1], [], []>} : vector<16x64xf32>, vector<64x128xf32>, vector<16x128xf32> -> vector<16x128xf32>
      %255 = vector.broadcast %244 : vector<1x128xf32> to vector<16x128xf32>
      %256 = arith.addf %254, %255 : vector<16x128xf32>
      %257 = vector.extract_strided_slice %256 {offsets = [0, 0], sizes = [16, 64], strides = [1, 1]} : vector<16x128xf32> to vector<16x64xf32>
      %258 = vector.extract_strided_slice %256 {offsets = [0, 64], sizes = [16, 64], strides = [1, 1]} : vector<16x128xf32> to vector<16x64xf32>
      %259 = vector.shape_cast %1 : vector<16x16xf32> to vector<16x16x1xf32>
      %260 = vector.extract_strided_slice %247 {offsets = [0, 0], sizes = [1, 64], strides = [1, 1]} : vector<2x64xf32> to vector<1x64xf32>
      %261 = vector.shape_cast %260 : vector<1x64xf32> to vector<64xf32>
      %262 = vector.shape_cast %261 : vector<64xf32> to vector<1x1x64xf32>
      %263 = vector.broadcast %259 : vector<16x16x1xf32> to vector<16x16x64xf32>
      %264 = vector.broadcast %262 : vector<1x1x64xf32> to vector<16x16x64xf32>
      %265 = arith.mulf %263, %264 : vector<16x16x64xf32>
      %266 = vector.shape_cast %2 : vector<16x16xf32> to vector<16x16x1xf32>
      %267 = vector.extract_strided_slice %247 {offsets = [1, 0], sizes = [1, 64], strides = [1, 1]} : vector<2x64xf32> to vector<1x64xf32>
      %268 = vector.shape_cast %267 : vector<1x64xf32> to vector<64xf32>
      %269 = vector.shape_cast %268 : vector<64xf32> to vector<1x1x64xf32>
      %270 = vector.broadcast %266 : vector<16x16x1xf32> to vector<16x16x64xf32>
      %271 = vector.broadcast %269 : vector<1x1x64xf32> to vector<16x16x64xf32>
      %272 = arith.mulf %270, %271 : vector<16x16x64xf32>
      %273 = arith.addf %265, %272 : vector<16x16x64xf32>
      %274 = vector.shape_cast %257 : vector<16x64xf32> to vector<1x16x64xf32>
      %275 = vector.shape_cast %258 : vector<16x64xf32> to vector<16x1x64xf32>
      %276 = vector.broadcast %274 : vector<1x16x64xf32> to vector<16x16x64xf32>
      %277 = vector.broadcast %275 : vector<16x1x64xf32> to vector<16x16x64xf32>
      %278 = arith.addf %276, %277 : vector<16x16x64xf32>
      %279 = arith.addf %278, %273 : vector<16x16x64xf32>
      %cst_104 = arith.constant 0.000000e+00 : f32
      %280 = vector.broadcast %cst_104 : f32 to vector<16x16x64xf32>
      %281 = arith.cmpf oge, %279, %280 : vector<16x16x64xf32>
      %cst_105 = arith.constant 2.000000e-01 : f32
      %282 = vector.broadcast %cst_105 : f32 to vector<16x16x64xf32>
      %283 = arith.mulf %282, %279 : vector<16x16x64xf32>
      %284 = arith.select %281, %279, %283 : vector<16x16x64xi1>, vector<16x16x64xf32>
      %285 = vector.shape_cast %284 : vector<16x16x64xf32> to vector<256x64xf32>
      %cst_106 = arith.constant dense<0.000000e+00> : vector<256x16xf32>
      %286 = tpu.matmul %285, %250, %cst_106 {dimension_numbers = #tpu.dot_dimension_numbers<[1], [0], [0], [1], [0, 0, 1, 1], [], []>} : vector<256x64xf32>, vector<64x16xf32>, vector<256x16xf32> -> vector<256x16xf32>
      %287 = vector.shape_cast %286 : vector<256x16xf32> to vector<16x16x16xf32>
      %288 = vector.shape_cast %0 : vector<16x16xf32> to vector<16x16x1xf32>
      %289 = vector.broadcast %288 : vector<16x16x1xf32> to vector<16x16x16xf32>
      %290 = arith.addf %287, %289 : vector<16x16x16xf32>
      %cst_107 = arith.constant dense<0xFF800000> : vector<16x16xf32>
      %291 = vector.multi_reduction <maximumf>, %290, %cst_107 [1] : vector<16x16x16xf32> to vector<16x16xf32>
      %292 = vector.shape_cast %291 : vector<16x16xf32> to vector<16x1x16xf32>
      %293 = vector.broadcast %292 : vector<16x1x16xf32> to vector<16x16x16xf32>
      %294 = arith.subf %290, %293 : vector<16x16x16xf32>
      %295 = math.exp %294 : vector<16x16x16xf32>
      %cst_108 = arith.constant dense<0.000000e+00> : vector<16x16xf32>
      %296 = vector.multi_reduction <add>, %295, %cst_108 [1] : vector<16x16x16xf32> to vector<16x16xf32>
      %297 = vector.shape_cast %296 : vector<16x16xf32> to vector<16x1x16xf32>
      %298 = tpu.reciprocal %297 {approx = true} : vector<16x1x16xf32> -> vector<16x1x16xf32>
      %299 = vector.broadcast %298 : vector<16x1x16xf32> to vector<16x16x16xf32>
      %300 = arith.mulf %295, %299 : vector<16x16x16xf32>
      %301 = vector.shape_cast %300 : vector<16x16x16xf32> to vector<256x16xf32>
      %cst_109 = arith.constant dense<0.000000e+00> : vector<256x64xf32>
      %302 = tpu.matmul %301, %3, %cst_109 {dimension_numbers = #tpu.dot_dimension_numbers<[1], [0], [0], [1], [0, 0, 1, 1], [], []>} : vector<256x16xf32>, vector<16x64xf32>, vector<256x64xf32> -> vector<256x64xf32>
      %303 = vector.shape_cast %302 : vector<256x64xf32> to vector<16x16x64xf32>
      %304 = vector.shape_cast %257 : vector<16x64xf32> to vector<1x16x64xf32>
      %305 = vector.broadcast %304 : vector<1x16x64xf32> to vector<16x16x64xf32>
      %306 = arith.mulf %303, %305 : vector<16x16x64xf32>
      %cst_110 = arith.constant dense<0.000000e+00> : vector<16x64xf32>
      %307 = vector.multi_reduction <add>, %306, %cst_110 [1] : vector<16x16x64xf32> to vector<16x64xf32>
      %308 = vector.broadcast %253 : vector<1x64xf32> to vector<16x64xf32>
      %309 = arith.addf %307, %308 : vector<16x64xf32>
      %cst_111 = arith.constant 0.000000e+00 : f32
      %310 = vector.broadcast %cst_111 : f32 to vector<16x64xf32>
      %311 = arith.cmpf oge, %309, %310 : vector<16x64xf32>
      %cst_112 = arith.constant 0.00999999977 : f32
      %312 = vector.broadcast %cst_112 : f32 to vector<16x64xf32>
      %313 = arith.mulf %312, %309 : vector<16x64xf32>
      %314 = arith.select %311, %309, %313 : vector<16x64xi1>, vector<16x64xf32>
      scf.yield %314 : vector<16x64xf32>
    }
    %c10_i32_37 = arith.constant 10 : i32
    %c0_38 = arith.constant 0 : index
    %c0_39 = arith.constant 0 : index
    %c0_40 = arith.constant 0 : index
    %97 = vector.load %arg18[%c0_38, %c0_39, %c0_40] : memref<2x64x32xf32, #tpu.memory_space<vmem>>, vector<1x64x32xf32>
    %98 = vector.shape_cast %97 : vector<1x64x32xf32> to vector<64x32xf32>
    %c0_41 = arith.constant 0 : index
    %c0_42 = arith.constant 0 : index
    %c0_43 = arith.constant 0 : index
    %99 = vector.load %arg19[%c0_41, %c0_42, %c0_43] : memref<2x1x32xf32, #tpu.memory_space<vmem>>, vector<1x1x32xf32>
    %100 = vector.shape_cast %99 : vector<1x1x32xf32> to vector<1x32xf32>
    %c0_44 = arith.constant 0 : index
    %c0_45 = arith.constant 0 : index
    %c0_46 = arith.constant 0 : index
    %101 = vector.load %arg20[%c0_44, %c0_45, %c0_46] : memref<2x2x16xf32, #tpu.memory_space<vmem>>, vector<1x2x16xf32>
    %102 = vector.shape_cast %101 : vector<1x2x16xf32> to vector<2x16xf32>
    %c0_47 = arith.constant 0 : index
    %c0_48 = arith.constant 0 : index
    %c0_49 = arith.constant 0 : index
    %103 = vector.load %arg21[%c0_47, %c0_48, %c0_49] : memref<2x16x16xf32, #tpu.memory_space<vmem>>, vector<1x16x16xf32>
    %104 = vector.shape_cast %103 : vector<1x16x16xf32> to vector<16x16xf32>
    %c0_50 = arith.constant 0 : index
    %c0_51 = arith.constant 0 : index
    %c0_52 = arith.constant 0 : index
    %105 = vector.load %arg22[%c0_50, %c0_51, %c0_52] : memref<2x1x1xf32, #tpu.memory_space<vmem>>, vector<1x1x1xf32>
    %106 = vector.shape_cast %105 : vector<1x1x1xf32> to vector<1x1xf32>
    %cst_53 = arith.constant dense<0.000000e+00> : vector<16x32xf32>
    %107 = tpu.matmul %96, %98, %cst_53 {dimension_numbers = #tpu.dot_dimension_numbers<[1], [0], [0], [1], [0, 0, 1, 1], [], []>} : vector<16x64xf32>, vector<64x32xf32>, vector<16x32xf32> -> vector<16x32xf32>
    %108 = vector.broadcast %100 : vector<1x32xf32> to vector<16x32xf32>
    %109 = arith.addf %107, %108 : vector<16x32xf32>
    %110 = vector.extract_strided_slice %109 {offsets = [0, 0], sizes = [16, 16], strides = [1, 1]} : vector<16x32xf32> to vector<16x16xf32>
    %111 = vector.extract_strided_slice %109 {offsets = [0, 16], sizes = [16, 16], strides = [1, 1]} : vector<16x32xf32> to vector<16x16xf32>
    %112 = vector.shape_cast %1 : vector<16x16xf32> to vector<16x16x1xf32>
    %113 = vector.extract_strided_slice %102 {offsets = [0, 0], sizes = [1, 16], strides = [1, 1]} : vector<2x16xf32> to vector<1x16xf32>
    %114 = vector.shape_cast %113 : vector<1x16xf32> to vector<16xf32>
    %115 = vector.shape_cast %114 : vector<16xf32> to vector<1x1x16xf32>
    %116 = vector.broadcast %112 : vector<16x16x1xf32> to vector<16x16x16xf32>
    %117 = vector.broadcast %115 : vector<1x1x16xf32> to vector<16x16x16xf32>
    %118 = arith.mulf %116, %117 : vector<16x16x16xf32>
    %119 = vector.shape_cast %2 : vector<16x16xf32> to vector<16x16x1xf32>
    %120 = vector.extract_strided_slice %102 {offsets = [1, 0], sizes = [1, 16], strides = [1, 1]} : vector<2x16xf32> to vector<1x16xf32>
    %121 = vector.shape_cast %120 : vector<1x16xf32> to vector<16xf32>
    %122 = vector.shape_cast %121 : vector<16xf32> to vector<1x1x16xf32>
    %123 = vector.broadcast %119 : vector<16x16x1xf32> to vector<16x16x16xf32>
    %124 = vector.broadcast %122 : vector<1x1x16xf32> to vector<16x16x16xf32>
    %125 = arith.mulf %123, %124 : vector<16x16x16xf32>
    %126 = arith.addf %118, %125 : vector<16x16x16xf32>
    %127 = vector.shape_cast %110 : vector<16x16xf32> to vector<1x16x16xf32>
    %128 = vector.shape_cast %111 : vector<16x16xf32> to vector<16x1x16xf32>
    %129 = vector.broadcast %127 : vector<1x16x16xf32> to vector<16x16x16xf32>
    %130 = vector.broadcast %128 : vector<16x1x16xf32> to vector<16x16x16xf32>
    %131 = arith.addf %129, %130 : vector<16x16x16xf32>
    %132 = arith.addf %131, %126 : vector<16x16x16xf32>
    %cst_54 = arith.constant 0.000000e+00 : f32
    %133 = vector.broadcast %cst_54 : f32 to vector<16x16x16xf32>
    %134 = arith.cmpf oge, %132, %133 : vector<16x16x16xf32>
    %cst_55 = arith.constant 2.000000e-01 : f32
    %135 = vector.broadcast %cst_55 : f32 to vector<16x16x16xf32>
    %136 = arith.mulf %135, %132 : vector<16x16x16xf32>
    %137 = arith.select %134, %132, %136 : vector<16x16x16xi1>, vector<16x16x16xf32>
    %138 = vector.shape_cast %137 : vector<16x16x16xf32> to vector<256x16xf32>
    %cst_56 = arith.constant dense<0.000000e+00> : vector<256x16xf32>
    %139 = tpu.matmul %138, %104, %cst_56 {dimension_numbers = #tpu.dot_dimension_numbers<[1], [0], [0], [1], [0, 0, 1, 1], [], []>} : vector<256x16xf32>, vector<16x16xf32>, vector<256x16xf32> -> vector<256x16xf32>
    %140 = vector.shape_cast %139 : vector<256x16xf32> to vector<16x16x16xf32>
    %141 = vector.shape_cast %0 : vector<16x16xf32> to vector<16x16x1xf32>
    %142 = vector.broadcast %141 : vector<16x16x1xf32> to vector<16x16x16xf32>
    %143 = arith.addf %140, %142 : vector<16x16x16xf32>
    %cst_57 = arith.constant dense<0xFF800000> : vector<16x16xf32>
    %144 = vector.multi_reduction <maximumf>, %143, %cst_57 [1] : vector<16x16x16xf32> to vector<16x16xf32>
    %145 = vector.shape_cast %144 : vector<16x16xf32> to vector<16x1x16xf32>
    %146 = vector.broadcast %145 : vector<16x1x16xf32> to vector<16x16x16xf32>
    %147 = arith.subf %143, %146 : vector<16x16x16xf32>
    %148 = math.exp %147 : vector<16x16x16xf32>
    %cst_58 = arith.constant dense<0.000000e+00> : vector<16x16xf32>
    %149 = vector.multi_reduction <add>, %148, %cst_58 [1] : vector<16x16x16xf32> to vector<16x16xf32>
    %150 = vector.shape_cast %149 : vector<16x16xf32> to vector<16x1x16xf32>
    %151 = tpu.reciprocal %150 {approx = true} : vector<16x1x16xf32> -> vector<16x1x16xf32>
    %152 = vector.broadcast %151 : vector<16x1x16xf32> to vector<16x16x16xf32>
    %153 = arith.mulf %148, %152 : vector<16x16x16xf32>
    %154 = vector.shape_cast %110 : vector<16x16xf32> to vector<1x16x16xf32>
    %155 = vector.broadcast %154 : vector<1x16x16xf32> to vector<16x16x16xf32>
    %156 = arith.mulf %153, %155 : vector<16x16x16xf32>
    %cst_59 = arith.constant dense<0.000000e+00> : vector<16x16xf32>
    %157 = vector.multi_reduction <add>, %156, %cst_59 [1] : vector<16x16x16xf32> to vector<16x16xf32>
    %cst_60 = arith.constant dense<0.000000e+00> : vector<16xf32>
    %158 = vector.multi_reduction <add>, %157, %cst_60 [1] : vector<16x16xf32> to vector<16xf32>
    %159 = vector.shape_cast %158 : vector<16xf32> to vector<16x1xf32>
    %cst_61 = arith.constant 1.600000e+01 : f32
    %160 = vector.broadcast %cst_61 : f32 to vector<16x1xf32>
    %161 = arith.divf %159, %160 : vector<16x1xf32>
    %162 = vector.broadcast %106 : vector<1x1xf32> to vector<16x1xf32>
    %163 = arith.addf %161, %162 : vector<16x1xf32>
    %c1 = arith.constant 1 : index
    %c0_62 = arith.constant 0 : index
    %c0_63 = arith.constant 0 : index
    %164 = vector.load %arg18[%c1, %c0_62, %c0_63] : memref<2x64x32xf32, #tpu.memory_space<vmem>>, vector<1x64x32xf32>
    %165 = vector.shape_cast %164 : vector<1x64x32xf32> to vector<64x32xf32>
    %c1_64 = arith.constant 1 : index
    %c0_65 = arith.constant 0 : index
    %c0_66 = arith.constant 0 : index
    %166 = vector.load %arg19[%c1_64, %c0_65, %c0_66] : memref<2x1x32xf32, #tpu.memory_space<vmem>>, vector<1x1x32xf32>
    %167 = vector.shape_cast %166 : vector<1x1x32xf32> to vector<1x32xf32>
    %c1_67 = arith.constant 1 : index
    %c0_68 = arith.constant 0 : index
    %c0_69 = arith.constant 0 : index
    %168 = vector.load %arg20[%c1_67, %c0_68, %c0_69] : memref<2x2x16xf32, #tpu.memory_space<vmem>>, vector<1x2x16xf32>
    %169 = vector.shape_cast %168 : vector<1x2x16xf32> to vector<2x16xf32>
    %c1_70 = arith.constant 1 : index
    %c0_71 = arith.constant 0 : index
    %c0_72 = arith.constant 0 : index
    %170 = vector.load %arg21[%c1_70, %c0_71, %c0_72] : memref<2x16x16xf32, #tpu.memory_space<vmem>>, vector<1x16x16xf32>
    %171 = vector.shape_cast %170 : vector<1x16x16xf32> to vector<16x16xf32>
    %c1_73 = arith.constant 1 : index
    %c0_74 = arith.constant 0 : index
    %c0_75 = arith.constant 0 : index
    %172 = vector.load %arg22[%c1_73, %c0_74, %c0_75] : memref<2x1x1xf32, #tpu.memory_space<vmem>>, vector<1x1x1xf32>
    %173 = vector.shape_cast %172 : vector<1x1x1xf32> to vector<1x1xf32>
    %cst_76 = arith.constant dense<0.000000e+00> : vector<16x32xf32>
    %174 = tpu.matmul %96, %165, %cst_76 {dimension_numbers = #tpu.dot_dimension_numbers<[1], [0], [0], [1], [0, 0, 1, 1], [], []>} : vector<16x64xf32>, vector<64x32xf32>, vector<16x32xf32> -> vector<16x32xf32>
    %175 = vector.broadcast %167 : vector<1x32xf32> to vector<16x32xf32>
    %176 = arith.addf %174, %175 : vector<16x32xf32>
    %177 = vector.extract_strided_slice %176 {offsets = [0, 0], sizes = [16, 16], strides = [1, 1]} : vector<16x32xf32> to vector<16x16xf32>
    %178 = vector.extract_strided_slice %176 {offsets = [0, 16], sizes = [16, 16], strides = [1, 1]} : vector<16x32xf32> to vector<16x16xf32>
    %179 = vector.shape_cast %1 : vector<16x16xf32> to vector<16x16x1xf32>
    %180 = vector.extract_strided_slice %169 {offsets = [0, 0], sizes = [1, 16], strides = [1, 1]} : vector<2x16xf32> to vector<1x16xf32>
    %181 = vector.shape_cast %180 : vector<1x16xf32> to vector<16xf32>
    %182 = vector.shape_cast %181 : vector<16xf32> to vector<1x1x16xf32>
    %183 = vector.broadcast %179 : vector<16x16x1xf32> to vector<16x16x16xf32>
    %184 = vector.broadcast %182 : vector<1x1x16xf32> to vector<16x16x16xf32>
    %185 = arith.mulf %183, %184 : vector<16x16x16xf32>
    %186 = vector.shape_cast %2 : vector<16x16xf32> to vector<16x16x1xf32>
    %187 = vector.extract_strided_slice %169 {offsets = [1, 0], sizes = [1, 16], strides = [1, 1]} : vector<2x16xf32> to vector<1x16xf32>
    %188 = vector.shape_cast %187 : vector<1x16xf32> to vector<16xf32>
    %189 = vector.shape_cast %188 : vector<16xf32> to vector<1x1x16xf32>
    %190 = vector.broadcast %186 : vector<16x16x1xf32> to vector<16x16x16xf32>
    %191 = vector.broadcast %189 : vector<1x1x16xf32> to vector<16x16x16xf32>
    %192 = arith.mulf %190, %191 : vector<16x16x16xf32>
    %193 = arith.addf %185, %192 : vector<16x16x16xf32>
    %194 = vector.shape_cast %177 : vector<16x16xf32> to vector<1x16x16xf32>
    %195 = vector.shape_cast %178 : vector<16x16xf32> to vector<16x1x16xf32>
    %196 = vector.broadcast %194 : vector<1x16x16xf32> to vector<16x16x16xf32>
    %197 = vector.broadcast %195 : vector<16x1x16xf32> to vector<16x16x16xf32>
    %198 = arith.addf %196, %197 : vector<16x16x16xf32>
    %199 = arith.addf %198, %193 : vector<16x16x16xf32>
    %cst_77 = arith.constant 0.000000e+00 : f32
    %200 = vector.broadcast %cst_77 : f32 to vector<16x16x16xf32>
    %201 = arith.cmpf oge, %199, %200 : vector<16x16x16xf32>
    %cst_78 = arith.constant 2.000000e-01 : f32
    %202 = vector.broadcast %cst_78 : f32 to vector<16x16x16xf32>
    %203 = arith.mulf %202, %199 : vector<16x16x16xf32>
    %204 = arith.select %201, %199, %203 : vector<16x16x16xi1>, vector<16x16x16xf32>
    %205 = vector.shape_cast %204 : vector<16x16x16xf32> to vector<256x16xf32>
    %cst_79 = arith.constant dense<0.000000e+00> : vector<256x16xf32>
    %206 = tpu.matmul %205, %171, %cst_79 {dimension_numbers = #tpu.dot_dimension_numbers<[1], [0], [0], [1], [0, 0, 1, 1], [], []>} : vector<256x16xf32>, vector<16x16xf32>, vector<256x16xf32> -> vector<256x16xf32>
    %207 = vector.shape_cast %206 : vector<256x16xf32> to vector<16x16x16xf32>
    %208 = vector.shape_cast %0 : vector<16x16xf32> to vector<16x16x1xf32>
    %209 = vector.broadcast %208 : vector<16x16x1xf32> to vector<16x16x16xf32>
    %210 = arith.addf %207, %209 : vector<16x16x16xf32>
    %cst_80 = arith.constant dense<0xFF800000> : vector<16x16xf32>
    %211 = vector.multi_reduction <maximumf>, %210, %cst_80 [1] : vector<16x16x16xf32> to vector<16x16xf32>
    %212 = vector.shape_cast %211 : vector<16x16xf32> to vector<16x1x16xf32>
    %213 = vector.broadcast %212 : vector<16x1x16xf32> to vector<16x16x16xf32>
    %214 = arith.subf %210, %213 : vector<16x16x16xf32>
    %215 = math.exp %214 : vector<16x16x16xf32>
    %cst_81 = arith.constant dense<0.000000e+00> : vector<16x16xf32>
    %216 = vector.multi_reduction <add>, %215, %cst_81 [1] : vector<16x16x16xf32> to vector<16x16xf32>
    %217 = vector.shape_cast %216 : vector<16x16xf32> to vector<16x1x16xf32>
    %218 = tpu.reciprocal %217 {approx = true} : vector<16x1x16xf32> -> vector<16x1x16xf32>
    %219 = vector.broadcast %218 : vector<16x1x16xf32> to vector<16x16x16xf32>
    %220 = arith.mulf %215, %219 : vector<16x16x16xf32>
    %221 = vector.shape_cast %177 : vector<16x16xf32> to vector<1x16x16xf32>
    %222 = vector.broadcast %221 : vector<1x16x16xf32> to vector<16x16x16xf32>
    %223 = arith.mulf %220, %222 : vector<16x16x16xf32>
    %cst_82 = arith.constant dense<0.000000e+00> : vector<16x16xf32>
    %224 = vector.multi_reduction <add>, %223, %cst_82 [1] : vector<16x16x16xf32> to vector<16x16xf32>
    %cst_83 = arith.constant dense<0.000000e+00> : vector<16xf32>
    %225 = vector.multi_reduction <add>, %224, %cst_83 [1] : vector<16x16xf32> to vector<16xf32>
    %226 = vector.shape_cast %225 : vector<16xf32> to vector<16x1xf32>
    %cst_84 = arith.constant 1.600000e+01 : f32
    %227 = vector.broadcast %cst_84 : f32 to vector<16x1xf32>
    %228 = arith.divf %226, %227 : vector<16x1xf32>
    %229 = vector.broadcast %173 : vector<1x1xf32> to vector<16x1xf32>
    %230 = arith.addf %228, %229 : vector<16x1xf32>
    %c0_85 = arith.constant 0 : index
    %c0_86 = arith.constant 0 : index
    %231 = vector.load %arg23[%c0_85, %c0_86] : memref<16x1xf32, #tpu.memory_space<vmem>>, vector<16x1xf32>
    tpu.vector_store %arg23[%c0_85, %c0_86], %163 {strides = array<i32>} : memref<16x1xf32, #tpu.memory_space<vmem>>, vector<16x1xf32>,
    %c0_87 = arith.constant 0 : index
    %c0_88 = arith.constant 0 : index
    %232 = vector.load %arg4[%c0_87, %c0_88] : memref<2x16xf32, #tpu.memory_space<vmem>>, vector<2x16xf32>
    %cst_89 = arith.constant dense<0.000000e+00> : vector<2x1xf32>
    %233 = tpu.matmul %232, %230, %cst_89 {dimension_numbers = #tpu.dot_dimension_numbers<[1], [0], [0], [1], [0, 0, 1, 1], [], []>} : vector<2x16xf32>, vector<16x1xf32>, vector<2x1xf32> -> vector<2x1xf32>
    %cst_90 = arith.constant dense<0.000000e+00> : vector<2xf32>
    %234 = vector.multi_reduction <add>, %232, %cst_90 [1] : vector<2x16xf32> to vector<2xf32>
    %235 = vector.shape_cast %234 : vector<2xf32> to vector<2x1xf32>
    %236 = tpu.reciprocal %235 {approx = true} : vector<2x1xf32> -> vector<2x1xf32>
    %237 = arith.mulf %233, %236 : vector<2x1xf32>
    %c0_91 = arith.constant 0 : index
    %c0_92 = arith.constant 0 : index
    %238 = vector.load %arg24[%c0_91, %c0_92] : memref<2x1xf32, #tpu.memory_space<vmem>>, vector<2x1xf32>
    tpu.vector_store %arg24[%c0_91, %c0_92], %237 {strides = array<i32>} : memref<2x1xf32, #tpu.memory_space<vmem>>, vector<2x1xf32>,
    return
  }
}

</mosaic_0001>

<bundles_post_ra>
// kernel: tpu_custom_call.1
= control target key start
LH: loop header
LB: loop body
LE: loop exit
PB: predicated region body
PF: predicated region fallthrough
CT: control target
= control target key end

     0   :  { %vm111_vm0 = vcmask 1041408   ;;  %vm104_vm1 = vcmask 15360   ;;  %v190_v0 = vlaneseq  ;;  %vm14352_vm2 = vcmask 523264   ;;  %s14125_s4 = inlined_call_operand.vmem [shape: f32[2,16], index: 4, kind: input, shape index: {}]   ;;  %s14126_s6 = inlined_call_operand.vmem [shape: f32[2,128], index: 6, kind: input, shape index: {}]   ;;  %s14127_s13 = inlined_call_operand.vmem [shape: f32[10,64,128], index: 13, kind: input, shape index: {}]   ;;  %s14128_s14 = inlined_call_operand.vmem [shape: f32[10,1,128], index: 14, kind: input, shape index: {}]   ;;  %s14129_s15 = inlined_call_operand.vmem [shape: f32[10,2,64], index: 15, kind: input, shape index: {}]   ;;  %s14130_s16 = inlined_call_operand.vmem [shape: f32[10,64,16], index: 16, kind: input, shape index: {}]   ;;  %s14131_s17 = inlined_call_operand.vmem [shape: f32[10,1,64], index: 17, kind: input, shape index: {}]   ;;  %s14132_s18 = inlined_call_operand.vmem [shape: f32[2,64,32], index: 18, kind: input, shape index: {}]   ;;  %s14133_s19 = inlined_call_operand.vmem [shape: f32[2,1,32], index: 19, kind: input, shape index: {}]   ;;  %s14134_s20 = inlined_call_operand.vmem [shape: f32[2,2,16], index: 20, kind: input, shape index: {}]   ;;  %s14135_s21 = inlined_call_operand.vmem [shape: f32[2,16,16], index: 21, kind: input, shape index: {}]   ;;  %s14136_s22 = inlined_call_operand.vmem [shape: f32[2,1,1], index: 22, kind: input, shape index: {}]   ;;  %s14137_s23 = inlined_call_operand.vmem [shape: f32[16,1], index: 23, kind: output, shape index: {0}]   ;;  %s14138_s24 = inlined_call_operand.vmem [shape: f32[2,1], index: 24, kind: output, shape index: {1}]   ;;  %s14139_s0 = inlined_call_operand.vmem [shape: f32[16,2], index: 0, kind: input, shape index: {}]   ;;  %s14140_s2 = inlined_call_operand.vmem [shape: f32[16,16], index: 2, kind: input, shape index: {}]   ;;  %s14141_s3 = inlined_call_operand.vmem [shape: f32[16,16], index: 3, kind: input, shape index: {}]   ;;  %s14142_s8 = inlined_call_operand.vmem [shape: f32[2,64], index: 8, kind: input, shape index: {}]   ;;  %s14143_s9 = inlined_call_operand.vmem [shape: f32[64,16], index: 9, kind: input, shape index: {}]   ;;  %s14144_s7 = inlined_call_operand.vmem [shape: f32[1,128], index: 7, kind: input, shape index: {}]   ;;  %s14145_s1 = inlined_call_operand.vmem [shape: f32[16,16], index: 1, kind: input, shape index: {}]   ;;  %s14146_s5 = inlined_call_operand.vmem [shape: f32[16,64], index: 5, kind: input, shape index: {}]   ;;  %s14147_s10 = inlined_call_operand.vmem [shape: f32[1,64], index: 10, kind: input, shape index: {}]   ;;  %s14148_s11 = inlined_call_operand.vmem [shape: f32[1,64], index: 11, kind: input, shape index: {}]   ;;  %s14149_s12 = inlined_call_operand.vmem [shape: f32[1,64], index: 12, kind: input, shape index: {}]  }
   0x1   :  { %14378 = sst [smem:[#allocation112_spill]] %s14125_s4  ;;  %v84_v2 = vld [vmem:[%s14139_s0] sm:$0xff]  ;;  %v85_v3 = vld [vmem:[%s14139_s0 + $0x8] sm:$0xff]  ;;  %s9795_s0 = smov 64  }
   0x2   :  { %14379 = sst [smem:[#allocation113_spill]] %s14126_s6  ;;  %8623 = vmatprep.mubr.msk.f32.mxu0 %vm104_vm1, %v84_v2  ;;  %v9935_v4 = vshrl.u32 %v190_v0, 7  ;;  %v78_v5 = vld [vmem:[%s14140_s2] sm:$0xff]  ;;  %v9986_v31 = vld [vmem:[%s14141_s3 + $0x8] sm:$0xff] }
   0x3   :  { %14380 = sst [smem:[#allocation114_spill]] %s14127_s13  ;;  %s14387_s27 = sld [smem:[#allocation113_spill]]  ;;  %v80_v7 = vld [vmem:[%s14141_s3] sm:$0xff]  ;;  %v9991_v32 = vld [vmem:[%s14140_s2 + $0x8] sm:$0xff] }
   0x4   :  { %14381 = sst [smem:[#allocation115_spill]] %s14128_s14  ;;  %v9941_v6 = vsub.s32 0, %v9935_v4  ;;  %v9949_v10 = vsub.s32 1, %v9935_v4  ;;  %v9954_v13 = vsub.s32 2, %v9935_v4  ;;  %v9959_v16 = vsub.s32 3, %v9935_v4 }
   0x5   :  { %14382 = sst [smem:[#allocation116_spill]] %s14129_s15  ;;  %v9964_v19 = vsub.s32 4, %v9935_v4  ;;  %v9969_v22 = vsub.s32 5, %v9935_v4  ;;  %v9974_v25 = vsub.s32 6, %v9935_v4  ;;  %v9979_v28 = vsub.s32 7, %v9935_v4 }
   0x6   :  { %14383 = sst [smem:[#allocation117_spill]] %s14130_s16  ;;  %14388 = vst [vmem:[#allocation2_spill] sm:$0xff] %v9941_v6  ;;  %v193_v8 = vrot.slane %v78_v5, %v9941_v6  ;;  %v405_v9 = vrot.slane %v80_v7, %v9941_v6  ;;  %14389 = vst [vmem:[#allocation3_spill] sm:$0xff] %v9949_v10  ;;  %v204_v11 = vrot.slane %v78_v5, %v9949_v10  ;;  %v88_v53 = vld [vmem:[%s14142_s8] sm:$0x3] }
   0x7   :  { %14384 = sst [smem:[#allocation118_spill]] %s14131_s17  ;;  %v416_v12 = vrot.slane %v80_v7, %v9949_v10  ;;  %v427_v14 = vrot.slane %v80_v7, %v9954_v13  ;;  %v215_v15 = vrot.slane %v78_v5, %v9954_v13  ;;  %v226_v17 = vrot.slane %v78_v5, %v9959_v16 }
   0x8   :  { %14385 = sst [smem:[#allocation119_spill]] %s14132_s18  ;;  %195 = vbcast.lane.b32.xlu0 %v193_v8, 256  ;;  %199 = vbcast.lane.b32.xlu1 %v193_v8, 264  ;;  %v438_v18 = vrot.slane %v80_v7, %v9959_v16  ;;  %v449_v20 = vrot.slane %v80_v7, %v9964_v19  ;;  %v237_v21 = vrot.slane %v78_v5, %v9964_v19 }
   0x9   :  { %14386 = sst [smem:[#allocation120_spill]] %s14133_s19  ;;  %v86_v1 = vld [vmem:[%s14387_s27] sm:$0x3]  ;;  %v248_v23 = vrot.slane %v78_v5, %v9969_v22  ;;  %v460_v24 = vrot.slane %v80_v7, %v9969_v22  ;;  %v471_v26 = vrot.slane %v80_v7, %v9974_v25  ;;  %v259_v27 = vrot.slane %v78_v5, %v9974_v25 }
   0xa   :  { %8621 = vmatprep.subr.msk.mxu0 %vm111_vm0, %v86_v1  ;;  %v270_v29 = vrot.slane %v78_v5, %v9979_v28  ;;  %v482_v30 = vrot.slane %v80_v7, %v9979_v28  ;;  %v493_v33 = vrot.slane %v9986_v31, %v9941_v6  ;;  %v281_v34 = vrot.slane %v9991_v32, %v9941_v6 }
   0xb   :  { %8622 = vmatpush3.msk.msra.mxu0 %vm111_vm0, %v86_v1  ;;  %v292_v35 = vrot.slane %v9991_v32, %v9949_v10  ;;  %v504_v36 = vrot.slane %v9986_v31, %v9949_v10  ;;  %v515_v37 = vrot.slane %v9986_v31, %v9954_v13  ;;  %v303_v38 = vrot.slane %v9991_v32, %v9954_v13 }
   0xc   :  { %8624 = vmatmul.mubr.msk.f32.vlgmr.msra.gmra.mrb[0].mxu0 %vm104_vm1, %v85_v3  ;;  %407 = vbcast.lane.b32.xlu0 %v405_v9, 256  ;;  %v314_v39 = vrot.slane %v9991_v32, %v9959_v16  ;;  %v10009_v40 = vrot.slane %v9986_v31, %v9959_v16  ;;  %v10044_v56 = vrot.slane %v88_v53, %v9949_v10 }
   0xd   :  { %411 = vbcast.lane.b32.xlu1 %v405_v9, 264  ;;  %v10047_v57 = vrot.slane %v88_v53, %v9941_v6 }
  0x10   :  { %418 = vbcast.lane.b32.xlu0 %v416_v12, 256 }
  0x11   :  { %206 = vbcast.lane.b32.xlu1 %v204_v11, 256 }
  0x14   :  { %422 = vbcast.lane.b32.xlu0 %v416_v12, 264  ;;  %v89_v12 = vld [vmem:[%s14143_s9] sm:$0xff] }
  0x15   :  { %210 = vbcast.lane.b32.xlu1 %v204_v11, 264 }
  0x18   :  { %217 = vbcast.lane.b32.xlu0 %v215_v15, 256 }
  0x19   :  { %429 = vbcast.lane.b32.xlu1 %v427_v14, 256 }
  0x1c   :  { %221 = vbcast.lane.b32.xlu0 %v215_v15, 264 }
  0x1d   :  { %433 = vbcast.lane.b32.xlu1 %v427_v14, 264  ;;  %v90_v14 = vld [vmem:[%s14143_s9 + $0x8] sm:$0xff] }
  0x20   :  { %440 = vbcast.lane.b32.xlu0 %v438_v18, 256 }
  0x21   :  { %228 = vbcast.lane.b32.xlu1 %v226_v17, 256 }
  0x24   :  { %444 = vbcast.lane.b32.xlu0 %v438_v18, 264  ;;  %v9026_v18 = vpack.c.bf16 %v90_v14, %v89_v12 }
  0x25   :  { %232 = vbcast.lane.b32.xlu1 %v226_v17, 264 }
  0x26   :  { %9027 = vmatprep.subr.bf16.mxu1 %v9026_v18 }
  0x27   :  { %9029 = vmatpush3.bf16.msra.mxu1 %v9026_v18 }
  0x28   :  { %239 = vbcast.lane.b32.xlu0 %v237_v21, 256 }
  0x29   :  { %451 = vbcast.lane.b32.xlu1 %v449_v20, 256 }
  0x2c   :  { %243 = vbcast.lane.b32.xlu0 %v237_v21, 264 }
  0x2d   :  { %455 = vbcast.lane.b32.xlu1 %v449_v20, 264 }
  0x30   :  { %462 = vbcast.lane.b32.xlu0 %v460_v24, 256 }
  0x31   :  { %250 = vbcast.lane.b32.xlu1 %v248_v23, 256 }
  0x34   :  { %466 = vbcast.lane.b32.xlu0 %v460_v24, 264 }
  0x35   :  { %254 = vbcast.lane.b32.xlu1 %v248_v23, 264 }
  0x38   :  { %261 = vbcast.lane.b32.xlu0 %v259_v27, 256 }
  0x39   :  { %473 = vbcast.lane.b32.xlu1 %v471_v26, 256 }
  0x3c   :  { %265 = vbcast.lane.b32.xlu0 %v259_v27, 264 }
  0x3d   :  { %477 = vbcast.lane.b32.xlu1 %v471_v26, 264 }
  0x40   :  { %484 = vbcast.lane.b32.xlu0 %v482_v30, 256 }
  0x41   :  { %272 = vbcast.lane.b32.xlu1 %v270_v29, 256 }
  0x44   :  { %488 = vbcast.lane.b32.xlu0 %v482_v30, 264 }
  0x45   :  { %276 = vbcast.lane.b32.xlu1 %v270_v29, 264 }
  0x48   :  { %283 = vbcast.lane.b32.xlu0 %v281_v34, 256 }
  0x49   :  { %495 = vbcast.lane.b32.xlu1 %v493_v33, 256 }
  0x4c   :  { %287 = vbcast.lane.b32.xlu0 %v281_v34, 264 }
  0x4d   :  { %499 = vbcast.lane.b32.xlu1 %v493_v33, 264 }
  0x50   :  { %506 = vbcast.lane.b32.xlu0 %v504_v36, 256 }
  0x51   :  { %294 = vbcast.lane.b32.xlu1 %v292_v35, 256 }
  0x54   :  { %510 = vbcast.lane.b32.xlu0 %v504_v36, 264 }
  0x55   :  { %298 = vbcast.lane.b32.xlu1 %v292_v35, 264 }
  0x58   :  { %305 = vbcast.lane.b32.xlu0 %v303_v38, 256 }
  0x59   :  { %517 = vbcast.lane.b32.xlu1 %v515_v37, 256 }
  0x5c   :  { %309 = vbcast.lane.b32.xlu0 %v303_v38, 264 }
  0x5d   :  { %521 = vbcast.lane.b32.xlu1 %v515_v37, 264 }
  0x60   :  { %528 = vbcast.lane.b32.xlu0 %v10009_v40, 256 }
  0x61   :  { %316 = vbcast.lane.b32.xlu1 %v314_v39, 256 }
  0x65   :  { %320 = vbcast.lane.b32.xlu1 %v314_v39, 264 }
  0x7a   :  { %v10012_v41 = vpop.permute.xlu0 %195  ;;  %v10014_v42 = vpop.permute.xlu1 %199 }
  0x7b   :  { %14390 = vst [vmem:[#allocation4_spill] sm:$0xff] %v10012_v41  ;;  %14391 = vst [vmem:[#allocation5_spill] sm:$0xff] %v10014_v42 }
  0x7e   :  { %v10016_v43 = vpop.permute.xlu0 %407 }
  0x7f   :  { %14392 = vst [vmem:[#allocation6_spill] sm:$0xff] %v10016_v43  ;;  %v10018_v44 = vpop.permute.xlu1 %411 }
  0x80   :  { %14393 = vst [vmem:[#allocation7_spill] sm:$0xff] %v10018_v44 }
  0x82   :  { %v10022_v46 = vpop.permute.xlu0 %418 }
  0x83   :  { %v10020_v45 = vpop.permute.xlu1 %206  ;;  %14395 = vst [vmem:[#allocation9_spill] sm:$0xff] %v10022_v46 }
  0x84   :  { %14394 = vst [vmem:[#allocation8_spill] sm:$0xff] %v10020_v45 }
  0x86   :  { %v10026_v48 = vpop.permute.xlu0 %422 }
  0x87   :  { %v10024_v47 = vpop.permute.xlu1 %210  ;;  %14397 = vst [vmem:[#allocation11_spill] sm:$0xff] %v10026_v48 }
  0x88   :  { %14396 = vst [vmem:[#allocation10_spill] sm:$0xff] %v10024_v47 }
  0x8a   :  { %v10030_v50 = vpop.permute.xlu0 %217 }
  0x8b   :  { %v10028_v49 = vpop.permute.xlu1 %429  ;;  %14399 = vst [vmem:[#allocation13_spill] sm:$0xff] %v10030_v50 }
  0x8c   :  { %14398 = vst [vmem:[#allocation12_spill] sm:$0xff] %v10028_v49 }
  0x8e   :  { %v10034_v52 = vpop.permute.xlu0 %221 }
  0x8f   :  { %v10032_v51 = vpop.permute.xlu1 %433  ;;  %14401 = vst [vmem:[#allocation15_spill] sm:$0xff] %v10034_v52 }
  0x90   :  { %14400 = vst [vmem:[#allocation14_spill] sm:$0xff] %v10032_v51 }
  0x92   :  { %v10041_v55 = vpop.permute.xlu0 %440 }
  0x93   :  { %v10039_v54 = vpop.permute.xlu1 %228  ;;  %14403 = vst [vmem:[#allocation17_spill] sm:$0xff] %v10041_v55 }
  0x94   :  { %14402 = vst [vmem:[#allocation16_spill] sm:$0xff] %v10039_v54 }
  0x96   :  { %v10051_v59 = vpop.permute.xlu0 %444 }
  0x97   :  { %v10049_v58 = vpop.permute.xlu1 %232  ;;  %14405 = vst [vmem:[#allocation19_spill] sm:$0xff] %v10051_v59  ;;  %v589_v61 = vmul.f32 %v10044_v56, %v10051_v59 }
  0x98   :  { %14404 = vst [vmem:[#allocation18_spill] sm:$0xff] %v10049_v58  ;;  %v377_v60 = vmul.f32 %v10047_v57, %v10049_v58 }
  0x9a   :  { %v10057_v62 = vadd.f32 %v589_v61, %v377_v60  ;;  %v10061_v0 = vpop.permute.xlu0 %239 }
  0x9b   :  { %v10059_v63 = vpop.permute.xlu1 %451  ;;  %14407 = vst [vmem:[#allocation21_spill] sm:$0xff] %v10061_v0  ;;  %v378_v2 = vmul.f32 %v10047_v57, %v10061_v0 }
  0x9c   :  { %14406 = vst [vmem:[#allocation20_spill] sm:$0xff] %v10059_v63  ;;  %v590_v1 = vmul.f32 %v10044_v56, %v10059_v63 }
  0x9e   :  { %v10067_v3 = vadd.f32 %v590_v1, %v378_v2  ;;  %v10071_v7 = vpop.permute.xlu0 %243 }
  0x9f   :  { %v10069_v5 = vpop.permute.xlu1 %455  ;;  %14409 = vst [vmem:[#allocation23_spill] sm:$0xff] %v10071_v7  ;;  %v379_v9 = vmul.f32 %v10047_v57, %v10071_v7 }
  0xa0   :  { %14408 = vst [vmem:[#allocation22_spill] sm:$0xff] %v10069_v5  ;;  %v591_v8 = vmul.f32 %v10044_v56, %v10069_v5  ;;  %v585_v5 = vmul.f32 %v10044_v56, %v10026_v48  ;;  %v374_v48 = vmul.f32 %v10047_v57, %v10030_v50 }
  0xa2   :  { %v10077_v11 = vadd.f32 %v591_v8, %v379_v9  ;;  %v10087_v17 = vpop.permute.xlu0 %462 }
  0xa3   :  { %v10085_v15 = vpop.permute.xlu1 %250  ;;  %14411 = vst [vmem:[#allocation25_spill] sm:$0xff] %v10087_v17  ;;  %v592_v21 = vmul.f32 %v10044_v56, %v10087_v17 }
  0xa4   :  { %14410 = vst [vmem:[#allocation24_spill] sm:$0xff] %v10085_v15  ;;  %v380_v20 = vmul.f32 %v10047_v57, %v10085_v15  ;;  %v583_v15 = vmul.f32 %v10044_v56, %v10018_v44 }
  0xa6   :  { %v10093_v23 = vadd.f32 %v592_v21, %v380_v20  ;;  %v10097_v26 = vpop.permute.xlu0 %466 }
  0xa7   :  { %v10095_v24 = vpop.permute.xlu1 %254  ;;  %14413 = vst [vmem:[#allocation27_spill] sm:$0xff] %v10097_v26  ;;  %v593_v29 = vmul.f32 %v10044_v56, %v10097_v26 }
  0xa8   :  { %14412 = vst [vmem:[#allocation26_spill] sm:$0xff] %v10095_v24  ;;  %v381_v27 = vmul.f32 %v10047_v57, %v10095_v24 }
  0xaa   :  { %v10103_v30 = vadd.f32 %v593_v29, %v381_v27  ;;  %v10107_v34 = vpop.permute.xlu0 %261  ;;  %v9794_v29 = vmov 1966171168  }
  0xab   :  { %v10105_v33 = vpop.permute.xlu1 %473  ;;  %14415 = vst [vmem:[#allocation29_spill] sm:$0xff] %v10107_v34  ;;  %v382_v36 = vmul.f32 %v10047_v57, %v10107_v34 }
  0xac   :  { %14414 = vst [vmem:[#allocation28_spill] sm:$0xff] %v10105_v33  ;;  %v594_v35 = vmul.f32 %v10044_v56, %v10105_v33 }
  0xae   :  { %v10113_v37 = vadd.f32 %v594_v35, %v382_v36  ;;  %v10117_v39 = vpop.permute.xlu0 %265  ;;  %v650_v35 = vunpack.c.l.s4 %v9794_v29 }
  0xaf   :  { %v10115_v38 = vpop.permute.xlu1 %477  ;;  %14417 = vst [vmem:[#allocation31_spill] sm:$0xff] %v10117_v39  ;;  %v383_v60 = vmul.f32 %v10047_v57, %v10117_v39 }
  0xb0   :  { %14416 = vst [vmem:[#allocation30_spill] sm:$0xff] %v10115_v38  ;;  %v595_v53 = vmul.f32 %v10044_v56, %v10115_v38  ;;  %v651_v36 = vunpack.c.0.s8 %v650_v35 }
  0xb2   :  { %v10123_v61 = vadd.f32 %v595_v53, %v383_v60  ;;  %v10127_v2 = vpop.permute.xlu0 %484  ;;  %v8142_v53 = vld [vmem:[%s14144_s7] ss:$0 sm:$0xff]  ;;  %v91_v60 = vld [vmem:[%s14143_s9 + $0x10] sm:$0xff] }
  0xb3   :  { %v10125_v1 = vpop.permute.xlu1 %272  ;;  %14419 = vst [vmem:[#allocation33_spill] sm:$0xff] %v10127_v2  ;;  %v596_v9 = vmul.f32 %v10044_v56, %v10127_v2  ;;  %v94_v2 = vld [vmem:[%s14143_s9 + $0x28] sm:$0xff] }
  0xb4   :  { %14418 = vst [vmem:[#allocation32_spill] sm:$0xff] %v10125_v1  ;;  %v384_v8 = vmul.f32 %v10047_v57, %v10125_v1 }
  0xb6   :  { %v10133_v12 = vadd.f32 %v596_v9, %v384_v8  ;;  %v10137_v18 = vpop.permute.xlu0 %488  ;;  %v92_v8 = vld [vmem:[%s14143_s9 + $0x18] sm:$0xff]  ;;  %v10155_v9 = vsub.s32 %v651_v36, %v9935_v4 }
  0xb7   :  { %v10135_v14 = vpop.permute.xlu1 %276  ;;  %14421 = vst [vmem:[#allocation35_spill] sm:$0xff] %v10137_v18  ;;  %v597_v21 = vmul.f32 %v10044_v56, %v10137_v18 }
  0xb8   :  { %14420 = vst [vmem:[#allocation34_spill] sm:$0xff] %v10135_v14  ;;  %v385_v20 = vmul.f32 %v10047_v57, %v10135_v14  ;;  %14422 = vst [vmem:[#allocation36_spill] sm:$0xff] %v10155_v9  ;;  %v93_v14 = vld [vmem:[%s14143_s9 + $0x20] sm:$0xff] }
  0xb9   :  { %v9034_v36 = vpack.c.bf16 %v94_v2, %v93_v14 }
  0xba   :  { %v10143_v27 = vadd.f32 %v597_v21, %v385_v20  ;;  %v9030_v20 = vpack.c.bf16 %v92_v8, %v91_v60 }
  0xbc   :  { %9031 = vmatprep.subr.bf16.mxu1 %v9030_v20 }
  0xbd   :  { %9033 = vmatpush3.bf16.msra.mxu1 %v9030_v20 }
  0xbe   :  { %9035 = vmatprep.subr.bf16.mxu1 %v9034_v36 }
  0xc1   :  { %9037 = vmatpush3.bf16.msra.mxu1 %v9034_v36  ;;  %v96_v36 = vld [vmem:[%s14143_s9 + $0x38] sm:$0xff] }
  0xdf   :  { %v8625_v21 = vpop.f32.mrb[0].mxu0 }
  0xe0   :  { %v10157_v18 = vadd.f32 %v8625_v21, %v8142_v53  ;;  %v181_v29 = vpop.f32.mrb[1].mxu0 }
  0xe1   :  { %v10159_v35 = vadd.f32 %v8142_v53, %v181_v29 }
  0xe2   :  { %14423 = vst [vmem:[#allocation37_spill] sm:$0xff] %v10157_v18  ;;  %v704_v4 = vrot.slane %v10157_v18, %v10155_v9 }
  0xe3   :  { %14424 = vst [vmem:[#allocation38_spill] sm:$0xff] %v10159_v35  ;;  %v655_v60 = vrot.slane %v10159_v35, %v10155_v9 }
  0xe4   :  { %v720_v8 = vrot.slane %v704_v4, %v10155_v9  ;;  %v712_v53 = vcombine.high %v704_v4, %v704_v4  ;;  %v95_v4 = vld [vmem:[%s14143_s9 + $0x30] sm:$0xff] }
  0xe5   :  { %v663_v20 = vcombine.high %v655_v60, %v655_v60  ;;  %v671_v1 = vrot.slane %v655_v60, %v10155_v9  ;;  %v9038_v38 = vpack.c.bf16 %v96_v36, %v95_v4 }
  0xe6   :  { %v781_v21 = vrot.slane %v720_v8, %v9941_v6  ;;  %v734_v29 = vrot.slane %v712_v53, %v10155_v9  ;;  %v742_v60 = vcombine.high %v720_v8, %v720_v8 }
  0xe7   :  { %v685_v14 = vrot.slane %v663_v20, %v10155_v9  ;;  %v749_v53 = vrot.slane %v671_v1, %v9941_v6  ;;  %v648_v20 = vcombine.high %v10159_v35, %v10159_v35  ;;  %9039 = vmatprep.subr.bf16.mxu1 %v9038_v38  ;;  %v693_v34 = vcombine.high %v671_v1, %v671_v1 }
  0xe8   :  { %826 = vrot.lane.b32.xlu0 %v781_v21, %s9795_s0  ;;  %v785_v2 = vrot.slane %v734_v29, %v9941_v6  ;;  %v744_v39 = vcombine.high %v734_v29, %v734_v29  ;;  %v789_v33 = vrot.slane %v742_v60, %v9941_v6  ;;  %9041 = vmatpush3.bf16.msra.mxu1 %v9038_v38 }
  0xe9   :  { %v753_v21 = vrot.slane %v685_v14, %v9941_v6  ;;  %v662_v4 = vrot.slane %v648_v20, %v10155_v9  ;;  %v757_v29 = vrot.slane %v693_v34, %v9941_v6  ;;  %v537_v38 = vrot.slane %v9986_v31, %v9964_v19 }
  0xea   :  { %828 = vrot.lane.b32.xlu1 %v785_v2, %s9795_s0  ;;  %v793_v8 = vrot.slane %v744_v39, %v9941_v6  ;;  %v695_v2 = vcombine.high %v685_v14, %v685_v14  ;;  %v325_v14 = vrot.slane %v9991_v32, %v9964_v19 }
  0xec   :  { %810 = vrot.lane.b32.xlu0 %v749_v53, %s9795_s0  ;;  %v761_v36 = vrot.slane %v695_v2, %v9941_v6  ;;  %v664_v53 = vcombine.high %v662_v4, %v662_v4 }
  0xee   :  { %812 = vrot.lane.b32.xlu1 %v753_v21, %s9795_s0  ;;  %v692_v39 = vrot.slane %v664_v53, %v10155_v9  ;;  %v697_v21 = vcombine.high %v10157_v18, %v10157_v18 }
  0xf0   :  { %830 = vrot.lane.b32.xlu0 %v789_v33, %s9795_s0  ;;  %v678_v33 = vrot.slane %v662_v4, %v10155_v9  ;;  %v769_v34 = vrot.slane %v692_v39, %v9941_v6  ;;  %v336_v4 = vrot.slane %v9991_v32, %v9969_v22 }
  0xf2   :  { %832 = vrot.lane.b32.xlu1 %v793_v8, %s9795_s0  ;;  %v765_v1 = vrot.slane %v678_v33, %v9941_v6  ;;  %v694_v60 = vcombine.high %v678_v33, %v678_v33  ;;  %v711_v8 = vrot.slane %v697_v21, %v10155_v9 }
  0xf4   :  { %814 = vrot.lane.b32.xlu0 %v757_v29, %s9795_s0  ;;  %v773_v20 = vrot.slane %v694_v60, %v9941_v6  ;;  %v727_v29 = vrot.slane %v711_v8, %v10155_v9 }
  0xf6   :  { %816 = vrot.lane.b32.xlu1 %v761_v36, %s9795_s0  ;;  %v713_v36 = vcombine.high %v711_v8, %v711_v8  ;;  %v797_v53 = vrot.slane %v727_v29, %v9941_v6  ;;  %v743_v60 = vcombine.high %v727_v29, %v727_v29  ;;  %v10245_v29 = vpop.permute.xlu1 %495 }
  0xf7   :  { %14425 = vst [vmem:[#allocation39_spill] sm:$0xff] %v10245_v29 }
  0xf8   :  { %532 = vbcast.lane.b32.xlu0 %v10009_v40, 264  ;;  %v696_v40 = vcombine.high %v692_v39, %v692_v39  ;;  %v741_v33 = vrot.slane %v713_v36, %v10155_v9  ;;  %v805_v21 = vrot.slane %v743_v60, %v9941_v6  ;;  %v10248_v36 = vpop.permute.xlu0 %283 }
  0xf9   :  { %14426 = vst [vmem:[#allocation40_spill] sm:$0xff] %v10248_v36 }
  0xfa   :  { %539 = vbcast.lane.b32.xlu1 %v537_v38, 256  ;;  %v777_v2 = vrot.slane %v696_v40, %v9941_v6  ;;  %v801_v39 = vrot.slane %v741_v33, %v9941_v6  ;;  %v570_v40 = vrot.slane %v9986_v31, %v9979_v28 }
  0xfc   :  { %818 = vrot.lane.b32.xlu0 %v765_v1, %s9795_s0  ;;  %v559_v1 = vrot.slane %v9986_v31, %v9974_v25 }
  0xfe   :  { %820 = vrot.lane.b32.xlu1 %v769_v34, %s9795_s0  ;;  %v347_v34 = vrot.slane %v9991_v32, %v9974_v25 }
 0x100   :  { %327 = vbcast.lane.b32.xlu0 %v325_v14, 256 }
 0x102   :  { %543 = vbcast.lane.b32.xlu1 %v537_v38, 264  ;;  %v548_v38 = vrot.slane %v9986_v31, %v9969_v22 }
 0x104   :  { %822 = vrot.lane.b32.xlu0 %v773_v20, %s9795_s0  ;;  %v745_v20 = vcombine.high %v741_v33, %v741_v33  ;;  %v10253_v33 = vpop.permute.xlu0 %287 }
 0x105   :  { %14428 = vst [vmem:[#allocation42_spill] sm:$0xff] %v10253_v33 }
 0x106   :  { %824 = vrot.lane.b32.xlu1 %v777_v2, %s9795_s0  ;;  %v809_v8 = vrot.slane %v745_v20, %v9941_v6  ;;  %v76_v2 = vld [vmem:[%s14145_s1] sm:$0xff] }
 0x107   :  { %v1365_v31 = vrot.slane %v76_v2, %v9954_v13  ;;  %v1420_v20 = vrot.slane %v76_v2, %v9979_v28 }
 0x108   :  { %331 = vbcast.lane.b32.xlu0 %v325_v14, 264  ;;  %v358_v14 = vrot.slane %v9991_v32, %v9979_v28  ;;  %v1343_v32 = vrot.slane %v76_v2, %v9941_v6 }
 0x10a   :  { %338 = vbcast.lane.b32.xlu1 %v336_v4, 256 }
 0x10c   :  { %834 = vrot.lane.b32.xlu0 %v797_v53, %s9795_s0  ;;  %v10250_v53 = vpop.permute.xlu1 %499 }
 0x10d   :  { %14427 = vst [vmem:[#allocation41_spill] sm:$0xff] %v10250_v53 }
 0x10e   :  { %342 = vbcast.lane.b32.xlu1 %v336_v4, 264  ;;  %v1354_v4 = vrot.slane %v76_v2, %v9949_v10 }
 0x110   :  { %550 = vbcast.lane.b32.xlu0 %v548_v38, 256 }
 0x112   :  { %836 = vrot.lane.b32.xlu1 %v801_v39, %s9795_s0  ;;  %v1387_v39 = vrot.slane %v76_v2, %v9964_v19 }
 0x114   :  { %554 = vbcast.lane.b32.xlu0 %v548_v38, 264  ;;  %v1376_v38 = vrot.slane %v76_v2, %v9959_v16 }
 0x116   :  { %561 = vbcast.lane.b32.xlu1 %v559_v1, 256 }
 0x118   :  { %349 = vbcast.lane.b32.xlu0 %v347_v34, 256 }
 0x11a   :  { %565 = vbcast.lane.b32.xlu1 %v559_v1, 264  ;;  %v10256_v1 = vpop.permute.xlu1 %294 }
 0x11b   :  { %14429 = vst [vmem:[#allocation43_spill] sm:$0xff] %v10256_v1 }
 0x11c   :  { %353 = vbcast.lane.b32.xlu0 %v347_v34, 264  ;;  %v1398_v34 = vrot.slane %v76_v2, %v9969_v22 }
 0x11e   :  { %360 = vbcast.lane.b32.xlu1 %v358_v14, 256  ;;  %v10261_v60 = vpop.permute.xlu1 %298 }
 0x11f   :  { %14431 = vst [vmem:[#allocation45_spill] sm:$0xff] %v10261_v60 }
 0x120   :  { %838 = vrot.lane.b32.xlu0 %v805_v21, %s9795_s0  ;;  %v1409_v21 = vrot.slane %v76_v2, %v9974_v25 }
 0x122   :  { %364 = vbcast.lane.b32.xlu1 %v358_v14, 264  ;;  %v10259_v14 = vpop.permute.xlu0 %506 }
 0x123   :  { %14430 = vst [vmem:[#allocation44_spill] sm:$0xff] %v10259_v14 }
 0x124   :  { %572 = vbcast.lane.b32.xlu0 %v570_v40, 256 }
 0x126   :  { %840 = vrot.lane.b32.xlu1 %v809_v8, %s9795_s0  ;;  %v77_v8 = vld [vmem:[%s14145_s1 + $0x8] sm:$0xff] }
 0x127   :  { %v1475_v24 = vrot.slane %v77_v8, %v9964_v19  ;;  %v372_v19 = vmul.f32 %v10047_v57, %v10020_v45  ;;  %v1497_v0 = vrot.slane %v77_v8, %v9974_v25 }
 0x128   :  { %576 = vbcast.lane.b32.xlu0 %v570_v40, 264  ;;  %v10264_v40 = vpop.permute.xlu0 %510 }
 0x129   :  { %14432 = vst [vmem:[#allocation46_spill] sm:$0xff] %v10264_v40 }
 0x12a   :  { %1349 = vbcast.lane.b32.xlu1 %v1343_v32, 264 }
 0x12c   :  { %1345 = vbcast.lane.b32.xlu0 %v1343_v32, 256  ;;  %v10270_v32 = vpop.permute.xlu1 %517 }
 0x12d   :  { %14433 = vst [vmem:[#allocation47_spill] sm:$0xff] %v10270_v32 }
 0x12e   :  { %1360 = vbcast.lane.b32.xlu1 %v1354_v4, 264 }
 0x130   :  { %1356 = vbcast.lane.b32.xlu0 %v1354_v4, 256  ;;  %v1431_v4 = vrot.slane %v77_v8, %v9941_v6 }
 0x132   :  { %1371 = vbcast.lane.b32.xlu1 %v1365_v31, 264 }
 0x134   :  { %1367 = vbcast.lane.b32.xlu0 %v1365_v31, 256  ;;  %v10273_v31 = vpop.permute.xlu0 %305 }
 0x135   :  { %14434 = vst [vmem:[#allocation48_spill] sm:$0xff] %v10273_v31 }
 0x136   :  { %1382 = vbcast.lane.b32.xlu1 %v1376_v38, 264 }
 0x138   :  { %1378 = vbcast.lane.b32.xlu0 %v1376_v38, 256  ;;  %v10275_v38 = vpop.permute.xlu1 %521  ;;  %v10278_v2 = vpop.permute.xlu0 %309 }
 0x139   :  { %14435 = vst [vmem:[#allocation49_spill] sm:$0xff] %v10275_v38  ;;  %14436 = vst [vmem:[#allocation50_spill] sm:$0xff] %v10278_v2 }
 0x13a   :  { %1393 = vbcast.lane.b32.xlu1 %v1387_v39, 264 }
 0x13c   :  { %1389 = vbcast.lane.b32.xlu0 %v1387_v39, 256  ;;  %v1442_v39 = vrot.slane %v77_v8, %v9949_v10  ;;  %v10281_v26 = vpop.permute.xlu1 %316  ;;  %v10284_v17 = vpop.permute.xlu0 %528 }
 0x13d   :  { %14437 = vst [vmem:[#allocation51_spill] sm:$0xff] %v10281_v26  ;;  %14438 = vst [vmem:[#allocation52_spill] sm:$0xff] %v10284_v17 }
 0x13e   :  { %1404 = vbcast.lane.b32.xlu1 %v1398_v34, 264 }
 0x140   :  { %1400 = vbcast.lane.b32.xlu0 %v1398_v34, 256  ;;  %v1453_v34 = vrot.slane %v77_v8, %v9954_v13  ;;  %v1486_v13 = vrot.slane %v77_v8, %v9969_v22  ;;  %v373_v22 = vmul.f32 %v10047_v57, %v10024_v47  ;;  %v586_v47 = vmul.f32 %v10044_v56, %v10028_v49 }
 0x142   :  { %1415 = vbcast.lane.b32.xlu1 %v1409_v21, 264 }
 0x144   :  { %1411 = vbcast.lane.b32.xlu0 %v1409_v21, 256  ;;  %v1464_v21 = vrot.slane %v77_v8, %v9959_v16  ;;  %v371_v16 = vmul.f32 %v10047_v57, %v10014_v42 }
 0x146   :  { %1426 = vbcast.lane.b32.xlu1 %v1420_v20, 264  ;;  %v615_v58 = vadd.f32 %v583_v15, %v371_v16  ;;  %v587_v15 = vmul.f32 %v10044_v56, %v10032_v51 }
 0x148   :  { %1422 = vbcast.lane.b32.xlu0 %v1420_v20, 256  ;;  %v10286_v20 = vpop.permute.xlu1 %320 }
 0x149   :  { %14439 = vst [vmem:[#allocation53_spill] sm:$0xff] %v10286_v20 }
 0x14a   :  { %1437 = vbcast.lane.b32.xlu1 %v1431_v4, 264 }
 0x14c   :  { %1433 = vbcast.lane.b32.xlu0 %v1431_v4, 256 }
 0x14e   :  { %1448 = vbcast.lane.b32.xlu1 %v1442_v39, 264 }
 0x150   :  { %1444 = vbcast.lane.b32.xlu0 %v1442_v39, 256  ;;  %v370_v39 = vmul.f32 %v10047_v57, %v10012_v41 }
 0x152   :  { %1459 = vbcast.lane.b32.xlu1 %v1453_v34, 264 }
 0x154   :  { %1455 = vbcast.lane.b32.xlu0 %v1453_v34, 256  ;;  %v582_v34 = vmul.f32 %v10044_v56, %v10016_v43  ;;  %v617_v43 = vadd.f32 %v585_v5, %v373_v22  ;;  %v376_v5 = vmul.f32 %v10047_v57, %v10039_v54 }
 0x156   :  { %1470 = vbcast.lane.b32.xlu1 %v1464_v21, 264  ;;  %v614_v59 = vadd.f32 %v582_v34, %v370_v39 }
 0x158   :  { %1466 = vbcast.lane.b32.xlu0 %v1464_v21, 256  ;;  %v584_v21 = vmul.f32 %v10044_v56, %v10022_v46 }
 0x15a   :  { %v10289_v4 = vpop.permute.xlu0 %826  ;;  %1481 = vbcast.lane.b32.xlu1 %v1475_v24, 264  ;;  %v616_v46 = vadd.f32 %v584_v21, %v372_v19 }
 0x15c   :  { %v10308_v7 = vpop.permute.xlu1 %828  ;;  %1477 = vbcast.lane.b32.xlu0 %v1475_v24, 256 }
 0x15e   :  { %v811_v63 = vpop.permute.xlu0 %810  ;;  %1492 = vbcast.lane.b32.xlu1 %v1486_v13, 264 }
 0x15f   :  { %v858_v45 = vadd.f32 %v811_v63, %v10159_v35  ;;  %v859_v44 = vadd.f32 %v811_v63, %v10157_v18  ;;  %v375_v63 = vmul.f32 %v10047_v57, %v10034_v52 }
 0x160   :  { %v813_v42 = vpop.permute.xlu1 %812  ;;  %1488 = vbcast.lane.b32.xlu0 %v1486_v13, 256 }
 0x161   :  { %v890_v24 = vadd.f32 %v858_v45, %v614_v59  ;;  %v891_v41 = vadd.f32 %v859_v44, %v615_v58  ;;  %v860_v10 = vadd.f32 %v813_v42, %v10159_v35  ;;  %v861_v25 = vadd.f32 %v813_v42, %v10157_v18 }
 0x162   :  { %v10325_v39 = vpop.permute.xlu0 %830  ;;  %1503 = vbcast.lane.b32.xlu1 %v1497_v0, 264  ;;  %v1508_v45 = vrot.slane %v77_v8, %v9979_v28  ;;  %v588_v44 = vmul.f32 %v10044_v56, %v10041_v55  ;;  %v618_v28 = vadd.f32 %v586_v47, %v374_v48  ;;  %v619_v8 = vadd.f32 %v587_v15, %v375_v63 }
 0x163   :  { %v892_v58 = vadd.f32 %v860_v10, %v616_v46  ;;  %v893_v42 = vadd.f32 %v861_v25, %v617_v43  ;;  %vm922_vm3 = vcmp.ge.f32.partialorder %v890_v24, 0.0  ;;  %v954_v13 = vmul.f32 0.2, %v890_v24 }
 0x164   :  { %v10330_v59 = vpop.permute.xlu1 %832  ;;  %vm923_vm4 = vcmp.ge.f32.partialorder %v891_v41, 0.0  ;;  %v955_v16 = vmul.f32 0.2, %v891_v41  ;;  %1499 = vbcast.lane.b32.xlu0 %v1497_v0, 256  ;;  %v620_v46 = vadd.f32 %v588_v44, %v376_v5 }
 0x165   :  { %v986_v34 = vsel %vm922_vm3, %v890_v24, %v954_v13  ;;  %vm924_vm5 = vcmp.ge.f32.partialorder %v892_v58, 0.0  ;;  %v956_v22 = vmul.f32 0.2, %v892_v58  ;;  %vm925_vm6 = vcmp.ge.f32.partialorder %v893_v42, 0.0 }
 0x166   :  { %v815_v19 = vpop.permute.xlu0 %814  ;;  %v987_v21 = vsel %vm923_vm4, %v891_v41, %v955_v16  ;;  %1514 = vbcast.lane.b32.xlu1 %v1508_v45, 264  ;;  %8642 = vmatprep.mubr.msk.f32.mxu1 %vm14352_vm2, %v986_v34  ;;  %v957_v0 = vmul.f32 0.2, %v893_v42 }
 0x167   :  { %v862_v10 = vadd.f32 %v815_v19, %v10159_v35  ;;  %v863_v43 = vadd.f32 %v815_v19, %v10157_v18  ;;  %8643 = vmatmul.mubr.msk.f32.vlgmr.msra.gmra.mrb[0].mxu1 %vm14352_vm2, %v987_v21  ;;  %v988_v25 = vsel %vm924_vm5, %v892_v58, %v956_v22 }
 0x168   :  { %v817_v55 = vpop.permute.xlu1 %816  ;;  %8645 = vmatprep.mubr.msk.f32.mxu1 %vm14352_vm2, %v988_v25  ;;  %1510 = vbcast.lane.b32.xlu0 %v1508_v45, 256  ;;  %v989_v44 = vsel %vm925_vm6, %v893_v42, %v957_v0 }
 0x169   :  { %v894_v24 = vadd.f32 %v862_v10, %v618_v28  ;;  %v895_v41 = vadd.f32 %v863_v43, %v619_v8  ;;  %v864_v47 = vadd.f32 %v817_v55, %v10159_v35  ;;  %v865_v48 = vadd.f32 %v817_v55, %v10157_v18 }
 0x16a   :  { %v10339_v15 = vpop.permute.xlu0 %532  ;;  %v598_v28 = vmul.f32 %v10044_v56, %v10245_v29  ;;  %v386_v8 = vmul.f32 %v10047_v57, %v10248_v36 }
 0x16b   :  { %14440 = vst [vmem:[#allocation54_spill] sm:$0xff] %v10339_v15  ;;  %v896_v63 = vadd.f32 %v864_v47, %v620_v46  ;;  %v897_v5 = vadd.f32 %v865_v48, %v10057_v62  ;;  %vm926_vm7 = vcmp.ge.f32.partialorder %v894_v24, 0.0  ;;  %8646 = vmatmul.mubr.msk.f32.gmra.mrb[2].mxu1 %vm14352_vm2, %v989_v44  ;;  %v958_v13 = vmul.f32 0.2, %v894_v24 }
 0x16c   :  { %v10343_v58 = vpop.permute.xlu1 %539  ;;  %vm927_vm8 = vcmp.ge.f32.partialorder %v895_v41, 0.0  ;;  %v959_v16 = vmul.f32 0.2, %v895_v41  ;;  %v388_v47 = vmul.f32 %v10047_v57, %v10256_v1 }
 0x16d   :  { %14441 = vst [vmem:[#allocation55_spill] sm:$0xff] %v10343_v58  ;;  %vm928_vm9 = vcmp.ge.f32.partialorder %v896_v63, 0.0  ;;  %v960_v34 = vmul.f32 0.2, %v896_v63  ;;  %v990_v19 = vsel %vm926_vm7, %v894_v24, %v958_v13  ;;  %v961_v22 = vmul.f32 0.2, %v897_v5 }
 0x16e   :  { %v819_v21 = vpop.permute.xlu0 %818  ;;  %v991_v55 = vsel %vm927_vm8, %v895_v41, %v959_v16  ;;  %8648 = vmatprep.mubr.msk.f32.mxu1 %vm14352_vm2, %v990_v19  ;;  %vm929_vm10 = vcmp.ge.f32.partialorder %v897_v5, 0.0  ;;  %v599_v24 = vmul.f32 %v10044_v56, %v10250_v53  ;;  %v387_v41 = vmul.f32 %v10047_v57, %v10253_v33 }
 0x16f   :  { %v866_v45 = vadd.f32 %v819_v21, %v10159_v35  ;;  %v867_v62 = vadd.f32 %v819_v21, %v10157_v18  ;;  %v992_v42 = vsel %vm928_vm9, %v896_v63, %v960_v34  ;;  %8649 = vmatmul.mubr.msk.f32.gmra.mrb[4].mxu1 %vm14352_vm2, %v991_v55  ;;  %v993_v44 = vsel %vm929_vm10, %v897_v5, %v961_v22 }
 0x170   :  { %v821_v10 = vpop.permute.xlu1 %820  ;;  %8651 = vmatprep.mubr.msk.f32.mxu1 %vm14352_vm2, %v992_v42  ;;  %v389_v13 = vmul.f32 %v10047_v57, %v10261_v60  ;;  %v601_v21 = vmul.f32 %v10044_v56, %v10264_v40  ;;  %v390_v5 = vmul.f32 %v10047_v57, %v10273_v31  ;;  %v874_v55 = vadd.f32 %v10289_v4, %v10159_v35 }
 0x171   :  { %v898_v43 = vadd.f32 %v866_v45, %v10067_v3  ;;  %v899_v46 = vadd.f32 %v867_v62, %v10077_v11  ;;  %v868_v25 = vadd.f32 %v821_v10, %v10159_v35  ;;  %v869_v0 = vadd.f32 %v821_v10, %v10157_v18 }
 0x172   :  { %v600_v3 = vmul.f32 %v10044_v56, %v10259_v14  ;;  %v10366_v48 = vpop.permute.xlu0 %327 }
 0x173   :  { %14442 = vst [vmem:[#allocation56_spill] sm:$0xff] %v10366_v48  ;;  %v900_v11 = vadd.f32 %v868_v25, %v10093_v23  ;;  %v901_v63 = vadd.f32 %v869_v0, %v10103_v30  ;;  %vm930_vm11 = vcmp.ge.f32.partialorder %v898_v43, 0.0  ;;  %8652 = vmatmul.mubr.msk.f32.gmra.mrb[6].mxu1 %vm14352_vm2, %v993_v44  ;;  %v962_v34 = vmul.f32 0.2, %v898_v43 }
 0x174   :  { %v10373_v16 = vpop.permute.xlu1 %543  ;;  %vm931_vm12 = vcmp.ge.f32.partialorder %v899_v46, 0.0  ;;  %v963_v19 = vmul.f32 0.2, %v899_v46  ;;  %v602_v23 = vmul.f32 %v10044_v56, %v10270_v32  ;;  %v630_v44 = vadd.f32 %v598_v28, %v386_v8 }
 0x175   :  { %14443 = vst [vmem:[#allocation57_spill] sm:$0xff] %v10373_v16  ;;  %vm932_vm13 = vcmp.ge.f32.partialorder %v900_v11, 0.0  ;;  %v964_v30 = vmul.f32 0.2, %v900_v11  ;;  %v994_v45 = vsel %vm930_vm11, %v898_v43, %v962_v34  ;;  %v965_v0 = vmul.f32 0.2, %v901_v63 }
 0x176   :  { %v823_v62 = vpop.permute.xlu0 %822  ;;  %v995_v42 = vsel %vm931_vm12, %v899_v46, %v963_v19  ;;  %8654 = vmatprep.mubr.msk.f32.mxu1 %vm14352_vm2, %v994_v45  ;;  %v631_v32 = vadd.f32 %v599_v24, %v387_v41  ;;  %v632_v40 = vadd.f32 %v600_v3, %v388_v47  ;;  %vm933_vm14 = vcmp.ge.f32.partialorder %v901_v63, 0.0 }
 0x177   :  { %v870_v22 = vadd.f32 %v823_v62, %v10159_v35  ;;  %v871_v10 = vadd.f32 %v823_v62, %v10157_v18  ;;  %v996_v25 = vsel %vm932_vm13, %v900_v11, %v964_v30  ;;  %8655 = vmatmul.mubr.msk.f32.gmra.mrb[8].mxu1 %vm14352_vm2, %v995_v42  ;;  %v633_v19 = vadd.f32 %v601_v21, %v389_v13 }
 0x178   :  { %v825_v31 = vpop.permute.xlu1 %824  ;;  %8657 = vmatprep.mubr.msk.f32.mxu1 %vm14352_vm2, %v996_v25  ;;  %v634_v11 = vadd.f32 %v602_v23, %v390_v5  ;;  %v875_v28 = vadd.f32 %v10289_v4, %v10157_v18  ;;  %v906_v8 = vadd.f32 %v874_v55, %v630_v44  ;;  %v997_v47 = vsel %vm933_vm14, %v901_v63, %v965_v0 }
 0x179   :  { %v902_v60 = vadd.f32 %v870_v22, %v10113_v37  ;;  %v903_v43 = vadd.f32 %v871_v10, %v10123_v61  ;;  %v872_v46 = vadd.f32 %v825_v31, %v10159_v35  ;;  %v873_v34 = vadd.f32 %v825_v31, %v10157_v18 }
 0x17a   :  { %v10394_v24 = vpop.permute.xlu0 %331  ;;  %v876_v61 = vadd.f32 %v10308_v7, %v10159_v35  ;;  %v877_v4 = vadd.f32 %v10308_v7, %v10157_v18  ;;  %v603_v63 = vmul.f32 %v10044_v56, %v10275_v38  ;;  %v907_v21 = vadd.f32 %v875_v28, %v631_v32 }
 0x17b   :  { %14444 = vst [vmem:[#allocation58_spill] sm:$0xff] %v10394_v24  ;;  %v904_v41 = vadd.f32 %v872_v46, %v10133_v12  ;;  %v905_v37 = vadd.f32 %v873_v34, %v10143_v27  ;;  %vm934_vm15 = vcmp.ge.f32.partialorder %v902_v60, 0.0  ;;  %8658 = vmatmul.mubr.msk.f32.gmra.mrb[10].mxu1 %vm14352_vm2, %v997_v47  ;;  %v966_v3 = vmul.f32 0.2, %v902_v60 }
 0x17c   :  { %v10401_v31 = vpop.permute.xlu1 %338  ;;  %vm935_vm0 = vcmp.ge.f32.partialorder %v903_v43, 0.0  ;;  %v967_v13 = vmul.f32 0.2, %v903_v43  ;;  %v878_v12 = vadd.f32 %v10325_v39, %v10159_v35  ;;  %v391_v55 = vmul.f32 %v10047_v57, %v10278_v2 }
 0x17d   :  { %14445 = vst [vmem:[#allocation59_spill] sm:$0xff] %v10401_v31  ;;  %vm936_vm1 = vcmp.ge.f32.partialorder %v904_v41, 0.0  ;;  %v968_v27 = vmul.f32 0.2, %v904_v41  ;;  %v998_v30 = vsel %vm934_vm15, %v902_v60, %v966_v3  ;;  %v392_v45 = vmul.f32 %v10047_v57, %v10281_v26 }
 0x17e   :  { %v835_v23 = vpop.permute.xlu0 %834  ;;  %v999_v5 = vsel %vm935_vm0, %v903_v43, %v967_v13  ;;  %8660 = vmatprep.mubr.msk.f32.mxu1 %vm14352_vm2, %v998_v30  ;;  %v969_v62 = vmul.f32 0.2, %v905_v37  ;;  %v604_v42 = vmul.f32 %v10044_v56, %v10284_v17  ;;  %v908_v22 = vadd.f32 %v876_v61, %v632_v40 }
 0x17f   :  { %v1000_v7 = vsel %vm936_vm1, %v904_v41, %v968_v27  ;;  %8661 = vmatmul.mubr.msk.f32.gmra.mrb[12].mxu1 %vm14352_vm2, %v999_v5  ;;  %vm937_vm3 = vcmp.ge.f32.partialorder %v905_v37, 0.0  ;;  %v970_v60 = vmul.f32 0.2, %v906_v8  ;;  %v909_v10 = vadd.f32 %v877_v4, %v633_v19 }
 0x180   :  { %v10417_v32 = vpop.permute.xlu1 %342  ;;  %v910_v25 = vadd.f32 %v878_v12, %v634_v11  ;;  %v605_v0 = vmul.f32 %v10044_v56, %v10339_v15  ;;  %8663 = vmatprep.mubr.msk.f32.mxu1 %vm14352_vm2, %v1000_v7  ;;  %vm938_vm4 = vcmp.ge.f32.partialorder %v906_v8, 0.0  ;;  %v393_v44 = vmul.f32 %v10047_v57, %v10286_v20 }
 0x181   :  { %14446 = vst [vmem:[#allocation60_spill] sm:$0xff] %v10417_v32  ;;  %v971_v40 = vmul.f32 0.2, %v907_v21  ;;  %v879_v46 = vadd.f32 %v10325_v39, %v10157_v18  ;;  %v880_v34 = vadd.f32 %v10330_v59, %v10159_v35  ;;  %v1001_v19 = vsel %vm937_vm3, %v905_v37, %v969_v62 }
 0x182   :  { %v10424_v43 = vpop.permute.xlu0 %550  ;;  %vm939_vm5 = vcmp.ge.f32.partialorder %v907_v21, 0.0  ;;  %v635_v11 = vadd.f32 %v603_v63, %v391_v55  ;;  %v636_v28 = vadd.f32 %v604_v42, %v392_v45  ;;  %v1002_v41 = vsel %vm938_vm4, %v906_v8, %v970_v60 }
 0x183   :  { %14447 = vst [vmem:[#allocation61_spill] sm:$0xff] %v10424_v43  ;;  %8664 = vmatmul.mubr.msk.f32.gmra.mrb[14].mxu1 %vm14352_vm2, %v1001_v19  ;;  %v972_v61 = vmul.f32 0.2, %v908_v22  ;;  %v637_v3 = vadd.f32 %v605_v0, %v393_v44  ;;  %vm940_vm6 = vcmp.ge.f32.partialorder %v908_v22, 0.0  ;;  %v973_v13 = vmul.f32 0.2, %v909_v10 }
 0x184   :  { %v837_v47 = vpop.permute.xlu1 %836  ;;  %8666 = vmatprep.mubr.msk.f32.mxu1 %vm14352_vm2, %v1002_v41  ;;  %v974_v4 = vmul.f32 0.2, %v910_v25  ;;  %v394_v39 = vmul.f32 %v10047_v57, %v10366_v48  ;;  %v1003_v37 = vsel %vm939_vm5, %v907_v21, %v971_v40  ;;  %vm941_vm7 = vcmp.ge.f32.partialorder %v909_v10, 0.0 }
 0x185   :  { %vm942_vm8 = vcmp.ge.f32.partialorder %v910_v25, 0.0  ;;  %v911_v27 = vadd.f32 %v879_v46, %v635_v11  ;;  %v881_v8 = vadd.f32 %v10330_v59, %v10157_v18  ;;  %v912_v63 = vadd.f32 %v880_v34, %v636_v28 }
 0x186   :  { %v10434_v12 = vpop.permute.xlu0 %554  ;;  %v395_v30 = vmul.f32 %v10047_v57, %v10394_v24  ;;  %v606_v5 = vmul.f32 %v10044_v56, %v10343_v58  ;;  %v882_v55 = vadd.f32 %v835_v23, %v10159_v35  ;;  %v608_v45 = vmul.f32 %v10044_v56, %v10424_v43 }
 0x187   :  { %14448 = vst [vmem:[#allocation62_spill] sm:$0xff] %v10434_v12  ;;  %8667 = vmatmul.mubr.msk.f32.gmra.mrb[16].mxu1 %vm14352_vm2, %v1003_v37  ;;  %v1004_v21 = vsel %vm940_vm6, %v908_v22, %v972_v61  ;;  %v913_v62 = vadd.f32 %v881_v8, %v637_v3  ;;  %v607_v59 = vmul.f32 %v10044_v56, %v10373_v16  ;;  %vm943_vm9 = vcmp.ge.f32.partialorder %v911_v27, 0.0 }
 0x188   :  { %v10447_v7 = vpop.permute.xlu1 %561  ;;  %8669 = vmatprep.mubr.msk.f32.mxu1 %vm14352_vm2, %v1004_v21  ;;  %v1005_v42 = vsel %vm941_vm7, %v909_v10, %v973_v13  ;;  %v1006_v60 = vsel %vm942_vm8, %v910_v25, %v974_v4  ;;  %v638_v0 = vadd.f32 %v606_v5, %v394_v39  ;;  %v396_v44 = vmul.f32 %v10047_v57, %v10401_v31 }
 0x189   :  { %14449 = vst [vmem:[#allocation63_spill] sm:$0xff] %v10447_v7  ;;  %v883_v40 = vadd.f32 %v835_v23, %v10157_v18  ;;  %v609_v46 = vmul.f32 %v10044_v56, %v10434_v12  ;;  %v639_v34 = vadd.f32 %v607_v59, %v395_v30  ;;  %v975_v19 = vmul.f32 0.2, %v911_v27 }
 0x18a   :  { %v10457_v22 = vpop.permute.xlu0 %349  ;;  %v976_v11 = vmul.f32 0.2, %v912_v63  ;;  %v914_v28 = vadd.f32 %v882_v55, %v638_v0  ;;  %v397_v10 = vmul.f32 %v10047_v57, %v10417_v32  ;;  %v640_v25 = vadd.f32 %v608_v45, %v396_v44 }
 0x18b   :  { %14450 = vst [vmem:[#allocation64_spill] sm:$0xff] %v10457_v22  ;;  %v884_v41 = vadd.f32 %v837_v47, %v10159_v35  ;;  %8670 = vmatmul.mubr.msk.f32.gmra.mrb[18].mxu1 %vm14352_vm2, %v1005_v42  ;;  %vm944_vm10 = vcmp.ge.f32.partialorder %v912_v63, 0.0  ;;  %v915_v23 = vadd.f32 %v883_v40, %v639_v34  ;;  %v977_v4 = vmul.f32 0.2, %v913_v62 }
 0x18c   :  { %v10463_v61 = vpop.permute.xlu1 %565  ;;  %8672 = vmatprep.mubr.msk.f32.mxu1 %vm14352_vm2, %v1006_v60  ;;  %v641_v3 = vadd.f32 %v609_v46, %v397_v10  ;;  %v610_v39 = vmul.f32 %v10044_v56, %v10447_v7  ;;  %v398_v37 = vmul.f32 %v10047_v57, %v10457_v22  ;;  %v1007_v8 = vsel %vm943_vm9, %v911_v27, %v975_v19 }
 0x18d   :  { %14451 = vst [vmem:[#allocation65_spill] sm:$0xff] %v10463_v61  ;;  %vm945_vm11 = vcmp.ge.f32.partialorder %v913_v62, 0.0  ;;  %v885_v30 = vadd.f32 %v837_v47, %v10157_v18  ;;  %v916_v5 = vadd.f32 %v884_v41, %v640_v25  ;;  %v1008_v55 = vsel %vm944_vm10, %v912_v63, %v976_v11 }
 0x18e   :  { %v10466_v13 = vpop.permute.xlu0 %353  ;;  %v978_v21 = vmul.f32 0.2, %v914_v28  ;;  %v611_v59 = vmul.f32 %v10044_v56, %v10463_v61  ;;  %vm946_vm12 = vcmp.ge.f32.partialorder %v914_v28, 0.0  ;;  %v1009_v0 = vsel %vm945_vm11, %v913_v62, %v977_v4 }
 0x18f   :  { %14452 = vst [vmem:[#allocation66_spill] sm:$0xff] %v10466_v13  ;;  %8673 = vmatmul.mubr.msk.f32.gmra.mrb[20].mxu1 %vm14352_vm2, %v1007_v8  ;;  %v399_v42 = vmul.f32 %v10047_v57, %v10466_v13  ;;  %v917_v27 = vadd.f32 %v885_v30, %v641_v3  ;;  %v979_v47 = vmul.f32 0.2, %v915_v23  ;;  %v642_v44 = vadd.f32 %v610_v39, %v398_v37 }
 0x190   :  { %v10475_v45 = vpop.permute.xlu1 %360  ;;  %8675 = vmatprep.mubr.msk.f32.mxu1 %vm14352_vm2, %v1008_v55  ;;  %vm947_vm13 = vcmp.ge.f32.partialorder %v915_v23, 0.0  ;;  %v1010_v46 = vsel %vm946_vm12, %v914_v28, %v978_v21  ;;  %v980_v19 = vmul.f32 0.2, %v916_v5  ;;  %vm948_vm14 = vcmp.ge.f32.partialorder %v916_v5, 0.0 }
 0x191   :  { %14453 = vst [vmem:[#allocation67_spill] sm:$0xff] %v10475_v45  ;;  %v643_v11 = vadd.f32 %v611_v59, %v399_v42  ;;  %v1011_v62 = vsel %vm947_vm13, %v915_v23, %v979_v47  ;;  %v981_v41 = vmul.f32 0.2, %v917_v27  ;;  %v400_v3 = vmul.f32 %v10047_v57, %v10475_v45 }
 0x192   :  { %v839_v60 = vpop.permute.xlu0 %838  ;;  %vm949_vm15 = vcmp.ge.f32.partialorder %v917_v27, 0.0  ;;  %v1012_v28 = vsel %vm948_vm14, %v916_v5, %v980_v19  ;;  %v82_v19 = vld [vmem:[%s14146_s5] sm:$0xff]  ;;  %vm14351_vm5 = vcmask 130048   ;;  %vm14359_vm6 = vcmask 1041409  }
 0x193   :  { %v886_v40 = vadd.f32 %v839_v60, %v10159_v35  ;;  %v887_v63 = vadd.f32 %v839_v60, %v10157_v18  ;;  %8676 = vmatmul.mubr.msk.f32.gmra.mrb[22].mxu1 %vm14352_vm2, %v1009_v0  ;;  %v1013_v21 = vsel %vm949_vm15, %v917_v27, %v981_v41  ;;  %vm14358_vm7 = vcmask 1042434  }
 0x194   :  { %v10485_v34 = vpop.permute.xlu1 %364  ;;  %8678 = vmatprep.mubr.msk.f32.mxu1 %vm14352_vm2, %v1010_v46  ;;  %vm14357_vm8 = vcmask 1043459   ;;  %vm14356_vm9 = vcmask 1044484   ;;  %vm14355_vm10 = vcmask 1045509   ;;  %vm14354_vm11 = vcmask 1046534  }
 0x195   :  { %14454 = vst [vmem:[#allocation68_spill] sm:$0xff] %v10485_v34  ;;  %v918_v10 = vadd.f32 %v886_v40, %v642_v44  ;;  %v919_v4 = vadd.f32 %v887_v63, %v643_v11  ;;  %v401_v59 = vmul.f32 %v10047_v57, %v10485_v34  ;;  %v83_v11 = vld [vmem:[%s14146_s5 + $0x8] sm:$0xff]  ;;  %vm14353_vm12 = vcmask 1047559  }
 0x196   :  { %v10488_v25 = vpop.permute.xlu0 %572 }
 0x197   :  { %14455 = vst [vmem:[#allocation69_spill] sm:$0xff] %v10488_v25  ;;  %v612_v39 = vmul.f32 %v10044_v56, %v10488_v25  ;;  %8679 = vmatmul.mubr.msk.f32.gmra.mrb[24].mxu1 %vm14352_vm2, %v1011_v62  ;;  %v982_v8 = vmul.f32 0.2, %v918_v10  ;;  %vm950_vm0 = vcmp.ge.f32.partialorder %v918_v10, 0.0  ;;  %v983_v0 = vmul.f32 0.2, %v919_v4 }
 0x198   :  { %v841_v37 = vpop.permute.xlu1 %840  ;;  %8681 = vmatprep.mubr.msk.f32.mxu1 %vm14352_vm2, %v1012_v28  ;;  %vm951_vm1 = vcmp.ge.f32.partialorder %v919_v4, 0.0 }
 0x199   :  { %v644_v30 = vadd.f32 %v612_v39, %v400_v3  ;;  %v888_v55 = vadd.f32 %v841_v37, %v10159_v35  ;;  %v1014_v5 = vsel %vm950_vm0, %v918_v10, %v982_v8  ;;  %v889_v47 = vadd.f32 %v841_v37, %v10157_v18 }
 0x19a   :  { %v10497_v23 = vpop.permute.xlu0 %576  ;;  %v1015_v63 = vsel %vm951_vm1, %v919_v4, %v983_v0  ;;  %v10515_v10 = vpack.c.bf16 %v83_v11, %v82_v19 }
 0x19b   :  { %14456 = vst [vmem:[#allocation70_spill] sm:$0xff] %v10497_v23  ;;  %v920_v42 = vadd.f32 %v888_v55, %v644_v30  ;;  %v613_v60 = vmul.f32 %v10044_v56, %v10497_v23  ;;  %8682 = vmatmul.mubr.msk.f32.gmra.mrb[26].mxu1 %vm14352_vm2, %v1013_v21 }
 0x19c   :  { %8684 = vmatprep.mubr.msk.f32.mxu1 %vm14352_vm2, %v1014_v5  ;;  %14457 = vst [vmem:[#allocation71_spill] sm:$0xff] %v10515_v10  ;;  %9043 = vmatprep.subr.bf16.mxu0 %v10515_v10  ;;  %v10519_v62 = vpop.permute.xlu1 %1349 }
 0x19d   :  { %v645_v44 = vadd.f32 %v613_v60, %v401_v59  ;;  %vm952_vm3 = vcmp.ge.f32.partialorder %v920_v42, 0.0  ;;  %v984_v40 = vmul.f32 0.2, %v920_v42  ;;  %9045 = vmatpush3.bf16.msra.mxu0 %v10515_v10  ;;  %14458 = vst [vmem:[#allocation72_spill] sm:$0xff] %v10519_v62 }
 0x19e   :  { %v10521_v41 = vpop.permute.xlu0 %1345 }
 0x19f   :  { %v921_v27 = vadd.f32 %v889_v47, %v645_v44  ;;  %v1016_v46 = vsel %vm952_vm3, %v920_v42, %v984_v40  ;;  %8685 = vmatmul.mubr.msk.f32.gmra.mrb[28].mxu1 %vm14352_vm2, %v1015_v63  ;;  %14459 = vst [vmem:[#allocation73_spill] sm:$0xff] %v10521_v41 }
 0x1a0   :  { %8687 = vmatprep.mubr.msk.f32.mxu1 %vm14352_vm2, %v1016_v46  ;;  %v10523_v3 = vpop.permute.xlu1 %1360 }
 0x1a1   :  { %vm953_vm4 = vcmp.ge.f32.partialorder %v921_v27, 0.0  ;;  %v985_v56 = vmul.f32 0.2, %v921_v27  ;;  %14460 = vst [vmem:[#allocation74_spill] sm:$0xff] %v10523_v3 }
 0x1a2   :  { %v10525_v4 = vpop.permute.xlu0 %1356 }
 0x1a3   :  { %v1017_v57 = vsel %vm953_vm4, %v921_v27, %v985_v56  ;;  %14461 = vst [vmem:[#allocation75_spill] sm:$0xff] %v10525_v4 }
 0x1a4   :  { %8688 = vmatmul.mubr.msk.f32.gmra.mrb[30].mxu1 %vm14352_vm2, %v1017_v57  ;;  %v10527_v39 = vpop.permute.xlu1 %1371 }
 0x1a5   :  { %14462 = vst [vmem:[#allocation76_spill] sm:$0xff] %v10527_v39 }
 0x1a6   :  { %v10529_v28 = vpop.permute.xlu0 %1367 }
 0x1a7   :  { %14463 = vst [vmem:[#allocation77_spill] sm:$0xff] %v10529_v28 }
 0x1a8   :  { %v10533_v21 = vpop.permute.xlu1 %1382 }
 0x1a9   :  { %14464 = vst [vmem:[#allocation78_spill] sm:$0xff] %v10533_v21 }
 0x1aa   :  { %v10537_v0 = vpop.permute.xlu0 %1378 }
 0x1ab   :  { %14465 = vst [vmem:[#allocation79_spill] sm:$0xff] %v10537_v0 }
 0x1ac   :  { %v10549_v57 = vpop.permute.xlu1 %1393 }
 0x1ad   :  { %14466 = vst [vmem:[#allocation80_spill] sm:$0xff] %v10549_v57 }
 0x23a   :  { %v8644_v37 = vpop.f32.mrb[0].mxu1 }
 0x23b   :  { %v1517_v8 = vadd.f32 %v8644_v37, %v10519_v62  ;;  %v1181_v30 = vpop.f32.mrb[1].mxu1 }
 0x23c   :  { %v1516_v55 = vadd.f32 %v10521_v41, %v1181_v30 }
 0x23d   :  { %v1550_v59 = vsel %vm14351_vm5, %v1517_v8, -inf }
 0x23e   :  { %v1549_v42 = vsel %vm14351_vm5, %v1516_v55, -inf  ;;  %v8647_v60 = vpop.f32.mrb[2].mxu1 }
 0x23f   :  { %v1551_v5 = vmax.f32 %v1549_v42, %v1550_v59  ;;  %v10540_v47 = vadd.f32 %v8647_v60, %v10523_v3  ;;  %v1191_v44 = vpop.f32.mrb[3].mxu1  ;;  %v10557_v42 = vpop.permute.xlu0 %1389 }
 0x240   :  { %v10543_v40 = vadd.f32 %v10525_v4, %v1191_v44  ;;  %14467 = vst [vmem:[#allocation81_spill] sm:$0xff] %v10557_v42 }
 0x241   :  { %v1552_v27 = vrot.slane %v1551_v5, 4  ;;  %v1559_v63 = vsel %vm14351_vm5, %v10540_v47, -inf }
 0x242   :  { %v1558_v46 = vsel %vm14351_vm5, %v10543_v40, -inf  ;;  %v8650_v56 = vpop.f32.mrb[4].mxu1 }
 0x243   :  { %v1553_v19 = vmax.f32 %v1551_v5, %v1552_v27  ;;  %v1560_v11 = vmax.f32 %v1558_v46, %v1559_v63  ;;  %v10552_v37 = vadd.f32 %v8650_v56, %v10527_v39  ;;  %v1201_v30 = vpop.f32.mrb[5].mxu1 }
 0x244   :  { %v10555_v59 = vadd.f32 %v10529_v28, %v1201_v30  ;;  %v10569_v28 = vpop.permute.xlu1 %1404 }
 0x245   :  { %v1554_v60 = vrot.slane %v1553_v19, 2  ;;  %v1561_v44 = vrot.slane %v1560_v11, 4  ;;  %v1568_v4 = vsel %vm14351_vm5, %v10552_v37, -inf  ;;  %14468 = vst [vmem:[#allocation82_spill] sm:$0xff] %v10569_v28 }
 0x246   :  { %v1567_v3 = vsel %vm14351_vm5, %v10555_v59, -inf  ;;  %v8653_v41 = vpop.f32.mrb[6].mxu1 }
 0x247   :  { %v1555_v5 = vmax.f32 %v1553_v19, %v1554_v60  ;;  %v1562_v27 = vmax.f32 %v1560_v11, %v1561_v44  ;;  %v1569_v63 = vmax.f32 %v1567_v3, %v1568_v4  ;;  %v10564_v46 = vadd.f32 %v8653_v41, %v10533_v21  ;;  %v1211_v56 = vpop.f32.mrb[7].mxu1  ;;  %v10575_v3 = vpop.permute.xlu0 %1400 }
 0x248   :  { %v10567_v30 = vadd.f32 %v10537_v0, %v1211_v56  ;;  %14469 = vst [vmem:[#allocation83_spill] sm:$0xff] %v10575_v3 }
 0x249   :  { %v1556_v39 = vrot.slane %v1555_v5, 1  ;;  %v1563_v62 = vrot.slane %v1562_v27, 2  ;;  %v1570_v23 = vrot.slane %v1569_v63, 4  ;;  %v1577_v34 = vsel %vm14351_vm5, %v10564_v46, -inf }
 0x24a   :  { %v1576_v19 = vsel %vm14351_vm5, %v10567_v30, -inf  ;;  %v8656_v11 = vpop.f32.mrb[8].mxu1 }
 0x24b   :  { %v1557_v41 = vmax.f32 %v1555_v5, %v1556_v39  ;;  %v1564_v4 = vmax.f32 %v1562_v27, %v1563_v62  ;;  %v1571_v60 = vmax.f32 %v1569_v63, %v1570_v23  ;;  %v1578_v44 = vmax.f32 %v1576_v19, %v1577_v34  ;;  %v1221_v56 = vpop.f32.mrb[9].mxu1  ;;  %v10587_v34 = vpop.permute.xlu1 %1415 }
 0x24c   :  { %v10578_v0 = vadd.f32 %v8656_v11, %v10549_v57  ;;  %v10581_v21 = vadd.f32 %v10557_v42, %v1221_v56  ;;  %14470 = vst [vmem:[#allocation84_spill] sm:$0xff] %v10587_v34  ;;  %v10595_v56 = vpop.permute.xlu0 %1411 }
 0x24d   :  { %v1693_v25 = vsub.f32 %v1516_v55, %v1557_v41  ;;  %v1694_v45 = vsub.f32 %v1517_v8, %v1557_v41  ;;  %v1565_v61 = vrot.slane %v1564_v4, 1  ;;  %v1572_v13 = vrot.slane %v1571_v60, 2  ;;  %14471 = vst [vmem:[#allocation85_spill] sm:$0xff] %v10595_v56 }
 0x24e   :  { %v1579_v7 = vrot.slane %v1578_v44, 4  ;;  %v1586_v22 = vsel %vm14351_vm5, %v10578_v0, -inf  ;;  %v1585_v62 = vsel %vm14351_vm5, %v10581_v21, -inf  ;;  %v8659_v23 = vpop.f32.mrb[10].mxu1 }
 0x24f   :  { %v1725_v39 = vmul.f32 1.442695, %v1693_v25  ;;  %v1727_v5 = vmul.f32 1.442695, %v1694_v45  ;;  %v1566_v27 = vmax.f32 %v1564_v4, %v1565_v61  ;;  %v1573_v63 = vmax.f32 %v1571_v60, %v1572_v13  ;;  %v1231_v19 = vpop.f32.mrb[11].mxu1 }
 0x250   :  { %v1580_v11 = vmax.f32 %v1578_v44, %v1579_v7  ;;  %v1587_v55 = vmax.f32 %v1585_v62, %v1586_v22  ;;  %v10590_v8 = vadd.f32 %v8659_v23, %v10569_v28  ;;  %v10593_v41 = vadd.f32 %v10575_v3, %v1231_v19 }
 0x251   :  { %9270 = vpow2.f32 %v1725_v39  ;;  %v1695_v42 = vsub.f32 %v10543_v40, %v1566_v27  ;;  %v1696_v57 = vsub.f32 %v10540_v47, %v1566_v27  ;;  %v1574_v25 = vrot.slane %v1573_v63, 1 }
 0x252   :  { %9272 = vpow2.f32 %v1727_v5  ;;  %v1581_v61 = vrot.slane %v1580_v11, 2  ;;  %v1588_v13 = vrot.slane %v1587_v55, 4  ;;  %v1595_v7 = vsel %vm14351_vm5, %v10590_v8, -inf  ;;  %v8662_v22 = vpop.f32.mrb[12].mxu1  ;;  %v10606_v5 = vpop.permute.xlu1 %1426 }
 0x253   :  { %v1729_v45 = vmul.f32 1.442695, %v1695_v42  ;;  %v1731_v4 = vmul.f32 1.442695, %v1696_v57  ;;  %v1575_v60 = vmax.f32 %v1573_v63, %v1574_v25  ;;  %v1594_v44 = vsel %vm14351_vm5, %v10593_v41, -inf  ;;  %v1241_v62 = vpop.f32.mrb[13].mxu1 }
 0x254   :  { %v1582_v23 = vmax.f32 %v1580_v11, %v1581_v61  ;;  %v1589_v39 = vmax.f32 %v1587_v55, %v1588_v13  ;;  %v1596_v40 = vmax.f32 %v1594_v44, %v1595_v7  ;;  %v10604_v47 = vadd.f32 %v8662_v22, %v10587_v34  ;;  %14472 = vst [vmem:[#allocation86_spill] sm:$0xff] %v10606_v5  ;;  %v10613_v55 = vpop.permute.xlu0 %1422 }
 0x255   :  { %9274 = vpow2.f32 %v1729_v45  ;;  %v1697_v27 = vsub.f32 %v10555_v59, %v1575_v60  ;;  %v1698_v19 = vsub.f32 %v10552_v37, %v1575_v60  ;;  %v10611_v57 = vadd.f32 %v10595_v56, %v1241_v62  ;;  %14473 = vst [vmem:[#allocation87_spill] sm:$0xff] %v10613_v55 }
 0x256   :  { %9276 = vpow2.f32 %v1731_v4  ;;  %v1583_v42 = vrot.slane %v1582_v23, 1  ;;  %v1590_v63 = vrot.slane %v1589_v39, 2  ;;  %v1597_v25 = vrot.slane %v1596_v40, 4  ;;  %v8665_v11 = vpop.f32.mrb[14].mxu1  ;;  %v10627_v3 = vpop.permute.xlu1 %1437 }
 0x257   :  { %v1733_v61 = vmul.f32 1.442695, %v1697_v27  ;;  %v1735_v13 = vmul.f32 1.442695, %v1698_v19  ;;  %v1604_v7 = vsel %vm14351_vm5, %v10604_v47, -inf  ;;  %v1603_v59 = vsel %vm14351_vm5, %v10611_v57, -inf }
 0x258   :  { %v1584_v22 = vmax.f32 %v1582_v23, %v1583_v42  ;;  %v1591_v37 = vmax.f32 %v1589_v39, %v1590_v63  ;;  %v1598_v45 = vmax.f32 %v1596_v40, %v1597_v25  ;;  %v1605_v60 = vmax.f32 %v1603_v59, %v1604_v7  ;;  %v1251_v44 = vpop.f32.mrb[15].mxu1  ;;  %14474 = vst [vmem:[#allocation88_spill] sm:$0xff] %v10627_v3  ;;  %v10645_v12 = vpop.permute.xlu0 %1433 }
 0x259   :  { %9278 = vpow2.f32 %v1733_v61  ;;  %v10620_v4 = vadd.f32 %v8665_v11, %v10606_v5  ;;  %v10623_v62 = vadd.f32 %v10613_v55, %v1251_v44  ;;  %14475 = vst [vmem:[#allocation89_spill] sm:$0xff] %v10645_v12 }
 0x25a   :  { %9280 = vpow2.f32 %v1735_v13  ;;  %v1699_v27 = vsub.f32 %v10567_v30, %v1584_v22  ;;  %v1700_v19 = vsub.f32 %v10564_v46, %v1584_v22  ;;  %v1592_v56 = vrot.slane %v1591_v37, 1  ;;  %v8668_v34 = vpop.f32.mrb[16].mxu1 }
 0x25b   :  { %v10629_v23 = vpop.eup %9270  ;;  %v1599_v39 = vrot.slane %v1598_v45, 2  ;;  %v1606_v40 = vrot.slane %v1605_v60, 4  ;;  %v1613_v42 = vsel %vm14351_vm5, %v10620_v4, -inf  ;;  %v1612_v63 = vsel %vm14351_vm5, %v10623_v62, -inf  ;;  %v10635_v25 = vpop.f32.mrb[17].mxu1 }
 0x25c   :  { %v10637_v11 = vpop.eup %9272  ;;  %v1789_v46 = vsel %vm14351_vm5, %v10629_v23, 0.0  ;;  %v1737_v30 = vmul.f32 1.442695, %v1699_v27  ;;  %v1739_v61 = vmul.f32 1.442695, %v1700_v19  ;;  %v1593_v13 = vmax.f32 %v1591_v37, %v1592_v56 }
 0x25d   :  { %v1790_v7 = vsel %vm14351_vm5, %v10637_v11, 0.0  ;;  %v1600_v59 = vmax.f32 %v1598_v45, %v1599_v39  ;;  %v1607_v22 = vmax.f32 %v1605_v60, %v1606_v40  ;;  %v1614_v44 = vmax.f32 %v1612_v63, %v1613_v42  ;;  %v10657_v40 = vpop.permute.xlu1 %1448 }
 0x25e   :  { %v1791_v55 = vadd.f32 %v1790_v7, %v1789_v46  ;;  %9282 = vpow2.f32 %v1737_v30  ;;  %v1701_v5 = vsub.f32 %v10581_v21, %v1593_v13  ;;  %v1702_v28 = vsub.f32 %v10578_v0, %v1593_v13  ;;  %v10647_v32 = vpop.f32.mrb[18].mxu1  ;;  %14476 = vst [vmem:[#allocation90_spill] sm:$0xff] %v10657_v40 }
 0x25f   :  { %v10649_v43 = vpop.eup %9274  ;;  %9284 = vpow2.f32 %v1739_v61  ;;  %v1601_v56 = vrot.slane %v1600_v59, 1  ;;  %v1608_v37 = vrot.slane %v1607_v22, 2  ;;  %v1615_v27 = vrot.slane %v1614_v44, 4  ;;  %v10651_v19 = vpop.f32.mrb[19].mxu1 }
 0x260   :  { %v10653_v45 = vpop.eup %9276  ;;  %v1792_v60 = vrot.slane %v1791_v55, 4  ;;  %v1798_v21 = vsel %vm14351_vm5, %v10649_v43, 0.0  ;;  %v1741_v39 = vmul.f32 1.442695, %v1701_v5  ;;  %v1743_v0 = vmul.f32 1.442695, %v1702_v28 }
 0x261   :  { %v1799_v42 = vsel %vm14351_vm5, %v10653_v45, 0.0  ;;  %v1602_v63 = vmax.f32 %v1600_v59, %v1601_v56  ;;  %v1609_v46 = vmax.f32 %v1607_v22, %v1608_v37  ;;  %v1616_v30 = vmax.f32 %v1614_v44, %v1615_v27  ;;  %v10676_v56 = vpop.permute.xlu0 %1444 }
 0x262   :  { %v1793_v61 = vadd.f32 %v1792_v60, %v1791_v55  ;;  %v1800_v13 = vadd.f32 %v1799_v42, %v1798_v21  ;;  %9286 = vpow2.f32 %v1741_v39  ;;  %v10662_v7 = vadd.f32 %v8668_v34, %v10627_v3  ;;  %v10664_v31 = vpop.f32.mrb[20].mxu1  ;;  %14477 = vst [vmem:[#allocation91_spill] sm:$0xff] %v10676_v56  ;;  %v10682_v42 = vpop.permute.xlu1 %1459 }
 0x263   :  { %v10666_v16 = vpop.eup %9278  ;;  %9288 = vpow2.f32 %v1743_v0  ;;  %v1703_v28 = vsub.f32 %v10593_v41, %v1602_v63  ;;  %v1704_v5 = vsub.f32 %v10590_v8, %v1602_v63  ;;  %v1610_v24 = vrot.slane %v1609_v46, 1  ;;  %v10670_v58 = vpop.f32.mrb[21].mxu1  ;;  %14478 = vst [vmem:[#allocation92_spill] sm:$0xff] %v10682_v42 }
 0x264   :  { %v10672_v59 = vpop.eup %9280  ;;  %v1794_v55 = vrot.slane %v1793_v61, 2  ;;  %v1801_v22 = vrot.slane %v1800_v13, 4  ;;  %v1807_v34 = vsel %vm14351_vm5, %v10666_v16, 0.0  ;;  %v1617_v44 = vrot.slane %v1616_v30, 2 }
 0x265   :  { %v1808_v37 = vsel %vm14351_vm5, %v10672_v59, 0.0  ;;  %v1745_v27 = vmul.f32 1.442695, %v1703_v28  ;;  %v1747_v41 = vmul.f32 1.442695, %v1704_v5  ;;  %v1611_v60 = vmax.f32 %v1609_v46, %v1610_v24 }
 0x266   :  { %v10680_v8 = vadd.f32 %v1794_v55, %v1793_v61  ;;  %v1802_v21 = vadd.f32 %v1801_v22, %v1800_v13  ;;  %v1809_v39 = vadd.f32 %v1808_v37, %v1807_v34  ;;  %v1618_v0 = vmax.f32 %v1616_v30, %v1617_v44  ;;  %v8677_v63 = vpop.f32.mrb[22].mxu1  ;;  %v10704_v37 = vpop.permute.xlu0 %1455 }
 0x267   :  { %9290 = vpow2.f32 %v1745_v27  ;;  %v1705_v3 = vsub.f32 %v10611_v57, %v1611_v60  ;;  %v1706_v48 = vsub.f32 %v10604_v47, %v1611_v60  ;;  %v1622_v15 = vsel %vm14351_vm5, %v10662_v7, -inf  ;;  %v10688_v20 = vpop.f32.mrb[23].mxu1  ;;  %14479 = vst [vmem:[#allocation93_spill] sm:$0xff] %v10704_v37 }
 0x268   :  { %v10690_v28 = vpop.eup %9282  ;;  %v1803_v24 = vrot.slane %v1802_v21, 2  ;;  %v1810_v46 = vrot.slane %v1809_v39, 4  ;;  %9292 = vpow2.f32 %v1747_v41  ;;  %v1619_v61 = vrot.slane %v1618_v0, 1 }
 0x269   :  { %v10692_v30 = vpop.eup %9284  ;;  %v1816_v13 = vsel %vm14351_vm5, %v10690_v28, 0.0  ;;  %v1749_v5 = vmul.f32 1.442695, %v1705_v3  ;;  %v1751_v57 = vmul.f32 1.442695, %v1706_v48  ;;  %v10698_v47 = vadd.f32 %v10645_v12, %v10635_v25 }
 0x26a   :  { %v10700_v55 = vadd.f32 %v1803_v24, %v1802_v21  ;;  %v1811_v22 = vadd.f32 %v1810_v46, %v1809_v39  ;;  %v1817_v34 = vsel %vm14351_vm5, %v10692_v30, 0.0  ;;  %v1620_v44 = vmax.f32 %v1618_v0, %v1619_v61  ;;  %v8680_v27 = vpop.f32.mrb[24].mxu1  ;;  %v10718_v24 = vpop.permute.xlu1 %1470 }
 0x26b   :  { %v1818_v41 = vadd.f32 %v1817_v34, %v1816_v13  ;;  %9294 = vpow2.f32 %v1749_v5  ;;  %v1621_v3 = vsel %vm14351_vm5, %v10698_v47, -inf  ;;  %v10710_v48 = vadd.f32 %v10647_v32, %v10657_v40  ;;  %v10712_v25 = vpop.f32.mrb[25].mxu1  ;;  %14480 = vst [vmem:[#allocation94_spill] sm:$0xff] %v10718_v24 }
 0x26c   :  { %v10714_v60 = vpop.eup %9286  ;;  %v1812_v21 = vrot.slane %v1811_v22, 2  ;;  %9296 = vpow2.f32 %v1751_v57  ;;  %v1707_v39 = vsub.f32 %v10623_v62, %v1620_v44  ;;  %v1708_v0 = vsub.f32 %v10620_v4, %v1620_v44 }
 0x26d   :  { %v10720_v46 = vpop.eup %9288  ;;  %v1819_v61 = vrot.slane %v1818_v41, 4  ;;  %v1825_v13 = vsel %vm14351_vm5, %v10714_v60, 0.0  ;;  %v1623_v32 = vmax.f32 %v1621_v3, %v1622_v15  ;;  %v1631_v5 = vsel %vm14351_vm5, %v10710_v48, -inf }
 0x26e   :  { %v10726_v34 = vadd.f32 %v1812_v21, %v1811_v22  ;;  %v1826_v57 = vsel %vm14351_vm5, %v10720_v46, 0.0  ;;  %v1753_v62 = vmul.f32 1.442695, %v1707_v39  ;;  %v1755_v40 = vmul.f32 1.442695, %v1708_v0  ;;  %v10730_v4 = vpop.f32.mrb[26].mxu1 }
 0x26f   :  { %v1820_v44 = vadd.f32 %v1819_v61, %v1818_v41  ;;  %v1827_v12 = vadd.f32 %v1826_v57, %v1825_v13  ;;  %v1624_v17 = vrot.slane %v1623_v32, 4  ;;  %v10734_v26 = vadd.f32 %v10676_v56, %v10651_v19  ;;  %v10736_v15 = vpop.f32.mrb[27].mxu1  ;;  %v10749_v41 = vpop.permute.xlu0 %1466 }
 0x270   :  { %9298 = vpow2.f32 %v1753_v62  ;;  %v10740_v22 = vadd.f32 %v10664_v31, %v10682_v42  ;;  %v10744_v3 = vadd.f32 %v10704_v37, %v10670_v58  ;;  %v10747_v21 = vadd.f32 %v8677_v63, %v10718_v24  ;;  %14481 = vst [vmem:[#allocation95_spill] sm:$0xff] %v10749_v41  ;;  %v10763_v62 = vpop.permute.xlu1 %1481 }
 0x271   :  { %v10751_v39 = vpop.eup %9290  ;;  %v1821_v19 = vrot.slane %v1820_v44, 2  ;;  %v1828_v0 = vrot.slane %v1827_v12, 4  ;;  %9300 = vpow2.f32 %v1755_v40  ;;  %v1625_v61 = vmax.f32 %v1623_v32, %v1624_v17  ;;  %14482 = vst [vmem:[#allocation96_spill] sm:$0xff] %v10763_v62 }
 0x272   :  { %v10753_v13 = vpop.eup %9292  ;;  %v1834_v31 = vsel %vm14351_vm5, %v10751_v39, 0.0  ;;  %v1630_v58 = vsel %vm14351_vm5, %v10734_v26, -inf  ;;  %v1640_v63 = vsel %vm14351_vm5, %v10740_v22, -inf  ;;  %v1639_v57 = vsel %vm14351_vm5, %v10744_v3, -inf  ;;  %v10765_v24 = vpop.f32.mrb[28].mxu1 }
 0x273   :  { %v10767_v40 = vadd.f32 %v1821_v19, %v1820_v44  ;;  %v1829_v17 = vadd.f32 %v1828_v0, %v1827_v12  ;;  %v1835_v32 = vsel %vm14351_vm5, %v10753_v13, 0.0  ;;  %v1626_v37 = vrot.slane %v1625_v61, 2  ;;  %v10771_v42 = vpop.f32.mrb[29].mxu1 }
 0x274   :  { %v1836_v56 = vadd.f32 %v1835_v32, %v1834_v31  ;;  %v1632_v38 = vmax.f32 %v1630_v58, %v1631_v5  ;;  %v1641_v2 = vmax.f32 %v1639_v57, %v1640_v63  ;;  %v1649_v14 = vsel %vm14351_vm5, %v10747_v21, -inf  ;;  %v10788_v63 = vpop.permute.xlu0 %1477 }
 0x275   :  { %v10775_v1 = vpop.eup %9294  ;;  %v1830_v53 = vrot.slane %v1829_v17, 2  ;;  %v1627_v33 = vmax.f32 %v1625_v61, %v1626_v37  ;;  %v10779_v44 = vadd.f32 %v10749_v41, %v10688_v20  ;;  %v10782_v12 = vadd.f32 %v8680_v27, %v10763_v62  ;;  %14483 = vst [vmem:[#allocation97_spill] sm:$0xff] %v10788_v63 }
 0x276   :  { %v10784_v19 = vpop.eup %9296  ;;  %v1837_v0 = vrot.slane %v1836_v56, 4  ;;  %v1843_v5 = vsel %vm14351_vm5, %v10775_v1, 0.0  ;;  %v1633_v31 = vrot.slane %v1632_v38, 4  ;;  %v1642_v58 = vrot.slane %v1641_v2, 4 }
 0x277   :  { %v10790_v57 = vpop.f32.mrb[30].mxu1  ;;  %v10792_v37 = vadd.f32 %v1830_v53, %v1829_v17  ;;  %v1844_v20 = vsel %vm14351_vm5, %v10784_v19, 0.0  ;;  %v1628_v61 = vrot.slane %v1627_v33, 1  ;;  %v1648_v27 = vsel %vm14351_vm5, %v10779_v44, -inf }
 0x278   :  { %v10798_v32 = vpop.f32.mrb[31].mxu1  ;;  %v1838_v62 = vadd.f32 %v1837_v0, %v1836_v56  ;;  %v1845_v41 = vadd.f32 %v1844_v20, %v1843_v5  ;;  %v1634_v29 = vmax.f32 %v1632_v38, %v1633_v31  ;;  %v1643_v36 = vmax.f32 %v1641_v2, %v1642_v58  ;;  %v10818_v31 = vpop.permute.xlu1 %1492 }
 0x279   :  { %v1629_v54 = vmax.f32 %v1627_v33, %v1628_v61  ;;  %v1650_v51 = vmax.f32 %v1648_v27, %v1649_v14  ;;  %v1658_v49 = vsel %vm14351_vm5, %v10782_v12, -inf  ;;  %v10804_v53 = vadd.f32 %v10788_v63, %v10712_v25  ;;  %14484 = vst [vmem:[#allocation98_spill] sm:$0xff] %v10818_v31  ;;  %v10820_v63 = vpop.permute.xlu0 %1488 }
 0x27a   :  { %v10806_v17 = vpop.eup %9298  ;;  %v1839_v52 = vrot.slane %v1838_v62, 2  ;;  %v1846_v50 = vrot.slane %v1845_v41, 4  ;;  %v1635_v9 = vrot.slane %v1634_v29, 2  ;;  %v1644_v10 = vrot.slane %v1643_v36, 2  ;;  %14485 = vst [vmem:[#allocation99_spill] sm:$0xff] %v10820_v63 }
 0x27b   :  { %v10808_v6 = vpop.eup %9300  ;;  %v1852_v38 = vsel %vm14351_vm5, %v10806_v17, 0.0  ;;  %v1709_v33 = vsub.f32 %v10698_v47, %v1629_v54  ;;  %v1710_v14 = vsub.f32 %v10662_v7, %v1629_v54  ;;  %v1651_v2 = vrot.slane %v1650_v51, 4 }
 0x27c   :  { %v10814_v56 = vadd.f32 %v1839_v52, %v1838_v62  ;;  %v1847_v25 = vadd.f32 %v1846_v50, %v1845_v41  ;;  %v1853_v0 = vsel %vm14351_vm5, %v10808_v6, 0.0  ;;  %v1636_v5 = vmax.f32 %v1634_v29, %v1635_v9 }
 0x27d   :  { %v1854_v58 = vadd.f32 %v1853_v0, %v1852_v38  ;;  %v1757_v20 = vmul.f32 1.442695, %v1709_v33  ;;  %v1759_v61 = vmul.f32 1.442695, %v1710_v14  ;;  %v1645_v27 = vmax.f32 %v1643_v36, %v1644_v10 }
 0x27e   :  { %v1848_v35 = vrot.slane %v1847_v25, 2  ;;  %v1637_v47 = vrot.slane %v1636_v5, 1  ;;  %v1652_v18 = vmax.f32 %v1650_v51, %v1651_v2  ;;  %v1657_v52 = vsel %vm14351_vm5, %v10804_v53, -inf }
 0x27f   :  { %v1855_v54 = vrot.slane %v1854_v58, 4  ;;  %9302 = vpow2.f32 %v1757_v20  ;;  %v1646_v50 = vrot.slane %v1645_v27, 1  ;;  %v1659_v7 = vmax.f32 %v1657_v52, %v1658_v49 }
 0x280   :  { %v10824_v41 = vadd.f32 %v1848_v35, %v1847_v25  ;;  %9304 = vpow2.f32 %v1759_v61  ;;  %v1638_v9 = vmax.f32 %v1636_v5, %v1637_v47  ;;  %v1653_v29 = vrot.slane %v1652_v18, 2  ;;  %v10836_v35 = vpop.permute.xlu1 %1503 }
 0x281   :  { %v1856_v62 = vadd.f32 %v1855_v54, %v1854_v58  ;;  %v1647_v38 = vmax.f32 %v1645_v27, %v1646_v50  ;;  %v1660_v36 = vrot.slane %v1659_v7, 4  ;;  %v10828_v10 = vadd.f32 %v10730_v4, %v10818_v31  ;;  %14486 = vst [vmem:[#allocation100_spill] sm:$0xff] %v10836_v35  ;;  %v10840_v58 = vpop.permute.xlu0 %1499 }
 0x282   :  { %v1711_v51 = vsub.f32 %v10734_v26, %v1638_v9  ;;  %v1712_v33 = vsub.f32 %v10710_v48, %v1638_v9  ;;  %v1654_v14 = vmax.f32 %v1652_v18, %v1653_v29  ;;  %v10834_v49 = vadd.f32 %v10820_v63, %v10736_v15  ;;  %14487 = vst [vmem:[#allocation101_spill] sm:$0xff] %v10840_v58 }
 0x283   :  { %v1857_v2 = vrot.slane %v1856_v62, 2  ;;  %v1713_v25 = vsub.f32 %v10744_v3, %v1647_v38  ;;  %v1714_v0 = vsub.f32 %v10740_v22, %v1647_v38  ;;  %v1661_v5 = vmax.f32 %v1659_v7, %v1660_v36 }
 0x284   :  { %v1761_v4 = vmul.f32 1.442695, %v1711_v51  ;;  %v1763_v20 = vmul.f32 1.442695, %v1712_v33  ;;  %v1655_v26 = vrot.slane %v1654_v14, 1  ;;  %v1667_v18 = vsel %vm14351_vm5, %v10828_v10, -inf }
 0x285   :  { %v10844_v48 = vadd.f32 %v1857_v2, %v1856_v62  ;;  %v1765_v15 = vmul.f32 1.442695, %v1713_v25  ;;  %v1767_v61 = vmul.f32 1.442695, %v1714_v0  ;;  %v1662_v27 = vrot.slane %v1661_v5, 2  ;;  %v10860_v62 = vpop.permute.xlu1 %1514 }
 0x286   :  { %9306 = vpow2.f32 %v1761_v4  ;;  %v1656_v47 = vmax.f32 %v1654_v14, %v1655_v26  ;;  %v1666_v3 = vsel %vm14351_vm5, %v10834_v49, -inf  ;;  %v10850_v22 = vadd.f32 %v10765_v24, %v10836_v35  ;;  %14488 = vst [vmem:[#allocation102_spill] sm:$0xff] %v10860_v62 }
 0x287   :  { %9308 = vpow2.f32 %v1763_v20  ;;  %v1663_v52 = vmax.f32 %v1661_v5, %v1662_v27  ;;  %v1668_v54 = vmax.f32 %v1666_v3, %v1667_v18  ;;  %v10854_v50 = vadd.f32 %v10840_v58, %v10771_v42  ;;  %v10866_v42 = vpop.permute.xlu0 %1510 }
 0x288   :  { %9310 = vpow2.f32 %v1765_v15  ;;  %v1715_v7 = vsub.f32 %v10779_v44, %v1656_v47  ;;  %v1716_v9 = vsub.f32 %v10747_v21, %v1656_v47  ;;  %v1676_v29 = vsel %vm14351_vm5, %v10850_v22, -inf  ;;  %14489 = vst [vmem:[#allocation103_spill] sm:$0xff] %v10866_v42 }
 0x289   :  { %v10862_v38 = vpop.eup %9302  ;;  %9312 = vpow2.f32 %v1767_v61  ;;  %v1664_v24 = vrot.slane %v1663_v52, 1  ;;  %v1669_v36 = vrot.slane %v1668_v54, 4  ;;  %v1675_v51 = vsel %vm14351_vm5, %v10854_v50, -inf }
 0x28a   :  { %v10868_v33 = vpop.eup %9304  ;;  %v1861_v21 = vsel %vm14351_vm5, %v10862_v38, 0.0  ;;  %v1769_v44 = vmul.f32 1.442695, %v1715_v7  ;;  %v1771_v14 = vmul.f32 1.442695, %v1716_v9  ;;  %v1677_v2 = vmax.f32 %v1675_v51, %v1676_v29 }
 0x28b   :  { %v1862_v25 = vsel %vm14351_vm5, %v10868_v33, 0.0  ;;  %v1665_v0 = vmax.f32 %v1663_v52, %v1664_v24  ;;  %v1670_v5 = vmax.f32 %v1668_v54, %v1669_v36  ;;  %v10876_v4 = vadd.f32 %v10790_v57, %v10860_v62 }
 0x28c   :  { %v1863_v20 = vadd.f32 %v1862_v25, %v1861_v21  ;;  %9314 = vpow2.f32 %v1769_v44  ;;  %v1678_v26 = vrot.slane %v1677_v2, 4  ;;  %v10880_v18 = vadd.f32 %v10866_v42, %v10798_v32 }
 0x28d   :  { %9316 = vpow2.f32 %v1771_v14  ;;  %v1717_v15 = vsub.f32 %v10804_v53, %v1665_v0  ;;  %v1718_v61 = vsub.f32 %v10782_v12, %v1665_v0  ;;  %v1671_v27 = vrot.slane %v1670_v5, 2 }
 0x28e   :  { %v1864_v47 = vrot.slane %v1863_v20, 4  ;;  %v1679_v3 = vmax.f32 %v1677_v2, %v1678_v26  ;;  %v1685_v52 = vsel %vm14351_vm5, %v10876_v4, -inf  ;;  %v1684_v57 = vsel %vm14351_vm5, %v10880_v18, -inf }
 0x28f   :  { %v1773_v54 = vmul.f32 1.442695, %v1717_v15  ;;  %v1775_v7 = vmul.f32 1.442695, %v1718_v61  ;;  %v1672_v9 = vmax.f32 %v1670_v5, %v1671_v27  ;;  %v1686_v29 = vmax.f32 %v1684_v57, %v1685_v52 }
 0x290   :  { %v10888_v32 = vpop.eup %9306  ;;  %v1865_v24 = vadd.f32 %v1864_v47, %v1863_v20  ;;  %v1680_v36 = vrot.slane %v1679_v3, 2  ;;  %v1796_v53 = vrot.slane %v10680_v8, 1  ;;  %v1805_v12 = vrot.slane %v10700_v55, 1 }
 0x291   :  { %v10892_v51 = vpop.eup %9308  ;;  %v1870_v21 = vsel %vm14351_vm5, %v10888_v32, 0.0  ;;  %9318 = vpow2.f32 %v1773_v54  ;;  %v1673_v44 = vrot.slane %v1672_v9, 1  ;;  %v1687_v14 = vrot.slane %v1686_v29, 4 }
 0x292   :  { %v10896_v2 = vpop.eup %9310  ;;  %v1866_v25 = vrot.slane %v1865_v24, 2  ;;  %v1871_v0 = vsel %vm14351_vm5, %v10892_v51, 0.0  ;;  %9320 = vpow2.f32 %v1775_v7  ;;  %v1681_v5 = vmax.f32 %v1679_v3, %v1680_v36 }
 0x293   :  { %v10900_v20 = vpop.eup %9312  ;;  %v1872_v26 = vadd.f32 %v1871_v0, %v1870_v21  ;;  %v1879_v15 = vsel %vm14351_vm5, %v10896_v2, 0.0  ;;  %v1674_v61 = vmax.f32 %v1672_v9, %v1673_v44  ;;  %v1688_v27 = vmax.f32 %v1686_v29, %v1687_v14 }
 0x294   :  { %v10904_v47 = vadd.f32 %v1866_v25, %v1865_v24  ;;  %v1880_v52 = vsel %vm14351_vm5, %v10900_v20, 0.0  ;;  %v1682_v57 = vrot.slane %v1681_v5, 1  ;;  %v1797_v54 = vadd.f32 %v1796_v53, %v10680_v8 }
 0x295   :  { %v1873_v42 = vrot.slane %v1872_v26, 4  ;;  %v1881_v62 = vadd.f32 %v1880_v52, %v1879_v15  ;;  %v1719_v3 = vsub.f32 %v10834_v49, %v1674_v61  ;;  %v1720_v7 = vsub.f32 %v10828_v10, %v1674_v61 }
 0x296   :  { %v10911_v36 = vpop.eup %9314  ;;  %v1683_v21 = vmax.f32 %v1681_v5, %v1682_v57  ;;  %v1689_v0 = vrot.slane %v1688_v27, 2  ;;  %9322 = vrcp.f32 %v1797_v54  ;;  %v1806_v9 = vadd.f32 %v1805_v12, %v10700_v55 }
 0x297   :  { %v10914_v29 = vpop.eup %9316  ;;  %v1874_v24 = vadd.f32 %v1873_v42, %v1872_v26  ;;  %v1882_v44 = vrot.slane %v1881_v62, 4  ;;  %v1888_v8 = vsel %vm14351_vm5, %v10911_v36, 0.0  ;;  %v1777_v53 = vmul.f32 1.442695, %v1719_v3 }
 0x298   :  { %v1889_v49 = vsel %vm14351_vm5, %v10914_v29, 0.0  ;;  %v1779_v14 = vmul.f32 1.442695, %v1720_v7  ;;  %v1721_v10 = vsub.f32 %v10854_v50, %v1683_v21  ;;  %v1722_v25 = vsub.f32 %v10850_v22, %v1683_v21 }
 0x299   :  { %v1875_v5 = vrot.slane %v1874_v24, 2  ;;  %v1883_v15 = vadd.f32 %v1882_v44, %v1881_v62  ;;  %v1890_v61 = vadd.f32 %v1889_v49, %v1888_v8  ;;  %9324 = vpow2.f32 %v1777_v53 }
 0x29a   :  { %9326 = vpow2.f32 %v1779_v14  ;;  %v1781_v55 = vmul.f32 1.442695, %v1721_v10  ;;  %v1783_v42 = vmul.f32 1.442695, %v1722_v25  ;;  %v1690_v12 = vmax.f32 %v1688_v27, %v1689_v0 }
 0x29b   :  { %v10922_v26 = vpop.eup %9318  ;;  %v1876_v52 = vadd.f32 %v1875_v5, %v1874_v24  ;;  %v1884_v57 = vrot.slane %v1883_v15, 2  ;;  %v1891_v54 = vrot.slane %v1890_v61, 4  ;;  %9328 = vrcp.f32 %v1806_v9 }
 0x29c   :  { %v10924_v3 = vpop.eup %9320  ;;  %v1897_v50 = vsel %vm14351_vm5, %v10922_v26, 0.0  ;;  %9330 = vpow2.f32 %v1781_v55  ;;  %v1691_v22 = vrot.slane %v1690_v12, 1  ;;  %v1814_v62 = vrot.slane %v10726_v34, 1 }
 0x29d   :  { %v10929_v7 = vadd.f32 %v1884_v57, %v1883_v15  ;;  %v1892_v21 = vadd.f32 %v1891_v54, %v1890_v61  ;;  %v1898_v27 = vsel %vm14351_vm5, %v10924_v3, 0.0  ;;  %9332 = vpow2.f32 %v1783_v42 }
 0x29e   :  { %v1899_v0 = vadd.f32 %v1898_v27, %v1897_v50  ;;  %v1692_v24 = vmax.f32 %v1690_v12, %v1691_v22  ;;  %v1815_v9 = vadd.f32 %v1814_v62, %v10726_v34  ;;  %v1823_v44 = vrot.slane %v10767_v40, 1 }
 0x29f   :  { %v1893_v8 = vrot.slane %v1892_v21, 2  ;;  %v1832_v53 = vrot.slane %v10792_v37, 1  ;;  %v1841_v49 = vrot.slane %v10814_v56, 1  ;;  %v1850_v14 = vrot.slane %v10824_v41, 1 }
 0x2a0   :  { %v9323_v10 = vpop.eup %9322  ;;  %v1900_v25 = vrot.slane %v1899_v0, 4  ;;  %v1723_v5 = vsub.f32 %v10880_v18, %v1692_v24  ;;  %v1724_v15 = vsub.f32 %v10876_v4, %v1692_v24  ;;  %9334 = vrcp.f32 %v1815_v9 }
 0x2a1   :  { %v1894_v61 = vadd.f32 %v1893_v8, %v1892_v21  ;;  %v1949_v55 = vmul.f32 %v9323_v10, %v10629_v23  ;;  %v1950_v34 = vmul.f32 %v9323_v10, %v10637_v11  ;;  %v1824_v42 = vadd.f32 %v1823_v44, %v10767_v40 }
 0x2a2   :  { %v1901_v12 = vadd.f32 %v1900_v25, %v1899_v0  ;;  %v1785_v57 = vmul.f32 1.442695, %v1723_v5  ;;  %v1787_v54 = vmul.f32 1.442695, %v1724_v15  ;;  %v1833_v50 = vadd.f32 %v1832_v53, %v10792_v37 }
 0x2a3   :  { %v10944_v22 = vpop.eup %9324  ;;  %8694 = vmatprep.mubr.msk.f32.mxu0 %vm14351_vm5, %v1949_v55  ;;  %9336 = vrcp.f32 %v1824_v42  ;;  %v1842_v4 = vadd.f32 %v1841_v49, %v10814_v56  ;;  %v1851_v18 = vadd.f32 %v1850_v14, %v10824_v41  ;;  %v1859_v23 = vrot.slane %v10844_v48, 1 }
 0x2a4   :  { %v10950_v62 = vpop.eup %9326  ;;  %v1902_v11 = vrot.slane %v1901_v12, 2  ;;  %v1906_v40 = vsel %vm14351_vm5, %v10944_v22, 0.0  ;;  %9338 = vpow2.f32 %v1785_v57  ;;  %8695 = vmatmul.mubr.msk.f32.vlgmr.msra.gmra.mrb[2].mxu0 %vm14351_vm5, %v1950_v34  ;;  %v1868_v37 = vrot.slane %v10904_v47, 1 }
 0x2a5   :  { %v9329_v21 = vpop.eup %9328  ;;  %v1907_v27 = vsel %vm14351_vm5, %v10950_v62, 0.0  ;;  %9340 = vpow2.f32 %v1787_v54  ;;  %v1860_v56 = vadd.f32 %v1859_v23, %v10844_v48  ;;  %v1877_v41 = vrot.slane %v1876_v52, 1 }
 0x2a6   :  { %v10959_v0 = vpop.eup %9330  ;;  %v1903_v24 = vadd.f32 %v1902_v11, %v1901_v12  ;;  %v1908_v9 = vadd.f32 %v1907_v27, %v1906_v40  ;;  %v1951_v44 = vmul.f32 %v9329_v21, %v10649_v43  ;;  %v1952_v8 = vmul.f32 %v9329_v21, %v10653_v45 }
 0x2a7   :  { %v10963_v53 = vpop.eup %9332  ;;  %v1915_v49 = vsel %vm14351_vm5, %v10959_v0, 0.0  ;;  %9342 = vrcp.f32 %v1833_v50  ;;  %v1869_v14 = vadd.f32 %v1868_v37, %v10904_v47  ;;  %v1878_v10 = vadd.f32 %v1877_v41, %v1876_v52 }
 0x2a8   :  { %v1909_v25 = vrot.slane %v1908_v9, 4  ;;  %v1916_v48 = vsel %vm14351_vm5, %v10963_v53, 0.0  ;;  %8697 = vmatprep.mubr.msk.f32.mxu0 %vm14351_vm5, %v1951_v44  ;;  %9344 = vrcp.f32 %v1842_v4  ;;  %v1886_v43 = vrot.slane %v10929_v7, 1 }
 0x2a9   :  { %v1917_v5 = vadd.f32 %v1916_v48, %v1915_v49  ;;  %8698 = vmatmul.mubr.msk.f32.gmra.mrb[4].mxu0 %vm14351_vm5, %v1952_v8  ;;  %9346 = vrcp.f32 %v1851_v18  ;;  %v1895_v45 = vrot.slane %v1894_v61, 1  ;;  %v1904_v15 = vrot.slane %v1903_v24, 1 }
 0x2aa   :  { %v9335_v55 = vpop.eup %9334  ;;  %v1910_v34 = vadd.f32 %v1909_v25, %v1908_v9  ;;  %9348 = vrcp.f32 %v1860_v56  ;;  %v1887_v47 = vadd.f32 %v1886_v43, %v10929_v7 }
 0x2ab   :  { %v1918_v52 = vrot.slane %v1917_v5, 4  ;;  %v1953_v42 = vmul.f32 %v9335_v55, %v10666_v16  ;;  %v1954_v12 = vmul.f32 %v9335_v55, %v10672_v59  ;;  %9350 = vrcp.f32 %v1869_v14 }
 0x2ac   :  { %v1911_v57 = vrot.slane %v1910_v34, 2  ;;  %9352 = vrcp.f32 %v1878_v10  ;;  %v1896_v54 = vadd.f32 %v1895_v45, %v1894_v61  ;;  %v1905_v50 = vadd.f32 %v1904_v15, %v1903_v24 }
 0x2ad   :  { %v9337_v4 = vpop.eup %9336  ;;  %v1919_v23 = vadd.f32 %v1918_v52, %v1917_v5  ;;  %8700 = vmatprep.mubr.msk.f32.mxu0 %vm14351_vm5, %v1953_v42  ;;  %9354 = vrcp.f32 %v1887_v47 }
 0x2ae   :  { %v10977_v18 = vpop.eup %9338  ;;  %v1912_v11 = vadd.f32 %v1911_v57, %v1910_v34  ;;  %8701 = vmatmul.mubr.msk.f32.gmra.mrb[6].mxu0 %vm14351_vm5, %v1954_v12  ;;  %v1955_v7 = vmul.f32 %v9337_v4, %v10690_v28  ;;  %v1956_v16 = vmul.f32 %v9337_v4, %v10692_v30  ;;  %9356 = vrcp.f32 %v1896_v54 }
 0x2af   :  { %v10982_v59 = vpop.eup %9340  ;;  %v1920_v40 = vrot.slane %v1919_v23, 2  ;;  %v1924_v61 = vsel %vm14351_vm5, %v10977_v18, 0.0  ;;  %9358 = vrcp.f32 %v1905_v50 }
 0x2b0   :  { %v1925_v37 = vsel %vm14351_vm5, %v10982_v59, 0.0  ;;  %8703 = vmatprep.mubr.msk.f32.mxu0 %vm14351_vm5, %v1955_v7  ;;  %v1913_v21 = vrot.slane %v1912_v11, 1 }
 0x2b1   :  { %v9343_v27 = vpop.eup %9342  ;;  %v1921_v56 = vadd.f32 %v1920_v40, %v1919_v23  ;;  %v1926_v41 = vadd.f32 %v1925_v37, %v1924_v61 }
 0x2b2   :  { %v9345_v28 = vpop.eup %9344  ;;  %8704 = vmatmul.mubr.msk.f32.gmra.mrb[8].mxu0 %vm14351_vm5, %v1956_v16  ;;  %v1957_v30 = vmul.f32 %v9343_v27, %v10714_v60  ;;  %v1958_v24 = vmul.f32 %v9343_v27, %v10720_v46  ;;  %v1914_v9 = vadd.f32 %v1913_v21, %v1912_v11 }
 0x2b3   :  { %v9347_v44 = vpop.eup %9346  ;;  %v1927_v8 = vrot.slane %v1926_v41, 4  ;;  %v1959_v49 = vmul.f32 %v9345_v28, %v10751_v39  ;;  %v1960_v14 = vmul.f32 %v9345_v28, %v10753_v13  ;;  %v1922_v10 = vrot.slane %v1921_v56, 1 }
 0x2b4   :  { %v9349_v25 = vpop.eup %9348  ;;  %8706 = vmatprep.mubr.msk.f32.mxu0 %vm14351_vm5, %v1957_v30  ;;  %v1961_v48 = vmul.f32 %v9347_v44, %v10775_v1  ;;  %v1962_v43 = vmul.f32 %v9347_v44, %v10784_v19  ;;  %9360 = vrcp.f32 %v1914_v9 }
 0x2b5   :  { %v9351_v5 = vpop.eup %9350  ;;  %v1928_v60 = vadd.f32 %v1927_v8, %v1926_v41  ;;  %v1963_v46 = vmul.f32 %v9349_v25, %v10806_v17  ;;  %v1964_v45 = vmul.f32 %v9349_v25, %v10808_v6  ;;  %v1923_v15 = vadd.f32 %v1922_v10, %v1921_v56 }
 0x2b6   :  { %v9353_v55 = vpop.eup %9352  ;;  %8707 = vmatmul.mubr.msk.f32.gmra.mrb[10].mxu0 %vm14351_vm5, %v1958_v24  ;;  %v1965_v39 = vmul.f32 %v9351_v5, %v10862_v38  ;;  %v1966_v13 = vmul.f32 %v9351_v5, %v10868_v33 }
 0x2b7   :  { %v9355_v34 = vpop.eup %9354  ;;  %v1929_v47 = vrot.slane %v1928_v60, 2  ;;  %8709 = vmatprep.mubr.msk.f32.mxu0 %vm14351_vm5, %v1959_v49  ;;  %v1967_v1 = vmul.f32 %v9353_v55, %v10888_v32  ;;  %v1968_v19 = vmul.f32 %v9353_v55, %v10892_v51  ;;  %9362 = vrcp.f32 %v1923_v15 }
 0x2b8   :  { %v9357_v17 = vpop.eup %9356  ;;  %v1969_v6 = vmul.f32 %v9355_v34, %v10896_v2  ;;  %v1970_v52 = vmul.f32 %v9355_v34, %v10900_v20 }
 0x2b9   :  { %v9359_v42 = vpop.eup %9358  ;;  %v1930_v12 = vadd.f32 %v1929_v47, %v1928_v60  ;;  %v1971_v38 = vmul.f32 %v9357_v17, %v10911_v36  ;;  %v1972_v33 = vmul.f32 %v9357_v17, %v10914_v29 }
 0x2ba   :  { %8710 = vmatmul.mubr.msk.f32.gmra.mrb[12].mxu0 %vm14351_vm5, %v1960_v14  ;;  %v1973_v57 = vmul.f32 %v9359_v42, %v10922_v26  ;;  %v1974_v32 = vmul.f32 %v9359_v42, %v10924_v3 }
 0x2bb   :  { %8712 = vmatprep.mubr.msk.f32.mxu0 %vm14351_vm5, %v1961_v48  ;;  %v1931_v51 = vrot.slane %v1930_v12, 1 }
 0x2bd   :  { %v1932_v54 = vadd.f32 %v1931_v51, %v1930_v12 }
 0x2be   :  { %v9361_v50 = vpop.eup %9360  ;;  %8713 = vmatmul.mubr.msk.f32.gmra.mrb[14].mxu0 %vm14351_vm5, %v1962_v43 }
 0x2bf   :  { %8715 = vmatprep.mubr.msk.f32.mxu0 %vm14351_vm5, %v1963_v46  ;;  %v1975_v2 = vmul.f32 %v9361_v50, %v10944_v22  ;;  %v1976_v20 = vmul.f32 %v9361_v50, %v10950_v62  ;;  %9364 = vrcp.f32 %v1932_v54 }
 0x2c1   :  { %v9363_v36 = vpop.eup %9362 }
 0x2c2   :  { %8716 = vmatmul.mubr.msk.f32.gmra.mrb[16].mxu0 %vm14351_vm5, %v1964_v45  ;;  %v1977_v29 = vmul.f32 %v9363_v36, %v10959_v0  ;;  %v1978_v26 = vmul.f32 %v9363_v36, %v10963_v53  ;;  %v14490_v53 = vld [vmem:[#allocation37_spill] sm:$0xff] }
 0x2c3   :  { %8718 = vmatprep.mubr.msk.f32.mxu0 %vm14351_vm5, %v1965_v39 }
 0x2c6   :  { %8719 = vmatmul.mubr.msk.f32.gmra.mrb[18].mxu0 %vm14351_vm5, %v1966_v13 }
 0x2c7   :  { %8721 = vmatprep.mubr.msk.f32.mxu0 %vm14351_vm5, %v1967_v1 }
 0x2c9   :  { %v9365_v3 = vpop.eup %9364 }
 0x2ca   :  { %8722 = vmatmul.mubr.msk.f32.gmra.mrb[20].mxu0 %vm14351_vm5, %v1968_v19  ;;  %v1979_v22 = vmul.f32 %v9365_v3, %v10977_v18  ;;  %v1980_v62 = vmul.f32 %v9365_v3, %v10982_v59  ;;  %v14491_v18 = vld [vmem:[#allocation38_spill] sm:$0xff] }
 0x2cb   :  { %8724 = vmatprep.mubr.msk.f32.mxu0 %vm14351_vm5, %v1969_v6 }
 0x2ce   :  { %8725 = vmatmul.mubr.msk.f32.gmra.mrb[22].mxu0 %vm14351_vm5, %v1970_v52 }
 0x2cf   :  { %8727 = vmatprep.mubr.msk.f32.mxu0 %vm14351_vm5, %v1971_v38 }
 0x2d2   :  { %8728 = vmatmul.mubr.msk.f32.gmra.mrb[24].mxu0 %vm14351_vm5, %v1972_v33 }
 0x2d3   :  { %8730 = vmatprep.mubr.msk.f32.mxu0 %vm14351_vm5, %v1973_v57 }
 0x2d6   :  { %8731 = vmatmul.mubr.msk.f32.gmra.mrb[26].mxu0 %vm14351_vm5, %v1974_v32 }
 0x2d7   :  { %8733 = vmatprep.mubr.msk.f32.mxu0 %vm14351_vm5, %v1975_v2 }
 0x2da   :  { %8734 = vmatmul.mubr.msk.f32.gmra.mrb[28].mxu0 %vm14351_vm5, %v1976_v20  ;;  %v11061_v20 = vld [vmem:[%s14147_s10] ss:$0 sm:$0xff] }
 0x2db   :  { %8736 = vmatprep.mubr.msk.f32.mxu0 %vm14351_vm5, %v1977_v29 }
 0x2de   :  { %8737 = vmatmul.mubr.msk.f32.gmra.mrb[30].mxu0 %vm14351_vm5, %v1978_v26 }
 0x2df   :  { %8739 = vmatprep.mubr.msk.f32.mxu0 %vm14351_vm5, %v1979_v22 }
 0x2e2   :  { %8740 = vmatmul.mubr.msk.f32.gmra.mrb[32].mxu0 %vm14351_vm5, %v1980_v62 }
 0x377   :  { %v8696_v0 = vpop.f32.mrb[2].mxu0 }
 0x378   :  { %v2303_v4 = vmul.f32 %v8696_v0, %v14490_v53  ;;  %v2143_v23 = vpop.f32.mrb[3].mxu0 }
 0x379   :  { %v2302_v11 = vmul.f32 %v2143_v23, %v14491_v18 }
 0x37a   :  { %v2335_v7 = vsel %vm14352_vm2, %v2303_v4, 0.0 }
 0x37b   :  { %v2334_v16 = vsel %vm14352_vm2, %v2302_v11, 0.0 }
 0x37c   :  { %v2336_v59 = vadd.f32 %v2335_v7, %v2334_v16  ;;  %v8699_v40 = vpop.f32.mrb[4].mxu0 }
 0x37d   :  { %v2305_v61 = vmul.f32 %v8699_v40, %v14490_v53  ;;  %v2153_v37 = vpop.f32.mrb[5].mxu0 }
 0x37e   :  { %v2337_v21 = vrot.slane %v2336_v59, 4  ;;  %v2304_v27 = vmul.f32 %v2153_v37, %v14491_v18 }
 0x37f   :  { %v2344_v56 = vsel %vm14352_vm2, %v2305_v61, 0.0 }
 0x380   :  { %v2338_v41 = vadd.f32 %v2337_v21, %v2336_v59  ;;  %v2343_v28 = vsel %vm14352_vm2, %v2304_v27, 0.0 }
 0x381   :  { %v2345_v30 = vadd.f32 %v2344_v56, %v2343_v28  ;;  %v8702_v24 = vpop.f32.mrb[6].mxu0 }
 0x382   :  { %v2339_v9 = vrot.slane %v2338_v41, 2  ;;  %v2307_v44 = vmul.f32 %v8702_v24, %v14490_v53  ;;  %v2163_v8 = vpop.f32.mrb[7].mxu0 }
 0x383   :  { %v2346_v49 = vrot.slane %v2345_v30, 4  ;;  %v2306_v14 = vmul.f32 %v2163_v8, %v14491_v18 }
 0x384   :  { %v2353_v10 = vsel %vm14352_vm2, %v2307_v44, 0.0  ;;  %v2340_v25 = vadd.f32 %v2339_v9, %v2338_v41 }
 0x385   :  { %v2347_v48 = vadd.f32 %v2346_v49, %v2345_v30  ;;  %v2352_v43 = vsel %vm14352_vm2, %v2306_v14, 0.0  ;;  %v8705_v5 = vpop.f32.mrb[8].mxu0 }
 0x386   :  { %v2354_v60 = vadd.f32 %v2353_v10, %v2352_v43  ;;  %v2309_v46 = vmul.f32 %v8705_v5, %v14490_v53  ;;  %v2173_v45 = vpop.f32.mrb[9].mxu0  ;;  %v2341_v34 = vrot.slane %v2340_v25, 1 }
 0x387   :  { %v2348_v15 = vrot.slane %v2347_v48, 2  ;;  %v2308_v55 = vmul.f32 %v2173_v45, %v14491_v18 }
 0x388   :  { %v2355_v39 = vrot.slane %v2354_v60, 4  ;;  %v2362_v13 = vsel %vm14352_vm2, %v2309_v46, 0.0  ;;  %v2342_v51 = vadd.f32 %v2341_v34, %v2340_v25 }
 0x389   :  { %v2349_v47 = vadd.f32 %v2348_v15, %v2347_v48  ;;  %v2361_v1 = vsel %vm14352_vm2, %v2308_v55, 0.0  ;;  %v8708_v19 = vpop.f32.mrb[10].mxu0 }
 0x38a   :  { %v2356_v17 = vadd.f32 %v2355_v39, %v2354_v60  ;;  %v2363_v6 = vadd.f32 %v2362_v13, %v2361_v1  ;;  %v2311_v52 = vmul.f32 %v8708_v19, %v14490_v53  ;;  %v2183_v42 = vpop.f32.mrb[11].mxu0  ;;  %v11070_v16 = vadd.f32 %v11061_v20, %v2342_v51 }
 0x38b   :  { %v2350_v12 = vrot.slane %v2349_v47, 1  ;;  %v2310_v38 = vmul.f32 %v2183_v42, %v14491_v18 }
 0x38c   :  { %v2357_v33 = vrot.slane %v2356_v17, 2  ;;  %v2364_v57 = vrot.slane %v2363_v6, 4  ;;  %v2371_v32 = vsel %vm14352_vm2, %v2311_v52, 0.0 }
 0x38d   :  { %v2351_v54 = vadd.f32 %v2350_v12, %v2349_v47  ;;  %v2370_v50 = vsel %vm14352_vm2, %v2310_v38, 0.0  ;;  %v8711_v2 = vpop.f32.mrb[12].mxu0 }
 0x38e   :  { %v2358_v36 = vadd.f32 %v2357_v33, %v2356_v17  ;;  %v2365_v29 = vadd.f32 %v2364_v57, %v2363_v6  ;;  %v2372_v26 = vadd.f32 %v2371_v32, %v2370_v50  ;;  %v2313_v3 = vmul.f32 %v8711_v2, %v14490_v53  ;;  %v2193_v22 = vpop.f32.mrb[13].mxu0 }
 0x38f   :  { %v11065_v62 = vadd.f32 %v11061_v20, %v2351_v54  ;;  %v2312_v0 = vmul.f32 %v2193_v22, %v14491_v18 }
 0x390   :  { %v2359_v4 = vrot.slane %v2358_v36, 1  ;;  %v2366_v23 = vrot.slane %v2365_v29, 2  ;;  %v2373_v11 = vrot.slane %v2372_v26, 4  ;;  %v2380_v7 = vsel %vm14352_vm2, %v2313_v3, 0.0 }
 0x391   :  { %v2516_v59 = vrot.slane %v11065_v62, 7  ;;  %v2379_v40 = vsel %vm14352_vm2, %v2312_v0, 0.0  ;;  %v8714_v61 = vpop.f32.mrb[14].mxu0 }
 0x392   :  { %v2360_v37 = vadd.f32 %v2359_v4, %v2358_v36  ;;  %v2367_v21 = vadd.f32 %v2366_v23, %v2365_v29  ;;  %v2374_v27 = vadd.f32 %v2373_v11, %v2372_v26  ;;  %v2381_v56 = vadd.f32 %v2380_v7, %v2379_v40  ;;  %v2203_v41 = vpop.f32.mrb[15].mxu0 }
 0x393   :  { %v2518_v28 = vsel %vm14359_vm6, %v2516_v59, %v11070_v16  ;;  %v2315_v30 = vmul.f32 %v8714_v61, %v14490_v53  ;;  %v2314_v24 = vmul.f32 %v2203_v41, %v14491_v18 }
 0x394   :  { %v11079_v9 = vadd.f32 %v11061_v20, %v2360_v37  ;;  %v2368_v44 = vrot.slane %v2367_v21, 1  ;;  %v2375_v8 = vrot.slane %v2374_v27, 2  ;;  %v2382_v49 = vrot.slane %v2381_v56, 4 }
 0x395   :  { %v2389_v14 = vsel %vm14352_vm2, %v2315_v30, 0.0  ;;  %v2388_v10 = vsel %vm14352_vm2, %v2314_v24, 0.0  ;;  %v8717_v25 = vpop.f32.mrb[16].mxu0 }
 0x396   :  { %v2519_v48 = vrot.slane %v11079_v9, 6  ;;  %v2369_v43 = vadd.f32 %v2368_v44, %v2367_v21  ;;  %v2376_v5 = vadd.f32 %v2375_v8, %v2374_v27  ;;  %v2383_v60 = vadd.f32 %v2382_v49, %v2381_v56  ;;  %v2213_v46 = vpop.f32.mrb[17].mxu0 }
 0x397   :  { %v2390_v45 = vadd.f32 %v2389_v14, %v2388_v10  ;;  %v2317_v15 = vmul.f32 %v8717_v25, %v14490_v53  ;;  %v2316_v55 = vmul.f32 %v2213_v46, %v14491_v18 }
 0x398   :  { %v2521_v39 = vsel %vm14358_vm7, %v2519_v48, %v2518_v28  ;;  %v11088_v13 = vadd.f32 %v11061_v20, %v2369_v43  ;;  %v2377_v34 = vrot.slane %v2376_v5, 1  ;;  %v2384_v47 = vrot.slane %v2383_v60, 2 }
 0x399   :  { %v2391_v1 = vrot.slane %v2390_v45, 4  ;;  %v2398_v19 = vsel %vm14352_vm2, %v2317_v15, 0.0  ;;  %v2397_v17 = vsel %vm14352_vm2, %v2316_v55, 0.0  ;;  %v8720_v6 = vpop.f32.mrb[18].mxu0 }
 0x39a   :  { %v2522_v52 = vrot.slane %v11088_v13, 5  ;;  %v2378_v42 = vadd.f32 %v2377_v34, %v2376_v5  ;;  %v2385_v12 = vadd.f32 %v2384_v47, %v2383_v60  ;;  %v2399_v38 = vadd.f32 %v2398_v19, %v2397_v17  ;;  %v2223_v33 = vpop.f32.mrb[19].mxu0 }
 0x39b   :  { %v2392_v57 = vadd.f32 %v2391_v1, %v2390_v45  ;;  %v2319_v32 = vmul.f32 %v8720_v6, %v14490_v53  ;;  %v2318_v51 = vmul.f32 %v2223_v33, %v14491_v18 }
 0x39c   :  { %v2524_v54 = vsel %vm14357_vm8, %v2522_v52, %v2521_v39  ;;  %v11097_v50 = vadd.f32 %v11061_v20, %v2378_v42  ;;  %v2386_v2 = vrot.slane %v2385_v12, 1  ;;  %v2400_v36 = vrot.slane %v2399_v38, 4 }
 0x39d   :  { %v2393_v29 = vrot.slane %v2392_v57, 2  ;;  %v2407_v26 = vsel %vm14352_vm2, %v2319_v32, 0.0  ;;  %v2406_v3 = vsel %vm14352_vm2, %v2318_v51, 0.0  ;;  %v8723_v22 = vpop.f32.mrb[20].mxu0 }
 0x39e   :  { %v2525_v0 = vrot.slane %v11097_v50, 4  ;;  %v2387_v4 = vadd.f32 %v2386_v2, %v2385_v12  ;;  %v2401_v23 = vadd.f32 %v2400_v36, %v2399_v38  ;;  %v2408_v11 = vadd.f32 %v2407_v26, %v2406_v3  ;;  %v2233_v7 = vpop.f32.mrb[21].mxu0 }
 0x39f   :  { %v2394_v59 = vadd.f32 %v2393_v29, %v2392_v57  ;;  %v2321_v40 = vmul.f32 %v8723_v22, %v14490_v53  ;;  %v2320_v61 = vmul.f32 %v2233_v7, %v14491_v18 }
 0x3a0   :  { %v2527_v37 = vsel %vm14356_vm9, %v2525_v0, %v2524_v54  ;;  %v11106_v21 = vadd.f32 %v11061_v20, %v2387_v4  ;;  %v2402_v27 = vrot.slane %v2401_v23, 2  ;;  %v2409_v56 = vrot.slane %v2408_v11, 4 }
 0x3a1   :  { %v2395_v41 = vrot.slane %v2394_v59, 1  ;;  %v2416_v28 = vsel %vm14352_vm2, %v2321_v40, 0.0  ;;  %v2415_v30 = vsel %vm14352_vm2, %v2320_v61, 0.0  ;;  %v8726_v24 = vpop.f32.mrb[22].mxu0 }
 0x3a2   :  { %v2528_v44 = vrot.slane %v11106_v21, 3  ;;  %v2403_v8 = vadd.f32 %v2402_v27, %v2401_v23  ;;  %v2410_v49 = vadd.f32 %v2409_v56, %v2408_v11  ;;  %v2417_v14 = vadd.f32 %v2416_v28, %v2415_v30  ;;  %v2243_v10 = vpop.f32.mrb[23].mxu0 }
 0x3a3   :  { %v2396_v25 = vadd.f32 %v2395_v41, %v2394_v59  ;;  %v2323_v48 = vmul.f32 %v8726_v24, %v14490_v53  ;;  %v2322_v43 = vmul.f32 %v2243_v10, %v14491_v18 }
 0x3a4   :  { %v2530_v5 = vsel %vm14355_vm10, %v2528_v44, %v2527_v37  ;;  %v2404_v60 = vrot.slane %v2403_v8, 1  ;;  %v2411_v46 = vrot.slane %v2410_v49, 2  ;;  %v2418_v45 = vrot.slane %v2417_v14, 4 }
 0x3a5   :  { %v11115_v15 = vadd.f32 %v11061_v20, %v2396_v25  ;;  %v2425_v55 = vsel %vm14352_vm2, %v2323_v48, 0.0  ;;  %v2424_v39 = vsel %vm14352_vm2, %v2322_v43, 0.0  ;;  %v8729_v34 = vpop.f32.mrb[24].mxu0 }
 0x3a6   :  { %v2405_v47 = vadd.f32 %v2404_v60, %v2403_v8  ;;  %v2412_v1 = vadd.f32 %v2411_v46, %v2410_v49  ;;  %v2419_v19 = vadd.f32 %v2418_v45, %v2417_v14  ;;  %v2426_v17 = vadd.f32 %v2425_v55, %v2424_v39  ;;  %v2253_v6 = vpop.f32.mrb[25].mxu0 }
 0x3a7   :  { %v2531_v52 = vrot.slane %v11115_v15, 2  ;;  %v2325_v42 = vmul.f32 %v8729_v34, %v14490_v53  ;;  %v2324_v12 = vmul.f32 %v2253_v6, %v14491_v18 }
 0x3a8   :  { %v11123_v38 = vadd.f32 %v11061_v20, %v2405_v47  ;;  %v2420_v33 = vrot.slane %v2419_v19, 2  ;;  %v2427_v57 = vrot.slane %v2426_v17, 4  ;;  %v2413_v51 = vrot.slane %v2412_v1, 1 }
 0x3a9   :  { %v2533_v32 = vsel %vm14354_vm11, %v2531_v52, %v2530_v5  ;;  %v2434_v54 = vsel %vm14352_vm2, %v2325_v42, 0.0  ;;  %v2433_v2 = vsel %vm14352_vm2, %v2324_v12, 0.0  ;;  %v8732_v36 = vpop.f32.mrb[26].mxu0 }
 0x3aa   :  { %v2534_v29 = vrot.slane %v11123_v38, 1  ;;  %v2421_v26 = vadd.f32 %v2420_v33, %v2419_v19  ;;  %v2428_v3 = vadd.f32 %v2427_v57, %v2426_v17  ;;  %v2263_v22 = vpop.f32.mrb[27].mxu0  ;;  %v2435_v0 = vadd.f32 %v2434_v54, %v2433_v2 }
 0x3ab   :  { %v2327_v4 = vmul.f32 %v8732_v36, %v14490_v53  ;;  %v2326_v23 = vmul.f32 %v2263_v22, %v14491_v18  ;;  %v2414_v40 = vadd.f32 %v2413_v51, %v2412_v1 }
 0x3ac   :  { %v11132_v11 = vsel %vm14353_vm12, %v2534_v29, %v2533_v32  ;;  %v2422_v7 = vrot.slane %v2421_v26, 1  ;;  %v2429_v59 = vrot.slane %v2428_v3, 2  ;;  %v2436_v61 = vrot.slane %v2435_v0, 4 }
 0x3ad   :  { %v2443_v37 = vsel %vm14352_vm2, %v2327_v4, 0.0  ;;  %v2442_v27 = vsel %vm14352_vm2, %v2326_v23, 0.0  ;;  %v8735_v56 = vpop.f32.mrb[28].mxu0  ;;  %v11143_v43 = vadd.f32 %v11061_v20, %v2414_v40 }
 0x3ae   :  { %v2423_v41 = vadd.f32 %v2422_v7, %v2421_v26  ;;  %v2430_v28 = vadd.f32 %v2429_v59, %v2428_v3  ;;  %v2444_v30 = vadd.f32 %v2443_v37, %v2442_v27  ;;  %v2329_v24 = vmul.f32 %v8735_v56, %v14490_v53  ;;  %v2273_v44 = vpop.f32.mrb[29].mxu0 }
 0x3af   :  { %v2437_v8 = vadd.f32 %v2436_v61, %v2435_v0  ;;  %v2328_v49 = vmul.f32 %v2273_v44, %v14491_v18 }
 0x3b0   :  { %v11139_v14 = vadd.f32 %v11061_v20, %v2423_v41  ;;  %v2431_v10 = vrot.slane %v2430_v28, 1  ;;  %v2445_v25 = vrot.slane %v2444_v30, 4  ;;  %v2452_v48 = vsel %vm14352_vm2, %v2329_v24, 0.0 }
 0x3b1   :  { %v2438_v5 = vrot.slane %v2437_v8, 2  ;;  %v2451_v60 = vsel %vm14352_vm2, %v2328_v49, 0.0  ;;  %v8738_v46 = vpop.f32.mrb[30].mxu0 }
 0x3b2   :  { %v2537_v45 = vrot.slane %v11139_v14, 7  ;;  %v2432_v55 = vadd.f32 %v2431_v10, %v2430_v28  ;;  %v2446_v39 = vadd.f32 %v2445_v25, %v2444_v30  ;;  %v2453_v34 = vadd.f32 %v2452_v48, %v2451_v60  ;;  %v2283_v47 = vpop.f32.mrb[31].mxu0 }
 0x3b3   :  { %v2439_v1 = vadd.f32 %v2438_v5, %v2437_v8  ;;  %v2331_v19 = vmul.f32 %v8738_v46, %v14490_v53  ;;  %v2330_v17 = vmul.f32 %v2283_v47, %v14491_v18 }
 0x3b4   :  { %v2538_v6 = vsel %vm14359_vm6, %v2537_v45, %v11143_v43  ;;  %v11152_v52 = vadd.f32 %v11061_v20, %v2432_v55  ;;  %v2447_v42 = vrot.slane %v2446_v39, 2  ;;  %v2454_v12 = vrot.slane %v2453_v34, 4 }
 0x3b5   :  { %v2440_v33 = vrot.slane %v2439_v1, 1  ;;  %v2461_v57 = vsel %vm14352_vm2, %v2331_v19, 0.0  ;;  %v2460_v32 = vsel %vm14352_vm2, %v2330_v17, 0.0  ;;  %v8741_v51 = vpop.f32.mrb[32].mxu0 }
 0x3b6   :  { %v2539_v54 = vrot.slane %v11152_v52, 6  ;;  %v2448_v2 = vadd.f32 %v2447_v42, %v2446_v39  ;;  %v2455_v36 = vadd.f32 %v2454_v12, %v2453_v34  ;;  %v2462_v29 = vadd.f32 %v2461_v57, %v2460_v32  ;;  %v2293_v26 = vpop.f32.mrb[33].mxu0 }
 0x3b7   :  { %v2441_v3 = vadd.f32 %v2440_v33, %v2439_v1  ;;  %v2333_v22 = vmul.f32 %v8741_v51, %v14490_v53  ;;  %v2332_v0 = vmul.f32 %v2293_v26, %v14491_v18  ;;  %v2553_v32 = vsel %vm14352_vm2, %v11132_v11, 0.0 }
 0x3b8   :  { %v2540_v4 = vsel %vm14358_vm7, %v2539_v54, %v2538_v6  ;;  %v2449_v23 = vrot.slane %v2448_v2, 1  ;;  %v2456_v7 = vrot.slane %v2455_v36, 2  ;;  %v2463_v59 = vrot.slane %v2462_v29, 4 }
 0x3b9   :  { %v2495_v40 = vadd.f32 %v11061_v20, %v2441_v3  ;;  %v2470_v61 = vsel %vm14352_vm2, %v2333_v22, 0.0  ;;  %v2469_v37 = vsel %vm14352_vm2, %v2332_v0, 0.0 }
 0x3ba   :  { %v2450_v27 = vadd.f32 %v2449_v23, %v2448_v2  ;;  %v2457_v56 = vadd.f32 %v2456_v7, %v2455_v36  ;;  %v2464_v41 = vadd.f32 %v2463_v59, %v2462_v29  ;;  %v2471_v28 = vadd.f32 %v2470_v61, %v2469_v37 }
 0x3bb   :  { %v2541_v30 = vrot.slane %v2495_v40, 5 }
 0x3bc   :  { %v2496_v53 = vadd.f32 %v11061_v20, %v2450_v27  ;;  %v2458_v24 = vrot.slane %v2457_v56, 1  ;;  %v2465_v18 = vrot.slane %v2464_v41, 2  ;;  %v2472_v44 = vrot.slane %v2471_v28, 4 }
 0x3bd   :  { %v2542_v8 = vsel %vm14357_vm8, %v2541_v30, %v2540_v4  ;;  %v14492_v4 = vld [vmem:[#allocation2_spill] sm:$0xff] }
 0x3be   :  { %v2543_v49 = vrot.slane %v2496_v53, 4  ;;  %v2459_v10 = vadd.f32 %v2458_v24, %v2457_v56  ;;  %v2466_v25 = vadd.f32 %v2465_v18, %v2464_v41  ;;  %v2473_v48 = vadd.f32 %v2472_v44, %v2471_v28 }
 0x3c0   :  { %v2544_v5 = vsel %vm14356_vm9, %v2543_v49, %v2542_v8  ;;  %v2497_v60 = vadd.f32 %v11061_v20, %v2459_v10  ;;  %v2467_v46 = vrot.slane %v2466_v25, 1  ;;  %v2474_v45 = vrot.slane %v2473_v48, 2 }
 0x3c2   :  { %v2545_v55 = vrot.slane %v2497_v60, 3  ;;  %v2468_v39 = vadd.f32 %v2467_v46, %v2466_v25  ;;  %v2475_v34 = vadd.f32 %v2474_v45, %v2473_v48 }
 0x3c4   :  { %v2546_v47 = vsel %vm14355_vm10, %v2545_v55, %v2544_v5  ;;  %v2498_v1 = vadd.f32 %v11061_v20, %v2468_v39  ;;  %v2476_v19 = vrot.slane %v2475_v34, 1 }
 0x3c6   :  { %v2547_v17 = vrot.slane %v2498_v1, 2  ;;  %v2477_v6 = vadd.f32 %v2476_v19, %v2475_v34 }
 0x3c8   :  { %v2548_v42 = vsel %vm14354_vm11, %v2547_v17, %v2546_v47  ;;  %v2499_v12 = vadd.f32 %v11061_v20, %v2477_v6 }
 0x3ca   :  { %v2549_v33 = vrot.slane %v2499_v12, 1 }
 0x3cc   :  { %v2550_v57 = vsel %vm14353_vm12, %v2549_v33, %v2548_v42 }
 0x3cd   :  { %v2554_v51 = vsel %vm14352_vm2, %v2550_v57, 0.0 }
 0x3ce   :  { %v2555_v54 = vadd.f32 %v2554_v51, %v2553_v32 }
 0x3d0   :  { %v2556_v2 = vrot.slane %v2555_v54, 4 }
 0x3d2   :  { %v2557_v36 = vadd.f32 %v2556_v2, %v2555_v54 }
 0x3d4   :  { %v2558_v29 = vrot.slane %v2557_v36, 2 }
 0x3d6   :  { %v2559_v26 = vadd.f32 %v2558_v29, %v2557_v36 }
 0x3d8   :  { %v2560_v3 = vrot.slane %v2559_v26, 1 }
 0x3da   :  { %v2561_v22 = vadd.f32 %v2560_v3, %v2559_v26 }
 0x3dc   :  { %v2563_v0 = vmul.f32 0.0625, %v2561_v22 }
 0x3de   :  { %v2567_v23 = vrot.slane %v2563_v0, %v14492_v4 }
 0x3e0   :  { %v11177_v20 = vsub.f32 %v11070_v16, %v2567_v23  ;;  %v11180_v7 = vsub.f32 %v11065_v62, %v2567_v23  ;;  %v11183_v11 = vsub.f32 %v11079_v9, %v2567_v23  ;;  %v11186_v59 = vsub.f32 %v11088_v13, %v2567_v23 }
 0x3e1   :  { %v11189_v61 = vsub.f32 %v11097_v50, %v2567_v23  ;;  %v11192_v37 = vsub.f32 %v11106_v21, %v2567_v23  ;;  %v11195_v27 = vsub.f32 %v11115_v15, %v2567_v23  ;;  %v11198_v16 = vsub.f32 %v11123_v38, %v2567_v23 }
 0x3e2   :  { %v11201_v62 = vsub.f32 %v11143_v43, %v2567_v23  ;;  %v11204_v9 = vsub.f32 %v11139_v14, %v2567_v23  ;;  %v11207_v13 = vsub.f32 %v11152_v52, %v2567_v23  ;;  %v11209_v50 = vsub.f32 %v2495_v40, %v2567_v23 }
 0x3e3   :  { %v11211_v56 = vsub.f32 %v2496_v53, %v2567_v23  ;;  %v11213_v21 = vsub.f32 %v2497_v60, %v2567_v23  ;;  %v11215_v15 = vsub.f32 %v2498_v1, %v2567_v23  ;;  %v11217_v41 = vsub.f32 %v2499_v12, %v2567_v23 }
 0x3e4   :  { %v2585_v38 = vmul.f32 %v11180_v7, %v11180_v7  ;;  %v2586_v14 = vmul.f32 %v11183_v11, %v11183_v11  ;;  %v2584_v43 = vmul.f32 %v11177_v20, %v11177_v20  ;;  %v2587_v52 = vmul.f32 %v11186_v59, %v11186_v59 }
 0x3e5   :  { %v2593_v40 = vmul.f32 %v11204_v9, %v11204_v9  ;;  %v2594_v28 = vmul.f32 %v11207_v13, %v11207_v13  ;;  %v2588_v30 = vmul.f32 %v11189_v61, %v11189_v61  ;;  %v2589_v53 = vmul.f32 %v11192_v37, %v11192_v37 }
 0x3e6   :  { %v2590_v24 = vmul.f32 %v11195_v27, %v11195_v27  ;;  %v2595_v18 = vmul.f32 %v11209_v50, %v11209_v50  ;;  %v2591_v44 = vmul.f32 %v11198_v16, %v11198_v16  ;;  %v2596_v8 = vmul.f32 %v11211_v56, %v11211_v56 }
 0x3e7   :  { %v2616_v49 = vrot.slane %v2585_v38, 7  ;;  %v2618_v10 = vrot.slane %v2586_v14, 6  ;;  %v2592_v25 = vmul.f32 %v11201_v62, %v11201_v62  ;;  %v2597_v48 = vmul.f32 %v11213_v21, %v11213_v21 }
 0x3e8   :  { %v2598_v5 = vmul.f32 %v11215_v15, %v11215_v15  ;;  %v2630_v60 = vrot.slane %v2593_v40, 7  ;;  %v2599_v46 = vmul.f32 %v11217_v41, %v11217_v41  ;;  %v2620_v55 = vrot.slane %v2587_v52, 5 }
 0x3e9   :  { %v2617_v45 = vsel %vm14359_vm6, %v2616_v49, %v2584_v43  ;;  %v2632_v39 = vrot.slane %v2594_v28, 6  ;;  %v2622_v47 = vrot.slane %v2588_v30, 4  ;;  %v2634_v19 = vrot.slane %v2595_v18, 5 }
 0x3ea   :  { %v2619_v34 = vsel %vm14358_vm7, %v2618_v10, %v2617_v45  ;;  %v2631_v1 = vsel %vm14359_vm6, %v2630_v60, %v2592_v25  ;;  %v2624_v6 = vrot.slane %v2589_v53, 3  ;;  %v2636_v12 = vrot.slane %v2596_v8, 4 }
 0x3eb   :  { %v2621_v17 = vsel %vm14357_vm8, %v2620_v55, %v2619_v34  ;;  %v2633_v42 = vsel %vm14358_vm7, %v2632_v39, %v2631_v1  ;;  %v2626_v57 = vrot.slane %v2590_v24, 2  ;;  %v2638_v51 = vrot.slane %v2597_v48, 3 }
 0x3ec   :  { %v2623_v33 = vsel %vm14356_vm9, %v2622_v47, %v2621_v17  ;;  %v2635_v32 = vsel %vm14357_vm8, %v2634_v19, %v2633_v42  ;;  %v2628_v2 = vrot.slane %v2591_v44, 1  ;;  %v2640_v29 = vrot.slane %v2598_v5, 2 }
 0x3ed   :  { %v2625_v54 = vsel %vm14355_vm10, %v2624_v6, %v2623_v33  ;;  %v2637_v36 = vsel %vm14356_vm9, %v2636_v12, %v2635_v32  ;;  %v2642_v22 = vrot.slane %v2599_v46, 1 }
 0x3ee   :  { %v2627_v26 = vsel %vm14354_vm11, %v2626_v57, %v2625_v54  ;;  %v2639_v3 = vsel %vm14355_vm10, %v2638_v51, %v2637_v36 }
 0x3ef   :  { %v2629_v0 = vsel %vm14353_vm12, %v2628_v2, %v2627_v26  ;;  %v2641_v23 = vsel %vm14354_vm11, %v2640_v29, %v2639_v3 }
 0x3f0   :  { %v2643_v38 = vsel %vm14353_vm12, %v2642_v22, %v2641_v23  ;;  %v2646_v14 = vsel %vm14352_vm2, %v2629_v0, 0.0 }
 0x3f1   :  { %v2647_v43 = vsel %vm14352_vm2, %v2643_v38, 0.0 }
 0x3f2   :  { %v2648_v52 = vadd.f32 %v2647_v43, %v2646_v14 }
 0x3f4   :  { %v2649_v40 = vrot.slane %v2648_v52, 4 }
 0x3f6   :  { %v2650_v28 = vadd.f32 %v2649_v40, %v2648_v52 }
 0x3f8   :  { %v2651_v30 = vrot.slane %v2650_v28, 2 }
 0x3fa   :  { %v2652_v53 = vadd.f32 %v2651_v30, %v2650_v28 }
 0x3fc   :  { %v2653_v24 = vrot.slane %v2652_v53, 1 }
 0x3fe   :  { %v2654_v18 = vadd.f32 %v2653_v24, %v2652_v53 }
 0x400   :  { %v2655_v44 = vmul.f32 0.0625, %v2654_v18 }
 0x402   :  { %v2656_v8 = vadd.f32 1e-05, %v2655_v44 }
 0x404   :  { %9366 = vrsqrt.f32 %v2656_v8 }
 0x40e   :  { %v9367_v49 = vpop.eup %9366 }
 0x40f   :  { %v2661_v10 = vrot.slane %v9367_v49, %v14492_v4  ;;  %v8211_v4 = vld [vmem:[%s14148_s11] ss:$0 sm:$0xff] }
 0x411   :  { %v2662_v25 = vmul.f32 %v2661_v10, %v11177_v20  ;;  %v2663_v48 = vmul.f32 %v2661_v10, %v11180_v7  ;;  %v2664_v5 = vmul.f32 %v2661_v10, %v11183_v11  ;;  %v2665_v60 = vmul.f32 %v2661_v10, %v11186_v59 }
 0x412   :  { %v2666_v46 = vmul.f32 %v2661_v10, %v11189_v61  ;;  %v2667_v45 = vmul.f32 %v2661_v10, %v11192_v37  ;;  %v2668_v55 = vmul.f32 %v2661_v10, %v11195_v27  ;;  %v2669_v39 = vmul.f32 %v2661_v10, %v11198_v16 }
 0x413   :  { %v2670_v20 = vmul.f32 %v2661_v10, %v11201_v62  ;;  %v2671_v7 = vmul.f32 %v2661_v10, %v11204_v9  ;;  %v2672_v11 = vmul.f32 %v2661_v10, %v11207_v13  ;;  %v2673_v59 = vmul.f32 %v2661_v10, %v11209_v50  ;;  %v8212_v13 = vld [vmem:[%s14149_s12] ss:$0 sm:$0xff]  ;;  %s11338_s12 = smov 0  }
 0x414   :  { %v2674_v61 = vmul.f32 %v2661_v10, %v11211_v56  ;;  %v2675_v37 = vmul.f32 %v2661_v10, %v11213_v21  ;;  %v2676_v27 = vmul.f32 %v2661_v10, %v11215_v15  ;;  %v2677_v16 = vmul.f32 %v2661_v10, %v11217_v41 }
 0x415   :  { %v2685_v34 = vmul.f32 %v8211_v4, %v2662_v25  ;;  %v2686_v47 = vmul.f32 %v8211_v4, %v2663_v48  ;;  %v2687_v1 = vmul.f32 %v8211_v4, %v2664_v5  ;;  %v2688_v19 = vmul.f32 %v8211_v4, %v2665_v60 }
 0x416   :  { %v2689_v17 = vmul.f32 %v8211_v4, %v2666_v46  ;;  %v2690_v62 = vmul.f32 %v8211_v4, %v2667_v45  ;;  %v2691_v6 = vmul.f32 %v8211_v4, %v2668_v55  ;;  %v2692_v9 = vmul.f32 %v8211_v4, %v2669_v39 }
 0x417   :  { %v2693_v50 = vmul.f32 %v8211_v4, %v2670_v20  ;;  %v2694_v56 = vmul.f32 %v8211_v4, %v2671_v7  ;;  %v2695_v42 = vmul.f32 %v8211_v4, %v2672_v11  ;;  %v2696_v21 = vmul.f32 %v8211_v4, %v2673_v59 }
 0x418   :  { %v2697_v12 = vmul.f32 %v8211_v4, %v2674_v61  ;;  %v2698_v15 = vmul.f32 %v8211_v4, %v2675_v37  ;;  %v2699_v33 = vmul.f32 %v8211_v4, %v2676_v27  ;;  %v2700_v41 = vmul.f32 %v8211_v4, %v2677_v16 }
 0x419   :  { %v2708_v57 = vadd.f32 %v8212_v13, %v2685_v34  ;;  %v2709_v32 = vadd.f32 %v8212_v13, %v2686_v47  ;;  %v2710_v51 = vadd.f32 %v8212_v13, %v2687_v1  ;;  %v2711_v54 = vadd.f32 %v8212_v13, %v2688_v19 }
 0x41a   :  { %v2712_v2 = vadd.f32 %v8212_v13, %v2689_v17  ;;  %v2713_v36 = vadd.f32 %v8212_v13, %v2690_v62  ;;  %v2714_v29 = vadd.f32 %v8212_v13, %v2691_v6  ;;  %v2715_v26 = vadd.f32 %v8212_v13, %v2692_v9 }
 0x41b   :  { %v2716_v3 = vadd.f32 %v8212_v13, %v2693_v50  ;;  %v2717_v22 = vadd.f32 %v8212_v13, %v2694_v56  ;;  %v2718_v0 = vadd.f32 %v8212_v13, %v2695_v42  ;;  %v2719_v23 = vadd.f32 %v8212_v13, %v2696_v21 }
 0x41c   :  { %v2720_v38 = vadd.f32 %v8212_v13, %v2697_v12  ;;  %v2721_v14 = vadd.f32 %v8212_v13, %v2698_v15  ;;  %v2722_v43 = vadd.f32 %v8212_v13, %v2699_v33  ;;  %v2723_v52 = vadd.f32 %v8212_v13, %v2700_v41 }
 0x41d   :  { %vm2724_vm13 = vcmp.ge.f32.partialorder %v2708_v57, 0.0  ;;  %vm2725_vm14 = vcmp.ge.f32.partialorder %v2709_v32, 0.0  ;;  %vm2726_vm15 = vcmp.ge.f32.partialorder %v2710_v51, 0.0  ;;  %vm2727_vm0 = vcmp.ge.f32.partialorder %v2711_v54, 0.0 }
 0x41e   :  { %vm2728_vm1 = vcmp.ge.f32.partialorder %v2712_v2, 0.0  ;;  %vm2729_vm3 = vcmp.ge.f32.partialorder %v2713_v36, 0.0  ;;  %vm2730_vm4 = vcmp.ge.f32.partialorder %v2714_v29, 0.0  ;;  %vm2731_vm5 = vcmp.ge.f32.partialorder %v2715_v26, 0.0 }
 0x41f   :  { %vm2732_vm2 = vcmp.ge.f32.partialorder %v2716_v3, 0.0  ;;  %vm2733_vm12 = vcmp.ge.f32.partialorder %v2717_v22, 0.0  ;;  %vm2734_vm11 = vcmp.ge.f32.partialorder %v2718_v0, 0.0  ;;  %vm2735_vm10 = vcmp.ge.f32.partialorder %v2719_v23, 0.0 }
 0x420   :  { %vm2736_vm9 = vcmp.ge.f32.partialorder %v2720_v38, 0.0  ;;  %vm2737_vm8 = vcmp.ge.f32.partialorder %v2721_v14, 0.0  ;;  %vm2738_vm7 = vcmp.ge.f32.partialorder %v2722_v43, 0.0  ;;  %vm2739_vm6 = vcmp.ge.f32.partialorder %v2723_v52, 0.0 }
 0x421   :  { %v2740_v40 = vmul.f32 0.01, %v2708_v57  ;;  %v2741_v28 = vmul.f32 0.01, %v2709_v32  ;;  %v2742_v30 = vmul.f32 0.01, %v2710_v51 }
 0x422   :  { %v2743_v53 = vmul.f32 0.01, %v2711_v54  ;;  %v2744_v24 = vmul.f32 0.01, %v2712_v2  ;;  %v2745_v18 = vmul.f32 0.01, %v2713_v36 }
 0x423   :  { %v2746_v44 = vmul.f32 0.01, %v2714_v29  ;;  %v2747_v8 = vmul.f32 0.01, %v2715_v26  ;;  %v2748_v49 = vmul.f32 0.01, %v2716_v3  ;;  %v2756_v10 = vsel %vm2724_vm13, %v2708_v57, %v2740_v40  }
 0x424   :  { %v2749_v25 = vmul.f32 0.01, %v2717_v22  ;;  %v2750_v48 = vmul.f32 0.01, %v2718_v0  ;;  %v2751_v5 = vmul.f32 0.01, %v2719_v23  ;;  %v2757_v60 = vsel %vm2725_vm14, %v2709_v32, %v2741_v28  }
 0x425   :  { %v2752_v46 = vmul.f32 0.01, %v2720_v38  ;;  %v2753_v45 = vmul.f32 0.01, %v2721_v14  ;;  %v2754_v55 = vmul.f32 0.01, %v2722_v43  ;;  %v2758_v39 = vsel %vm2726_vm15, %v2710_v51, %v2742_v30  }
 0x426   :  { %v2755_v4 = vmul.f32 0.01, %v2723_v52  ;;  %v2759_v20 = vsel %vm2727_vm0, %v2711_v54, %v2743_v53   ;;  %v2760_v7 = vsel %vm2728_vm1, %v2712_v2, %v2744_v24   ;;  %v2761_v11 = vsel %vm2729_vm3, %v2713_v36, %v2745_v18  }
 0x427   :  { %v2762_v59 = vsel %vm2730_vm4, %v2714_v29, %v2746_v44   ;;  %v2763_v61 = vsel %vm2731_vm5, %v2715_v26, %v2747_v8   ;;  %v2764_v37 = vsel %vm2732_vm2, %v2716_v3, %v2748_v49   ;;  %v2765_v27 = vsel %vm2733_vm12, %v2717_v22, %v2749_v25  }
 0x428   :  { %v2766_v16 = vsel %vm2734_vm11, %v2718_v0, %v2750_v48   ;;  %v2767_v34 = vsel %vm2735_vm10, %v2719_v23, %v2751_v5   ;;  %v2768_v47 = vsel %vm2736_vm9, %v2720_v38, %v2752_v46   ;;  %v2769_v1 = vsel %vm2737_vm8, %v2721_v14, %v2753_v45  }
 0x429   :  { %v2770_v19 = vsel %vm2738_vm7, %v2722_v43, %v2754_v55   ;;  %v2771_v17 = vsel %vm2739_vm6, %v2723_v52, %v2755_v4  }
 0x42a LB: > { %s8213_s29 = sshll.u32 %s9792_s12, 6  ;;  %s14493_s18 = sld [smem:[#allocation114_spill]]  ;;  %v2842_v13 = vrot.slane %v9784_v60, 7  ;;  %v2844_v50 = vrot.slane %v9780_v39, 6  ;;  %v2846_v56 = vrot.slane %v9776_v20, 5  ;;  %v2848_v12 = vrot.slane %v9772_v7, 4  ;;  %s9792_s12 = sphi %s11338_s12, %s2777_s12   ;;  %v9788_v10 = vphi %v2756_v10, %v14797_v10   ;;  %v9784_v60 = vphi %v2757_v60, %v14796_v60   ;;  %v9780_v39 = vphi %v2758_v39, %v14795_v39   ;;  %v9776_v20 = vphi %v2759_v20, %v14794_v20   ;;  %v9772_v7 = vphi %v2760_v7, %v14793_v7   ;;  %v9768_v11 = vphi %v2761_v11, %v14792_v11   ;;  %v9764_v59 = vphi %v2762_v59, %v14791_v59   ;;  %v9760_v61 = vphi %v2763_v61, %v14790_v61   ;;  %v9756_v37 = vphi %v2764_v37, %v14789_v37   ;;  %v9752_v27 = vphi %v2765_v27, %v14788_v27   ;;  %v9748_v16 = vphi %v2766_v16, %v14787_v16   ;;  %v9744_v34 = vphi %v2767_v34, %v14786_v34   ;;  %v9740_v47 = vphi %v2768_v47, %v14785_v47   ;;  %v9736_v1 = vphi %v2769_v1, %v14784_v1   ;;  %v9732_v19 = vphi %v2770_v19, %v14783_v19   ;;  %v9728_v17 = vphi %v2771_v17, %v14782_v17  }
 0x42b   : > { %vm14494_vm2 = vcmask 1041409   ;;  %vm14495_vm5 = vcmask 1042434   ;;  %v2850_v51 = vrot.slane %v9768_v11, 3  ;;  %v2852_v54 = vrot.slane %v9764_v59, 2  ;;  %v14509_v5 = vld [vmem:[#allocation71_spill] sm:$0xff]  ;;  %s14511_s25 = sld [smem:[#allocation117_spill]] }
 0x42c   : > { %v2843_v57 = vsel %vm14494_vm2, %v2842_v13, %v9788_v10  ;;  %vm14496_vm6 = vcmask 1043459   ;;  %v2854_v29 = vrot.slane %v9760_v61, 1  ;;  %vm14497_vm7 = vcmask 1044484   ;;  %vm14502_vm12 = vmmov %vm14494_vm2  ;;  %s14512_s9 = sld [smem:[#allocation115_spill]]  ;;  %s9796_s8 = smov 64   ;;  %v14681_v58 = vld [vmem:[#allocation101_spill] sm:$0xff] }
 0x42d   : > { %v2845_v32 = vsel %vm14495_vm5, %v2844_v50, %v2843_v57  ;;  %vm14498_vm8 = vcmask 1045509   ;;  %vm14499_vm9 = vcmask 1046534   ;;  %vm14500_vm10 = vcmask 1047559   ;;  %vm14503_vm13 = vmmov %vm14495_vm5  ;;  %v14516_v50 = vld [vmem:[#allocation2_spill] sm:$0xff]  ;;  %s8214_s6 = sshll.u32 %s9792_s12, 1  ;;  %s14517_s26 = sld [smem:[#allocation116_spill]] }
 0x42e   : > { %v2847_v36 = vsel %vm14496_vm6, %v2846_v56, %v2845_v32  ;;  %vm14501_vm11 = vcmask 523264   ;;  %v2856_v43 = vrot.slane %v9752_v27, 7  ;;  %v2858_v52 = vrot.slane %v9748_v16, 6  ;;  %vm14504_vm14 = vmmov %vm14496_vm6  ;;  %s14739_s10 = sld [smem:[#allocation118_spill]] }
 0x42f   : > { %v2849_v22 = vsel %vm14497_vm7, %v2848_v12, %v2847_v36  ;;  %v2860_v40 = vrot.slane %v9744_v34, 5  ;;  %v2862_v28 = vrot.slane %v9740_v47, 4  ;;  %v2864_v53 = vrot.slane %v9736_v1, 3  ;;  %vm14505_vm15 = vmmov %vm14497_vm7  ;;  %v14515_v1 = vld [vmem:[#allocation36_spill] sm:$0xff] }
 0x430   : > { %s2795_s30 = scalar_lea.vmem %s14493_s18, %s8213_s29  ;;  %v2851_v0 = vsel %vm14498_vm8, %v2850_v51, %v2849_v22  ;;  %v2857_v30 = vsel %vm14502_vm12, %v2856_v43, %v9756_v37  ;;  %v2866_v18 = vrot.slane %v9732_v19, 2  ;;  %v2868_v8 = vrot.slane %v9728_v17, 1  ;;  %vm14506_vm0 = vmmov %vm14498_vm8 }
 0x431   : > { %v2796_v62 = vld [vmem:[%s2795_s30] sm:$0xff]  ;;  %v2797_v6 = vld [vmem:[%s2795_s30 + $0x8] sm:$0xff]  ;;  %v2798_v9 = vld [vmem:[%s2795_s30 + $0x10] sm:$0xff]  ;;  %v2853_v23 = vsel %vm14499_vm9, %v2852_v54, %v2851_v0  ;;  %v2859_v24 = vsel %vm14503_vm13, %v2858_v52, %v2857_v30  ;;  %s2809_s19 = scalar_lea.vmem %s14511_s25, %s8213_s29 }
 0x432   : > { %v9046_v42 = vpack.c.bf16 %v2797_v6, %v2796_v62  ;;  %v2799_v21 = vld [vmem:[%s2795_s30 + $0x18] sm:$0xff]  ;;  %v2800_v33 = vld [vmem:[%s2795_s30 + $0x20] sm:$0xff]  ;;  %v2801_v41 = vld [vmem:[%s2795_s30 + $0x28] sm:$0xff]  ;;  %v2855_v14 = vsel %vm14500_vm10, %v2854_v29, %v2853_v23  ;;  %v2861_v44 = vsel %vm14504_vm14, %v2860_v40, %v2859_v24  ;;  %s2804_s3 = scalar_lea.vmem %s14512_s9, %s9792_s12 }
 0x433   : > { %v9050_v15 = vpack.c.bf16 %v2799_v21, %v2798_v9  ;;  %v9054_v2 = vpack.c.bf16 %v2801_v41, %v2800_v33  ;;  %v2802_v26 = vld [vmem:[%s2795_s30 + $0x30] sm:$0xff]  ;;  %v2803_v3 = vld [vmem:[%s2795_s30 + $0x38] sm:$0xff]  ;;  %8758 = vmatprep.mubr.msk.f32.mxu0 %vm14501_vm11, %v2855_v14  ;;  %v2863_v49 = vsel %vm14505_vm15, %v2862_v28, %v2861_v44  ;;  %vm14507_vm1 = vmmov %vm14499_vm9  ;;  %s2807_s27 = scalar_lea.vmem %s14517_s26, %s8214_s6 }
 0x434   : > { %9047 = vmatprep.subr.bf16.mxu0 %v9046_v42  ;;  %v9058_v38 = vpack.c.bf16 %v2803_v3, %v2802_v26  ;;  %v2865_v10 = vsel %vm14506_vm0, %v2864_v53, %v2863_v49  ;;  %vm14508_vm3 = vmmov %vm14500_vm10  ;;  %v2810_v60 = vld [vmem:[%s2809_s19] sm:$0xff]  ;;  %v2811_v46 = vld [vmem:[%s2809_s19 + $0x8] sm:$0xff]  ;;  %s2818_s17 = scalar_lea.vmem %s14739_s10, %s9792_s12  ;;  %s2777_s12 = sadd.s32 1, %s9792_s12  }
 0x435   : > { %9049 = vmatpush3.bf16.msra.mxu0 %v9046_v42  ;;  %v2867_v25 = vsel %vm14507_vm1, %v2866_v18, %v2865_v10  ;;  %vm14510_vm4 = vmmov %vm14501_vm11  ;;  %v2812_v45 = vld [vmem:[%s2809_s19 + $0x10] sm:$0xff]  ;;  %v9062_v55 = vpack.c.bf16 %v2811_v46, %v2810_v60  ;;  %v2813_v39 = vld [vmem:[%s2809_s19 + $0x18] sm:$0xff]  ;;  %p12212_p0 = scmp.ge.s32.totalorder %s2777_s12, 10  }
 0x436   : > { %9051 = vmatprep.subr.bf16.mxu0 %v9050_v15  ;;  %v2869_v48 = vsel %vm14508_vm3, %v2868_v8, %v2867_v25  ;;  %v9066_v4 = vpack.c.bf16 %v2813_v39, %v2812_v45  ;;  %v8215_v20 = vld [vmem:[%s2804_s3] ss:$0 sm:$0xff]  ;;  %v2815_v11 = vld [vmem:[%s2809_s19 + $0x28] sm:$0xff]  ;;  %v2816_v34 = vld [vmem:[%s2809_s19 + $0x30] sm:$0xff]  ;;  %s14798_s4 = sld [smem:[#allocation119_spill]] (%p12212_p0)  ;;  %s14815_s26 = sld [smem:[#allocation120_spill]] (%p12212_p0) }
 0x437   : > { %9063 = vmatprep.subr.bf16.mxu1 %v9062_v55  ;;  %v2814_v7 = vld [vmem:[%s2809_s19 + $0x20] sm:$0xff]  ;;  %v2817_v47 = vld [vmem:[%s2809_s19 + $0x38] sm:$0xff]  ;;  %v14518_v39 = vld [vmem:[#allocation3_spill] sm:$0xff]  ;;  %s15271_s11 = sld [smem:[#allocation112_spill]] (%p12212_p0) }
 0x438   : > { %9065 = vmatpush3.bf16.msra.mxu1 %v9062_v55  ;;  %v9070_v61 = vpack.c.bf16 %v2815_v11, %v2814_v7  ;;  %v9074_v62 = vpack.c.bf16 %v2817_v47, %v2816_v34  ;;  %v2808_v45 = vld [vmem:[%s2807_s27] sm:$0x3]  ;;  %v14520_v11 = vld [vmem:[#allocation5_spill] sm:$0xff]  ;;  %v14522_v34 = vld [vmem:[#allocation7_spill] sm:$0xff] }
 0x439   : > { %9053 = vmatpush3.bf16.msra.mxu0 %v9050_v15  ;;  %9067 = vmatprep.subr.bf16.mxu1 %v9066_v4  ;;  %v11460_v55 = vrot.slane %v2808_v45, %v14516_v50  ;;  %vm14542_vm6 = vmmov %vm14510_vm4 }
 0x43a   : > { %9055 = vmatprep.subr.bf16.mxu0 %v9054_v2  ;;  %vm14543_vm7 = vmmov %vm14510_vm4 }
 0x43b   : > { %vm14547_vm11 = vmmov %vm14510_vm4 }
 0x43c   : > { %9069 = vmatpush3.bf16.msra.mxu1 %v9066_v4  ;;  %v11463_v4 = vrot.slane %v2808_v45, %v14518_v39  ;;  %v14537_v45 = vld [vmem:[#allocation23_spill] sm:$0xff]  ;;  %vm14548_vm12 = vmmov %vm14510_vm4 }
 0x43d   : > { %9057 = vmatpush3.bf16.msra.mxu0 %v9054_v2  ;;  %9071 = vmatprep.subr.bf16.mxu1 %v9070_v61  ;;  %v2962_v39 = vmul.f32 %v11460_v55, %v14537_v45  ;;  %vm14551_vm14 = vmmov %vm14510_vm4 }
 0x43e   : > { %9059 = vmatprep.subr.bf16.mxu0 %v9058_v38  ;;  %v2990_v47 = vmul.f32 %v11463_v4, %v14522_v34  ;;  %vm14554_vm0 = vmmov %vm14510_vm4 }
 0x43f   : > { %vm14557_vm3 = vmmov %vm14554_vm0 }
 0x440   : > { %9073 = vmatpush3.bf16.msra.mxu1 %v9070_v61  ;;  %v14521_v61 = vld [vmem:[#allocation6_spill] sm:$0xff] }
 0x441   : > { %9061 = vmatpush3.bf16.msra.mxu0 %v9058_v38  ;;  %9075 = vmatprep.subr.bf16.mxu1 %v9074_v62 }
 0x442   : > { %9079 = vmatprep.subr.bf16.mxu0 %v14509_v5 }
 0x444   : > { %8759 = vmatmul.mubr.msk.f32.vlgmr.msra.gmra.mrb[0].mxu0 %vm14510_vm4, %v2869_v48  ;;  %9077 = vmatpush3.bf16.msra.mxu1 %v9074_v62 }
 0x445   : > { %9081 = vmatpush3.bf16.msra.mxu0 %v14509_v5 }
 0x517   : > { %v8760_v59 = vpop.f32.mrb[0].mxu0 }
 0x518   : > { %v11401_v37 = vadd.f32 %v8760_v59, %v8215_v20  ;;  %v2940_v27 = vpop.f32.mrb[1].mxu0  ;;  %v2954_v59 = vmul.f32 %v11460_v55, %v14520_v11  ;;  %v14539_v11 = vld [vmem:[#allocation24_spill] sm:$0xff] }
 0x519   : > { %v11403_v16 = vadd.f32 %v8215_v20, %v2940_v27  ;;  %v14519_v20 = vld [vmem:[#allocation4_spill] sm:$0xff]  ;;  %v2989_v27 = vmul.f32 %v11463_v4, %v14521_v61 }
 0x51a   : > { %14513 = vst [vmem:[#allocation104_spill] sm:$0xff] %v11401_v37  ;;  %v3111_v54 = vrot.slane %v11401_v37, %v14515_v1  ;;  %v3104_v22 = vcombine.high %v11401_v37, %v11401_v37  ;;  %v2953_v7 = vmul.f32 %v11460_v55, %v14519_v20  ;;  %v14538_v20 = vld [vmem:[#allocation22_spill] sm:$0xff] }
 0x51b   : > { %14514 = vst [vmem:[#allocation105_spill] sm:$0xff] %v11403_v16  ;;  %v3062_v19 = vrot.slane %v11403_v16, %v14515_v1  ;;  %v3055_v17 = vcombine.high %v11403_v16, %v11403_v16 }
 0x51c   : > { %v3119_v3 = vcombine.high %v3111_v54, %v3111_v54  ;;  %v3127_v23 = vrot.slane %v3111_v54, %v14515_v1  ;;  %v3118_v43 = vrot.slane %v3104_v22, %v14515_v1  ;;  %v14532_v54 = vld [vmem:[#allocation18_spill] sm:$0xff]  ;;  %v3021_v22 = vadd.f32 %v2989_v27, %v2953_v7 }
 0x51d   : > { %v3078_v6 = vrot.slane %v3062_v19, %v14515_v1  ;;  %v3070_v9 = vcombine.high %v3062_v19, %v3062_v19  ;;  %v3069_v13 = vrot.slane %v3055_v17, %v14515_v1  ;;  %v14524_v17 = vld [vmem:[#allocation15_spill] sm:$0xff]  ;;  %v2998_v7 = vmul.f32 %v11463_v4, %v14538_v20 }
 0x51e   : > { %v3141_v14 = vrot.slane %v3119_v3, %v14515_v1  ;;  %v3188_v52 = vrot.slane %v3127_v23, %v14516_v50  ;;  %v3149_v40 = vcombine.high %v3127_v23, %v3127_v23  ;;  %v3120_v53 = vcombine.high %v3118_v43, %v3118_v43 }
 0x51f   : > { %v3156_v56 = vrot.slane %v3078_v6, %v14516_v50  ;;  %v3100_v42 = vcombine.high %v3078_v6, %v3078_v6  ;;  %v3092_v21 = vrot.slane %v3070_v9, %v14515_v1  ;;  %v3071_v33 = vcombine.high %v3069_v13, %v3069_v13  ;;  %v14525_v6 = vld [vmem:[#allocation12_spill] sm:$0xff] }
 0x520   : > { %v3085_v57 = vrot.slane %v3069_v13, %v14515_v1  ;;  %v3192_v28 = vrot.slane %v3141_v14, %v14516_v50  ;;  %v3151_v30 = vcombine.high %v3141_v14, %v3141_v14  ;;  %v3196_v24 = vrot.slane %v3149_v40, %v14516_v50  ;;  %v14526_v13 = vld [vmem:[#allocation14_spill] sm:$0xff] }
 0x521   : > { %3217 = vrot.lane.b32.xlu0 %v3156_v56, %s9796_s8  ;;  %v3164_v12 = vrot.slane %v3100_v42, %v14516_v50  ;;  %v3102_v15 = vcombine.high %v3092_v21, %v3092_v21  ;;  %v3160_v41 = vrot.slane %v3092_v21, %v14516_v50  ;;  %v3099_v51 = vrot.slane %v3071_v33, %v14515_v1  ;;  %v14527_v56 = vld [vmem:[#allocation8_spill] sm:$0xff]  ;;  %v14528_v21 = vld [vmem:[#allocation10_spill] sm:$0xff] }
 0x522   : > { %v3172_v2 = vrot.slane %v3085_v57, %v14516_v50  ;;  %v3101_v36 = vcombine.high %v3085_v57, %v3085_v57  ;;  %v3134_v18 = vrot.slane %v3118_v43, %v14515_v1  ;;  %v3200_v44 = vrot.slane %v3151_v30, %v14516_v50 }
 0x523   : > { %3221 = vrot.lane.b32.xlu1 %v3164_v12, %s9796_s8  ;;  %v3168_v32 = vrot.slane %v3102_v15, %v14516_v50  ;;  %v3176_v29 = vrot.slane %v3099_v51, %v14516_v50  ;;  %v3103_v26 = vcombine.high %v3099_v51, %v3099_v51  ;;  %v3148_v8 = vrot.slane %v3120_v53, %v14515_v1  ;;  %v14523_v1 = vld [vmem:[#allocation13_spill] sm:$0xff] }
 0x524   : > { %v3180_v0 = vrot.slane %v3101_v36, %v14516_v50  ;;  %v3204_v49 = vrot.slane %v3134_v18, %v14516_v50  ;;  %v3150_v10 = vcombine.high %v3134_v18, %v3134_v18  ;;  %v2957_v19 = vmul.f32 %v11460_v55, %v14523_v1  ;;  %v14529_v15 = vld [vmem:[#allocation9_spill] sm:$0xff] }
 0x525   : > { %3219 = vrot.lane.b32.xlu0 %v3160_v41, %s9796_s8  ;;  %v3184_v38 = vrot.slane %v3103_v26, %v14516_v50  ;;  %v3208_v25 = vrot.slane %v3148_v8, %v14516_v50  ;;  %v3152_v48 = vcombine.high %v3148_v8, %v3148_v8  ;;  %v2958_v62 = vmul.f32 %v11460_v55, %v14524_v17  ;;  %v14530_v41 = vld [vmem:[#allocation11_spill] sm:$0xff]  ;;  %v14533_v36 = vld [vmem:[#allocation17_spill] sm:$0xff] }
 0x526   : > { %v3212_v60 = vrot.slane %v3150_v10, %v14516_v50  ;;  %v2993_v9 = vmul.f32 %v11463_v4, %v14525_v6  ;;  %v2955_v42 = vmul.f32 %v11460_v55, %v14527_v56  ;;  %v2956_v12 = vmul.f32 %v11460_v55, %v14528_v21  ;;  %v14534_v26 = vld [vmem:[#allocation19_spill] sm:$0xff]  ;;  %v14535_v18 = vld [vmem:[#allocation21_spill] sm:$0xff] }
 0x527   : > { %3223 = vrot.lane.b32.xlu1 %v3168_v32, %s9796_s8  ;;  %v3216_v46 = vrot.slane %v3152_v48, %v14516_v50  ;;  %v2994_v50 = vmul.f32 %v11463_v4, %v14526_v13  ;;  %v2991_v33 = vmul.f32 %v11463_v4, %v14529_v15  ;;  %v2992_v57 = vmul.f32 %v11463_v4, %v14530_v41  ;;  %v14531_v32 = vld [vmem:[#allocation16_spill] sm:$0xff]  ;;  %v14541_v15 = vld [vmem:[#allocation25_spill] sm:$0xff] }
 0x528   : > { %v2959_v51 = vmul.f32 %v11460_v55, %v14531_v32  ;;  %v2996_v3 = vmul.f32 %v11463_v4, %v14534_v26  ;;  %v14544_v26 = vld [vmem:[#allocation27_spill] sm:$0xff] }
 0x529   : > { %3225 = vrot.lane.b32.xlu0 %v3172_v2, %s9796_s8  ;;  %v2960_v2 = vmul.f32 %v11460_v55, %v14532_v54  ;;  %v3023_v40 = vadd.f32 %v2991_v33, %v2955_v42  ;;  %v3024_v30 = vadd.f32 %v2992_v57, %v2956_v12  ;;  %v2999_v33 = vmul.f32 %v11463_v4, %v14541_v15  ;;  %v14559_v15 = vld [vmem:[#allocation39_spill] sm:$0xff] }
 0x52b   : > { %3227 = vrot.lane.b32.xlu1 %v3176_v29, %s9796_s8  ;;  %v2995_v29 = vmul.f32 %v11463_v4, %v14533_v36 }
 0x52d   : > { %3229 = vrot.lane.b32.xlu0 %v3180_v0, %s9796_s8  ;;  %v3022_v0 = vadd.f32 %v2990_v47, %v2954_v59  ;;  %v3027_v53 = vadd.f32 %v2995_v29, %v2959_v51  ;;  %v2963_v59 = vmul.f32 %v11460_v55, %v14539_v11  ;;  %v14540_v47 = vld [vmem:[#allocation26_spill] sm:$0xff]  ;;  %v3030_v29 = vadd.f32 %v2998_v7, %v2962_v39  ;;  %v14552_v39 = vld [vmem:[#allocation32_spill] sm:$0xff]  ;;  %v14553_v7 = vld [vmem:[#allocation33_spill] sm:$0xff] }
 0x52e   : > { %v2964_v1 = vmul.f32 %v11460_v55, %v14540_v47  ;;  %v2967_v20 = vmul.f32 %v11460_v55, %v14552_v39  ;;  %v3003_v11 = vmul.f32 %v11463_v4, %v14553_v7  ;;  %v14570_v7 = vld [vmem:[#allocation48_spill] sm:$0xff] }
 0x52f   : > { %3231 = vrot.lane.b32.xlu1 %v3184_v38, %s9796_s8  ;;  %v3025_v38 = vadd.f32 %v2993_v9, %v2957_v19 }
 0x531   : > { %3233 = vrot.lane.b32.xlu0 %v3188_v52, %s9796_s8  ;;  %v3026_v52 = vadd.f32 %v2994_v50, %v2958_v62 }
 0x533   : > { %3235 = vrot.lane.b32.xlu1 %v3192_v28, %s9796_s8 }
 0x535   : > { %3237 = vrot.lane.b32.xlu0 %v3196_v24, %s9796_s8  ;;  %v3028_v24 = vadd.f32 %v2996_v3, %v2960_v2  ;;  %v3000_v3 = vmul.f32 %v11463_v4, %v14544_v26 }
 0x537   : > { %3239 = vrot.lane.b32.xlu1 %v3200_v44, %s9796_s8  ;;  %v2961_v44 = vmul.f32 %v11460_v55, %v14535_v18 }
 0x539   : > { %3241 = vrot.lane.b32.xlu0 %v3204_v49, %s9796_s8 }
 0x53b   : > { %3243 = vrot.lane.b32.xlu1 %v3208_v25, %s9796_s8  ;;  %v14536_v25 = vld [vmem:[#allocation20_spill] sm:$0xff] }
 0x53c   : > { %v2997_v48 = vmul.f32 %v11463_v4, %v14536_v25  ;;  %v14549_v25 = vld [vmem:[#allocation31_spill] sm:$0xff] }
 0x53d   : > { %3245 = vrot.lane.b32.xlu0 %v3212_v60, %s9796_s8 }
 0x53e   : > { %v3029_v50 = vadd.f32 %v2997_v48, %v2961_v44  ;;  %v2966_v48 = vmul.f32 %v11460_v55, %v14549_v25 }
 0x53f   : > { %3247 = vrot.lane.b32.xlu1 %v3216_v46, %s9796_s8 }
 0x593   : > { %v3218_v23 = vpop.permute.xlu0 %3217 }
 0x594   : > { %v3265_v14 = vadd.f32 %v3218_v23, %v11403_v16  ;;  %v3266_v43 = vadd.f32 %v3218_v23, %v11401_v37  ;;  %v3031_v23 = vadd.f32 %v2999_v33, %v2963_v59  ;;  %v3005_v33 = vmul.f32 %v11463_v4, %v14559_v15  ;;  %v14576_v15 = vld [vmem:[#allocation51_spill] sm:$0xff] }
 0x595   : > { %v3222_v28 = vpop.permute.xlu1 %3221 }
 0x596   : > { %v3297_v8 = vadd.f32 %v3265_v14, %v3021_v22  ;;  %v3298_v49 = vadd.f32 %v3266_v43, %v3022_v0  ;;  %v3269_v10 = vadd.f32 %v3222_v28, %v11403_v16  ;;  %v3270_v60 = vadd.f32 %v3222_v28, %v11401_v37  ;;  %v14545_v22 = vld [vmem:[#allocation29_spill] sm:$0xff]  ;;  %v14546_v14 = vld [vmem:[#allocation28_spill] sm:$0xff] }
 0x597   : > { %v3220_v46 = vpop.permute.xlu0 %3219  ;;  %v2965_v0 = vmul.f32 %v11460_v55, %v14545_v22  ;;  %v3001_v43 = vmul.f32 %v11463_v4, %v14546_v14 }
 0x598   : > { %v3301_v61 = vadd.f32 %v3269_v10, %v3025_v38  ;;  %v3267_v27 = vadd.f32 %v3220_v46, %v11403_v16  ;;  %v3268_v34 = vadd.f32 %v3220_v46, %v11401_v37  ;;  %vm3329_vm2 = vcmp.ge.f32.partialorder %v3297_v8, 0.0 }
 0x599   : > { %v3224_v19 = vpop.permute.xlu1 %3223  ;;  %v3361_v17 = vmul.f32 0.2, %v3297_v8  ;;  %vm3330_vm5 = vcmp.ge.f32.partialorder %v3298_v49, 0.0  ;;  %v3362_v62 = vmul.f32 0.2, %v3298_v49  ;;  %v3302_v56 = vadd.f32 %v3270_v60, %v3026_v52  ;;  %v14550_v60 = vld [vmem:[#allocation30_spill] sm:$0xff] }
 0x59a   : > { %v3299_v6 = vadd.f32 %v3267_v27, %v3023_v40  ;;  %v3300_v9 = vadd.f32 %v3268_v34, %v3024_v30  ;;  %v3271_v13 = vadd.f32 %v3224_v19, %v11403_v16  ;;  %v3272_v41 = vadd.f32 %v3224_v19, %v11401_v37 }
 0x59b   : > { %v3393_v42 = vsel %vm3329_vm2, %v3297_v8, %v3361_v17  ;;  %v3226_v21 = vpop.permute.xlu0 %3225  ;;  %v3394_v12 = vsel %vm3330_vm5, %v3298_v49, %v3362_v62  ;;  %v3365_v51 = vmul.f32 0.2, %v3301_v61  ;;  %vm3333_vm10 = vcmp.ge.f32.partialorder %v3301_v61, 0.0  ;;  %v14555_v62 = vld [vmem:[#allocation34_spill] sm:$0xff]  ;;  %vm14560_vm2 = vmmov %vm14554_vm0 }
 0x59c   : > { %v3303_v57 = vadd.f32 %v3271_v13, %v3027_v53  ;;  %8777 = vmatprep.mubr.msk.f32.mxu1 %vm14542_vm6, %v3393_v42  ;;  %v3273_v32 = vadd.f32 %v3226_v21, %v11403_v16  ;;  %vm3331_vm8 = vcmp.ge.f32.partialorder %v3299_v6, 0.0  ;;  %v3363_v2 = vmul.f32 0.2, %v3299_v6  ;;  %vm14563_vm6 = vmmov %vm14554_vm0 }
 0x59d   : > { %8778 = vmatmul.mubr.msk.f32.vlgmr.msra.gmra.mrb[0].mxu1 %vm14543_vm7, %v3394_v12  ;;  %v3228_v54 = vpop.permute.xlu1 %3227  ;;  %vm3332_vm9 = vcmp.ge.f32.partialorder %v3300_v9, 0.0  ;;  %v3364_v36 = vmul.f32 0.2, %v3300_v9  ;;  %v3304_v40 = vadd.f32 %v3272_v41, %v3028_v24  ;;  %v3274_v28 = vadd.f32 %v3226_v21, %v11401_v37  ;;  %v14558_v21 = vld [vmem:[#allocation40_spill] sm:$0xff] }
 0x59e   : > { %v3395_v38 = vsel %vm3331_vm8, %v3299_v6, %v3363_v2  ;;  %v3305_v30 = vadd.f32 %v3273_v32, %v3029_v50  ;;  %v3275_v53 = vadd.f32 %v3228_v54, %v11403_v16  ;;  %v3397_v44 = vsel %vm3333_vm10, %v3301_v61, %v3365_v51  ;;  %vm14566_vm8 = vmmov %vm14554_vm0 }
 0x59f   : > { %v3396_v52 = vsel %vm3332_vm9, %v3300_v9, %v3364_v36  ;;  %8780 = vmatprep.mubr.msk.f32.mxu1 %vm14547_vm11, %v3395_v38  ;;  %v3230_v18 = vpop.permute.xlu0 %3229  ;;  %vm3334_vm13 = vcmp.ge.f32.partialorder %v3302_v56, 0.0  ;;  %v3366_v8 = vmul.f32 0.2, %v3302_v56  ;;  %v3367_v49 = vmul.f32 0.2, %v3303_v57  ;;  %v14556_v9 = vld [vmem:[#allocation35_spill] sm:$0xff]  ;;  %vm14569_vm10 = vmmov %vm14554_vm0 }
 0x5a0   : > { %v3032_v10 = vadd.f32 %v3000_v3, %v2964_v1  ;;  %v3002_v24 = vmul.f32 %v11463_v4, %v14550_v60  ;;  %vm3335_vm15 = vcmp.ge.f32.partialorder %v3303_v57, 0.0  ;;  %v3276_v46 = vadd.f32 %v3228_v54, %v11401_v37  ;;  %v14561_v3 = vld [vmem:[#allocation42_spill] sm:$0xff] }
 0x5a1   : > { %8781 = vmatmul.mubr.msk.f32.gmra.mrb[2].mxu1 %vm14548_vm12, %v3396_v52  ;;  %v3033_v45 = vadd.f32 %v3001_v43, %v2965_v0  ;;  %v3306_v59 = vadd.f32 %v3274_v28, %v3030_v29  ;;  %v3277_v61 = vadd.f32 %v3230_v18, %v11403_v16  ;;  %v3398_v27 = vsel %vm3334_vm13, %v3302_v56, %v3366_v8  ;;  %v3232_v50 = vpop.permute.xlu1 %3231  ;;  %v14562_v0 = vld [vmem:[#allocation41_spill] sm:$0xff]  ;;  %v14564_v43 = vld [vmem:[#allocation43_spill] sm:$0xff]  ;;  %vm14572_vm12 = vmmov %vm14554_vm0 }
 0x5a2   : > { %8783 = vmatprep.mubr.msk.f32.mxu1 %vm14551_vm14, %v3397_v44  ;;  %v3368_v34 = vmul.f32 0.2, %v3304_v40  ;;  %v3307_v47 = vadd.f32 %v3275_v53, %v3031_v23  ;;  %v3399_v1 = vsel %vm3335_vm15, %v3303_v57, %v3367_v49  ;;  %vm3336_vm1 = vcmp.ge.f32.partialorder %v3304_v40, 0.0  ;;  %vm14575_vm14 = vmmov %vm14554_vm0 }
 0x5a3   : > { %v3369_v19 = vmul.f32 0.2, %v3305_v30  ;;  %v3034_v17 = vadd.f32 %v3002_v24, %v2966_v48  ;;  %v2968_v6 = vmul.f32 %v11460_v55, %v14555_v62  ;;  %v3004_v13 = vmul.f32 %v11463_v4, %v14556_v9  ;;  %v3234_v2 = vpop.permute.xlu0 %3233  ;;  %v14567_v48 = vld [vmem:[#allocation45_spill] sm:$0xff]  ;;  %v14568_v24 = vld [vmem:[#allocation46_spill] sm:$0xff] }
 0x5a4   : > { %vm3337_vm4 = vcmp.ge.f32.partialorder %v3305_v30, 0.0  ;;  %v3308_v42 = vadd.f32 %v3276_v46, %v3032_v10  ;;  %v3035_v56 = vadd.f32 %v3003_v11, %v2967_v20  ;;  %v2969_v12 = vmul.f32 %v11460_v55, %v14558_v21 }
 0x5a5   : > { %8784 = vmatmul.mubr.msk.f32.gmra.mrb[4].mxu1 %vm14554_vm0, %v3398_v27  ;;  %v3278_v41 = vadd.f32 %v3230_v18, %v11401_v37  ;;  %v3309_v57 = vadd.f32 %v3277_v61, %v3033_v45  ;;  %v3400_v32 = vsel %vm3336_vm1, %v3304_v40, %v3368_v34  ;;  %v3370_v51 = vmul.f32 0.2, %v3306_v59  ;;  %v14565_v40 = vld [vmem:[#allocation44_spill] sm:$0xff]  ;;  %v3236_v45 = vpop.permute.xlu1 %3235 }
 0x5a6   : > { %8786 = vmatprep.mubr.msk.f32.mxu1 %vm14557_vm3, %v3399_v1  ;;  %v3279_v54 = vadd.f32 %v3232_v50, %v11403_v16  ;;  %v3401_v36 = vsel %vm3337_vm4, %v3305_v30, %v3369_v19  ;;  %vm3338_vm5 = vcmp.ge.f32.partialorder %v3306_v59, 0.0  ;;  %v3371_v29 = vmul.f32 0.2, %v3307_v47  ;;  %vm14580_vm3 = vmmov %vm14554_vm0 }
 0x5a7   : > { %v3036_v26 = vadd.f32 %v3004_v13, %v2968_v6  ;;  %v2970_v22 = vmul.f32 %v11460_v55, %v14561_v3  ;;  %v3006_v23 = vmul.f32 %v11463_v4, %v14562_v0  ;;  %vm3339_vm7 = vcmp.ge.f32.partialorder %v3307_v47, 0.0  ;;  %v14573_v13 = vld [vmem:[#allocation50_spill] sm:$0xff] }
 0x5a8   : > { %v3280_v38 = vadd.f32 %v3232_v50, %v11401_v37  ;;  %v3037_v14 = vadd.f32 %v3005_v33, %v2969_v12  ;;  %v2971_v52 = vmul.f32 %v11460_v55, %v14564_v43  ;;  %v3007_v28 = vmul.f32 %v11463_v4, %v14565_v40  ;;  %v14581_v40 = vld [vmem:[#allocation56_spill] sm:$0xff] }
 0x5a9   : > { %8787 = vmatmul.mubr.msk.f32.gmra.mrb[6].mxu1 %vm14560_vm2, %v3400_v32  ;;  %v3310_v30 = vadd.f32 %v3278_v41, %v3034_v17  ;;  %v3281_v53 = vadd.f32 %v3234_v2, %v11403_v16  ;;  %v3402_v18 = vsel %vm3338_vm5, %v3306_v59, %v3370_v51  ;;  %v3372_v44 = vmul.f32 0.2, %v3308_v42  ;;  %v14571_v59 = vld [vmem:[#allocation47_spill] sm:$0xff]  ;;  %v3238_v17 = vpop.permute.xlu0 %3237  ;;  %v14577_v41 = vld [vmem:[#allocation52_spill] sm:$0xff]  ;;  %vm14583_vm2 = vmmov %vm14554_vm0 }
 0x5aa   : > { %8789 = vmatprep.mubr.msk.f32.mxu1 %vm14563_vm6, %v3401_v36  ;;  %v3311_v8 = vadd.f32 %v3279_v54, %v3035_v56  ;;  %v3403_v49 = vsel %vm3339_vm7, %v3307_v47, %v3371_v29  ;;  %vm3340_vm9 = vcmp.ge.f32.partialorder %v3308_v42, 0.0  ;;  %v3373_v10 = vmul.f32 0.2, %v3309_v57  ;;  %v14574_v56 = vld [vmem:[#allocation49_spill] sm:$0xff]  ;;  %vm14586_vm6 = vmmov %vm14554_vm0 }
 0x5ab   : > { %v3038_v25 = vadd.f32 %v3006_v23, %v2970_v22  ;;  %v2972_v60 = vmul.f32 %v11460_v55, %v14567_v48  ;;  %v3008_v46 = vmul.f32 %v11463_v4, %v14568_v24  ;;  %vm3341_vm11 = vcmp.ge.f32.partialorder %v3309_v57, 0.0  ;;  %v14578_v22 = vld [vmem:[#allocation53_spill] sm:$0xff]  ;;  %v14579_v23 = vld [vmem:[#allocation54_spill] sm:$0xff] }
 0x5ac   : > { %v3312_v39 = vadd.f32 %v3280_v38, %v3036_v26  ;;  %v3039_v20 = vadd.f32 %v3007_v28, %v2971_v52  ;;  %v2973_v11 = vmul.f32 %v11460_v55, %v14570_v7  ;;  %v3009_v61 = vmul.f32 %v11463_v4, %v14571_v59  ;;  %v14587_v59 = vld [vmem:[#allocation59_spill] sm:$0xff] }
 0x5ad   : > { %8790 = vmatmul.mubr.msk.f32.gmra.mrb[8].mxu1 %vm14566_vm8, %v3402_v18  ;;  %v3282_v27 = vadd.f32 %v3234_v2, %v11401_v37  ;;  %v3313_v34 = vadd.f32 %v3281_v53, %v3037_v14  ;;  %v3404_v47 = vsel %vm3340_vm9, %v3308_v42, %v3372_v44  ;;  %v3374_v1 = vmul.f32 0.2, %v3310_v30  ;;  %v3240_v14 = vpop.permute.xlu1 %3239  ;;  %vm14589_vm8 = vmmov %vm14554_vm0 }
 0x5ae   : > { %8792 = vmatprep.mubr.msk.f32.mxu1 %vm14569_vm10, %v3403_v49  ;;  %v3283_v19 = vadd.f32 %v3236_v45, %v11403_v16  ;;  %v3405_v62 = vsel %vm3341_vm11, %v3309_v57, %v3373_v10  ;;  %vm3342_vm13 = vcmp.ge.f32.partialorder %v3310_v30, 0.0  ;;  %v3375_v6 = vmul.f32 0.2, %v3311_v8  ;;  %vm14592_vm10 = vmmov %vm14554_vm0 }
 0x5af   : > { %v3040_v9 = vadd.f32 %v3008_v46, %v2972_v60  ;;  %v2974_v50 = vmul.f32 %v11460_v55, %v14573_v13  ;;  %v3010_v21 = vmul.f32 %v11463_v4, %v14574_v56  ;;  %vm3343_vm15 = vcmp.ge.f32.partialorder %v3311_v8, 0.0  ;;  %v14584_v46 = vld [vmem:[#allocation58_spill] sm:$0xff] }
 0x5b0   : > { %v3284_v42 = vadd.f32 %v3236_v45, %v11401_v37  ;;  %v3041_v12 = vadd.f32 %v3009_v61, %v2973_v11  ;;  %v2975_v33 = vmul.f32 %v11460_v55, %v14576_v15  ;;  %v3011_v57 = vmul.f32 %v11463_v4, %v14577_v41  ;;  %v14593_v41 = vld [vmem:[#allocation64_spill] sm:$0xff] }
 0x5b1   : > { %8793 = vmatmul.mubr.msk.f32.gmra.mrb[10].mxu1 %vm14572_vm12, %v3404_v47  ;;  %v3314_v32 = vadd.f32 %v3282_v27, %v3038_v25  ;;  %v3285_v51 = vadd.f32 %v3238_v17, %v11403_v16  ;;  %v3406_v54 = vsel %vm3342_vm13, %v3310_v30, %v3374_v1  ;;  %v3376_v2 = vmul.f32 0.2, %v3312_v39  ;;  %v14582_v30 = vld [vmem:[#allocation55_spill] sm:$0xff]  ;;  %v3242_v25 = vpop.permute.xlu0 %3241  ;;  %v14588_v27 = vld [vmem:[#allocation61_spill] sm:$0xff]  ;;  %vm14595_vm12 = vmmov %vm14554_vm0 }
 0x5b2   : > { %8795 = vmatprep.mubr.msk.f32.mxu1 %vm14575_vm14, %v3405_v62  ;;  %v3315_v36 = vadd.f32 %v3283_v19, %v3039_v20  ;;  %v3407_v29 = vsel %vm3343_vm15, %v3311_v8, %v3375_v6  ;;  %vm3344_vm1 = vcmp.ge.f32.partialorder %v3312_v39, 0.0  ;;  %v3377_v26 = vmul.f32 0.2, %v3313_v34  ;;  %v14585_v20 = vld [vmem:[#allocation57_spill] sm:$0xff]  ;;  %vm14598_vm14 = vmmov %vm14554_vm0 }
 0x5b3   : > { %v3042_v3 = vadd.f32 %v3010_v21, %v2974_v50  ;;  %v2976_v0 = vmul.f32 %v11460_v55, %v14578_v22  ;;  %v3012_v38 = vmul.f32 %v11463_v4, %v14579_v23  ;;  %vm3345_vm4 = vcmp.ge.f32.partialorder %v3313_v34, 0.0  ;;  %v14590_v50 = vld [vmem:[#allocation60_spill] sm:$0xff]  ;;  %v14591_v21 = vld [vmem:[#allocation62_spill] sm:$0xff] }
 0x5b4   : > { %v3316_v43 = vadd.f32 %v3284_v42, %v3040_v9  ;;  %v3043_v52 = vadd.f32 %v3011_v57, %v2975_v33  ;;  %v2977_v28 = vmul.f32 %v11460_v55, %v14581_v40  ;;  %v3013_v53 = vmul.f32 %v11463_v4, %v14582_v30  ;;  %v14599_v30 = vld [vmem:[#allocation67_spill] sm:$0xff] }
 0x5b5   : > { %8796 = vmatmul.mubr.msk.f32.gmra.mrb[12].mxu1 %vm14554_vm0, %v3406_v54  ;;  %v3286_v18 = vadd.f32 %v3238_v17, %v11401_v37  ;;  %v3317_v44 = vadd.f32 %v3285_v51, %v3041_v12  ;;  %v3408_v8 = vsel %vm3344_vm1, %v3312_v39, %v3376_v2  ;;  %v3378_v49 = vmul.f32 0.2, %v3314_v32  ;;  %v3244_v12 = vpop.permute.xlu1 %3243 }
 0x5b6   : > { %8798 = vmatprep.mubr.msk.f32.mxu1 %vm14580_vm3, %v3407_v29  ;;  %v3287_v10 = vadd.f32 %v3240_v14, %v11403_v16  ;;  %v3409_v48 = vsel %vm3345_vm4, %v3313_v34, %v3377_v26  ;;  %vm3346_vm5 = vcmp.ge.f32.partialorder %v3314_v32, 0.0  ;;  %v3379_v60 = vmul.f32 0.2, %v3315_v36  ;;  %vm14602_vm3 = vmmov %vm14554_vm0 }
 0x5b7   : > { %v3044_v24 = vadd.f32 %v3012_v38, %v2976_v0  ;;  %v2978_v45 = vmul.f32 %v11460_v55, %v14584_v46  ;;  %v3014_v7 = vmul.f32 %v11463_v4, %v14585_v20  ;;  %vm3347_vm7 = vcmp.ge.f32.partialorder %v3315_v36, 0.0  ;;  %v14596_v38 = vld [vmem:[#allocation66_spill] sm:$0xff]  ;;  %v14601_v46 = vld [vmem:[#allocation68_spill] sm:$0xff] }
 0x5b8   : > { %v3288_v39 = vadd.f32 %v3240_v14, %v11401_v37  ;;  %v3045_v11 = vadd.f32 %v3013_v53, %v2977_v28  ;;  %v2979_v61 = vmul.f32 %v11460_v55, %v14587_v59  ;;  %v3015_v34 = vmul.f32 %v11463_v4, %v14588_v27 }
 0x5b9   : > { %8799 = vmatmul.mubr.msk.f32.gmra.mrb[14].mxu1 %vm14583_vm2, %v3408_v8  ;;  %v3318_v47 = vadd.f32 %v3286_v18, %v3042_v3  ;;  %v3289_v1 = vadd.f32 %v3242_v25, %v11403_v16  ;;  %v3410_v19 = vsel %vm3346_vm5, %v3314_v32, %v3378_v49  ;;  %v3380_v17 = vmul.f32 0.2, %v3316_v43  ;;  %v14594_v32 = vld [vmem:[#allocation63_spill] sm:$0xff]  ;;  %v3246_v3 = vpop.permute.xlu0 %3245  ;;  %v14600_v18 = vld [vmem:[#allocation69_spill] sm:$0xff]  ;;  %v3248_v20 = vpop.permute.xlu1 %3247  ;;  %vm14604_vm2 = vmmov %vm14554_vm0 }
 0x5ba   : > { %8801 = vmatprep.mubr.msk.f32.mxu1 %vm14586_vm6, %v3409_v48  ;;  %v3319_v62 = vadd.f32 %v3287_v10, %v3043_v52  ;;  %v3411_v6 = vsel %vm3347_vm7, %v3315_v36, %v3379_v60  ;;  %vm3348_vm9 = vcmp.ge.f32.partialorder %v3316_v43, 0.0  ;;  %v3381_v9 = vmul.f32 0.2, %v3317_v44  ;;  %v14597_v52 = vld [vmem:[#allocation65_spill] sm:$0xff]  ;;  %vm14605_vm6 = vmmov %vm14554_vm0 }
 0x5bb   : > { %v3046_v13 = vadd.f32 %v3014_v7, %v2978_v45  ;;  %v2980_v56 = vmul.f32 %v11460_v55, %v14590_v50  ;;  %v3016_v42 = vmul.f32 %v11463_v4, %v14591_v21  ;;  %vm3349_vm11 = vcmp.ge.f32.partialorder %v3317_v44, 0.0 }
 0x5bc   : > { %v3320_v15 = vadd.f32 %v3288_v39, %v3044_v24  ;;  %v3047_v33 = vadd.f32 %v3015_v34, %v2979_v61  ;;  %v2981_v57 = vmul.f32 %v11460_v55, %v14593_v41  ;;  %v3017_v51 = vmul.f32 %v11463_v4, %v14594_v32 }
 0x5bd   : > { %8802 = vmatmul.mubr.msk.f32.gmra.mrb[16].mxu1 %vm14589_vm8, %v3410_v19  ;;  %v3290_v54 = vadd.f32 %v3242_v25, %v11401_v37  ;;  %v3321_v2 = vadd.f32 %v3289_v1, %v3045_v11  ;;  %v3412_v36 = vsel %vm3348_vm9, %v3316_v43, %v3380_v17  ;;  %v3382_v29 = vmul.f32 0.2, %v3318_v47  ;;  %v14603_v11 = vld [vmem:[#allocation70_spill] sm:$0xff]  ;;  %vm14606_vm8 = vmmov %vm14554_vm0 }
 0x5be   : > { %8804 = vmatprep.mubr.msk.f32.mxu1 %vm14592_vm10, %v3411_v6  ;;  %v3291_v26 = vadd.f32 %v3244_v12, %v11403_v16  ;;  %v3413_v22 = vsel %vm3349_vm11, %v3317_v44, %v3381_v9  ;;  %vm3350_vm13 = vcmp.ge.f32.partialorder %v3318_v47, 0.0  ;;  %v3383_v0 = vmul.f32 0.2, %v3319_v62  ;;  %vm14607_vm10 = vmmov %vm14554_vm0 }
 0x5bf   : > { %v3048_v23 = vadd.f32 %v3016_v42, %v2980_v56  ;;  %v2982_v14 = vmul.f32 %v11460_v55, %v14596_v38  ;;  %v3018_v40 = vmul.f32 %v11463_v4, %v14597_v52  ;;  %vm3351_vm15 = vcmp.ge.f32.partialorder %v3319_v62, 0.0  ;;  %v14616_v52 = vld [vmem:[#allocation74_spill] sm:$0xff] }
 0x5c0   : > { %v3292_v43 = vadd.f32 %v3244_v12, %v11401_v37  ;;  %v3049_v28 = vadd.f32 %v3017_v51, %v2981_v57  ;;  %v2983_v53 = vmul.f32 %v11460_v55, %v14599_v30  ;;  %v3019_v44 = vmul.f32 %v11463_v4, %v14600_v18 }
 0x5c1   : > { %8805 = vmatmul.mubr.msk.f32.gmra.mrb[18].mxu1 %vm14595_vm12, %v3412_v36  ;;  %v3322_v8 = vadd.f32 %v3290_v54, %v3046_v13  ;;  %v3293_v49 = vadd.f32 %v3246_v3, %v11403_v16  ;;  %v3414_v10 = vsel %vm3350_vm13, %v3318_v47, %v3382_v29  ;;  %v3384_v25 = vmul.f32 0.2, %v3320_v15  ;;  %vm14608_vm12 = vmmov %vm14554_vm0  ;;  %v14612_v36 = vld [vmem:[#allocation72_spill] sm:$0xff] }
 0x5c2   : > { %8807 = vmatprep.mubr.msk.f32.mxu1 %vm14598_vm14, %v3413_v22  ;;  %v3323_v48 = vadd.f32 %v3291_v26, %v3047_v33  ;;  %v3415_v60 = vsel %vm3351_vm15, %v3319_v62, %v3383_v0  ;;  %vm3352_vm1 = vcmp.ge.f32.partialorder %v3320_v15, 0.0  ;;  %v3385_v24 = vmul.f32 0.2, %v3321_v2  ;;  %vm14609_vm14 = vmmov %vm14554_vm0 }
 0x5c3   : > { %v2984_v45 = vmul.f32 %v11460_v55, %v14601_v46  ;;  %vm3353_vm4 = vcmp.ge.f32.partialorder %v3321_v2, 0.0  ;;  %v3324_v7 = vadd.f32 %v3292_v43, %v3048_v23  ;;  %v3050_v39 = vadd.f32 %v3018_v40, %v2982_v14 }
 0x5c4   : > { %v3020_v59 = vmul.f32 %v11463_v4, %v14603_v11  ;;  %v3051_v61 = vadd.f32 %v3019_v44, %v2983_v53  ;;  %v3294_v27 = vadd.f32 %v3246_v3, %v11401_v37  ;;  %v3325_v34 = vadd.f32 %v3293_v49, %v3049_v28  ;;  %v14613_v3 = vld [vmem:[#allocation73_spill] sm:$0xff]  ;;  %v14617_v28 = vld [vmem:[#allocation75_spill] sm:$0xff] }
 0x5c5   : > { %8808 = vmatmul.mubr.msk.f32.gmra.mrb[20].mxu1 %vm14554_vm0, %v3414_v10  ;;  %v3416_v47 = vsel %vm3352_vm1, %v3320_v15, %v3384_v25  ;;  %v3386_v1 = vmul.f32 0.2, %v3322_v8  ;;  %v3295_v19 = vadd.f32 %v3248_v20, %v11403_v16  ;;  %v3417_v55 = vsel %vm3353_vm4, %v3321_v2, %v3385_v24  ;;  %vm14611_vm4 = vmmov %vm14554_vm0  ;;  %v14620_v25 = vld [vmem:[#allocation76_spill] sm:$0xff]  ;;  %v14621_v24 = vld [vmem:[#allocation77_spill] sm:$0xff] }
 0x5c6   : > { %8810 = vmatprep.mubr.msk.f32.mxu1 %vm14602_vm3, %v3415_v60  ;;  %vm3354_vm5 = vcmp.ge.f32.partialorder %v3322_v8, 0.0  ;;  %v3387_v17 = vmul.f32 0.2, %v3323_v48  ;;  %vm3355_vm7 = vcmp.ge.f32.partialorder %v3323_v48, 0.0  ;;  %v3052_v62 = vadd.f32 %v3020_v59, %v2984_v45  ;;  %vm14610_vm3 = vmmov %vm14554_vm0 }
 0x5c7   : > { %v3326_v6 = vadd.f32 %v3294_v27, %v3050_v39  ;;  %v3296_v4 = vadd.f32 %v3248_v20, %v11401_v37  ;;  %v3418_v9 = vsel %vm3354_vm5, %v3322_v8, %v3386_v1  ;;  %v3388_v13 = vmul.f32 0.2, %v3324_v7 }
 0x5c8   : > { %v3327_v50 = vadd.f32 %v3295_v19, %v3051_v61  ;;  %v3419_v56 = vsel %vm3355_vm7, %v3323_v48, %v3387_v17  ;;  %vm3356_vm9 = vcmp.ge.f32.partialorder %v3324_v7, 0.0  ;;  %v3389_v21 = vmul.f32 0.2, %v3325_v34  ;;  %v14625_v19 = vld [vmem:[#allocation79_spill] sm:$0xff] }
 0x5c9   : > { %8811 = vmatmul.mubr.msk.f32.gmra.mrb[22].mxu1 %vm14604_vm2, %v3416_v47  ;;  %vm3357_vm11 = vcmp.ge.f32.partialorder %v3325_v34, 0.0  ;;  %v3328_v42 = vadd.f32 %v3296_v4, %v3052_v62  ;;  %v3420_v12 = vsel %vm3356_vm9, %v3324_v7, %v3388_v13  ;;  %v3390_v15 = vmul.f32 0.2, %v3326_v6 }
 0x5ca   : > { %8813 = vmatprep.mubr.msk.f32.mxu1 %vm14605_vm6, %v3417_v55  ;;  %v3421_v33 = vsel %vm3357_vm11, %v3325_v34, %v3389_v21  ;;  %vm3358_vm13 = vcmp.ge.f32.partialorder %v3326_v6, 0.0  ;;  %v3391_v41 = vmul.f32 0.2, %v3327_v50  ;;  %vm3359_vm15 = vcmp.ge.f32.partialorder %v3327_v50, 0.0  ;;  %v14624_v34 = vld [vmem:[#allocation78_spill] sm:$0xff] }
 0x5cb   : > { %v3422_v57 = vsel %vm3358_vm13, %v3326_v6, %v3390_v15  ;;  %v3392_v32 = vmul.f32 0.2, %v3328_v42  ;;  %vm3360_vm1 = vcmp.ge.f32.partialorder %v3328_v42, 0.0  ;;  %vm14614_vm2 = vcmask 130048   ;;  %v14628_v15 = vld [vmem:[#allocation80_spill] sm:$0xff] }
 0x5cc   : > { %v3423_v51 = vsel %vm3359_vm15, %v3327_v50, %v3391_v41  ;;  %vm14615_vm5 = vmmov %vm14614_vm2  ;;  %v14629_v41 = vld [vmem:[#allocation81_spill] sm:$0xff] }
 0x5cd   : > { %8814 = vmatmul.mubr.msk.f32.gmra.mrb[24].mxu1 %vm14606_vm8, %v3418_v9  ;;  %v3424_v54 = vsel %vm3360_vm1, %v3328_v42, %v3392_v32  ;;  %vm14618_vm6 = vmmov %vm14614_vm2 }
 0x5ce   : > { %8816 = vmatprep.mubr.msk.f32.mxu1 %vm14607_vm10, %v3419_v56  ;;  %vm14619_vm7 = vmmov %vm14614_vm2 }
 0x5cf   : > { %vm14622_vm8 = vmmov %vm14614_vm2 }
 0x5d0   : > { %vm14623_vm9 = vmmov %vm14614_vm2 }
 0x5d1   : > { %8817 = vmatmul.mubr.msk.f32.gmra.mrb[26].mxu1 %vm14608_vm12, %v3420_v12  ;;  %vm14626_vm10 = vmmov %vm14614_vm2 }
 0x5d2   : > { %8819 = vmatprep.mubr.msk.f32.mxu1 %vm14609_vm14, %v3421_v33  ;;  %vm14627_vm11 = vmmov %vm14614_vm2 }
 0x5d3   : > { %vm14630_vm12 = vmmov %vm14614_vm2 }
 0x5d4   : > { %vm14631_vm13 = vmmov %vm14614_vm2 }
 0x5d5   : > { %8820 = vmatmul.mubr.msk.f32.gmra.mrb[28].mxu1 %vm14554_vm0, %v3422_v57  ;;  %vm14634_vm14 = vmmov %vm14614_vm2 }
 0x5d6   : > { %8822 = vmatprep.mubr.msk.f32.mxu1 %vm14610_vm3, %v3423_v51  ;;  %vm14635_vm15 = vmmov %vm14614_vm2 }
 0x5d7   : > { %vm14638_vm0 = vmmov %vm14614_vm2 }
 0x5d8   : > { %vm14639_vm1 = vmmov %vm14638_vm0 }
 0x5d9   : > { %8823 = vmatmul.mubr.msk.f32.gmra.mrb[30].mxu1 %vm14611_vm4, %v3424_v54  ;;  %vm14642_vm3 = vmmov %vm14638_vm0 }
 0x5da   : > { %vm14643_vm4 = vmmov %vm14638_vm0 }
 0x670   : > { %v8779_v2 = vpop.f32.mrb[0].mxu1 }
 0x671   : > { %v3747_v29 = vadd.f32 %v8779_v2, %v14612_v36  ;;  %v3587_v26 = vpop.f32.mrb[1].mxu1 }
 0x672   : > { %v3746_v22 = vadd.f32 %v3587_v26, %v14613_v3 }
 0x673   : > { %v3779_v0 = vsel %vm14614_vm2, %v3747_v29, -inf  ;;  %vm14644_vm2 = vmmov %vm14638_vm0 }
 0x674   : > { %v3778_v23 = vsel %vm14615_vm5, %v3746_v22, -inf  ;;  %v8782_v38 = vpop.f32.mrb[2].mxu1  ;;  %vm14645_vm5 = vmmov %vm14638_vm0 }
 0x675   : > { %v3780_v14 = vmax.f32 %v3778_v23, %v3779_v0  ;;  %v11662_v40 = vadd.f32 %v8782_v38, %v14616_v52  ;;  %v3597_v43 = vpop.f32.mrb[3].mxu1 }
 0x676   : > { %v3748_v30 = vadd.f32 %v3597_v43, %v14617_v28 }
 0x677   : > { %v3781_v53 = vrot.slane %v3780_v14, 4  ;;  %v3788_v18 = vsel %vm14618_vm6, %v11662_v40, -inf  ;;  %vm14646_vm6 = vmmov %vm14638_vm0 }
 0x678   : > { %v3787_v44 = vsel %vm14619_vm7, %v3748_v30, -inf  ;;  %v8785_v8 = vpop.f32.mrb[4].mxu1  ;;  %vm14647_vm7 = vmmov %vm14638_vm0 }
 0x679   : > { %v3782_v49 = vmax.f32 %v3780_v14, %v3781_v53  ;;  %v3789_v10 = vmax.f32 %v3787_v44, %v3788_v18  ;;  %v11669_v48 = vadd.f32 %v8785_v8, %v14620_v25  ;;  %v3607_v60 = vpop.f32.mrb[5].mxu1  ;;  %v14632_v18 = vld [vmem:[#allocation82_spill] sm:$0xff] }
 0x67a   : > { %v11672_v46 = vadd.f32 %v3607_v60, %v14621_v24 }
 0x67b   : > { %v3783_v45 = vrot.slane %v3782_v49, 2  ;;  %v3790_v20 = vrot.slane %v3789_v10, 4  ;;  %v3797_v7 = vsel %vm14622_vm8, %v11669_v48, -inf  ;;  %vm14649_vm8 = vmmov %vm14638_vm0 }
 0x67c   : > { %v3796_v39 = vsel %vm14623_vm9, %v11672_v46, -inf  ;;  %v8788_v11 = vpop.f32.mrb[6].mxu1  ;;  %vm14650_vm9 = vmmov %vm14638_vm0 }
 0x67d   : > { %v3784_v59 = vmax.f32 %v3782_v49, %v3783_v45  ;;  %v3791_v61 = vmax.f32 %v3789_v10, %v3790_v20  ;;  %v3798_v27 = vmax.f32 %v3796_v39, %v3797_v7  ;;  %v11679_v47 = vadd.f32 %v8788_v11, %v14624_v34  ;;  %v3617_v1 = vpop.f32.mrb[7].mxu1  ;;  %v14636_v34 = vld [vmem:[#allocation84_spill] sm:$0xff] }
 0x67e   : > { %v11682_v55 = vadd.f32 %v3617_v1, %v14625_v19 }
 0x67f   : > { %v3785_v17 = vrot.slane %v3784_v59, 1  ;;  %v3792_v62 = vrot.slane %v3791_v61, 2  ;;  %v3799_v6 = vrot.slane %v3798_v27, 4  ;;  %v3806_v4 = vsel %vm14626_vm10, %v11679_v47, -inf  ;;  %vm14651_vm10 = vmmov %vm14638_vm0 }
 0x680   : > { %v3805_v9 = vsel %vm14627_vm11, %v11682_v55, -inf  ;;  %v8791_v13 = vpop.f32.mrb[8].mxu1  ;;  %vm14654_vm11 = vmmov %vm14638_vm0 }
 0x681   : > { %v3786_v50 = vmax.f32 %v3784_v59, %v3785_v17  ;;  %v3793_v56 = vmax.f32 %v3791_v61, %v3792_v62  ;;  %v3800_v21 = vmax.f32 %v3798_v27, %v3799_v6  ;;  %v3807_v42 = vmax.f32 %v3805_v9, %v3806_v4  ;;  %v3627_v12 = vpop.f32.mrb[9].mxu1  ;;  %v14637_v17 = vld [vmem:[#allocation85_spill] sm:$0xff] }
 0x682   : > { %v11689_v33 = vadd.f32 %v8791_v13, %v14628_v15  ;;  %v11692_v57 = vadd.f32 %v3627_v12, %v14629_v41 }
 0x683   : > { %v3922_v32 = vsub.f32 %v3746_v22, %v3786_v50  ;;  %v3923_v51 = vsub.f32 %v3747_v29, %v3786_v50  ;;  %v3794_v54 = vrot.slane %v3793_v56, 1  ;;  %v3801_v2 = vrot.slane %v3800_v21, 2  ;;  %v14633_v29 = vld [vmem:[#allocation83_spill] sm:$0xff] }
 0x684   : > { %v3808_v36 = vrot.slane %v3807_v42, 4  ;;  %v3815_v26 = vsel %vm14630_vm12, %v11689_v33, -inf  ;;  %v3814_v3 = vsel %vm14631_vm13, %v11692_v57, -inf  ;;  %v8794_v0 = vpop.f32.mrb[10].mxu1  ;;  %vm14655_vm12 = vmmov %vm14638_vm0 }
 0x685   : > { %v3954_v23 = vmul.f32 1.442695, %v3922_v32  ;;  %v3956_v38 = vmul.f32 1.442695, %v3923_v51  ;;  %v3795_v14 = vmax.f32 %v3793_v56, %v3794_v54  ;;  %v3802_v52 = vmax.f32 %v3800_v21, %v3801_v2  ;;  %v3637_v43 = vpop.f32.mrb[11].mxu1  ;;  %v14640_v32 = vld [vmem:[#allocation86_spill] sm:$0xff]  ;;  %vm14656_vm13 = vmmov %vm14638_vm0 }
 0x686   : > { %v3809_v28 = vmax.f32 %v3807_v42, %v3808_v36  ;;  %v3816_v53 = vmax.f32 %v3814_v3, %v3815_v26  ;;  %v11699_v22 = vadd.f32 %v8794_v0, %v14632_v18  ;;  %v11702_v44 = vadd.f32 %v3637_v43, %v14633_v29  ;;  %v14641_v54 = vld [vmem:[#allocation87_spill] sm:$0xff] }
 0x687   : > { %9368 = vpow2.f32 %v3954_v23  ;;  %v3924_v8 = vsub.f32 %v3748_v30, %v3795_v14  ;;  %v3925_v49 = vsub.f32 %v11662_v40, %v3795_v14  ;;  %v3803_v10 = vrot.slane %v3802_v52, 1 }
 0x688   : > { %9370 = vpow2.f32 %v3956_v38  ;;  %v3810_v25 = vrot.slane %v3809_v28, 2  ;;  %v3817_v60 = vrot.slane %v3816_v53, 4  ;;  %v3824_v24 = vsel %vm14634_vm14, %v11699_v22, -inf  ;;  %v8797_v45 = vpop.f32.mrb[12].mxu1  ;;  %vm14657_vm14 = vmmov %vm14638_vm0 }
 0x689   : > { %v3958_v20 = vmul.f32 1.442695, %v3924_v8  ;;  %v3960_v7 = vmul.f32 1.442695, %v3925_v49  ;;  %v3804_v39 = vmax.f32 %v3802_v52, %v3803_v10  ;;  %v3823_v11 = vsel %vm14635_vm15, %v11702_v44, -inf  ;;  %v3647_v59 = vpop.f32.mrb[13].mxu1  ;;  %vm14660_vm15 = vmmov %vm14638_vm0 }
 0x68a   : > { %v3811_v61 = vmax.f32 %v3809_v28, %v3810_v25  ;;  %v3818_v27 = vmax.f32 %v3816_v53, %v3817_v60  ;;  %v3825_v30 = vmax.f32 %v3823_v11, %v3824_v24  ;;  %v11710_v40 = vadd.f32 %v8797_v45, %v14636_v34 }
 0x68b   : > { %9372 = vpow2.f32 %v3958_v20  ;;  %v3926_v1 = vsub.f32 %v11672_v46, %v3804_v39  ;;  %v3927_v19 = vsub.f32 %v11669_v48, %v3804_v39  ;;  %v11715_v62 = vadd.f32 %v3647_v59, %v14637_v17 }
 0x68c   : > { %9374 = vpow2.f32 %v3960_v7  ;;  %v3812_v6 = vrot.slane %v3811_v61, 1  ;;  %v3819_v4 = vrot.slane %v3818_v27, 2  ;;  %v3826_v9 = vrot.slane %v3825_v30, 4  ;;  %v8800_v13 = vpop.f32.mrb[14].mxu1 }
 0x68d   : > { %v3962_v50 = vmul.f32 1.442695, %v3926_v1  ;;  %v3964_v56 = vmul.f32 1.442695, %v3927_v19  ;;  %v3833_v21 = vsel %vm14638_vm0, %v11710_v40, -inf  ;;  %v3832_v42 = vsel %vm14639_vm1, %v11715_v62, -inf  ;;  %vm14661_vm1 = vmmov %vm14638_vm0 }
 0x68e   : > { %v3813_v12 = vmax.f32 %v3811_v61, %v3812_v6  ;;  %v3820_v46 = vmax.f32 %v3818_v27, %v3819_v4  ;;  %v3827_v15 = vmax.f32 %v3825_v30, %v3826_v9  ;;  %v3834_v48 = vmax.f32 %v3832_v42, %v3833_v21  ;;  %v3657_v41 = vpop.f32.mrb[15].mxu1 }
 0x68f   : > { %9376 = vpow2.f32 %v3962_v50  ;;  %v11722_v51 = vadd.f32 %v8800_v13, %v14640_v32  ;;  %v11725_v2 = vadd.f32 %v3657_v41, %v14641_v54  ;;  %v14648_v13 = vld [vmem:[#allocation88_spill] sm:$0xff] }
 0x690   : > { %9378 = vpow2.f32 %v3964_v56  ;;  %v3928_v36 = vsub.f32 %v11682_v55, %v3813_v12  ;;  %v3929_v26 = vsub.f32 %v11679_v47, %v3813_v12  ;;  %v3821_v3 = vrot.slane %v3820_v46, 1  ;;  %v8803_v0 = vpop.f32.mrb[16].mxu1 }
 0x691   : > { %v11729_v23 = vpop.eup %9368  ;;  %v3828_v38 = vrot.slane %v3827_v15, 2  ;;  %v3835_v14 = vrot.slane %v3834_v48, 4  ;;  %v3842_v52 = vsel %vm14642_vm3, %v11722_v51, -inf  ;;  %v3841_v43 = vsel %vm14643_vm4, %v11725_v2, -inf  ;;  %v3667_v28 = vpop.f32.mrb[17].mxu1  ;;  %vm14662_vm3 = vmmov %vm14638_vm0 }
 0x692   : > { %v11735_v53 = vpop.eup %9370  ;;  %v4018_v55 = vsel %vm14644_vm2, %v11729_v23, 0.0  ;;  %v3966_v18 = vmul.f32 1.442695, %v3928_v36  ;;  %v3968_v47 = vmul.f32 1.442695, %v3929_v26  ;;  %v3822_v29 = vmax.f32 %v3820_v46, %v3821_v3  ;;  %vm14666_vm4 = vmmov %vm14638_vm0 }
 0x693   : > { %v4019_v8 = vsel %vm14645_vm5, %v11735_v53, 0.0  ;;  %v3829_v49 = vmax.f32 %v3827_v15, %v3828_v38  ;;  %v3836_v10 = vmax.f32 %v3834_v48, %v3835_v14  ;;  %v3843_v25 = vmax.f32 %v3841_v43, %v3842_v52  ;;  %v14652_v52 = vld [vmem:[#allocation89_spill] sm:$0xff]  ;;  %vm14667_vm2 = vmmov %vm14638_vm0 }
 0x694   : > { %v4020_v60 = vadd.f32 %v4019_v8, %v4018_v55  ;;  %9380 = vpow2.f32 %v3966_v18  ;;  %v3930_v24 = vsub.f32 %v11692_v57, %v3822_v29  ;;  %v3931_v45 = vsub.f32 %v11689_v33, %v3822_v29  ;;  %v8806_v20 = vpop.f32.mrb[18].mxu1  ;;  %v14653_v29 = vld [vmem:[#allocation90_spill] sm:$0xff]  ;;  %vm14668_vm5 = vmmov %vm14638_vm0 }
 0x695   : > { %v11743_v7 = vpop.eup %9372  ;;  %9382 = vpow2.f32 %v3968_v47  ;;  %v3830_v39 = vrot.slane %v3829_v49, 1  ;;  %v3837_v11 = vrot.slane %v3836_v10, 2  ;;  %v3844_v59 = vrot.slane %v3843_v25, 4  ;;  %v3677_v61 = vpop.f32.mrb[19].mxu1 }
 0x696   : > { %v11745_v27 = vpop.eup %9374  ;;  %v4021_v30 = vrot.slane %v4020_v60, 4  ;;  %v4027_v34 = vsel %vm14646_vm6, %v11743_v7, 0.0  ;;  %v3970_v1 = vmul.f32 1.442695, %v3930_v24  ;;  %v3972_v19 = vmul.f32 1.442695, %v3931_v45  ;;  %vm14669_vm6 = vmmov %vm14638_vm0 }
 0x697   : > { %v4028_v57 = vsel %vm14647_vm7, %v11745_v27, 0.0  ;;  %v3831_v33 = vmax.f32 %v3829_v49, %v3830_v39  ;;  %v3838_v17 = vmax.f32 %v3836_v10, %v3837_v11  ;;  %v3845_v6 = vmax.f32 %v3843_v25, %v3844_v59  ;;  %vm14670_vm7 = vmmov %vm14638_vm0 }
 0x698   : > { %v11751_v4 = vadd.f32 %v4021_v30, %v4020_v60  ;;  %v4029_v9 = vadd.f32 %v4028_v57, %v4027_v34  ;;  %9384 = vpow2.f32 %v3970_v1  ;;  %v11754_v50 = vadd.f32 %v8803_v0, %v14648_v13  ;;  %v8809_v56 = vpop.f32.mrb[20].mxu1  ;;  %v14658_v57 = vld [vmem:[#allocation91_spill] sm:$0xff] }
 0x699   : > { %v11756_v21 = vpop.eup %9376  ;;  %9386 = vpow2.f32 %v3972_v19  ;;  %v3932_v42 = vsub.f32 %v11702_v44, %v3831_v33  ;;  %v3933_v12 = vsub.f32 %v11699_v22, %v3831_v33  ;;  %v3839_v46 = vrot.slane %v3838_v17, 1  ;;  %v3687_v15 = vpop.f32.mrb[21].mxu1 }
 0x69a   : > { %v11760_v48 = vpop.eup %9378  ;;  %v4030_v41 = vrot.slane %v4029_v9, 4  ;;  %v4036_v32 = vsel %vm14649_vm8, %v11756_v21, 0.0  ;;  %v3846_v54 = vrot.slane %v3845_v6, 2  ;;  %v3851_v36 = vsel %vm14650_vm9, %v11754_v50, -inf  ;;  %vm14673_vm8 = vmmov %vm14638_vm0 }
 0x69b   : > { %v4037_v26 = vsel %vm14651_vm10, %v11760_v48, 0.0  ;;  %v3974_v3 = vmul.f32 1.442695, %v3932_v42  ;;  %v3976_v0 = vmul.f32 1.442695, %v3933_v12  ;;  %v3840_v44 = vmax.f32 %v3838_v17, %v3839_v46  ;;  %v14659_v42 = vld [vmem:[#allocation92_spill] sm:$0xff]  ;;  %vm14674_vm9 = vmmov %vm14638_vm0 }
 0x69c   : > { %v11768_v38 = vadd.f32 %v4030_v41, %v4029_v9  ;;  %v4038_v22 = vadd.f32 %v4037_v26, %v4036_v32  ;;  %v3847_v14 = vmax.f32 %v3845_v6, %v3846_v54  ;;  %v11771_v43 = vadd.f32 %v3667_v28, %v14652_v52  ;;  %v8812_v55 = vpop.f32.mrb[22].mxu1  ;;  %vm14675_vm10 = vmmov %vm14638_vm0 }
 0x69d   : > { %9388 = vpow2.f32 %v3974_v3  ;;  %v3934_v18 = vsub.f32 %v11715_v62, %v3840_v44  ;;  %v3935_v47 = vsub.f32 %v11710_v40, %v3840_v44  ;;  %v11776_v8 = vadd.f32 %v8806_v20, %v14653_v29  ;;  %v3697_v49 = vpop.f32.mrb[23].mxu1  ;;  %v14664_v29 = vld [vmem:[#allocation94_spill] sm:$0xff] }
 0x69e   : > { %v11778_v10 = vpop.eup %9380  ;;  %v4039_v25 = vrot.slane %v4038_v22, 4  ;;  %9390 = vpow2.f32 %v3976_v0  ;;  %v3848_v60 = vrot.slane %v3847_v14, 1  ;;  %v3850_v24 = vsel %vm14654_vm11, %v11771_v43, -inf  ;;  %vm14676_vm11 = vmmov %vm14638_vm0 }
 0x69f   : > { %v11782_v28 = vpop.eup %9382  ;;  %v4045_v45 = vsel %vm14655_vm12, %v11778_v10, 0.0  ;;  %v3978_v62 = vmul.f32 1.442695, %v3934_v18  ;;  %v3980_v39 = vmul.f32 1.442695, %v3935_v47  ;;  %v3852_v40 = vmax.f32 %v3850_v24, %v3851_v36  ;;  %v14663_v18 = vld [vmem:[#allocation93_spill] sm:$0xff]  ;;  %vm14677_vm12 = vmmov %vm14638_vm0 }
 0x6a0   : > { %v11786_v11 = vadd.f32 %v4039_v25, %v4038_v22  ;;  %v4046_v20 = vsel %vm14656_vm13, %v11782_v28, 0.0  ;;  %v3849_v59 = vmax.f32 %v3847_v14, %v3848_v60  ;;  %v3860_v30 = vsel %vm14657_vm14, %v11776_v8, -inf  ;;  %v8815_v34 = vpop.f32.mrb[24].mxu1  ;;  %vm14678_vm13 = vmmov %vm14638_vm0 }
 0x6a1   : > { %v4047_v1 = vadd.f32 %v4046_v20, %v4045_v45  ;;  %9392 = vpow2.f32 %v3978_v62  ;;  %v3853_v19 = vrot.slane %v3852_v40, 4  ;;  %v11793_v33 = vadd.f32 %v3677_v61, %v14658_v57  ;;  %v3707_v17 = vpop.f32.mrb[25].mxu1  ;;  %v14665_v62 = vld [vmem:[#allocation95_spill] sm:$0xff]  ;;  %vm14679_vm14 = vmmov %vm14638_vm0 }
 0x6a2   : > { %v11795_v6 = vpop.eup %9384  ;;  %9394 = vpow2.f32 %v3980_v39  ;;  %v3936_v9 = vsub.f32 %v11725_v2, %v3849_v59  ;;  %v3937_v13 = vsub.f32 %v11722_v51, %v3849_v59  ;;  %v11800_v12 = vadd.f32 %v8809_v56, %v14659_v42 }
 0x6a3   : > { %v11802_v46 = vpop.eup %9386  ;;  %v4048_v41 = vrot.slane %v4047_v1, 4  ;;  %v4054_v32 = vsel %vm14660_vm15, %v11795_v6, 0.0  ;;  %v3854_v54 = vmax.f32 %v3852_v40, %v3853_v19  ;;  %v3859_v61 = vsel %vm14638_vm0, %v11793_v33, -inf  ;;  %vm14680_vm15 = vmmov %vm14638_vm0 }
 0x6a4   : > { %v4055_v36 = vsel %vm14661_vm1, %v11802_v46, 0.0  ;;  %v3982_v26 = vmul.f32 1.442695, %v3936_v9  ;;  %v3984_v2 = vmul.f32 1.442695, %v3937_v13  ;;  %v3861_v3 = vmax.f32 %v3859_v61, %v3860_v30  ;;  %v11810_v51 = vpop.f32.mrb[26].mxu1  ;;  %vm14684_vm1 = vmmov %vm14638_vm0 }
 0x6a5   : > { %v11812_v56 = vadd.f32 %v4048_v41, %v4047_v1  ;;  %v4056_v0 = vadd.f32 %v4055_v36, %v4054_v32  ;;  %v3855_v44 = vrot.slane %v3854_v54, 2  ;;  %v3869_v22 = vsel %vm14662_vm3, %v11800_v12, -inf  ;;  %v11816_v14 = vpop.f32.mrb[27].mxu1  ;;  %v14671_v32 = vld [vmem:[#allocation96_spill] sm:$0xff]  ;;  %vm14685_vm3 = vmmov %vm14638_vm0 }
 0x6a6   : > { %9396 = vpow2.f32 %v3982_v26  ;;  %v3862_v52 = vrot.slane %v3861_v3, 4  ;;  %v11819_v47 = vadd.f32 %v3687_v15, %v14663_v18  ;;  %v11822_v25 = vadd.f32 %v8812_v55, %v14664_v29 }
 0x6a7   : > { %v11824_v60 = vpop.eup %9388  ;;  %v4057_v24 = vrot.slane %v4056_v0, 4  ;;  %9398 = vpow2.f32 %v3984_v2  ;;  %v3856_v45 = vmax.f32 %v3854_v54, %v3855_v44  ;;  %v11827_v39 = vadd.f32 %v3697_v49, %v14665_v62 }
 0x6a8   : > { %v11829_v40 = vpop.eup %9390  ;;  %v4063_v20 = vsel %vm14666_vm4, %v11824_v60, 0.0  ;;  %v3863_v59 = vmax.f32 %v3861_v3, %v3862_v52  ;;  %v3868_v15 = vsel %vm14667_vm2, %v11819_v47, -inf  ;;  %v3878_v55 = vsel %vm14668_vm5, %v11822_v25, -inf  ;;  %v11837_v30 = vpop.f32.mrb[28].mxu1  ;;  %v14672_v3 = vld [vmem:[#allocation97_spill] sm:$0xff]  ;;  %vm14686_vm4 = vmmov %vm14638_vm0 }
 0x6a9   : > { %v11839_v1 = vadd.f32 %v4057_v24, %v4056_v0  ;;  %v4064_v49 = vsel %vm14669_vm6, %v11829_v40, 0.0  ;;  %v3857_v19 = vrot.slane %v3856_v45, 1  ;;  %v3870_v57 = vmax.f32 %v3868_v15, %v3869_v22  ;;  %v11843_v9 = vpop.f32.mrb[29].mxu1  ;;  %vm14687_vm2 = vmmov %vm14638_vm0 }
 0x6aa   : > { %v4065_v13 = vadd.f32 %v4064_v49, %v4063_v20  ;;  %v3864_v42 = vrot.slane %v3863_v59, 2  ;;  %v3877_v41 = vsel %vm14670_vm7, %v11827_v39, -inf  ;;  %v11848_v54 = vadd.f32 %v8815_v34, %v14671_v32  ;;  %vm14688_vm5 = vmmov %vm14638_vm0 }
 0x6ab   : > { %v11850_v61 = vpop.eup %9392  ;;  %v3858_v36 = vmax.f32 %v3856_v45, %v3857_v19  ;;  %v3871_v26 = vrot.slane %v3870_v57, 4  ;;  %v3879_v2 = vmax.f32 %v3877_v41, %v3878_v55  ;;  %v11853_v0 = vadd.f32 %v3707_v17, %v14672_v3  ;;  %vm14689_vm6 = vmmov %vm14638_vm0 }
 0x6ac   : > { %v11855_v44 = vpop.eup %9394  ;;  %v4066_v22 = vrot.slane %v4065_v13, 4  ;;  %v4072_v52 = vsel %vm14673_vm8, %v11850_v61, 0.0  ;;  %v3865_v18 = vmax.f32 %v3863_v59, %v3864_v42  ;;  %v3887_v29 = vsel %vm14674_vm9, %v11848_v54, -inf  ;;  %v8824_v34 = vpop.f32.mrb[30].mxu1  ;;  %vm14690_vm7 = vmmov %vm14638_vm0 }
 0x6ad   : > { %v4073_v24 = vsel %vm14675_vm10, %v11855_v44, 0.0  ;;  %v3938_v45 = vsub.f32 %v11771_v43, %v3858_v36  ;;  %v3939_v62 = vsub.f32 %v11754_v50, %v3858_v36  ;;  %v3872_v17 = vmax.f32 %v3870_v57, %v3871_v26  ;;  %v3737_v20 = vpop.f32.mrb[31].mxu1  ;;  %vm14691_vm8 = vmmov %vm14638_vm0 }
 0x6ae   : > { %v11865_v15 = vadd.f32 %v4066_v22, %v4065_v13  ;;  %v4074_v55 = vadd.f32 %v4073_v24, %v4072_v52  ;;  %v3866_v49 = vrot.slane %v3865_v18, 1  ;;  %v3880_v19 = vrot.slane %v3879_v2, 4  ;;  %vm14692_vm9 = vmmov %vm14638_vm0 }
 0x6af   : > { %v3986_v41 = vmul.f32 1.442695, %v3938_v45  ;;  %v3988_v59 = vmul.f32 1.442695, %v3939_v62  ;;  %v3873_v42 = vrot.slane %v3872_v17, 2  ;;  %v3886_v32 = vsel %vm14676_vm11, %v11853_v0, -inf  ;;  %vm14693_vm10 = vmmov %vm14638_vm0 }
 0x6b0   : > { %v11869_v3 = vpop.eup %9396  ;;  %v4075_v5 = vrot.slane %v4074_v55, 4  ;;  %v3867_v16 = vmax.f32 %v3865_v18, %v3866_v49  ;;  %v3881_v43 = vmax.f32 %v3879_v2, %v3880_v19  ;;  %v3888_v37 = vmax.f32 %v3886_v32, %v3887_v29  ;;  %vm14694_vm11 = vmmov %vm14638_vm0 }
 0x6b1   : > { %v11871_v50 = vpop.eup %9398  ;;  %v4081_v57 = vsel %vm14677_vm12, %v11869_v3, 0.0  ;;  %9400 = vpow2.f32 %v3986_v41  ;;  %v3874_v13 = vmax.f32 %v3872_v17, %v3873_v42  ;;  %v11877_v36 = vadd.f32 %v11810_v51, %v10818_v31  ;;  %vm14695_vm12 = vmmov %vm14638_vm0 }
 0x6b2   : > { %v11879_v26 = vadd.f32 %v4075_v5, %v4074_v55  ;;  %v4082_v22 = vsel %vm14678_vm13, %v11871_v50, 0.0  ;;  %9402 = vpow2.f32 %v3988_v59  ;;  %v3940_v2 = vsub.f32 %v11793_v33, %v3867_v16  ;;  %vm14696_vm13 = vmmov %vm14638_vm0 }
 0x6b3   : > { %v4083_v52 = vadd.f32 %v4082_v22, %v4081_v57  ;;  %v3941_v18 = vsub.f32 %v11776_v8, %v3867_v16  ;;  %v3875_v29 = vrot.slane %v3874_v13, 1  ;;  %v3882_v24 = vrot.slane %v3881_v43, 2 }
 0x6b4   : > { %v3990_v45 = vmul.f32 1.442695, %v3940_v2  ;;  %v3889_v62 = vrot.slane %v3888_v37, 4  ;;  %v3896_v17 = vsel %vm14679_vm14, %v11877_v36, -inf  ;;  %v11889_v5 = vadd.f32 %v11816_v14, %v10820_v63  ;;  %vm14697_vm14 = vmmov %vm14638_vm0 }
 0x6b5   : > { %v4084_v51 = vrot.slane %v4083_v52, 4  ;;  %v3992_v55 = vmul.f32 1.442695, %v3941_v18  ;;  %v3876_v49 = vmax.f32 %v3874_v13, %v3875_v29  ;;  %v3883_v19 = vmax.f32 %v3881_v43, %v3882_v24  ;;  %v14683_v29 = vld [vmem:[#allocation103_spill] sm:$0xff] }
 0x6b6   : > { %9404 = vpow2.f32 %v3990_v45  ;;  %v3890_v33 = vmax.f32 %v3888_v37, %v3889_v62  ;;  %v3895_v16 = vsel %vm14680_vm15, %v11889_v5, -inf  ;;  %v11895_v8 = vadd.f32 %v11837_v30, %v10836_v35  ;;  %v14682_v30 = vld [vmem:[#allocation102_spill] sm:$0xff]  ;;  %vm14698_vm15 = vmmov %vm14638_vm0 }
 0x6b7   : > { %v11897_v41 = vadd.f32 %v4084_v51, %v4083_v52  ;;  %9406 = vpow2.f32 %v3992_v55  ;;  %v3942_v59 = vsub.f32 %v11819_v47, %v3876_v49  ;;  %v3943_v14 = vsub.f32 %v11800_v12, %v3876_v49 }
 0x6b8   : > { %v3884_v42 = vrot.slane %v3883_v19, 1  ;;  %v3891_v32 = vrot.slane %v3890_v33, 2  ;;  %v3897_v57 = vmax.f32 %v3895_v16, %v3896_v17  ;;  %v3905_v37 = vsel %vm14638_vm0, %v11895_v8, -inf }
 0x6b9   : > { %v3994_v43 = vmul.f32 1.442695, %v3942_v59  ;;  %v3996_v13 = vmul.f32 1.442695, %v3943_v14  ;;  %v11905_v22 = vadd.f32 %v11843_v9, %v14681_v58  ;;  %v11908_v2 = vadd.f32 %v8824_v34, %v14682_v30 }
 0x6ba   : > { %v3885_v52 = vmax.f32 %v3883_v19, %v3884_v42  ;;  %v3892_v18 = vmax.f32 %v3890_v33, %v3891_v32  ;;  %v3898_v47 = vrot.slane %v3897_v57, 4  ;;  %v11911_v12 = vadd.f32 %v3737_v20, %v14683_v29 }
 0x6bb   : > { %v11913_v24 = vpop.eup %9400  ;;  %9408 = vpow2.f32 %v3994_v43  ;;  %v3904_v45 = vsel %vm14684_vm1, %v11905_v22, -inf  ;;  %v3914_v62 = vsel %vm14685_vm3, %v11908_v2, -inf  ;;  %v4023_v9 = vrot.slane %v11751_v4, 2  ;;  %vm14699_vm1 = vmmov %vm14638_vm0 }
 0x6bc   : > { %v11920_v17 = vpop.eup %9402  ;;  %v4090_v34 = vsel %vm14686_vm4, %v11913_v24, 0.0  ;;  %9410 = vpow2.f32 %v3996_v13  ;;  %v3944_v20 = vsub.f32 %v11827_v39, %v3885_v52  ;;  %v3945_v51 = vsub.f32 %v11822_v25, %v3885_v52  ;;  %vm14700_vm3 = vmmov %vm14638_vm0 }
 0x6bd   : > { %v4091_v55 = vsel %vm14687_vm2, %v11920_v17, 0.0  ;;  %v3893_v49 = vrot.slane %v3892_v18, 1  ;;  %v3899_v19 = vmax.f32 %v3897_v57, %v3898_v47  ;;  %v3906_v33 = vmax.f32 %v3904_v45, %v3905_v37  ;;  %vm14701_vm4 = vmmov %vm14638_vm0 }
 0x6be   : > { %v4092_v16 = vadd.f32 %v4091_v55, %v4090_v34  ;;  %v3998_v59 = vmul.f32 1.442695, %v3944_v20  ;;  %v4000_v14 = vmul.f32 1.442695, %v3945_v51  ;;  %v3913_v42 = vsel %vm14688_vm5, %v11911_v12, -inf  ;;  %vm14702_vm2 = vmmov %vm14638_vm0 }
 0x6bf   : > { %v3894_v32 = vmax.f32 %v3892_v18, %v3893_v49  ;;  %v3900_v43 = vrot.slane %v3899_v19, 2  ;;  %v3907_v30 = vrot.slane %v3906_v33, 4  ;;  %v3915_v13 = vmax.f32 %v3913_v42, %v3914_v62  ;;  %vm14703_vm5 = vmmov %vm14638_vm0 }
 0x6c0   : > { %v11930_v29 = vpop.eup %9404  ;;  %v4093_v39 = vrot.slane %v4092_v16, 4  ;;  %9412 = vpow2.f32 %v3998_v59  ;;  %v4024_v25 = vadd.f32 %v4023_v9, %v11751_v4  ;;  %v4032_v52 = vrot.slane %v11768_v38, 2 }
 0x6c1   : > { %v11934_v57 = vpop.eup %9406  ;;  %v4099_v37 = vsel %vm14689_vm6, %v11930_v29, 0.0  ;;  %9414 = vpow2.f32 %v4000_v14  ;;  %v3946_v47 = vsub.f32 %v11853_v0, %v3894_v32  ;;  %v3947_v18 = vsub.f32 %v11848_v54, %v3894_v32  ;;  %vm14704_vm6 = vmmov %vm14638_vm0 }
 0x6c2   : > { %v11940_v45 = vadd.f32 %v4093_v39, %v4092_v16  ;;  %v4100_v62 = vsel %vm14690_vm7, %v11934_v57, 0.0  ;;  %v3901_v34 = vmax.f32 %v3899_v19, %v3900_v43  ;;  %v3908_v20 = vmax.f32 %v3906_v33, %v3907_v30  ;;  %vm14705_vm7 = vmmov %vm14638_vm0 }
 0x6c3   : > { %v4101_v4 = vadd.f32 %v4100_v62, %v4099_v37  ;;  %v4002_v9 = vmul.f32 1.442695, %v3946_v47  ;;  %v4004_v51 = vmul.f32 1.442695, %v3947_v18  ;;  %v3916_v55 = vrot.slane %v3915_v13, 4 }
 0x6c4   : > { %v3902_v49 = vrot.slane %v3901_v34, 1  ;;  %v3909_v59 = vrot.slane %v3908_v20, 2  ;;  %v4025_v42 = vrot.slane %v4024_v25, 1  ;;  %v4033_v14 = vadd.f32 %v4032_v52, %v11768_v38 }
 0x6c5   : > { %v11945_v58 = vpop.eup %9408  ;;  %v4102_v0 = vrot.slane %v4101_v4, 4  ;;  %9416 = vpow2.f32 %v4002_v9  ;;  %v3917_v54 = vmax.f32 %v3915_v13, %v3916_v55  ;;  %v4041_v16 = vrot.slane %v11786_v11, 2 }
 0x6c6   : > { %v11948_v32 = vpop.eup %9410  ;;  %v4108_v19 = vsel %vm14691_vm8, %v11945_v58, 0.0  ;;  %9418 = vpow2.f32 %v4004_v51  ;;  %v3903_v33 = vmax.f32 %v3901_v34, %v3902_v49  ;;  %v3910_v43 = vmax.f32 %v3908_v20, %v3909_v59  ;;  %vm14706_vm8 = vmmov %vm14638_vm0 }
 0x6c7   : > { %v11952_v30 = vadd.f32 %v4102_v0, %v4101_v4  ;;  %v4109_v38 = vsel %vm14692_vm9, %v11948_v32, 0.0  ;;  %v3918_v39 = vrot.slane %v3917_v54, 2  ;;  %v4026_v52 = vadd.f32 %v4025_v42, %v4024_v25  ;;  %vm14707_vm9 = vmmov %vm14638_vm0 }
 0x6c8   : > { %v4110_v37 = vadd.f32 %v4109_v38, %v4108_v19  ;;  %v3948_v13 = vsub.f32 %v11889_v5, %v3903_v33  ;;  %v3949_v47 = vsub.f32 %v11877_v36, %v3903_v33  ;;  %v3911_v18 = vrot.slane %v3910_v43, 1 }
 0x6c9   : > { %v3919_v62 = vmax.f32 %v3917_v54, %v3918_v39  ;;  %9420 = vrcp.f32 %v4026_v52  ;;  %v4034_v9 = vrot.slane %v4033_v14, 1  ;;  %v4042_v51 = vadd.f32 %v4041_v16, %v11786_v11 }
 0x6ca   : > { %v11959_v34 = vpop.eup %9412  ;;  %v4111_v20 = vrot.slane %v4110_v37, 4  ;;  %v4006_v4 = vmul.f32 1.442695, %v3948_v13  ;;  %v4008_v55 = vmul.f32 1.442695, %v3949_v47  ;;  %v3912_v49 = vmax.f32 %v3910_v43, %v3911_v18 }
 0x6cb   : > { %v11961_v59 = vpop.eup %9414  ;;  %v4117_v25 = vsel %vm14693_vm10, %v11959_v34, 0.0  ;;  %v3920_v5 = vrot.slane %v3919_v62, 1  ;;  %v4035_v42 = vadd.f32 %v4034_v9, %v4033_v14  ;;  %v4043_v36 = vrot.slane %v4042_v51, 1  ;;  %vm14708_vm10 = vmmov %vm14638_vm0 }
 0x6cc   : > { %v11965_v0 = vadd.f32 %v4111_v20, %v4110_v37  ;;  %v4118_v54 = vsel %vm14694_vm11, %v11961_v59, 0.0  ;;  %9422 = vpow2.f32 %v4006_v4  ;;  %v3950_v11 = vsub.f32 %v11905_v22, %v3912_v49  ;;  %vm14709_vm11 = vmmov %vm14638_vm0 }
 0x6cd   : > { %v4119_v16 = vadd.f32 %v4118_v54, %v4117_v25  ;;  %9424 = vpow2.f32 %v4008_v55  ;;  %v3951_v19 = vsub.f32 %v11895_v8, %v3912_v49  ;;  %v3921_v33 = vmax.f32 %v3919_v62, %v3920_v5 }
 0x6ce   : > { %v4010_v43 = vmul.f32 1.442695, %v3950_v11  ;;  %9426 = vrcp.f32 %v4035_v42  ;;  %v4044_v38 = vadd.f32 %v4043_v36, %v4042_v51  ;;  %v4050_v39 = vrot.slane %v11812_v56, 2 }
 0x6cf   : > { %v11972_v14 = vpop.eup %9416  ;;  %v4120_v52 = vrot.slane %v4119_v16, 4  ;;  %v4012_v37 = vmul.f32 1.442695, %v3951_v19  ;;  %v3952_v13 = vsub.f32 %v11911_v12, %v3921_v33  ;;  %v3953_v47 = vsub.f32 %v11908_v2, %v3921_v33 }
 0x6d0   : > { %v11976_v18 = vpop.eup %9418  ;;  %v4126_v22 = vsel %vm14695_vm12, %v11972_v14, 0.0  ;;  %9428 = vpow2.f32 %v4010_v43  ;;  %v4051_v8 = vadd.f32 %v4050_v39, %v11812_v56  ;;  %v4059_v62 = vrot.slane %v11839_v1, 2  ;;  %vm14710_vm12 = vmmov %vm14638_vm0 }
 0x6d1   : > { %v11982_v9 = vadd.f32 %v4120_v52, %v4119_v16  ;;  %v4127_v51 = vsel %vm14696_vm13, %v11976_v18, 0.0  ;;  %9430 = vpow2.f32 %v4012_v37  ;;  %v4014_v20 = vmul.f32 1.442695, %v3952_v13  ;;  %vm14711_vm13 = vmmov %vm14638_vm0 }
 0x6d2   : > { %v4128_v12 = vadd.f32 %v4127_v51, %v4126_v22  ;;  %v4016_v4 = vmul.f32 1.442695, %v3953_v47  ;;  %9432 = vrcp.f32 %v4044_v38  ;;  %v4052_v2 = vrot.slane %v4051_v8, 1 }
 0x6d3   : > { %v9421_v55 = vpop.eup %9420  ;;  %9434 = vpow2.f32 %v4014_v20  ;;  %v4060_v49 = vadd.f32 %v4059_v62, %v11839_v1  ;;  %v4068_v25 = vrot.slane %v11865_v15, 2  ;;  %v4077_v56 = vrot.slane %v11879_v26, 2 }
 0x6d4   : > { %v4129_v5 = vrot.slane %v4128_v12, 4  ;;  %9436 = vpow2.f32 %v4016_v4  ;;  %v4178_v42 = vmul.f32 %v9421_v55, %v11729_v23  ;;  %v4179_v36 = vmul.f32 %v9421_v55, %v11735_v53 }
 0x6d5   : > { %v4053_v54 = vadd.f32 %v4052_v2, %v4051_v8  ;;  %v4061_v11 = vrot.slane %v4060_v49, 1  ;;  %v4069_v16 = vadd.f32 %v4068_v25, %v11865_v15  ;;  %v4078_v19 = vadd.f32 %v4077_v56, %v11879_v26 }
 0x6d6   : > { %v11993_v33 = vpop.eup %9422  ;;  %v11995_v43 = vadd.f32 %v4129_v5, %v4128_v12  ;;  %8829 = vmatprep.mubr.msk.f32.mxu0 %vm14697_vm14, %v4178_v42  ;;  %v4086_v1 = vrot.slane %v11897_v41, 2  ;;  %v4095_v38 = vrot.slane %v11940_v45, 2  ;;  %v4104_v23 = vrot.slane %v11952_v30, 2  ;;  %vm14712_vm14 = vmmov %vm14638_vm0 }
 0x6d7   : > { %v12001_v39 = vpop.eup %9424  ;;  %v4135_v53 = vsel %vm14698_vm15, %v11993_v33, 0.0  ;;  %8830 = vmatmul.mubr.msk.f32.vlgmr.msra.gmra.mrb[2].mxu0 %vm14638_vm0, %v4179_v36  ;;  %9438 = vrcp.f32 %v4053_v54  ;;  %v4062_v15 = vadd.f32 %v4061_v11, %v4060_v49  ;;  %v4070_v26 = vrot.slane %v4069_v16, 1  ;;  %vm14713_vm15 = vmmov %vm14638_vm0 }
 0x6d8   : > { %v9427_v52 = vpop.eup %9426  ;;  %v4136_v37 = vsel %vm14699_vm1, %v12001_v39, 0.0  ;;  %v4079_v13 = vrot.slane %v4078_v19, 1  ;;  %v4087_v47 = vadd.f32 %v4086_v1, %v11897_v41  ;;  %v4096_v22 = vadd.f32 %v4095_v38, %v11940_v45  ;;  %vm14714_vm1 = vmmov %vm14638_vm0 }
 0x6d9   : > { %v4137_v8 = vadd.f32 %v4136_v37, %v4135_v53  ;;  %v4180_v62 = vmul.f32 %v9427_v52, %v11743_v7  ;;  %v4181_v51 = vmul.f32 %v9427_v52, %v11745_v27  ;;  %9440 = vrcp.f32 %v4062_v15 }
 0x6da   : > { %v12012_v20 = vpop.eup %9428  ;;  %v4071_v12 = vadd.f32 %v4070_v26, %v4069_v16  ;;  %v4080_v4 = vadd.f32 %v4079_v13, %v4078_v19  ;;  %v4088_v2 = vrot.slane %v4087_v47, 1  ;;  %v4097_v55 = vrot.slane %v4096_v22, 1 }
 0x6db   : > { %v12014_v49 = vpop.eup %9430  ;;  %v4138_v25 = vrot.slane %v4137_v8, 4  ;;  %v4144_v41 = vsel %vm14700_vm3, %v12012_v20, 0.0  ;;  %8832 = vmatprep.mubr.msk.f32.mxu0 %vm14701_vm4, %v4180_v62  ;;  %v4105_v45 = vadd.f32 %v4104_v23, %v11952_v30  ;;  %v4113_v7 = vrot.slane %v11965_v0, 2  ;;  %vm14715_vm3 = vmmov %vm14638_vm0 }
 0x6dc   : > { %v9433_v27 = vpop.eup %9432  ;;  %v4145_v56 = vsel %vm14702_vm2, %v12014_v49, 0.0  ;;  %8833 = vmatmul.mubr.msk.f32.gmra.mrb[4].mxu0 %vm14703_vm5, %v4181_v51  ;;  %9442 = vrcp.f32 %v4071_v12  ;;  %v4089_v5 = vadd.f32 %v4088_v2, %v4087_v47  ;;  %v4098_v42 = vadd.f32 %v4097_v55, %v4096_v22  ;;  %vm14716_vm4 = vmmov %vm14638_vm0 }
 0x6dd   : > { %v12024_v36 = vpop.eup %9434  ;;  %v4139_v54 = vadd.f32 %v4138_v25, %v4137_v8  ;;  %v4146_v11 = vadd.f32 %v4145_v56, %v4144_v41  ;;  %v4182_v16 = vmul.f32 %v9433_v27, %v11756_v21  ;;  %v4183_v19 = vmul.f32 %v9433_v27, %v11760_v48  ;;  %vm14717_vm2 = vmmov %vm14638_vm0 }
 0x6de   : > { %v12028_v30 = vpop.eup %9436  ;;  %v4153_v1 = vsel %vm14704_vm6, %v12024_v36, 0.0  ;;  %9444 = vrcp.f32 %v4080_v4  ;;  %v4106_v38 = vrot.slane %v4105_v45, 1  ;;  %v4114_v23 = vadd.f32 %v4113_v7, %v11965_v0  ;;  %vm14718_vm5 = vmmov %vm14638_vm0 }
 0x6df   : > { %v4147_v53 = vrot.slane %v4146_v11, 4  ;;  %v4154_v15 = vsel %vm14705_vm7, %v12028_v30, 0.0  ;;  %8835 = vmatprep.mubr.msk.f32.mxu0 %vm14706_vm8, %v4182_v16  ;;  %9446 = vrcp.f32 %v4089_v5  ;;  %v4122_v21 = vrot.slane %v11982_v9, 2  ;;  %vm14719_vm6 = vmmov %vm14638_vm0 }
 0x6e0   : > { %v4155_v26 = vadd.f32 %v4154_v15, %v4153_v1  ;;  %8836 = vmatmul.mubr.msk.f32.gmra.mrb[6].mxu0 %vm14707_vm9, %v4183_v19  ;;  %9448 = vrcp.f32 %v4098_v42  ;;  %v4107_v48 = vadd.f32 %v4106_v38, %v4105_v45  ;;  %v4115_v52 = vrot.slane %v4114_v23, 1  ;;  %vm14720_vm7 = vmmov %vm14638_vm0 }
 0x6e1   : > { %v9439_v37 = vpop.eup %9438  ;;  %v4148_v13 = vadd.f32 %v4147_v53, %v4146_v11  ;;  %v4123_v47 = vadd.f32 %v4122_v21, %v11982_v9  ;;  %v4131_v0 = vrot.slane %v11995_v43, 2  ;;  %v4140_v22 = vrot.slane %v4139_v54, 2  ;;  %vm14721_vm8 = vmmov %vm14638_vm0 }
 0x6e2   : > { %v4156_v8 = vrot.slane %v4155_v26, 4  ;;  %v4184_v62 = vmul.f32 %v9439_v37, %v11778_v10  ;;  %v4185_v51 = vmul.f32 %v9439_v37, %v11782_v28  ;;  %9450 = vrcp.f32 %v4107_v48  ;;  %vm14722_vm9 = vmmov %vm14638_vm0 }
 0x6e3   : > { %v9441_v12 = vpop.eup %9440  ;;  %v4116_v4 = vadd.f32 %v4115_v52, %v4114_v23  ;;  %v4124_v2 = vrot.slane %v4123_v47, 1  ;;  %v4132_v55 = vadd.f32 %v4131_v0, %v11995_v43  ;;  %v4141_v25 = vadd.f32 %v4140_v22, %v4139_v54 }
 0x6e4   : > { %v4157_v41 = vadd.f32 %v4156_v8, %v4155_v26  ;;  %8838 = vmatprep.mubr.msk.f32.mxu0 %vm14708_vm10, %v4184_v62  ;;  %v4186_v9 = vmul.f32 %v9441_v12, %v11795_v6  ;;  %v4187_v45 = vmul.f32 %v9441_v12, %v11802_v46  ;;  %v4149_v7 = vrot.slane %v4148_v13, 2  ;;  %vm14723_vm10 = vmmov %vm14638_vm0 }
 0x6e5   : > { %8839 = vmatmul.mubr.msk.f32.gmra.mrb[8].mxu0 %vm14709_vm11, %v4185_v51  ;;  %9452 = vrcp.f32 %v4116_v4  ;;  %v4125_v10 = vadd.f32 %v4124_v2, %v4123_v47  ;;  %v4133_v28 = vrot.slane %v4132_v55, 1  ;;  %v4142_v27 = vrot.slane %v4141_v25, 1  ;;  %vm14724_vm11 = vmmov %vm14638_vm0 }
 0x6e6   : > { %v9443_v56 = vpop.eup %9442  ;;  %v4158_v5 = vrot.slane %v4157_v41, 2  ;;  %8841 = vmatprep.mubr.msk.f32.mxu0 %vm14710_vm12, %v4186_v9  ;;  %v4150_v43 = vadd.f32 %v4149_v7, %v4148_v13  ;;  %vm14725_vm12 = vmmov %vm14638_vm0 }
 0x6e7   : > { %v4188_v42 = vmul.f32 %v9443_v56, %v11824_v60  ;;  %v4189_v54 = vmul.f32 %v9443_v56, %v11829_v40  ;;  %9454 = vrcp.f32 %v4125_v10  ;;  %v4134_v6 = vadd.f32 %v4133_v28, %v4132_v55 }
 0x6e8   : > { %v9445_v11 = vpop.eup %9444  ;;  %v4143_v46 = vadd.f32 %v4142_v27, %v4141_v25  ;;  %v4151_v16 = vrot.slane %v4150_v43, 1  ;;  %v4159_v19 = vadd.f32 %v4158_v5, %v4157_v41 }
 0x6e9   : > { %v9447_v1 = vpop.eup %9446  ;;  %8842 = vmatmul.mubr.msk.f32.gmra.mrb[10].mxu0 %vm14711_vm13, %v4187_v45  ;;  %v4190_v38 = vmul.f32 %v9445_v11, %v11850_v61  ;;  %v4191_v23 = vmul.f32 %v9445_v11, %v11855_v44  ;;  %9456 = vrcp.f32 %v4134_v6  ;;  %vm14726_vm13 = vmmov %vm14638_vm0 }
 0x6ea   : > { %v9449_v53 = vpop.eup %9448  ;;  %8844 = vmatprep.mubr.msk.f32.mxu0 %vm14712_vm14, %v4188_v42  ;;  %v4192_v60 = vmul.f32 %v9447_v1, %v11869_v3  ;;  %v4193_v40 = vmul.f32 %v9447_v1, %v11871_v50  ;;  %9458 = vrcp.f32 %v4143_v46  ;;  %v4152_v15 = vadd.f32 %v4151_v16, %v4150_v43  ;;  %vm14727_vm14 = vmmov %vm14638_vm0 }
 0x6eb   : > { %v4194_v21 = vmul.f32 %v9449_v53, %v11913_v24  ;;  %v4195_v26 = vmul.f32 %v9449_v53, %v11920_v17  ;;  %v4160_v48 = vrot.slane %v4159_v19, 1 }
 0x6ec   : > { %v9451_v52 = vpop.eup %9450  ;;  %9460 = vrcp.f32 %v4152_v15 }
 0x6ed   : > { %8845 = vmatmul.mubr.msk.f32.gmra.mrb[12].mxu0 %vm14713_vm15, %v4189_v54  ;;  %v4196_v61 = vmul.f32 %v9451_v52, %v11930_v29  ;;  %v4197_v44 = vmul.f32 %v9451_v52, %v11934_v57  ;;  %v4161_v37 = vadd.f32 %v4160_v48, %v4159_v19  ;;  %vm14728_vm15 = vmmov %vm14638_vm0 }
 0x6ee   : > { %8847 = vmatprep.mubr.msk.f32.mxu0 %vm14638_vm0, %v4190_v38 }
 0x6ef   : > { %v9453_v3 = vpop.eup %9452  ;;  %9462 = vrcp.f32 %v4161_v37 }
 0x6f0   : > { %v4198_v50 = vmul.f32 %v9453_v3, %v11945_v58  ;;  %v4199_v24 = vmul.f32 %v9453_v3, %v11948_v32 }
 0x6f1   : > { %v9455_v13 = vpop.eup %9454  ;;  %8848 = vmatmul.mubr.msk.f32.gmra.mrb[14].mxu0 %vm14714_vm1, %v4191_v23  ;;  %vm14729_vm1 = vmmov %vm14638_vm0 }
 0x6f2   : > { %8850 = vmatprep.mubr.msk.f32.mxu0 %vm14715_vm3, %v4192_v60  ;;  %v4200_v17 = vmul.f32 %v9455_v13, %v11959_v34  ;;  %v4201_v29 = vmul.f32 %v9455_v13, %v11961_v59  ;;  %vm14730_vm3 = vmmov %vm14638_vm0  ;;  %v12110_v60 = vld [vmem:[%s2818_s17] ss:$0 sm:$0xff]  ;;  %s9797_s17 = smov (%p12212_p0), 112  }
 0x6f3   : > { %v9457_v47 = vpop.eup %9456 }
 0x6f4   : > { %v9459_v57 = vpop.eup %9458  ;;  %v4202_v0 = vmul.f32 %v9457_v47, %v11972_v14  ;;  %v4203_v22 = vmul.f32 %v9457_v47, %v11976_v18 }
 0x6f5   : > { %8851 = vmatmul.mubr.msk.f32.gmra.mrb[16].mxu0 %vm14716_vm4, %v4193_v40  ;;  %v4204_v58 = vmul.f32 %v9459_v57, %v11993_v33  ;;  %v4205_v32 = vmul.f32 %v9459_v57, %v12001_v39  ;;  %vm14731_vm4 = vmmov %vm14638_vm0  ;;  %v14732_v39 = vld [vmem:[#allocation104_spill] sm:$0xff] }
 0x6f6   : > { %v9461_v8 = vpop.eup %9460  ;;  %8853 = vmatprep.mubr.msk.f32.mxu0 %vm14717_vm2, %v4194_v21  ;;  %vm14734_vm2 = vcmask 523264  }
 0x6f7   : > { %v4206_v62 = vmul.f32 %v9461_v8, %v12012_v20  ;;  %v4207_v34 = vmul.f32 %v9461_v8, %v12014_v49 }
 0x6f9   : > { %v9463_v59 = vpop.eup %9462  ;;  %8854 = vmatmul.mubr.msk.f32.gmra.mrb[18].mxu0 %vm14718_vm5, %v4195_v26  ;;  %vm14735_vm5 = vmmov %vm14734_vm2 }
 0x6fa   : > { %8856 = vmatprep.mubr.msk.f32.mxu0 %vm14719_vm6, %v4196_v61  ;;  %v4208_v14 = vmul.f32 %v9463_v59, %v12024_v36  ;;  %v4209_v18 = vmul.f32 %v9463_v59, %v12028_v30  ;;  %v14733_v36 = vld [vmem:[#allocation105_spill] sm:$0xff]  ;;  %vm14736_vm6 = vmmov %vm14734_vm2 }
 0x6fd   : > { %8857 = vmatmul.mubr.msk.f32.gmra.mrb[20].mxu0 %vm14720_vm7, %v4197_v44  ;;  %vm14737_vm7 = vmmov %vm14734_vm2 }
 0x6fe   : > { %8859 = vmatprep.mubr.msk.f32.mxu0 %vm14721_vm8, %v4198_v50  ;;  %vm14738_vm8 = vmmov %vm14734_vm2 }
 0x701   : > { %8860 = vmatmul.mubr.msk.f32.gmra.mrb[22].mxu0 %vm14722_vm9, %v4199_v24  ;;  %vm14740_vm9 = vmmov %vm14734_vm2 }
 0x702   : > { %8862 = vmatprep.mubr.msk.f32.mxu0 %vm14723_vm10, %v4200_v17  ;;  %vm14741_vm10 = vmmov %vm14734_vm2 }
 0x705   : > { %8863 = vmatmul.mubr.msk.f32.gmra.mrb[24].mxu0 %vm14724_vm11, %v4201_v29  ;;  %vm14742_vm11 = vmmov %vm14734_vm2 }
 0x706   : > { %8865 = vmatprep.mubr.msk.f32.mxu0 %vm14725_vm12, %v4202_v0 }
 0x709   : > { %8866 = vmatmul.mubr.msk.f32.gmra.mrb[26].mxu0 %vm14726_vm13, %v4203_v22  ;;  %vm14743_vm13 = vmmov %vm14734_vm2 }
 0x70a   : > { %8868 = vmatprep.mubr.msk.f32.mxu0 %vm14727_vm14, %v4204_v58  ;;  %vm14744_vm14 = vmmov %vm14734_vm2 }
 0x70d   : > { %8869 = vmatmul.mubr.msk.f32.gmra.mrb[28].mxu0 %vm14728_vm15, %v4205_v32  ;;  %vm14746_vm15 = vmmov %vm14734_vm2 }
 0x70e   : > { %8871 = vmatprep.mubr.msk.f32.mxu0 %vm14638_vm0, %v4206_v62 }
 0x711   : > { %8872 = vmatmul.mubr.msk.f32.gmra.mrb[30].mxu0 %vm14729_vm1, %v4207_v34  ;;  %vm14747_vm1 = vmmov %vm14734_vm2 }
 0x712   : > { %8874 = vmatprep.mubr.msk.f32.mxu0 %vm14730_vm3, %v4208_v14  ;;  %vm14749_vm3 = vmmov %vm14747_vm1 }
 0x715   : > { %8875 = vmatmul.mubr.msk.f32.gmra.mrb[32].mxu0 %vm14731_vm4, %v4209_v18 }
 0x7aa   : > { %v8831_v33 = vpop.f32.mrb[2].mxu0 }
 0x7ab   : > { %v4532_v20 = vmul.f32 %v8831_v33, %v14732_v39  ;;  %v4372_v49 = vpop.f32.mrb[3].mxu0 }
 0x7ac   : > { %v4531_v30 = vmul.f32 %v4372_v49, %v14733_v36 }
 0x7ad   : > { %v4564_v51 = vsel %vm14734_vm2, %v4532_v20, 0.0  ;;  %vm14750_vm2 = vmmov %vm14747_vm1 }
 0x7ae   : > { %v4563_v12 = vsel %vm14735_vm5, %v4531_v30, 0.0  ;;  %vm14751_vm5 = vmmov %vm14747_vm1 }
 0x7af   : > { %v4565_v4 = vadd.f32 %v4564_v51, %v4563_v12  ;;  %v8834_v2 = vpop.f32.mrb[4].mxu0 }
 0x7b0   : > { %v4534_v55 = vmul.f32 %v8834_v2, %v14732_v39  ;;  %v4382_v25 = vpop.f32.mrb[5].mxu0 }
 0x7b1   : > { %v4566_v41 = vrot.slane %v4565_v4, 4  ;;  %v4533_v9 = vmul.f32 %v4382_v25, %v14733_v36 }
 0x7b2   : > { %v4573_v45 = vsel %vm14736_vm6, %v4534_v55, 0.0  ;;  %vm14752_vm6 = vmmov %vm14747_vm1 }
 0x7b3   : > { %v4567_v7 = vadd.f32 %v4566_v41, %v4565_v4  ;;  %v4572_v10 = vsel %vm14737_vm7, %v4533_v9, 0.0  ;;  %v8837_v28 = vpop.f32.mrb[6].mxu0 }
 0x7b4   : > { %v4574_v27 = vadd.f32 %v4573_v45, %v4572_v10  ;;  %v4536_v56 = vmul.f32 %v8837_v28, %v14732_v39  ;;  %v4392_v5 = vpop.f32.mrb[7].mxu0 }
 0x7b5   : > { %v4568_v43 = vrot.slane %v4567_v7, 2  ;;  %v4535_v42 = vmul.f32 %v4392_v5, %v14733_v36 }
 0x7b6   : > { %v4575_v54 = vrot.slane %v4574_v27, 4  ;;  %v4582_v6 = vsel %vm14738_vm8, %v4536_v56, 0.0  ;;  %vm14754_vm8 = vmmov %vm14747_vm1 }
 0x7b7   : > { %v4569_v11 = vadd.f32 %v4568_v43, %v4567_v7  ;;  %v4581_v46 = vsel %vm14740_vm9, %v4535_v42, 0.0  ;;  %vm14755_vm9 = vmmov %vm14747_vm1 }
 0x7b8   : > { %v4576_v16 = vadd.f32 %v4575_v54, %v4574_v27  ;;  %v4583_v19 = vadd.f32 %v4582_v6, %v4581_v46  ;;  %v8840_v1 = vpop.f32.mrb[8].mxu0 }
 0x7b9   : > { %v4570_v38 = vrot.slane %v4569_v11, 1  ;;  %v4538_v23 = vmul.f32 %v8840_v1, %v14732_v39  ;;  %v4402_v53 = vpop.f32.mrb[9].mxu0 }
 0x7ba   : > { %v4577_v40 = vrot.slane %v4576_v16, 2  ;;  %v4584_v15 = vrot.slane %v4583_v19, 4  ;;  %v4537_v21 = vmul.f32 %v4402_v53, %v14733_v36 }
 0x7bb   : > { %v4571_v26 = vadd.f32 %v4570_v38, %v4569_v11  ;;  %v4591_v48 = vsel %vm14741_vm10, %v4538_v23, 0.0 }
 0x7bc   : > { %v4578_v52 = vadd.f32 %v4577_v40, %v4576_v16  ;;  %v4585_v61 = vadd.f32 %v4584_v15, %v4583_v19  ;;  %v4590_v44 = vsel %vm14742_vm11, %v4537_v21, 0.0  ;;  %v8843_v37 = vpop.f32.mrb[10].mxu0  ;;  %vm14757_vm11 = vmmov %vm14747_vm1 }
 0x7bd   : > { %v4713_v3 = vadd.f32 %v12110_v60, %v4571_v26  ;;  %v4592_v50 = vadd.f32 %v4591_v48, %v4590_v44  ;;  %v4540_v24 = vmul.f32 %v8843_v37, %v14732_v39  ;;  %v4412_v13 = vpop.f32.mrb[11].mxu0 }
 0x7be   : > { %v4579_v17 = vrot.slane %v4578_v52, 1  ;;  %v4586_v29 = vrot.slane %v4585_v61, 2  ;;  %v4539_v47 = vmul.f32 %v4412_v13, %v14733_v36 }
 0x7bf   : > { %vm4729_vm12 = vcmp.ge.f32.partialorder %v4713_v3, 0.0  ;;  %v4745_v57 = vmul.f32 0.01, %v4713_v3  ;;  %v4593_v0 = vrot.slane %v4592_v50, 4  ;;  %v4600_v22 = vsel %vm14743_vm13, %v4540_v24, 0.0 }
 0x7c0   : > { %v4580_v58 = vadd.f32 %v4579_v17, %v4578_v52  ;;  %v4587_v32 = vadd.f32 %v4586_v29, %v4585_v61  ;;  %v4599_v8 = vsel %vm14744_vm14, %v4539_v47, 0.0  ;;  %v8846_v62 = vpop.f32.mrb[12].mxu0  ;;  %vm14760_vm14 = vmmov %vm14747_vm1 }
 0x7c1   : > { %v12120_v10 = vsel %vm4729_vm12, %v4713_v3, %v4745_v57   ;;  %v4594_v34 = vadd.f32 %v4593_v0, %v4592_v50  ;;  %v4601_v59 = vadd.f32 %v4600_v22, %v4599_v8  ;;  %v4542_v18 = vmul.f32 %v8846_v62, %v14732_v39  ;;  %v4422_v33 = vpop.f32.mrb[13].mxu0  ;;  %vm14758_vm12 = vmmov %vm14747_vm1 }
 0x7c2   : > { %v14745_v14 = vmov %v12120_v10  ;;  %v4714_v20 = vadd.f32 %v12110_v60, %v4580_v58  ;;  %v4588_v49 = vrot.slane %v4587_v32, 1  ;;  %v4541_v30 = vmul.f32 %v4422_v33, %v14733_v36 }
 0x7c3   : > { %v4595_v51 = vrot.slane %v4594_v34, 2  ;;  %v4602_v12 = vrot.slane %v4601_v59, 4  ;;  %v4609_v4 = vsel %vm14746_vm15, %v4542_v18, 0.0  ;;  %vm14761_vm15 = vmmov %vm14747_vm1 }
 0x7c4   : > { %vm4730_vm0 = vcmp.ge.f32.partialorder %v4714_v20, 0.0  ;;  %v4746_v2 = vmul.f32 0.01, %v4714_v20  ;;  %v4589_v55 = vadd.f32 %v4588_v49, %v4587_v32  ;;  %v4608_v25 = vsel %vm14747_vm1, %v4541_v30, 0.0  ;;  %v8849_v41 = vpop.f32.mrb[14].mxu0 }
 0x7c5   : > { %v4596_v9 = vadd.f32 %v4595_v51, %v4594_v34  ;;  %v4603_v45 = vadd.f32 %v4602_v12, %v4601_v59  ;;  %v4610_v7 = vadd.f32 %v4609_v4, %v4608_v25  ;;  %v4544_v10 = vmul.f32 %v8849_v41, %v14732_v39  ;;  %v4432_v28 = vpop.f32.mrb[15].mxu0 }
 0x7c6   : > { %v12128_v27 = vsel %vm4730_vm0, %v4714_v20, %v4746_v2   ;;  %v4715_v5 = vadd.f32 %v12110_v60, %v4589_v55  ;;  %v4543_v43 = vmul.f32 %v4432_v28, %v14733_v36 }
 0x7c7   : > { %v14748_v56 = vmov %v12128_v27  ;;  %v4597_v42 = vrot.slane %v4596_v9, 1  ;;  %v4604_v54 = vrot.slane %v4603_v45, 2  ;;  %v4611_v6 = vrot.slane %v4610_v7, 4 }
 0x7c8   : > { %v4618_v11 = vsel %vm14749_vm3, %v4544_v10, 0.0  ;;  %vm4731_vm4 = vcmp.ge.f32.partialorder %v4715_v5, 0.0  ;;  %v4747_v46 = vmul.f32 0.01, %v4715_v5  ;;  %v4617_v16 = vsel %vm14750_vm2, %v4543_v43, 0.0  ;;  %v8852_v19 = vpop.f32.mrb[16].mxu0  ;;  %vm14763_vm3 = vmmov %vm14747_vm1 }
 0x7c9   : > { %v4598_v1 = vadd.f32 %v4597_v42, %v4596_v9  ;;  %v4605_v38 = vadd.f32 %v4604_v54, %v4603_v45  ;;  %v4612_v23 = vadd.f32 %v4611_v6, %v4610_v7  ;;  %v4619_v53 = vadd.f32 %v4618_v11, %v4617_v16  ;;  %v4442_v40 = vpop.f32.mrb[17].mxu0  ;;  %vm14765_vm2 = vmmov %vm14747_vm1 }
 0x7ca   : > { %v12134_v15 = vsel %vm4731_vm4, %v4715_v5, %v4747_v46   ;;  %v4546_v21 = vmul.f32 %v8852_v19, %v14732_v39  ;;  %v4545_v26 = vmul.f32 %v4442_v40, %v14733_v36 }
 0x7cb   : > { %v4716_v48 = vadd.f32 %v12110_v60, %v4598_v1  ;;  %v4606_v52 = vrot.slane %v4605_v38, 1  ;;  %v4613_v61 = vrot.slane %v4612_v23, 2  ;;  %v4620_v44 = vrot.slane %v4619_v53, 4 }
 0x7cc   : > { %v4627_v37 = vsel %vm14751_vm5, %v4546_v21, 0.0  ;;  %v4626_v3 = vsel %vm14752_vm6, %v4545_v26, 0.0  ;;  %v8855_v50 = vpop.f32.mrb[18].mxu0  ;;  %vm14766_vm5 = vmmov %vm14747_vm1 }
 0x7cd   : > { %vm4732_vm7 = vcmp.ge.f32.partialorder %v4716_v48, 0.0  ;;  %v4748_v24 = vmul.f32 0.01, %v4716_v48  ;;  %v4607_v13 = vadd.f32 %v4606_v52, %v4605_v38  ;;  %v4614_v17 = vadd.f32 %v4613_v61, %v4612_v23  ;;  %v4452_v29 = vpop.f32.mrb[19].mxu0 }
 0x7ce   : > { %v4621_v47 = vadd.f32 %v4620_v44, %v4619_v53  ;;  %v4628_v57 = vadd.f32 %v4627_v37, %v4626_v3  ;;  %v4548_v0 = vmul.f32 %v8855_v50, %v14732_v39  ;;  %v4547_v22 = vmul.f32 %v4452_v29, %v14733_v36 }
 0x7cf   : > { %v12143_v20 = vsel %vm4732_vm7, %v4716_v48, %v4748_v24   ;;  %v4717_v32 = vadd.f32 %v12110_v60, %v4607_v13  ;;  %v4615_v8 = vrot.slane %v4614_v17, 1  ;;  %vm14768_vm7 = vmmov %vm14747_vm1 }
 0x7d0   : > { %v14753_v58 = vmov %v12143_v20  ;;  %v4622_v62 = vrot.slane %v4621_v47, 2  ;;  %v4629_v34 = vrot.slane %v4628_v57, 4  ;;  %v4636_v59 = vsel %vm14754_vm8, %v4548_v0, 0.0  ;;  %v8858_v33 = vpop.f32.mrb[20].mxu0  ;;  %vm14769_vm8 = vmmov %vm14747_vm1 }
 0x7d1   : > { %v4635_v18 = vsel %vm14755_vm9, %v4547_v22, 0.0  ;;  %vm4733_vm10 = vcmp.ge.f32.partialorder %v4717_v32, 0.0  ;;  %v4749_v49 = vmul.f32 0.01, %v4717_v32  ;;  %v4616_v30 = vadd.f32 %v4615_v8, %v4614_v17  ;;  %v4462_v12 = vpop.f32.mrb[21].mxu0 }
 0x7d2   : > { %v4637_v51 = vadd.f32 %v4636_v59, %v4635_v18  ;;  %v4623_v4 = vadd.f32 %v4622_v62, %v4621_v47  ;;  %v4630_v2 = vadd.f32 %v4629_v34, %v4628_v57  ;;  %v4550_v55 = vmul.f32 %v8858_v33, %v14732_v39 }
 0x7d3   : > { %v4549_v20 = vmul.f32 %v4462_v12, %v14733_v36  ;;  %v12150_v7 = vsel %vm4733_vm10, %v4717_v32, %v4749_v49   ;;  %v4718_v41 = vadd.f32 %v12110_v60, %v4616_v30  ;;  %vm14771_vm10 = vmmov %vm14747_vm1 }
 0x7d4   : > { %v14756_v25 = vmov %v12150_v7  ;;  %v4638_v9 = vrot.slane %v4637_v51, 4  ;;  %v4624_v45 = vrot.slane %v4623_v4, 1  ;;  %v4631_v10 = vrot.slane %v4630_v2, 2  ;;  %v8861_v5 = vpop.f32.mrb[22].mxu0 }
 0x7d5   : > { %v4645_v28 = vsel %vm14757_vm11, %v4550_v55, 0.0  ;;  %v4644_v27 = vsel %vm14758_vm12, %v4549_v20, 0.0  ;;  %vm4734_vm13 = vcmp.ge.f32.partialorder %v4718_v41, 0.0  ;;  %v4750_v43 = vmul.f32 0.01, %v4718_v41  ;;  %v4472_v6 = vpop.f32.mrb[23].mxu0  ;;  %vm14772_vm11 = vmmov %vm14747_vm1 }
 0x7d6   : > { %v4639_v42 = vadd.f32 %v4638_v9, %v4637_v51  ;;  %v4646_v54 = vadd.f32 %v4645_v28, %v4644_v27  ;;  %v4625_v11 = vadd.f32 %v4624_v45, %v4623_v4  ;;  %v4632_v46 = vadd.f32 %v4631_v10, %v4630_v2 }
 0x7d7   : > { %v4552_v16 = vmul.f32 %v8861_v5, %v14732_v39  ;;  %v4551_v7 = vmul.f32 %v4472_v6, %v14733_v36  ;;  %v12157_v19 = vsel %vm4734_vm13, %v4718_v41, %v4750_v43   ;;  %vm14774_vm13 = vmmov %vm14747_vm1 }
 0x7d8   : > { %v14759_v38 = vmov %v12157_v19  ;;  %v4640_v1 = vrot.slane %v4639_v42, 2  ;;  %v4647_v23 = vrot.slane %v4646_v54, 4  ;;  %v4719_v53 = vadd.f32 %v12110_v60, %v4625_v11  ;;  %v8864_v48 = vpop.f32.mrb[24].mxu0 }
 0x7d9   : > { %v4633_v40 = vrot.slane %v4632_v46, 1  ;;  %v4654_v21 = vsel %vm14760_vm14, %v4552_v16, 0.0  ;;  %v4653_v26 = vsel %vm14761_vm15, %v4551_v7, 0.0  ;;  %v4554_v37 = vmul.f32 %v8864_v48, %v14732_v39  ;;  %v4482_v3 = vpop.f32.mrb[25].mxu0  ;;  %vm14775_vm14 = vmmov %vm14747_vm1 }
 0x7da   : > { %v4641_v52 = vadd.f32 %v4640_v1, %v4639_v42  ;;  %v4648_v61 = vadd.f32 %v4647_v23, %v4646_v54  ;;  %v4655_v44 = vadd.f32 %v4654_v21, %v4653_v26  ;;  %vm4735_vm0 = vcmp.ge.f32.partialorder %v4719_v53, 0.0 }
 0x7db   : > { %v4751_v50 = vmul.f32 0.01, %v4719_v53  ;;  %v4634_v24 = vadd.f32 %v4633_v40, %v4632_v46  ;;  %v4553_v13 = vmul.f32 %v4482_v3, %v14733_v36  ;;  %v4663_v57 = vsel %vm14747_vm1, %v4554_v37, 0.0 }
 0x7dc   : > { %v4642_v17 = vrot.slane %v4641_v52, 1  ;;  %v4649_v29 = vrot.slane %v4648_v61, 2  ;;  %v4656_v47 = vrot.slane %v4655_v44, 4  ;;  %v8867_v8 = vpop.f32.mrb[26].mxu0 }
 0x7dd   : > { %v12165_v59 = vsel %vm4735_vm0, %v4719_v53, %v4751_v50   ;;  %v4720_v22 = vadd.f32 %v12110_v60, %v4634_v24  ;;  %v4662_v32 = vsel %vm14763_vm3, %v4553_v13, 0.0  ;;  %v4492_v49 = vpop.f32.mrb[27].mxu0  ;;  %v4556_v51 = vmul.f32 %v8867_v8, %v14732_v39 }
 0x7de   : > { %v14762_v0 = vmov %v12165_v59  ;;  %v4643_v62 = vadd.f32 %v4642_v17, %v4641_v52  ;;  %v4650_v34 = vadd.f32 %v4649_v29, %v4648_v61  ;;  %v4657_v18 = vadd.f32 %v4656_v47, %v4655_v44 }
 0x7df   : > { %v4664_v33 = vadd.f32 %v4663_v57, %v4662_v32  ;;  %vm4736_vm4 = vcmp.ge.f32.partialorder %v4720_v22, 0.0  ;;  %v4752_v30 = vmul.f32 0.01, %v4720_v22  ;;  %v4555_v12 = vmul.f32 %v4492_v49, %v14733_v36 }
 0x7e0   : > { %v4721_v4 = vadd.f32 %v12110_v60, %v4643_v62  ;;  %v4651_v2 = vrot.slane %v4650_v34, 1  ;;  %v4658_v59 = vrot.slane %v4657_v18, 2  ;;  %v4672_v20 = vsel %vm14765_vm2, %v4556_v51, 0.0  ;;  %v8870_v45 = vpop.f32.mrb[28].mxu0 }
 0x7e1   : > { %v4665_v55 = vrot.slane %v4664_v33, 4  ;;  %v12172_v61 = vsel %vm4736_vm4, %v4720_v22, %v4752_v30   ;;  %v4671_v9 = vsel %vm14766_vm5, %v4555_v12, 0.0  ;;  %v4502_v5 = vpop.f32.mrb[29].mxu0  ;;  %v4558_v54 = vmul.f32 %v8870_v45, %v14732_v39 }
 0x7e2   : > { %v14764_v41 = vmov %v12172_v61  ;;  %vm4737_vm6 = vcmp.ge.f32.partialorder %v4721_v4, 0.0  ;;  %v4753_v10 = vmul.f32 0.01, %v4721_v4  ;;  %v4652_v28 = vadd.f32 %v4651_v2, %v4650_v34 }
 0x7e3   : > { %v4659_v27 = vadd.f32 %v4658_v59, %v4657_v18  ;;  %v4666_v43 = vadd.f32 %v4665_v55, %v4664_v33  ;;  %v4673_v42 = vadd.f32 %v4672_v20, %v4671_v9  ;;  %v4557_v6 = vmul.f32 %v4502_v5, %v14733_v36 }
 0x7e4   : > { %v12178_v37 = vsel %vm4737_vm6, %v4721_v4, %v4753_v10   ;;  %v4722_v11 = vadd.f32 %v12110_v60, %v4652_v28  ;;  %v4681_v1 = vsel %vm14768_vm7, %v4558_v54, 0.0  ;;  %v8873_v53 = vpop.f32.mrb[30].mxu0  ;;  %vm14799_vm2 = vcmask (%p12212_p0), 1041409  }
 0x7e5   : > { %v14767_v46 = vmov %v12178_v37  ;;  %v4660_v16 = vrot.slane %v4659_v27, 1  ;;  %v4667_v7 = vrot.slane %v4666_v43, 2  ;;  %v4674_v19 = vrot.slane %v4673_v42, 4  ;;  %v4512_v48 = vpop.f32.mrb[31].mxu0 }
 0x7e6   : > { %v4680_v23 = vsel %vm14769_vm8, %v4557_v6, 0.0  ;;  %vm4738_vm9 = vcmp.ge.f32.partialorder %v4722_v11, 0.0  ;;  %v4754_v40 = vmul.f32 0.01, %v4722_v11  ;;  %v4560_v44 = vmul.f32 %v8873_v53, %v14732_v39  ;;  %vm14803_vm8 = vmmov (%p12212_p0), %vm14799_vm2 }
 0x7e7   : > { %v4661_v21 = vadd.f32 %v4660_v16, %v4659_v27  ;;  %v4682_v26 = vadd.f32 %v4681_v1, %v4680_v23  ;;  %v4668_v52 = vadd.f32 %v4667_v7, %v4666_v43  ;;  %v4675_v61 = vadd.f32 %v4674_v19, %v4673_v42 }
 0x7e8   : > { %v4559_v37 = vmul.f32 %v4512_v48, %v14733_v36  ;;  %v12185_v27 = vsel %vm4738_vm9, %v4722_v11, %v4754_v40   ;;  %v4690_v29 = vsel %vm14771_vm10, %v4560_v44, 0.0  ;;  %v8876_v57 = vpop.f32.mrb[32].mxu0  ;;  %vm14800_vm5 = vcmask (%p12212_p0), 1042434  }
 0x7e9   : > { %v14770_v3 = vmov %v12185_v27  ;;  %v4723_v50 = vadd.f32 %v12110_v60, %v4661_v21  ;;  %v4683_v24 = vrot.slane %v4682_v26, 4  ;;  %v4669_v13 = vrot.slane %v4668_v52, 1  ;;  %v4522_v62 = vpop.f32.mrb[33].mxu0  ;;  %vm14805_vm10 = vmmov (%p12212_p0), %vm14800_vm5 }
 0x7ea   : > { %v4676_v17 = vrot.slane %v4675_v61, 2  ;;  %v4689_v47 = vsel %vm14772_vm11, %v4559_v37, 0.0  ;;  %v4562_v33 = vmul.f32 %v8876_v57, %v14732_v39  ;;  %v4561_v49 = vmul.f32 %v4522_v62, %v14733_v36  ;;  %v4779_v57 = vld [vmem:[%s14798_s4 + $0x10] sm:$0xff] (%p12212_p0) }
 0x7eb   : > { %vm4739_vm12 = vcmp.ge.f32.partialorder %v4723_v50, 0.0  ;;  %v4755_v22 = vmul.f32 0.01, %v4723_v50  ;;  %v4684_v32 = vadd.f32 %v4683_v24, %v4682_v26  ;;  %v4691_v8 = vadd.f32 %v4690_v29, %v4689_v47  ;;  %v4778_v29 = vld [vmem:[%s14798_s4 + $0x8] sm:$0xff] (%p12212_p0) }
 0x7ec   : > { %v4670_v34 = vadd.f32 %v4669_v13, %v4668_v52  ;;  %v4677_v18 = vadd.f32 %v4676_v17, %v4675_v61  ;;  %v4699_v59 = vsel %vm14774_vm13, %v4562_v33, 0.0  ;;  %v4698_v55 = vsel %vm14775_vm14, %v4561_v49, 0.0  ;;  %v4777_v13 = vld [vmem:[%s14798_s4] sm:$0xff] (%p12212_p0) }
 0x7ed   : > { %v12192_v16 = vsel %vm4739_vm12, %v4723_v50, %v4755_v22   ;;  %v4685_v51 = vrot.slane %v4684_v32, 2  ;;  %v4692_v12 = vrot.slane %v4691_v8, 4  ;;  %v4700_v45 = vadd.f32 %v4699_v59, %v4698_v55 }
 0x7ee   : > { %v14773_v30 = vmov %v12192_v16  ;;  %v4724_v4 = vadd.f32 %v12110_v60, %v4670_v34  ;;  %v4678_v2 = vrot.slane %v4677_v18, 1  ;;  %v14791_v59 = vmov %v14762_v0 }
 0x7ef   : > { %v4686_v20 = vadd.f32 %v4685_v51, %v4684_v32  ;;  %v4693_v9 = vadd.f32 %v4692_v12, %v4691_v8  ;;  %v4701_v36 = vrot.slane %v4700_v45, 4  ;;  %v4812_v22 = vrot.slane (%p12212_p0), %v14748_v56, 7 }
 0x7f0   : > { %vm4740_vm15 = vcmp.ge.f32.partialorder %v4724_v4, 0.0  ;;  %v4756_v10 = vmul.f32 0.01, %v4724_v4  ;;  %v4679_v28 = vadd.f32 %v4678_v2, %v4677_v18  ;;  %v4814_v32 = vrot.slane (%p12212_p0), %v12134_v15, 6 }
 0x7f1   : > { %v4687_v39 = vrot.slane %v4686_v20, 1  ;;  %v4694_v27 = vrot.slane %v4693_v9, 2  ;;  %v4702_v6 = vadd.f32 %v4701_v36, %v4700_v45  ;;  %v4816_v8 = vrot.slane (%p12212_p0), %v14753_v58, 5 }
 0x7f2   : > { %v12197_v34 = vsel %vm4740_vm15, %v4724_v4, %v4756_v10   ;;  %v4725_v43 = vadd.f32 %v12110_v60, %v4679_v28  ;;  %v14797_v10 = vmov %v14745_v14  ;;  %v9082_v62 = vpack.c.bf16 (%p12212_p0), %v4778_v29, %v4777_v13 }
 0x7f3   : > { %v14776_v5 = vmov %v12197_v34  ;;  %v4688_v42 = vadd.f32 %v4687_v39, %v4686_v20  ;;  %v4695_v54 = vadd.f32 %v4694_v27, %v4693_v9  ;;  %v4703_v19 = vrot.slane %v4702_v6, 2 }
 0x7f4   : > { %vm4741_vm0 = vcmp.ge.f32.partialorder %v4725_v43, 0.0  ;;  %v4757_v11 = vmul.f32 0.01, %v4725_v43  ;;  %v14786_v34 = vmov %v14776_v5  ;;  %v14788_v27 = vmov %v14770_v3  ;;  %9083 = vmatprep.subr.bf16.mxu0 (%p12212_p0), %v9082_v62 }
 0x7f5   : > { %v4726_v16 = vadd.f32 %v12110_v60, %v4688_v42  ;;  %v4696_v7 = vrot.slane %v4695_v54, 1  ;;  %v4704_v40 = vadd.f32 %v4703_v19, %v4702_v6  ;;  %v14794_v20 = vmov %v14753_v58  ;;  %v4781_v34 = vld [vmem:[%s14798_s4 + $0x20] sm:$0xff] (%p12212_p0)  ;;  %9085 = vmatpush3.bf16.msra.mxu0 (%p12212_p0), %v9082_v62 }
 0x7f6   : > { %v12201_v47 = vsel %vm4741_vm0, %v4725_v43, %v4757_v11   ;;  %v14792_v11 = vmov %v14759_v38  ;;  %v14795_v39 = vmov %v12134_v15  ;;  %v4813_v15 = vsel (%p12212_p0), %vm14799_vm2, %v4812_v22, %v14745_v14  ;;  %v8283_v43 = vld [vmem:[%s14815_s26] ss:$0 sm:$0xff] (%p12212_p0)  ;;  %v8320_v22 = vld [vmem:[%s14798_s4 + $0x48] sm:$0xff] (%p12212_p0) }
 0x7f7   : > { %v14777_v23 = vmov %v12201_v47  ;;  %vm4742_vm1 = vcmp.ge.f32.partialorder %v4726_v16, 0.0  ;;  %v4758_v1 = vmul.f32 0.01, %v4726_v16  ;;  %v4697_v53 = vadd.f32 %v4696_v7, %v4695_v54  ;;  %v4787_v11 = vld [vmem:[%s14135_s21] sm:$0xff] (%p12212_p0) }
 0x7f8   : > { %v4705_v48 = vrot.slane %v4704_v40, 1  ;;  %v14785_v47 = vmov %v14777_v23  ;;  %v14793_v7 = vmov %v14756_v25  ;;  %v4820_v58 = vrot.slane (%p12212_p0), %v14759_v38, 3 }
 0x7f9   : > { %v12203_v1 = vsel %vm4742_vm1, %v4726_v16, %v4758_v1   ;;  %v4727_v26 = vadd.f32 %v12110_v60, %v4697_v53  ;;  %v14787_v16 = vmov %v14773_v30  ;;  %v4815_v18 = vsel (%p12212_p0), %vm14800_vm5, %v4814_v32, %v4813_v15  ;;  %v14816_v7 = vld [vmem:[#allocation36_spill] sm:$0xff] (%p12212_p0) }
 0x7fa   : > { %v14778_v21 = vmov %v12203_v1  ;;  %v4706_v61 = vadd.f32 %v4705_v48, %v4704_v40  ;;  %v4822_v33 = vrot.slane (%p12212_p0), %v14762_v0, 2  ;;  %v4828_v49 = vrot.slane (%p12212_p0), %v14773_v30, 6  ;;  %v4784_v30 = vld [vmem:[%s14798_s4 + $0x38] sm:$0xff] (%p12212_p0)  ;;  %v4788_v16 = vld [vmem:[%s14135_s21 + $0x8] sm:$0xff] (%p12212_p0) }
 0x7fb   : > { %vm4743_vm3 = vcmp.ge.f32.partialorder %v4727_v26, 0.0  ;;  %v4759_v52 = vmul.f32 0.01, %v4727_v26  ;;  %v14784_v1 = vmov %v14778_v21  ;;  %vm14801_vm6 = vcmask (%p12212_p0), 1043459  }
 0x7fc   : > { %v4728_v37 = vadd.f32 %v12110_v60, %v4706_v61  ;;  %v14790_v61 = vmov %v14764_v41  ;;  %v14796_v60 = vmov %v14748_v56  ;;  %2776 = sbr.rel (!%p12212_p0) target bundleno = 1066 (0x42a), region = 137  ;;  %v4782_v56 = vld [vmem:[%s14798_s4 + $0x28] sm:$0xff] (%p12212_p0)  ;;  %v4817_v51 = vsel (%p12212_p0), %vm14801_vm6, %v4816_v8, %v4815_v18  ;;  %vm14807_vm12 = vmmov (%p12212_p0), %vm14801_vm6 }
 0x7fd   : > { %v12206_v19 = vsel %vm4743_vm3, %v4727_v26, %v4759_v52   ;;  %v4780_v60 = vld [vmem:[%s14798_s4 + $0x18] sm:$0xff] (%p12212_p0)  ;;  %v4824_v12 = vrot.slane (%p12212_p0), %v14764_v41, 1  ;;  %v4830_v4 = vrot.slane (%p12212_p0), %v14776_v5, 5  ;;  %v4832_v14 = vrot.slane (%p12212_p0), %v14777_v23, 4  ;;  %v14817_v26 = vld [vmem:[#allocation2_spill] sm:$0xff] (%p12212_p0) }
 0x7fe   : > { %v14779_v44 = vmov %v12206_v19  ;;  %vm4744_vm4 = vcmp.ge.f32.partialorder %v4728_v37, 0.0  ;;  %v4760_v50 = vmul.f32 0.01, %v4728_v37  ;;  %v9086_v47 = vpack.c.bf16 (%p12212_p0), %v4780_v60, %v4779_v57  ;;  %v8319_v57 = vld [vmem:[%s14798_s4 + $0x40] sm:$0xff] (%p12212_p0) }
 0x7ff   : > { %v14783_v19 = vmov %v14779_v44  ;;  %v9090_v38 = vpack.c.bf16 (%p12212_p0), %v4782_v56, %v4781_v34  ;;  %vm14802_vm7 = vcmask (%p12212_p0), 1044484   ;;  %vm14804_vm9 = vcmask (%p12212_p0), 1045509  }
 0x800   : > { %v12209_v17 = vsel %vm4744_vm4, %v4728_v37, %v4760_v50   ;;  %v14789_v37 = vmov %v14767_v46  ;;  %9087 = vmatprep.subr.bf16.mxu0 (%p12212_p0), %v9086_v47  ;;  %v4834_v55 = vrot.slane (%p12212_p0), %v14778_v21, 3  ;;  %vm14806_vm11 = vcmask (%p12212_p0), 1046534   ;;  %vm14809_vm14 = vmmov (%p12212_p0), %vm14802_vm7 }
 0x801   : > { %v14780_v24 = vmov %v12209_v17  ;;  %9089 = vmatpush3.bf16.msra.mxu0 (%p12212_p0), %v9086_v47  ;;  %vm14808_vm13 = vcmask (%p12212_p0), 1047559   ;;  %vm14810_vm15 = vcmask (%p12212_p0), 523264   ;;  %v4836_v28 = vrot.slane (%p12212_p0), %v14779_v44, 2  ;;  %vm14811_vm0 = vmmov (%p12212_p0), %vm14804_vm9 }
 0x802   : > { %v14782_v17 = vmov %v14780_v24  ;;  %9091 = vmatprep.subr.bf16.mxu0 (%p12212_p0), %v9090_v38  ;;  %v4838_v27 = vrot.slane (%p12212_p0), %v14780_v24, 1  ;;  %vm14812_vm1 = vmmov (%p12212_p0), %vm14806_vm11  ;;  %v9098_v1 = vpack.c.bf16 (%p12212_p0), %v4788_v16, %v4787_v11  ;;  %v12369_v47 = vpack.c.bf16 (%p12212_p0), %v8320_v22, %v8319_v57  ;;  %v14822_v16 = vld [vmem:[#allocation6_spill] sm:$0xff] (%p12212_p0)  ;;  %v14830_v22 = vld [vmem:[#allocation9_spill] sm:$0xff] (%p12212_p0) }
 0x803   :  { %v4818_v17 = vrot.slane %v14756_v25, 4  ;;  %v4826_v25 = vrot.slane %v14770_v3, 7  ;;  %v4783_v3 = vld [vmem:[%s14798_s4 + $0x30] sm:$0xff]  ;;  %vm14813_vm3 = vmmov %vm14808_vm13  ;;  %vm14844_vm6 = vcmask 130048  }
 0x804   :  { %v9094_v10 = vpack.c.bf16 %v4784_v30, %v4783_v3  ;;  %vm14814_vm4 = vmmov %vm14810_vm15  ;;  %9099 = vmatprep.subr.bf16.mxu1 %v9098_v1 }
 0x805   :  { %v4819_v2 = vsel %vm14802_vm7, %v4818_v17, %v4817_v51  ;;  %v4827_v0 = vsel %vm14803_vm8, %v4826_v25, %v14767_v46  ;;  %9093 = vmatpush3.bf16.msra.mxu0 %v9090_v38  ;;  %9101 = vmatpush3.bf16.msra.mxu1 %v9098_v1  ;;  %vm14845_vm7 = vmmov %vm14844_vm6 }
 0x806   :  { %v4821_v41 = vsel %vm14804_vm9, %v4820_v58, %v4819_v2  ;;  %v4829_v59 = vsel %vm14805_vm10, %v4828_v49, %v4827_v0  ;;  %9095 = vmatprep.subr.bf16.mxu0 %v9094_v10  ;;  %9103 = vmatprep.subr.bf16.mxu1 %v12369_v47 }
 0x807   :  { %v4823_v20 = vsel %vm14806_vm11, %v4822_v33, %v4821_v41  ;;  %v4831_v9 = vsel %vm14807_vm12, %v4830_v4, %v4829_v59  ;;  %vm14849_vm11 = vmmov %vm14844_vm6 }
 0x808   :  { %v12316_v46 = vsel %vm14808_vm13, %v4824_v12, %v4823_v20  ;;  %v4833_v45 = vsel %vm14809_vm14, %v4832_v14, %v4831_v9  ;;  %vm14850_vm12 = vmmov %vm14844_vm6 }
 0x809   :  { %8893 = vmatprep.mubr.msk.f32.mxu0 %vm14810_vm15, %v12316_v46  ;;  %v4835_v39 = vsel %vm14811_vm0, %v4834_v55, %v4833_v45  ;;  %9097 = vmatpush3.bf16.msra.mxu0 %v9094_v10  ;;  %vm14852_vm14 = vmmov %vm14844_vm6 }
 0x80a   :  { %v4837_v36 = vsel %vm14812_vm1, %v4836_v28, %v4835_v39  ;;  %v4786_v28 = vld [vmem:[%s14134_s20] sm:$0x3]  ;;  %vm14855_vm0 = vmmov %vm14844_vm6 }
 0x80b   :  { %v12326_v5 = vsel %vm14813_vm3, %v4838_v27, %v4837_v36  ;;  %v12406_v39 = vrot.slane %v4786_v28, %v14817_v26  ;;  %v14819_v27 = vld [vmem:[#allocation3_spill] sm:$0xff]  ;;  %vm14858_vm3 = vmmov %vm14855_vm0 }
 0x80c   :  { %8894 = vmatmul.mubr.msk.f32.vlgmr.msra.gmra.mrb[0].mxu0 %vm14814_vm4, %v12326_v5  ;;  %v12409_v36 = vrot.slane %v4786_v28, %v14819_v27 }
 0x8df   :  { %v8895_v42 = vpop.f32.mrb[0].mxu0 }
 0x8e0   :  { %v4910_v54 = vpop.f32.mrb[1].mxu0  ;;  %v12349_v44 = vadd.f32 %v8895_v42, %v8283_v43 }
 0x8e1   :  { %v12333_v6 = vadd.f32 %v8283_v43, %v4910_v54  ;;  %v14820_v43 = vld [vmem:[#allocation4_spill] sm:$0xff]  ;;  %v14821_v54 = vld [vmem:[#allocation5_spill] sm:$0xff] }
 0x8e2   :  { %14818 = vst [vmem:[#allocation37_spill] sm:$0xff] %v12349_v44  ;;  %v5081_v62 = vrot.slane %v12349_v44, %v14816_v7  ;;  %v5074_v34 = vcombine.high %v12349_v44, %v12349_v44  ;;  %v4923_v42 = vmul.f32 %v12406_v39, %v14820_v43  ;;  %v4924_v11 = vmul.f32 %v12406_v39, %v14821_v54 }
 0x8e3   :  { %v5032_v19 = vrot.slane %v12333_v6, %v14816_v7  ;;  %v5025_v23 = vcombine.high %v12333_v6, %v12333_v6 }
 0x8e4   :  { %v5089_v58 = vcombine.high %v5081_v62, %v5081_v62  ;;  %v5097_v33 = vrot.slane %v5081_v62, %v14816_v7  ;;  %v5088_v51 = vrot.slane %v5074_v34, %v14816_v7  ;;  %v14833_v34 = vld [vmem:[#allocation18_spill] sm:$0xff] }
 0x8e5   :  { %v5048_v53 = vrot.slane %v5032_v19, %v14816_v7  ;;  %v5040_v40 = vcombine.high %v5032_v19, %v5032_v19  ;;  %v5039_v21 = vrot.slane %v5025_v23, %v14816_v7  ;;  %v4959_v19 = vmul.f32 %v12409_v36, %v14822_v16  ;;  %v14823_v23 = vld [vmem:[#allocation7_spill] sm:$0xff] }
 0x8e6   :  { %v5111_v49 = vrot.slane %v5089_v58, %v14816_v7  ;;  %v5158_v12 = vrot.slane %v5097_v33, %v14817_v26  ;;  %v5119_v4 = vcombine.high %v5097_v33, %v5097_v33  ;;  %v5090_v2 = vcombine.high %v5088_v51, %v5088_v51 }
 0x8e7   :  { %v5126_v48 = vrot.slane %v5048_v53, %v14817_v26  ;;  %v5070_v52 = vcombine.high %v5048_v53, %v5048_v53  ;;  %v5062_v61 = vrot.slane %v5040_v40, %v14816_v7  ;;  %v5041_v24 = vcombine.high %v5039_v21, %v5039_v21  ;;  %v14824_v53 = vld [vmem:[#allocation13_spill] sm:$0xff] }
 0x8e8   :  { %v5055_v29 = vrot.slane %v5039_v21, %v14816_v7  ;;  %v5162_v14 = vrot.slane %v5111_v49, %v14817_v26  ;;  %v5121_v38 = vcombine.high %v5111_v49, %v5111_v49  ;;  %v5166_v0 = vrot.slane %v5119_v4, %v14817_v26  ;;  %v14825_v21 = vld [vmem:[#allocation15_spill] sm:$0xff] }
 0x8e9   :  { %5187 = vrot.lane.b32.xlu0 %v5126_v48, %s9797_s17  ;;  %v5134_v37 = vrot.slane %v5070_v52, %v14817_v26  ;;  %v5072_v50 = vcombine.high %v5062_v61, %v5062_v61  ;;  %v5130_v13 = vrot.slane %v5062_v61, %v14817_v26  ;;  %v5069_v8 = vrot.slane %v5041_v24, %v14816_v7  ;;  %v14826_v52 = vld [vmem:[#allocation12_spill] sm:$0xff] }
 0x8ea   :  { %v5142_v60 = vrot.slane %v5055_v29, %v14817_v26  ;;  %v5071_v17 = vcombine.high %v5055_v29, %v5055_v29  ;;  %v5104_v3 = vrot.slane %v5088_v51, %v14816_v7  ;;  %v5170_v30 = vrot.slane %v5121_v38, %v14817_v26  ;;  %v14828_v24 = vld [vmem:[#allocation8_spill] sm:$0xff]  ;;  %v14829_v29 = vld [vmem:[#allocation10_spill] sm:$0xff] }
 0x8eb   :  { %5191 = vrot.lane.b32.xlu1 %v5134_v37, %s9797_s17  ;;  %v5138_v32 = vrot.slane %v5072_v50, %v14817_v26  ;;  %v5146_v56 = vrot.slane %v5069_v8, %v14817_v26  ;;  %v5073_v15 = vcombine.high %v5069_v8, %v5069_v8  ;;  %v5118_v41 = vrot.slane %v5090_v2, %v14816_v7  ;;  %v14827_v37 = vld [vmem:[#allocation14_spill] sm:$0xff]  ;;  %v14831_v8 = vld [vmem:[#allocation11_spill] sm:$0xff]  ;;  %v14838_v2 = vld [vmem:[#allocation20_spill] sm:$0xff] }
 0x8ec   :  { %v5150_v18 = vrot.slane %v5071_v17, %v14817_v26  ;;  %v5174_v59 = vrot.slane %v5104_v3, %v14817_v26  ;;  %v5120_v55 = vcombine.high %v5104_v3, %v5104_v3  ;;  %v4960_v1 = vmul.f32 %v12409_v36, %v14823_v23  ;;  %v14839_v3 = vld [vmem:[#allocation22_spill] sm:$0xff] }
 0x8ed   :  { %5189 = vrot.lane.b32.xlu0 %v5130_v13, %s9797_s17  ;;  %v5154_v25 = vrot.slane %v5073_v15, %v14817_v26  ;;  %v5178_v20 = vrot.slane %v5118_v41, %v14817_v26  ;;  %v5122_v9 = vcombine.high %v5118_v41, %v5118_v41  ;;  %v4927_v40 = vmul.f32 %v12406_v39, %v14824_v53  ;;  %v14834_v15 = vld [vmem:[#allocation17_spill] sm:$0xff] }
 0x8ee   :  { %v5182_v45 = vrot.slane %v5120_v55, %v14817_v26  ;;  %v4928_v48 = vmul.f32 %v12406_v39, %v14825_v21  ;;  %v4963_v61 = vmul.f32 %v12409_v36, %v14826_v52  ;;  %v4964_v50 = vmul.f32 %v12409_v36, %v14827_v37 }
 0x8ef   :  { %5193 = vrot.lane.b32.xlu1 %v5138_v32, %s9797_s17  ;;  %v5186_v10 = vrot.slane %v5122_v9, %v14817_v26  ;;  %v4925_v13 = vmul.f32 %v12406_v39, %v14828_v24  ;;  %v4926_v57 = vmul.f32 %v12406_v39, %v14829_v29  ;;  %v4961_v32 = vmul.f32 %v12409_v36, %v14830_v22 }
 0x8f0   :  { %v4962_v62 = vmul.f32 %v12409_v36, %v14831_v8  ;;  %v4965_v58 = vmul.f32 %v12409_v36, %v14834_v15  ;;  %v4992_v49 = vadd.f32 %v4960_v1, %v4924_v11  ;;  %v4995_v55 = vadd.f32 %v4963_v61, %v4927_v40  ;;  %v14841_v40 = vld [vmem:[#allocation26_spill] sm:$0xff] }
 0x8f1   :  { %5195 = vrot.lane.b32.xlu0 %v5142_v60, %s9797_s17  ;;  %v14832_v60 = vld [vmem:[#allocation16_spill] sm:$0xff] }
 0x8f2   :  { %v4929_v17 = vmul.f32 %v12406_v39, %v14832_v60  ;;  %v14964_v60 = vld [vmem:[#allocation92_spill] sm:$0xff] }
 0x8f3   :  { %5197 = vrot.lane.b32.xlu1 %v5146_v56, %s9797_s17  ;;  %v4930_v56 = vmul.f32 %v12406_v39, %v14833_v34 }
 0x8f4   :  { %v4997_v28 = vadd.f32 %v4965_v58, %v4929_v17  ;;  %v8322_v17 = vld [vmem:[%s14798_s4 + $0x58] sm:$0xff] }
 0x8f5   :  { %5199 = vrot.lane.b32.xlu0 %v5150_v18, %s9797_s17  ;;  %v14835_v18 = vld [vmem:[#allocation19_spill] sm:$0xff] }
 0x8f6   :  { %v4966_v33 = vmul.f32 %v12409_v36, %v14835_v18 }
 0x8f7   :  { %5201 = vrot.lane.b32.xlu1 %v5154_v25, %s9797_s17  ;;  %v4991_v25 = vadd.f32 %v4959_v19, %v4923_v42 }
 0x8f8   :  { %v4998_v42 = vadd.f32 %v4966_v33, %v4930_v56 }
 0x8f9   :  { %5203 = vrot.lane.b32.xlu0 %v5158_v12, %s9797_s17  ;;  %v14836_v12 = vld [vmem:[#allocation21_spill] sm:$0xff] }
 0x8fa   :  { %v4931_v4 = vmul.f32 %v12406_v39, %v14836_v12 }
 0x8fb   :  { %5205 = vrot.lane.b32.xlu1 %v5162_v14, %s9797_s17  ;;  %v14837_v14 = vld [vmem:[#allocation23_spill] sm:$0xff] }
 0x8fc   :  { %v4932_v38 = vmul.f32 %v12406_v39, %v14837_v14  ;;  %v14840_v14 = vld [vmem:[#allocation24_spill] sm:$0xff] }
 0x8fd   :  { %5207 = vrot.lane.b32.xlu0 %v5166_v0, %s9797_s17  ;;  %v4967_v0 = vmul.f32 %v12409_v36, %v14838_v2  ;;  %v4933_v2 = vmul.f32 %v12406_v39, %v14840_v14 }
 0x8ff   :  { %5209 = vrot.lane.b32.xlu1 %v5170_v30, %s9797_s17  ;;  %v4968_v30 = vmul.f32 %v12409_v36, %v14839_v3  ;;  %v4999_v18 = vadd.f32 %v4967_v0, %v4931_v4 }
 0x901   :  { %5211 = vrot.lane.b32.xlu0 %v5174_v59, %s9797_s17  ;;  %v12457_v15 = vadd.f32 %v4968_v30, %v4932_v38 }
 0x903   :  { %5213 = vrot.lane.b32.xlu1 %v5178_v20, %s9797_s17  ;;  %v4996_v20 = vadd.f32 %v4964_v50, %v4928_v48  ;;  %v4934_v48 = vmul.f32 %v12406_v39, %v14841_v40 }
 0x905   :  { %5215 = vrot.lane.b32.xlu0 %v5182_v45, %s9797_s17  ;;  %v4993_v45 = vadd.f32 %v4961_v32, %v4925_v13 }
 0x907   :  { %5217 = vrot.lane.b32.xlu1 %v5186_v10, %s9797_s17  ;;  %v4994_v10 = vadd.f32 %v4962_v62, %v4926_v57  ;;  %v14842_v57 = vld [vmem:[#allocation25_spill] sm:$0xff]  ;;  %v8321_v62 = vld [vmem:[%s14798_s4 + $0x50] sm:$0xff] }
 0x908   :  { %v4969_v32 = vmul.f32 %v12409_v36, %v14842_v57 }
 0x95b   :  { %v5188_v51 = vpop.permute.xlu0 %5187 }
 0x95c   :  { %v5235_v41 = vadd.f32 %v5188_v51, %v12333_v6  ;;  %v5236_v59 = vadd.f32 %v5188_v51, %v12349_v44 }
 0x95d   :  { %v5192_v9 = vpop.permute.xlu1 %5191 }
 0x95e   :  { %v5267_v11 = vadd.f32 %v5235_v41, %v4991_v25  ;;  %v5268_v19 = vadd.f32 %v5236_v59, %v4992_v49  ;;  %v5239_v1 = vadd.f32 %v5192_v9, %v12333_v6  ;;  %v5240_v3 = vadd.f32 %v5192_v9, %v12349_v44 }
 0x95f   :  { %v5190_v12 = vpop.permute.xlu0 %5189  ;;  %v9106_v59 = vpack.c.bf16 %v8322_v17, %v8321_v62 }
 0x960   :  { %v5271_v61 = vadd.f32 %v5239_v1, %v4995_v55  ;;  %v5237_v50 = vadd.f32 %v5190_v12, %v12333_v6  ;;  %v5238_v13 = vadd.f32 %v5190_v12, %v12349_v44  ;;  %vm5299_vm2 = vcmp.ge.f32.partialorder %v5267_v11, 0.0  ;;  %v14843_v12 = vld [vmem:[#allocation27_spill] sm:$0xff] }
 0x961   :  { %v5194_v56 = vpop.permute.xlu1 %5193  ;;  %v5331_v58 = vmul.f32 0.2, %v5267_v11  ;;  %vm5300_vm5 = vcmp.ge.f32.partialorder %v5268_v19, 0.0  ;;  %v5332_v33 = vmul.f32 0.2, %v5268_v19  ;;  %v4970_v4 = vmul.f32 %v12409_v36, %v14843_v12 }
 0x962   :  { %v5269_v25 = vadd.f32 %v5237_v50, %v4993_v45  ;;  %v5270_v49 = vadd.f32 %v5238_v13, %v4994_v10  ;;  %v5241_v51 = vadd.f32 %v5194_v56, %v12333_v6  ;;  %v5272_v38 = vadd.f32 %v5240_v3, %v4996_v20  ;;  %v8323_v45 = vld [vmem:[%s14798_s4 + $0x60] sm:$0xff]  ;;  %v8324_v3 = vld [vmem:[%s14798_s4 + $0x68] sm:$0xff] }
 0x963   :  { %v5363_v0 = vsel %vm5299_vm2, %v5267_v11, %v5331_v58  ;;  %v5196_v30 = vpop.permute.xlu0 %5195  ;;  %v5364_v41 = vsel %vm5300_vm5, %v5268_v19, %v5332_v33  ;;  %v5242_v55 = vadd.f32 %v5194_v56, %v12349_v44  ;;  %v5335_v40 = vmul.f32 0.2, %v5271_v61  ;;  %v14846_v19 = vld [vmem:[#allocation29_spill] sm:$0xff]  ;;  %v14847_v13 = vld [vmem:[#allocation31_spill] sm:$0xff]  ;;  %v14848_v56 = vld [vmem:[#allocation28_spill] sm:$0xff] }
 0x964   :  { %v5273_v9 = vadd.f32 %v5241_v51, %v4997_v28  ;;  %8900 = vmatprep.mubr.msk.f32.mxu1 %vm14844_vm6, %v5363_v0  ;;  %v5243_v1 = vadd.f32 %v5196_v30, %v12333_v6  ;;  %vm5301_vm8 = vcmp.ge.f32.partialorder %v5269_v25, 0.0  ;;  %v5333_v10 = vmul.f32 0.2, %v5269_v25  ;;  %vm14861_vm2 = vmmov %vm14855_vm0 }
 0x965   :  { %8901 = vmatmul.mubr.msk.f32.vlgmr.msra.gmra.mrb[0].mxu1 %vm14845_vm7, %v5364_v41  ;;  %v5198_v20 = vpop.permute.xlu1 %5197  ;;  %vm5302_vm9 = vcmp.ge.f32.partialorder %v5270_v49, 0.0  ;;  %v5334_v28 = vmul.f32 0.2, %v5270_v49  ;;  %v5001_v11 = vadd.f32 %v4969_v32, %v4933_v2  ;;  %v4935_v50 = vmul.f32 %v12406_v39, %v14846_v19  ;;  %v8325_v2 = vld [vmem:[%s14798_s4 + $0x70] sm:$0xff]  ;;  %v8326_v32 = vld [vmem:[%s14798_s4 + $0x78] sm:$0xff]  ;;  %vm14864_vm6 = vmmov %vm14855_vm0 }
 0x966   :  { %9105 = vmatpush3.bf16.msra.mxu1 %v12369_v47  ;;  %v4936_v62 = vmul.f32 %v12406_v39, %v14847_v13  ;;  %vm5303_vm10 = vcmp.ge.f32.partialorder %v5271_v61, 0.0  ;;  %v5365_v17 = vsel %vm5301_vm8, %v5269_v25, %v5333_v10  ;;  %v4971_v58 = vmul.f32 %v12409_v36, %v14848_v56  ;;  %vm14867_vm8 = vmmov %vm14855_vm0 }
 0x967   :  { %v5366_v33 = vsel %vm5302_vm9, %v5270_v49, %v5334_v28  ;;  %9107 = vmatprep.subr.bf16.mxu1 %v9106_v59  ;;  %v9110_v51 = vpack.c.bf16 %v8324_v3, %v8323_v45  ;;  %v5274_v0 = vadd.f32 %v5242_v55, %v4998_v42  ;;  %v5244_v41 = vadd.f32 %v5196_v30, %v12349_v44  ;;  %v5200_v25 = vpop.permute.xlu0 %5199  ;;  %v14851_v55 = vld [vmem:[#allocation30_spill] sm:$0xff]  ;;  %v14853_v45 = vld [vmem:[#allocation32_spill] sm:$0xff] }
 0x968   :  { %v5275_v12 = vadd.f32 %v5243_v1, %v4999_v18  ;;  %v5245_v47 = vadd.f32 %v5198_v20, %v12333_v6  ;;  %8903 = vmatprep.mubr.msk.f32.mxu1 %vm14849_vm11, %v5365_v17  ;;  %v5367_v49 = vsel %vm5303_vm10, %v5271_v61, %v5335_v40  ;;  %vm5304_vm13 = vcmp.ge.f32.partialorder %v5272_v38, 0.0  ;;  %v14854_v17 = vld [vmem:[#allocation33_spill] sm:$0xff]  ;;  %vm14870_vm10 = vmmov %vm14855_vm0 }
 0x969   :  { %8904 = vmatmul.mubr.msk.f32.gmra.mrb[2].mxu1 %vm14850_vm12, %v5366_v33  ;;  %v5336_v42 = vmul.f32 0.2, %v5272_v38  ;;  %v5337_v30 = vmul.f32 0.2, %v5273_v9  ;;  %v5002_v18 = vadd.f32 %v4970_v4, %v4934_v48  ;;  %v4972_v1 = vmul.f32 %v12409_v36, %v14851_v55  ;;  %vm14873_vm12 = vmmov %vm14855_vm0 }
 0x96a   :  { %8906 = vmatprep.mubr.msk.f32.mxu1 %vm14852_vm14, %v5367_v49  ;;  %v4937_v3 = vmul.f32 %v12406_v39, %v14853_v45  ;;  %vm5305_vm15 = vcmp.ge.f32.partialorder %v5273_v9, 0.0  ;;  %v5246_v10 = vadd.f32 %v5198_v20, %v12349_v44  ;;  %v5003_v28 = vadd.f32 %v4971_v58, %v4935_v50  ;;  %9109 = vmatpush3.bf16.msra.mxu1 %v9106_v59  ;;  %v14856_v50 = vld [vmem:[#allocation34_spill] sm:$0xff]  ;;  %vm14876_vm14 = vmmov %vm14855_vm0 }
 0x96b   :  { %v4973_v33 = vmul.f32 %v12409_v36, %v14854_v17  ;;  %v9114_v40 = vpack.c.bf16 %v8326_v32, %v8325_v2  ;;  %v5276_v61 = vadd.f32 %v5244_v41, %v12457_v15  ;;  %v5247_v48 = vadd.f32 %v5200_v25, %v12333_v6  ;;  %9111 = vmatprep.subr.bf16.mxu1 %v9110_v51  ;;  %v14857_v17 = vld [vmem:[#allocation35_spill] sm:$0xff]  ;;  %v5202_v2 = vpop.permute.xlu1 %5201  ;;  %v14859_v41 = vld [vmem:[#allocation40_spill] sm:$0xff] }
 0x96c   :  { %v5368_v4 = vsel %vm5304_vm13, %v5272_v38, %v5336_v42  ;;  %v5338_v55 = vmul.f32 0.2, %v5274_v0  ;;  %v5277_v49 = vadd.f32 %v5245_v47, %v5001_v11  ;;  %v5369_v45 = vsel %vm5305_vm15, %v5273_v9, %v5337_v30  ;;  %v14860_v47 = vld [vmem:[#allocation39_spill] sm:$0xff] }
 0x96d   :  { %8907 = vmatmul.mubr.msk.f32.gmra.mrb[4].mxu1 %vm14855_vm0, %v5368_v4  ;;  %vm5306_vm1 = vcmp.ge.f32.partialorder %v5274_v0, 0.0  ;;  %v5339_v13 = vmul.f32 0.2, %v5275_v12  ;;  %v5004_v20 = vadd.f32 %v4972_v1, %v4936_v62  ;;  %v4938_v58 = vmul.f32 %v12406_v39, %v14856_v50  ;;  %v5204_v4 = vpop.permute.xlu0 %5203 }
 0x96e   :  { %v4974_v59 = vmul.f32 %v12409_v36, %v14857_v17  ;;  %8909 = vmatprep.mubr.msk.f32.mxu1 %vm14858_vm3, %v5369_v45  ;;  %vm5307_vm4 = vcmp.ge.f32.partialorder %v5275_v12, 0.0  ;;  %v5278_v15 = vadd.f32 %v5246_v10, %v5002_v18  ;;  %v5005_v38 = vadd.f32 %v4973_v33, %v4937_v3  ;;  %9113 = vmatpush3.bf16.msra.mxu1 %v9110_v51  ;;  %v14862_v10 = vld [vmem:[#allocation42_spill] sm:$0xff]  ;;  %vm14881_vm3 = vmmov %vm14855_vm0 }
 0x96f   :  { %v4939_v11 = vmul.f32 %v12406_v39, %v14859_v41  ;;  %v4975_v9 = vmul.f32 %v12409_v36, %v14860_v47  ;;  %v5248_v62 = vadd.f32 %v5200_v25, %v12349_v44  ;;  %v5279_v32 = vadd.f32 %v5247_v48, %v5003_v28  ;;  %9115 = vmatprep.subr.bf16.mxu1 %v9114_v40  ;;  %v14863_v47 = vld [vmem:[#allocation41_spill] sm:$0xff]  ;;  %v14866_v48 = vld [vmem:[#allocation44_spill] sm:$0xff] }
 0x970   :  { %v5370_v42 = vsel %vm5306_vm1, %v5274_v0, %v5338_v55  ;;  %v5340_v30 = vmul.f32 0.2, %v5276_v61  ;;  %v5249_v1 = vadd.f32 %v5202_v2, %v12333_v6  ;;  %v5371_v18 = vsel %vm5307_vm4, %v5275_v12, %v5339_v13  ;;  %v14865_v55 = vld [vmem:[#allocation43_spill] sm:$0xff] }
 0x971   :  { %8910 = vmatmul.mubr.msk.f32.gmra.mrb[6].mxu1 %vm14861_vm2, %v5370_v42  ;;  %vm5308_vm5 = vcmp.ge.f32.partialorder %v5276_v61, 0.0  ;;  %v5341_v45 = vmul.f32 0.2, %v5277_v49  ;;  %v5006_v3 = vadd.f32 %v4974_v59, %v4938_v58  ;;  %v4940_v33 = vmul.f32 %v12406_v39, %v14862_v10  ;;  %vm14884_vm2 = vmmov %vm14855_vm0 }
 0x972   :  { %v4976_v51 = vmul.f32 %v12409_v36, %v14863_v47  ;;  %8912 = vmatprep.mubr.msk.f32.mxu1 %vm14864_vm6, %v5371_v18  ;;  %vm5309_vm7 = vcmp.ge.f32.partialorder %v5277_v49, 0.0  ;;  %v5250_v0 = vadd.f32 %v5202_v2, %v12349_v44  ;;  %v5007_v25 = vadd.f32 %v4975_v9, %v4939_v11  ;;  %9117 = vmatpush3.bf16.msra.mxu1 %v9114_v40  ;;  %v14868_v11 = vld [vmem:[#allocation45_spill] sm:$0xff]  ;;  %vm14887_vm6 = vmmov %vm14855_vm0 }
 0x973   :  { %v4941_v28 = vmul.f32 %v12406_v39, %v14865_v55  ;;  %v4977_v12 = vmul.f32 %v12409_v36, %v14866_v48  ;;  %v5280_v13 = vadd.f32 %v5248_v62, %v5004_v20  ;;  %v5251_v58 = vadd.f32 %v5204_v4, %v12333_v6  ;;  %v14869_v55 = vld [vmem:[#allocation46_spill] sm:$0xff]  ;;  %v5206_v48 = vpop.permute.xlu1 %5205  ;;  %v14871_v20 = vld [vmem:[#allocation48_spill] sm:$0xff]  ;;  %v14872_v62 = vld [vmem:[#allocation47_spill] sm:$0xff] }
 0x974   :  { %v5372_v59 = vsel %vm5308_vm5, %v5276_v61, %v5340_v30  ;;  %v5342_v42 = vmul.f32 0.2, %v5278_v15  ;;  %v5281_v10 = vadd.f32 %v5249_v1, %v5005_v38  ;;  %v5373_v18 = vsel %vm5309_vm7, %v5277_v49, %v5341_v45 }
 0x975   :  { %8913 = vmatmul.mubr.msk.f32.gmra.mrb[8].mxu1 %vm14867_vm8, %v5372_v59  ;;  %vm5310_vm9 = vcmp.ge.f32.partialorder %v5278_v15, 0.0  ;;  %v5343_v47 = vmul.f32 0.2, %v5279_v32  ;;  %v5008_v2 = vadd.f32 %v4976_v51, %v4940_v33  ;;  %v4942_v9 = vmul.f32 %v12406_v39, %v14868_v11  ;;  %v5208_v59 = vpop.permute.xlu0 %5207  ;;  %vm14890_vm8 = vmmov %vm14855_vm0 }
 0x976   :  { %v4978_v41 = vmul.f32 %v12409_v36, %v14869_v55  ;;  %8915 = vmatprep.mubr.msk.f32.mxu1 %vm14870_vm10, %v5373_v18  ;;  %vm5311_vm11 = vcmp.ge.f32.partialorder %v5279_v32, 0.0  ;;  %v5282_v40 = vadd.f32 %v5250_v0, %v5006_v3  ;;  %v5009_v61 = vadd.f32 %v4977_v12, %v4941_v28  ;;  %v14874_v28 = vld [vmem:[#allocation50_spill] sm:$0xff]  ;;  %vm14893_vm10 = vmmov %vm14855_vm0 }
 0x977   :  { %v4943_v38 = vmul.f32 %v12406_v39, %v14871_v20  ;;  %v4979_v49 = vmul.f32 %v12409_v36, %v14872_v62  ;;  %v5252_v30 = vadd.f32 %v5204_v4, %v12349_v44  ;;  %v5283_v1 = vadd.f32 %v5251_v58, %v5007_v25  ;;  %v14875_v20 = vld [vmem:[#allocation49_spill] sm:$0xff]  ;;  %v14877_v25 = vld [vmem:[#allocation51_spill] sm:$0xff]  ;;  %v5210_v11 = vpop.permute.xlu1 %5209 }
 0x978   :  { %v5374_v45 = vsel %vm5310_vm9, %v5278_v15, %v5342_v42  ;;  %v5344_v33 = vmul.f32 0.2, %v5280_v13  ;;  %v5253_v51 = vadd.f32 %v5206_v48, %v12333_v6  ;;  %v5375_v18 = vsel %vm5311_vm11, %v5279_v32, %v5343_v47  ;;  %v14878_v42 = vld [vmem:[#allocation52_spill] sm:$0xff] }
 0x979   :  { %8916 = vmatmul.mubr.msk.f32.gmra.mrb[10].mxu1 %vm14873_vm12, %v5374_v45  ;;  %vm5312_vm13 = vcmp.ge.f32.partialorder %v5280_v13, 0.0  ;;  %v5345_v3 = vmul.f32 0.2, %v5281_v10  ;;  %v5010_v0 = vadd.f32 %v4978_v41, %v4942_v9  ;;  %v4944_v12 = vmul.f32 %v12406_v39, %v14874_v28  ;;  %vm14896_vm12 = vmmov %vm14855_vm0 }
 0x97a   :  { %v4980_v62 = vmul.f32 %v12409_v36, %v14875_v20  ;;  %8918 = vmatprep.mubr.msk.f32.mxu1 %vm14876_vm14, %v5375_v18  ;;  %vm5313_vm15 = vcmp.ge.f32.partialorder %v5281_v10, 0.0  ;;  %v5254_v15 = vadd.f32 %v5206_v48, %v12349_v44  ;;  %v5011_v4 = vadd.f32 %v4979_v49, %v4943_v38  ;;  %v14879_v48 = vld [vmem:[#allocation53_spill] sm:$0xff]  ;;  %v14880_v49 = vld [vmem:[#allocation54_spill] sm:$0xff]  ;;  %vm14899_vm14 = vmmov %vm14855_vm0 }
 0x97b   :  { %v4945_v58 = vmul.f32 %v12406_v39, %v14877_v25  ;;  %v4981_v47 = vmul.f32 %v12409_v36, %v14878_v42  ;;  %v5284_v32 = vadd.f32 %v5252_v30, %v5008_v2  ;;  %v5255_v41 = vadd.f32 %v5208_v59, %v12333_v6  ;;  %v14882_v30 = vld [vmem:[#allocation56_spill] sm:$0xff] }
 0x97c   :  { %v5376_v9 = vsel %vm5312_vm13, %v5280_v13, %v5344_v33  ;;  %v5346_v45 = vmul.f32 0.2, %v5282_v40  ;;  %v5285_v28 = vadd.f32 %v5253_v51, %v5009_v61  ;;  %v5377_v20 = vsel %vm5313_vm15, %v5281_v10, %v5345_v3  ;;  %v14883_v33 = vld [vmem:[#allocation55_spill] sm:$0xff] }
 0x97d   :  { %8919 = vmatmul.mubr.msk.f32.gmra.mrb[12].mxu1 %vm14855_vm0, %v5376_v9  ;;  %vm5314_vm1 = vcmp.ge.f32.partialorder %v5282_v40, 0.0  ;;  %v5347_v18 = vmul.f32 0.2, %v5283_v1  ;;  %v5012_v55 = vadd.f32 %v4980_v62, %v4944_v12  ;;  %v4946_v38 = vmul.f32 %v12406_v39, %v14879_v48  ;;  %v5214_v48 = vpop.permute.xlu1 %5213 }
 0x97e   :  { %v4982_v25 = vmul.f32 %v12409_v36, %v14880_v49  ;;  %8921 = vmatprep.mubr.msk.f32.mxu1 %vm14881_vm3, %v5377_v20  ;;  %vm5315_vm4 = vcmp.ge.f32.partialorder %v5283_v1, 0.0  ;;  %v5286_v2 = vadd.f32 %v5254_v15, %v5010_v0  ;;  %v5013_v13 = vadd.f32 %v4981_v47, %v4945_v58  ;;  %v5212_v49 = vpop.permute.xlu0 %5211  ;;  %v14885_v58 = vld [vmem:[#allocation58_spill] sm:$0xff]  ;;  %vm14903_vm3 = vmmov %vm14855_vm0 }
 0x97f   :  { %v4947_v61 = vmul.f32 %v12406_v39, %v14882_v30  ;;  %v4983_v10 = vmul.f32 %v12409_v36, %v14883_v33  ;;  %v5256_v62 = vadd.f32 %v5208_v59, %v12349_v44  ;;  %v5287_v51 = vadd.f32 %v5255_v41, %v5011_v4  ;;  %v14886_v30 = vld [vmem:[#allocation57_spill] sm:$0xff]  ;;  %v14888_v4 = vld [vmem:[#allocation59_spill] sm:$0xff] }
 0x980   :  { %v5378_v3 = vsel %vm5314_vm1, %v5282_v40, %v5346_v45  ;;  %v5348_v12 = vmul.f32 0.2, %v5284_v32  ;;  %v5257_v9 = vadd.f32 %v5210_v11, %v12333_v6  ;;  %v5379_v20 = vsel %vm5315_vm4, %v5283_v1, %v5347_v18  ;;  %v14889_v45 = vld [vmem:[#allocation61_spill] sm:$0xff] }
 0x981   :  { %8922 = vmatmul.mubr.msk.f32.gmra.mrb[14].mxu1 %vm14884_vm2, %v5378_v3  ;;  %vm5316_vm5 = vcmp.ge.f32.partialorder %v5284_v32, 0.0  ;;  %v5349_v0 = vmul.f32 0.2, %v5285_v28  ;;  %v5014_v15 = vadd.f32 %v4982_v25, %v4946_v38  ;;  %v4948_v47 = vmul.f32 %v12406_v39, %v14885_v58  ;;  %vm14905_vm2 = vmmov %vm14855_vm0 }
 0x982   :  { %v4984_v33 = vmul.f32 %v12409_v36, %v14886_v30  ;;  %8924 = vmatprep.mubr.msk.f32.mxu1 %vm14887_vm6, %v5379_v20  ;;  %vm5317_vm7 = vcmp.ge.f32.partialorder %v5285_v28, 0.0  ;;  %v5258_v40 = vadd.f32 %v5210_v11, %v12349_v44  ;;  %v5015_v59 = vadd.f32 %v4983_v10, %v4947_v61  ;;  %v14891_v11 = vld [vmem:[#allocation60_spill] sm:$0xff]  ;;  %v14892_v10 = vld [vmem:[#allocation62_spill] sm:$0xff]  ;;  %vm14906_vm6 = vmmov %vm14855_vm0 }
 0x983   :  { %v4949_v41 = vmul.f32 %v12406_v39, %v14888_v4  ;;  %v4985_v1 = vmul.f32 %v12409_v36, %v14889_v45  ;;  %v5288_v18 = vadd.f32 %v5256_v62, %v5012_v55  ;;  %v5259_v25 = vadd.f32 %v5212_v49, %v12333_v6  ;;  %v14894_v62 = vld [vmem:[#allocation64_spill] sm:$0xff] }
 0x984   :  { %v5380_v38 = vsel %vm5316_vm5, %v5284_v32, %v5348_v12  ;;  %v5350_v3 = vmul.f32 0.2, %v5286_v2  ;;  %v5289_v58 = vadd.f32 %v5257_v9, %v5013_v13  ;;  %v5381_v30 = vsel %vm5317_vm7, %v5285_v28, %v5349_v0  ;;  %v14895_v12 = vld [vmem:[#allocation63_spill] sm:$0xff]  ;;  %v14902_v45 = vld [vmem:[#allocation68_spill] sm:$0xff] }
 0x985   :  { %8925 = vmatmul.mubr.msk.f32.gmra.mrb[16].mxu1 %vm14890_vm8, %v5380_v38  ;;  %vm5318_vm9 = vcmp.ge.f32.partialorder %v5286_v2, 0.0  ;;  %v5351_v20 = vmul.f32 0.2, %v5287_v51  ;;  %v5016_v42 = vadd.f32 %v4984_v33, %v4948_v47  ;;  %v4950_v61 = vmul.f32 %v12406_v39, %v14891_v11  ;;  %vm14907_vm8 = vmmov %vm14855_vm0 }
 0x986   :  { %v4986_v4 = vmul.f32 %v12409_v36, %v14892_v10  ;;  %8927 = vmatprep.mubr.msk.f32.mxu1 %vm14893_vm10, %v5381_v30  ;;  %vm5319_vm11 = vcmp.ge.f32.partialorder %v5287_v51, 0.0  ;;  %v5290_v55 = vadd.f32 %v5258_v40, %v5014_v15  ;;  %v5017_v32 = vadd.f32 %v4985_v1, %v4949_v41  ;;  %v5216_v10 = vpop.permute.xlu0 %5215  ;;  %v14897_v41 = vld [vmem:[#allocation66_spill] sm:$0xff]  ;;  %vm14908_vm10 = vmmov %vm14855_vm0 }
 0x987   :  { %v4951_v13 = vmul.f32 %v12406_v39, %v14894_v62  ;;  %v4987_v28 = vmul.f32 %v12409_v36, %v14895_v12  ;;  %v5260_v33 = vadd.f32 %v5212_v49, %v12349_v44  ;;  %v5291_v9 = vadd.f32 %v5259_v25, %v5015_v59  ;;  %v14898_v62 = vld [vmem:[#allocation65_spill] sm:$0xff]  ;;  %v14900_v59 = vld [vmem:[#allocation67_spill] sm:$0xff] }
 0x988   :  { %v5382_v0 = vsel %vm5318_vm9, %v5286_v2, %v5350_v3  ;;  %v5352_v47 = vmul.f32 0.2, %v5288_v18  ;;  %v5261_v38 = vadd.f32 %v5214_v48, %v12333_v6  ;;  %v5383_v30 = vsel %vm5319_vm11, %v5287_v51, %v5351_v20  ;;  %v14901_v3 = vld [vmem:[#allocation69_spill] sm:$0xff] }
 0x989   :  { %8928 = vmatmul.mubr.msk.f32.gmra.mrb[18].mxu1 %vm14896_vm12, %v5382_v0  ;;  %vm5320_vm13 = vcmp.ge.f32.partialorder %v5288_v18, 0.0  ;;  %v5353_v15 = vmul.f32 0.2, %v5289_v58  ;;  %v5018_v40 = vadd.f32 %v4986_v4, %v4950_v61  ;;  %v4952_v1 = vmul.f32 %v12406_v39, %v14897_v41  ;;  %vm14909_vm12 = vmmov %vm14855_vm0 }
 0x98a   :  { %v4988_v12 = vmul.f32 %v12409_v36, %v14898_v62  ;;  %8930 = vmatprep.mubr.msk.f32.mxu1 %vm14899_vm14, %v5383_v30  ;;  %vm5321_vm15 = vcmp.ge.f32.partialorder %v5289_v58, 0.0  ;;  %v5262_v49 = vadd.f32 %v5214_v48, %v12349_v44  ;;  %v5019_v2 = vadd.f32 %v4987_v28, %v4951_v13  ;;  %v5218_v13 = vpop.permute.xlu1 %5217  ;;  %vm14910_vm14 = vmmov %vm14855_vm0 }
 0x98b   :  { %v4953_v25 = vmul.f32 %v12406_v39, %v14900_v59  ;;  %v4989_v51 = vmul.f32 %v12409_v36, %v14901_v3  ;;  %v5292_v20 = vadd.f32 %v5260_v33, %v5016_v42  ;;  %v5263_v4 = vadd.f32 %v5216_v10, %v12333_v6  ;;  %v14904_v42 = vld [vmem:[#allocation70_spill] sm:$0xff] }
 0x98c   :  { %v5384_v61 = vsel %vm5320_vm13, %v5288_v18, %v5352_v47  ;;  %v5354_v0 = vmul.f32 0.2, %v5290_v55  ;;  %v5293_v41 = vadd.f32 %v5261_v38, %v5017_v32  ;;  %v5385_v62 = vsel %vm5321_vm15, %v5289_v58, %v5353_v15 }
 0x98d   :  { %8931 = vmatmul.mubr.msk.f32.gmra.mrb[20].mxu1 %vm14855_vm0, %v5384_v61  ;;  %vm5322_vm1 = vcmp.ge.f32.partialorder %v5290_v55, 0.0  ;;  %v5355_v30 = vmul.f32 0.2, %v5291_v9  ;;  %v4954_v48 = vmul.f32 %v12406_v39, %v14902_v45  ;;  %vm5323_vm4 = vcmp.ge.f32.partialorder %v5291_v9, 0.0 }
 0x98e   :  { %8933 = vmatprep.mubr.msk.f32.mxu1 %vm14903_vm3, %v5385_v62  ;;  %v5294_v28 = vadd.f32 %v5262_v49, %v5018_v40  ;;  %v5020_v3 = vadd.f32 %v4988_v12, %v4952_v1  ;;  %v4990_v33 = vmul.f32 %v12409_v36, %v14904_v42  ;;  %v5021_v18 = vadd.f32 %v4989_v51, %v4953_v25  ;;  %vm14911_vm3 = vmmov %vm14855_vm0 }
 0x98f   :  { %v5264_v32 = vadd.f32 %v5216_v10, %v12349_v44  ;;  %v5295_v47 = vadd.f32 %v5263_v4, %v5019_v2  ;;  %v5386_v38 = vsel %vm5322_vm1, %v5290_v55, %v5354_v0  ;;  %v5356_v58 = vmul.f32 0.2, %v5292_v20 }
 0x990   :  { %v5265_v15 = vadd.f32 %v5218_v13, %v12333_v6  ;;  %v5387_v39 = vsel %vm5323_vm4, %v5291_v9, %v5355_v30  ;;  %vm5324_vm5 = vcmp.ge.f32.partialorder %v5292_v20, 0.0  ;;  %v5357_v61 = vmul.f32 0.2, %v5293_v41  ;;  %vm14912_vm4 = vmmov %vm14855_vm0 }
 0x991   :  { %8934 = vmatmul.mubr.msk.f32.gmra.mrb[22].mxu1 %vm14905_vm2, %v5386_v38  ;;  %vm5325_vm7 = vcmp.ge.f32.partialorder %v5293_v41, 0.0  ;;  %v5022_v62 = vadd.f32 %v4990_v33, %v4954_v48  ;;  %v5296_v12 = vadd.f32 %v5264_v32, %v5020_v3  ;;  %v5266_v36 = vadd.f32 %v5218_v13, %v12349_v44  ;;  %v14915_v48 = vld [vmem:[#allocation72_spill] sm:$0xff]  ;;  %v14916_v33 = vld [vmem:[#allocation73_spill] sm:$0xff] }
 0x992   :  { %8936 = vmatprep.mubr.msk.f32.mxu1 %vm14906_vm6, %v5387_v39  ;;  %v5388_v40 = vsel %vm5324_vm5, %v5292_v20, %v5356_v58  ;;  %v5358_v1 = vmul.f32 0.2, %v5294_v28  ;;  %v5297_v10 = vadd.f32 %v5265_v15, %v5021_v18  ;;  %v5389_v55 = vsel %vm5325_vm7, %v5293_v41, %v5357_v61  ;;  %vm14917_vm6 = vmmov %vm14855_vm0  ;;  %v14919_v15 = vld [vmem:[#allocation74_spill] sm:$0xff] }
 0x993   :  { %vm5326_vm9 = vcmp.ge.f32.partialorder %v5294_v28, 0.0  ;;  %v5359_v49 = vmul.f32 0.2, %v5295_v47  ;;  %vm5327_vm11 = vcmp.ge.f32.partialorder %v5295_v47, 0.0  ;;  %v5298_v9 = vadd.f32 %v5266_v36, %v5022_v62  ;;  %vm14918_vm7 = vmmov %vm14855_vm0 }
 0x994   :  { %v5390_v2 = vsel %vm5326_vm9, %v5294_v28, %v5358_v1  ;;  %v5360_v25 = vmul.f32 0.2, %v5296_v12  ;;  %vm5328_vm13 = vcmp.ge.f32.partialorder %v5296_v12, 0.0  ;;  %v5361_v3 = vmul.f32 0.2, %v5297_v10  ;;  %vm14922_vm9 = vmmov %vm14855_vm0 }
 0x995   :  { %8937 = vmatmul.mubr.msk.f32.gmra.mrb[24].mxu1 %vm14907_vm8, %v5388_v40  ;;  %v5391_v51 = vsel %vm5327_vm11, %v5295_v47, %v5359_v49  ;;  %vm5329_vm15 = vcmp.ge.f32.partialorder %v5297_v10, 0.0  ;;  %v5362_v4 = vmul.f32 0.2, %v5298_v9  ;;  %vm5330_vm1 = vcmp.ge.f32.partialorder %v5298_v9, 0.0  ;;  %vm14921_vm8 = vmmov %vm14855_vm0 }
 0x996   :  { %8939 = vmatprep.mubr.msk.f32.mxu1 %vm14908_vm10, %v5389_v55  ;;  %v5392_v20 = vsel %vm5328_vm13, %v5296_v12, %v5360_v25  ;;  %v5393_v41 = vsel %vm5329_vm15, %v5297_v10, %v5361_v3  ;;  %vm14913_vm2 = vcmask 523264   ;;  %v14923_v55 = vld [vmem:[#allocation76_spill] sm:$0xff]  ;;  %vm14925_vm10 = vmmov %vm14855_vm0 }
 0x997   :  { %v5394_v0 = vsel %vm5330_vm1, %v5298_v9, %v5362_v4  ;;  %vm14914_vm5 = vmmov %vm14913_vm2 }
 0x998   :  { %vm14926_vm11 = vmmov %vm14855_vm0 }
 0x999   :  { %8940 = vmatmul.mubr.msk.f32.gmra.mrb[26].mxu1 %vm14909_vm12, %v5390_v2  ;;  %v14924_v2 = vld [vmem:[#allocation77_spill] sm:$0xff]  ;;  %vm14929_vm12 = vmmov %vm14855_vm0 }
 0x99a   :  { %8942 = vmatprep.mubr.msk.f32.mxu1 %vm14910_vm14, %v5391_v51  ;;  %vm14930_vm13 = vmmov %vm14855_vm0 }
 0x99b   :  { %vm14933_vm14 = vmmov %vm14855_vm0 }
 0x99c   :  { %vm14934_vm15 = vmmov %vm14855_vm0 }
 0x99d   :  { %8943 = vmatmul.mubr.msk.f32.gmra.mrb[28].mxu1 %vm14855_vm0, %v5392_v20  ;;  %vm14937_vm1 = vmmov %vm14855_vm0 }
 0x99e   :  { %8945 = vmatprep.mubr.msk.f32.mxu1 %vm14911_vm3, %v5393_v41  ;;  %vm14940_vm3 = vmmov %vm14855_vm0 }
 0x9a1   :  { %8946 = vmatmul.mubr.msk.f32.gmra.mrb[30].mxu1 %vm14912_vm4, %v5394_v0  ;;  %vm14941_vm4 = vmmov %vm14855_vm0 }
 0x9a2   :  { %8964 = vmatprep.mubr.msk.f32.mxu1 %vm14913_vm2, %v12316_v46  ;;  %v14920_v46 = vld [vmem:[#allocation75_spill] sm:$0xff]  ;;  %vm14944_vm2 = vmmov %vm14855_vm0 }
 0x9a5   :  { %8965 = vmatmul.mubr.msk.f32.vlgmr.msra.gmra.mrb[32].mxu1 %vm14914_vm5, %v12326_v5  ;;  %vm14945_vm5 = vmmov %vm14855_vm0 }
 0xa38   :  { %v8902_v30 = vpop.f32.mrb[0].mxu1 }
 0xa39   :  { %v5717_v13 = vadd.f32 %v8902_v30, %v14915_v48  ;;  %v5557_v28 = vpop.f32.mrb[1].mxu1 }
 0xa3a   :  { %v5716_v18 = vadd.f32 %v5557_v28, %v14916_v33 }
 0xa3b   :  { %v5749_v32 = vsel %vm14917_vm6, %v5717_v13, -inf  ;;  %vm14946_vm6 = vmmov %vm14855_vm0 }
 0xa3c   :  { %v5748_v47 = vsel %vm14918_vm7, %v5716_v18, -inf  ;;  %v8905_v38 = vpop.f32.mrb[2].mxu1  ;;  %vm14947_vm7 = vmmov %vm14855_vm0 }
 0xa3d   :  { %v5750_v58 = vmax.f32 %v5748_v47, %v5749_v32  ;;  %v12634_v39 = vadd.f32 %v8905_v38, %v14919_v15  ;;  %v5567_v61 = vpop.f32.mrb[3].mxu1  ;;  %v14927_v32 = vld [vmem:[#allocation78_spill] sm:$0xff] }
 0xa3e   :  { %v5718_v62 = vadd.f32 %v5567_v61, %v14920_v46 }
 0xa3f   :  { %v5751_v12 = vrot.slane %v5750_v58, 4  ;;  %v5758_v5 = vsel %vm14921_vm8, %v12634_v39, -inf  ;;  %vm14948_vm8 = vmmov %vm14855_vm0 }
 0xa40   :  { %v5757_v36 = vsel %vm14922_vm9, %v5718_v62, -inf  ;;  %v8908_v40 = vpop.f32.mrb[4].mxu1  ;;  %vm14949_vm9 = vmmov %vm14855_vm0 }
 0xa41   :  { %v5752_v1 = vmax.f32 %v5750_v58, %v5751_v12  ;;  %v5759_v10 = vmax.f32 %v5757_v36, %v5758_v5  ;;  %v12641_v49 = vadd.f32 %v8908_v40, %v14923_v55  ;;  %v5577_v9 = vpop.f32.mrb[5].mxu1  ;;  %v14928_v58 = vld [vmem:[#allocation79_spill] sm:$0xff] }
 0xa42   :  { %v12644_v25 = vadd.f32 %v5577_v9, %v14924_v2 }
 0xa43   :  { %v5753_v51 = vrot.slane %v5752_v1, 2  ;;  %v5760_v3 = vrot.slane %v5759_v10, 4  ;;  %v5767_v20 = vsel %vm14925_vm10, %v12641_v49, -inf  ;;  %vm14951_vm10 = vmmov %vm14855_vm0 }
 0xa44   :  { %v5766_v4 = vsel %vm14926_vm11, %v12644_v25, -inf  ;;  %v8911_v41 = vpop.f32.mrb[6].mxu1  ;;  %vm14952_vm11 = vmmov %vm14855_vm0 }
 0xa45   :  { %v5754_v0 = vmax.f32 %v5752_v1, %v5753_v51  ;;  %v5761_v30 = vmax.f32 %v5759_v10, %v5760_v3  ;;  %v5768_v28 = vmax.f32 %v5766_v4, %v5767_v20  ;;  %v12651_v47 = vadd.f32 %v8911_v41, %v14927_v32  ;;  %v5587_v38 = vpop.f32.mrb[7].mxu1  ;;  %v14931_v4 = vld [vmem:[#allocation80_spill] sm:$0xff] }
 0xa46   :  { %v12654_v61 = vadd.f32 %v5587_v38, %v14928_v58  ;;  %v14932_v38 = vld [vmem:[#allocation81_spill] sm:$0xff] }
 0xa47   :  { %v5755_v12 = vrot.slane %v5754_v0, 1  ;;  %v5762_v5 = vrot.slane %v5761_v30, 2  ;;  %v5769_v36 = vrot.slane %v5768_v28, 4  ;;  %v5776_v40 = vsel %vm14929_vm12, %v12651_v47, -inf  ;;  %vm14953_vm12 = vmmov %vm14855_vm0 }
 0xa48   :  { %v5775_v9 = vsel %vm14930_vm13, %v12654_v61, -inf  ;;  %v8914_v2 = vpop.f32.mrb[8].mxu1  ;;  %vm14954_vm13 = vmmov %vm14855_vm0 }
 0xa49   :  { %v5756_v1 = vmax.f32 %v5754_v0, %v5755_v12  ;;  %v5763_v10 = vmax.f32 %v5761_v30, %v5762_v5  ;;  %v5770_v51 = vmax.f32 %v5768_v28, %v5769_v36  ;;  %v5777_v3 = vmax.f32 %v5775_v9, %v5776_v40  ;;  %v5597_v20 = vpop.f32.mrb[9].mxu1 }
 0xa4a   :  { %v12661_v41 = vadd.f32 %v8914_v2, %v14931_v4  ;;  %v12664_v58 = vadd.f32 %v5597_v20, %v14932_v38  ;;  %v14935_v20 = vld [vmem:[#allocation82_spill] sm:$0xff] }
 0xa4b   :  { %v5892_v32 = vsub.f32 %v5716_v18, %v5756_v1  ;;  %v5893_v55 = vsub.f32 %v5717_v13, %v5756_v1  ;;  %v5764_v46 = vrot.slane %v5763_v10, 1  ;;  %v5771_v15 = vrot.slane %v5770_v51, 2  ;;  %v14936_v13 = vld [vmem:[#allocation83_spill] sm:$0xff] }
 0xa4c   :  { %v5778_v33 = vrot.slane %v5777_v3, 4  ;;  %v5785_v48 = vsel %vm14933_vm14, %v12661_v41, -inf  ;;  %v5784_v0 = vsel %vm14934_vm15, %v12664_v58, -inf  ;;  %v8917_v30 = vpop.f32.mrb[10].mxu1  ;;  %vm14955_vm14 = vmmov %vm14855_vm0 }
 0xa4d   :  { %v5924_v28 = vmul.f32 1.442695, %v5892_v32  ;;  %v5926_v12 = vmul.f32 1.442695, %v5893_v55  ;;  %v5765_v5 = vmax.f32 %v5763_v10, %v5764_v46  ;;  %v5772_v2 = vmax.f32 %v5770_v51, %v5771_v15  ;;  %v5607_v36 = vpop.f32.mrb[11].mxu1  ;;  %vm14958_vm15 = vmmov %vm14855_vm0 }
 0xa4e   :  { %v5779_v40 = vmax.f32 %v5777_v3, %v5778_v33  ;;  %v5786_v9 = vmax.f32 %v5784_v0, %v5785_v48  ;;  %v12671_v18 = vadd.f32 %v8917_v30, %v14935_v20  ;;  %v12674_v1 = vadd.f32 %v5607_v36, %v14936_v13  ;;  %v14938_v30 = vld [vmem:[#allocation84_spill] sm:$0xff] }
 0xa4f   :  { %9464 = vpow2.f32 %v5924_v28  ;;  %v5894_v38 = vsub.f32 %v5718_v62, %v5765_v5  ;;  %v5895_v4 = vsub.f32 %v12634_v39, %v5765_v5  ;;  %v5773_v42 = vrot.slane %v5772_v2, 1  ;;  %v14939_v5 = vld [vmem:[#allocation85_spill] sm:$0xff] }
 0xa50   :  { %9466 = vpow2.f32 %v5926_v12  ;;  %v5780_v45 = vrot.slane %v5779_v40, 2  ;;  %v5787_v32 = vrot.slane %v5786_v9, 4  ;;  %v5794_v15 = vsel %vm14855_vm0, %v12671_v18, -inf  ;;  %v8920_v46 = vpop.f32.mrb[12].mxu1 }
 0xa51   :  { %v5928_v33 = vmul.f32 1.442695, %v5894_v38  ;;  %v5930_v48 = vmul.f32 1.442695, %v5895_v4  ;;  %v5774_v55 = vmax.f32 %v5772_v2, %v5773_v42  ;;  %v5793_v10 = vsel %vm14937_vm1, %v12674_v1, -inf  ;;  %v5617_v51 = vpop.f32.mrb[13].mxu1  ;;  %vm14959_vm1 = vmmov %vm14855_vm0 }
 0xa52   :  { %v5781_v3 = vmax.f32 %v5779_v40, %v5780_v45  ;;  %v5788_v0 = vmax.f32 %v5786_v9, %v5787_v32  ;;  %v5795_v62 = vmax.f32 %v5793_v10, %v5794_v15  ;;  %v12682_v39 = vadd.f32 %v8920_v46, %v14938_v30 }
 0xa53   :  { %9468 = vpow2.f32 %v5928_v33  ;;  %v5896_v28 = vsub.f32 %v12644_v25, %v5774_v55  ;;  %v5897_v12 = vsub.f32 %v12641_v49, %v5774_v55  ;;  %v12687_v36 = vadd.f32 %v5617_v51, %v14939_v5  ;;  %v14942_v33 = vld [vmem:[#allocation86_spill] sm:$0xff]  ;;  %v14943_v55 = vld [vmem:[#allocation87_spill] sm:$0xff] }
 0xa54   :  { %9470 = vpow2.f32 %v5930_v48  ;;  %v5782_v42 = vrot.slane %v5781_v3, 1  ;;  %v5789_v4 = vrot.slane %v5788_v0, 2  ;;  %v5796_v38 = vrot.slane %v5795_v62, 4  ;;  %v8923_v2 = vpop.f32.mrb[14].mxu1 }
 0xa55   :  { %v5932_v13 = vmul.f32 1.442695, %v5896_v28  ;;  %v5934_v45 = vmul.f32 1.442695, %v5897_v12  ;;  %v5803_v40 = vsel %vm14940_vm3, %v12682_v39, -inf  ;;  %v5802_v9 = vsel %vm14941_vm4, %v12687_v36, -inf  ;;  %vm14960_vm3 = vmmov %vm14855_vm0 }
 0xa56   :  { %v5783_v32 = vmax.f32 %v5781_v3, %v5782_v42  ;;  %v5790_v25 = vmax.f32 %v5788_v0, %v5789_v4  ;;  %v5797_v15 = vmax.f32 %v5795_v62, %v5796_v38  ;;  %v5804_v49 = vmax.f32 %v5802_v9, %v5803_v40  ;;  %v5627_v46 = vpop.f32.mrb[15].mxu1  ;;  %vm14961_vm4 = vmmov %vm14855_vm0 }
 0xa57   :  { %9472 = vpow2.f32 %v5932_v13  ;;  %v12694_v48 = vadd.f32 %v8923_v2, %v14942_v33  ;;  %v12697_v10 = vadd.f32 %v5627_v46, %v14943_v55 }
 0xa58   :  { %9474 = vpow2.f32 %v5934_v45  ;;  %v5898_v51 = vsub.f32 %v12654_v61, %v5783_v32  ;;  %v5899_v28 = vsub.f32 %v12651_v47, %v5783_v32  ;;  %v5791_v12 = vrot.slane %v5790_v25, 1  ;;  %v8926_v5 = vpop.f32.mrb[16].mxu1 }
 0xa59   :  { %v12701_v30 = vpop.eup %9464  ;;  %v5798_v3 = vrot.slane %v5797_v15, 2  ;;  %v5805_v0 = vrot.slane %v5804_v49, 4  ;;  %v5812_v13 = vsel %vm14944_vm2, %v12694_v48, -inf  ;;  %v5811_v62 = vsel %vm14945_vm5, %v12697_v10, -inf  ;;  %v12707_v42 = vpop.f32.mrb[17].mxu1  ;;  %vm14962_vm2 = vmmov %vm14855_vm0 }
 0xa5a   :  { %v12709_v4 = vpop.eup %9466  ;;  %v5988_v61 = vsel %vm14946_vm6, %v12701_v30, 0.0  ;;  %v5936_v47 = vmul.f32 1.442695, %v5898_v51  ;;  %v5938_v38 = vmul.f32 1.442695, %v5899_v28  ;;  %v5792_v2 = vmax.f32 %v5790_v25, %v5791_v12  ;;  %vm14965_vm5 = vmmov %vm14855_vm0 }
 0xa5b   :  { %v5989_v45 = vsel %vm14947_vm7, %v12709_v4, 0.0  ;;  %v5799_v40 = vmax.f32 %v5797_v15, %v5798_v3  ;;  %v5806_v9 = vmax.f32 %v5804_v49, %v5805_v0  ;;  %v5813_v32 = vmax.f32 %v5811_v62, %v5812_v13  ;;  %vm14967_vm6 = vmmov %vm14855_vm0 }
 0xa5c   :  { %v5990_v46 = vadd.f32 %v5989_v45, %v5988_v61  ;;  %9476 = vpow2.f32 %v5936_v47  ;;  %v5900_v55 = vsub.f32 %v12664_v58, %v5792_v2  ;;  %v5901_v33 = vsub.f32 %v12661_v41, %v5792_v2  ;;  %v12717_v20 = vpop.f32.mrb[18].mxu1  ;;  %vm14969_vm7 = vmmov %vm14855_vm0 }
 0xa5d   :  { %v12719_v59 = vpop.eup %9468  ;;  %9478 = vpow2.f32 %v5938_v38  ;;  %v5800_v51 = vrot.slane %v5799_v40, 1  ;;  %v5807_v28 = vrot.slane %v5806_v9, 2  ;;  %v5814_v25 = vrot.slane %v5813_v32, 4  ;;  %v12721_v12 = vpop.f32.mrb[19].mxu1  ;;  %v14950_v38 = vld [vmem:[#allocation88_spill] sm:$0xff] }
 0xa5e   :  { %v12723_v11 = vpop.eup %9470  ;;  %v5991_v15 = vrot.slane %v5990_v46, 4  ;;  %v5997_v49 = vsel %vm14948_vm8, %v12719_v59, 0.0  ;;  %v5940_v3 = vmul.f32 1.442695, %v5900_v55  ;;  %v5942_v58 = vmul.f32 1.442695, %v5901_v33  ;;  %vm14970_vm8 = vmmov %vm14855_vm0 }
 0xa5f   :  { %v5998_v41 = vsel %vm14949_vm9, %v12723_v11, 0.0  ;;  %v5801_v0 = vmax.f32 %v5799_v40, %v5800_v51  ;;  %v5808_v13 = vmax.f32 %v5806_v9, %v5807_v28  ;;  %v5815_v62 = vmax.f32 %v5813_v32, %v5814_v25  ;;  %vm14971_vm9 = vmmov %vm14855_vm0 }
 0xa60   :  { %v5992_v61 = vadd.f32 %v5991_v15, %v5990_v46  ;;  %v5999_v47 = vadd.f32 %v5998_v41, %v5997_v49  ;;  %9480 = vpow2.f32 %v5940_v3  ;;  %v12730_v2 = vadd.f32 %v8926_v5, %v14950_v38  ;;  %v12732_v45 = vpop.f32.mrb[20].mxu1 }
 0xa61   :  { %v12734_v17 = vpop.eup %9472  ;;  %9482 = vpow2.f32 %v5942_v58  ;;  %v5902_v55 = vsub.f32 %v12674_v1, %v5801_v0  ;;  %v5903_v33 = vsub.f32 %v12671_v18, %v5801_v0  ;;  %v5809_v50 = vrot.slane %v5808_v13, 1  ;;  %v12738_v56 = vpop.f32.mrb[21].mxu1 }
 0xa62   :  { %v12740_v40 = vpop.eup %9474  ;;  %v5993_v9 = vrot.slane %v5992_v61, 2  ;;  %v6000_v32 = vrot.slane %v5999_v47, 4  ;;  %v6006_v5 = vsel %vm14951_vm10, %v12734_v17, 0.0  ;;  %v5816_v46 = vrot.slane %v5815_v62, 2  ;;  %vm14973_vm10 = vmmov %vm14855_vm0 }
 0xa63   :  { %v6007_v51 = vsel %vm14952_vm11, %v12740_v40, 0.0  ;;  %v5944_v28 = vmul.f32 1.442695, %v5902_v55  ;;  %v5946_v25 = vmul.f32 1.442695, %v5903_v33  ;;  %v5810_v15 = vmax.f32 %v5808_v13, %v5809_v50  ;;  %vm14974_vm11 = vmmov %vm14855_vm0 }
 0xa64   :  { %v5994_v1 = vadd.f32 %v5993_v9, %v5992_v61  ;;  %v6001_v49 = vadd.f32 %v6000_v32, %v5999_v47  ;;  %v6008_v18 = vadd.f32 %v6007_v51, %v6006_v5  ;;  %v5817_v3 = vmax.f32 %v5815_v62, %v5816_v46  ;;  %v12746_v58 = vpop.f32.mrb[22].mxu1 }
 0xa65   :  { %9484 = vpow2.f32 %v5944_v28  ;;  %v5904_v41 = vsub.f32 %v12687_v36, %v5810_v15  ;;  %v5905_v0 = vsub.f32 %v12682_v39, %v5810_v15  ;;  %v5821_v38 = vsel %vm14953_vm12, %v12730_v2, -inf  ;;  %v12752_v19 = vpop.f32.mrb[23].mxu1  ;;  %vm14979_vm12 = vmmov %vm14855_vm0 }
 0xa66   :  { %v12754_v57 = vpop.eup %9476  ;;  %v5995_v55 = vrot.slane %v5994_v1, 1  ;;  %v6002_v50 = vrot.slane %v6001_v49, 2  ;;  %v6009_v13 = vrot.slane %v6008_v18, 4  ;;  %9486 = vpow2.f32 %v5946_v25  ;;  %v14956_v25 = vld [vmem:[#allocation89_spill] sm:$0xff] }
 0xa67   :  { %v12756_v61 = vpop.eup %9478  ;;  %v6015_v62 = vsel %vm14954_vm13, %v12754_v57, 0.0  ;;  %v5948_v47 = vmul.f32 1.442695, %v5904_v41  ;;  %v5950_v36 = vmul.f32 1.442695, %v5905_v0  ;;  %v5818_v33 = vrot.slane %v5817_v3, 1  ;;  %vm14981_vm13 = vmmov %vm14855_vm0 }
 0xa68   :  { %v5996_v39 = vadd.f32 %v5995_v55, %v5994_v1  ;;  %v6003_v9 = vadd.f32 %v6002_v50, %v6001_v49  ;;  %v6010_v32 = vadd.f32 %v6009_v13, %v6008_v18  ;;  %v6016_v5 = vsel %vm14955_vm14, %v12756_v61, 0.0  ;;  %v12762_v46 = vpop.f32.mrb[24].mxu1  ;;  %v14957_v18 = vld [vmem:[#allocation90_spill] sm:$0xff]  ;;  %vm14982_vm14 = vmmov %vm14855_vm0 }
 0xa69   :  { %v6017_v51 = vadd.f32 %v6016_v5, %v6015_v62  ;;  %9488 = vpow2.f32 %v5948_v47  ;;  %v5819_v28 = vmax.f32 %v5817_v3, %v5818_v33  ;;  %v12766_v15 = vadd.f32 %v12707_v42, %v14956_v25  ;;  %v12768_v14 = vpop.f32.mrb[25].mxu1 }
 0xa6a   :  { %v12770_v41 = vpop.eup %9480  ;;  %9490 = vrcp.f32 %v5996_v39  ;;  %v6004_v1 = vrot.slane %v6003_v9, 1  ;;  %v6011_v49 = vrot.slane %v6010_v32, 2  ;;  %v12774_v0 = vadd.f32 %v12717_v20, %v14957_v18 }
 0xa6b   :  { %v12776_v55 = vpop.eup %9482  ;;  %v6018_v50 = vrot.slane %v6017_v51, 4  ;;  %v6024_v3 = vsel %vm14958_vm15, %v12770_v41, 0.0  ;;  %9492 = vpow2.f32 %v5950_v36  ;;  %v5906_v42 = vsub.f32 %v12697_v10, %v5819_v28  ;;  %vm14985_vm15 = vmmov %vm14855_vm0 }
 0xa6c   :  { %v6005_v13 = vadd.f32 %v6004_v1, %v6003_v9  ;;  %v6012_v62 = vadd.f32 %v6011_v49, %v6010_v32  ;;  %v6025_v47 = vsel %vm14855_vm0, %v12776_v55, 0.0  ;;  %v5907_v33 = vsub.f32 %v12694_v48, %v5819_v28  ;;  %v12784_v39 = vpop.f32.mrb[26].mxu1 }
 0xa6d   :  { %v6019_v20 = vadd.f32 %v6018_v50, %v6017_v51  ;;  %v6026_v5 = vadd.f32 %v6025_v47, %v6024_v3  ;;  %v5952_v18 = vmul.f32 1.442695, %v5906_v42  ;;  %v5820_v25 = vsel %vm14959_vm1, %v12766_v15, -inf  ;;  %v12788_v34 = vpop.f32.mrb[27].mxu1  ;;  %v14963_v47 = vld [vmem:[#allocation91_spill] sm:$0xff]  ;;  %vm14986_vm1 = vmmov %vm14855_vm0 }
 0xa6e   :  { %9494 = vrcp.f32 %v6005_v13  ;;  %v6013_v36 = vrot.slane %v6012_v62, 1  ;;  %v5954_v10 = vmul.f32 1.442695, %v5907_v33  ;;  %v5822_v9 = vmax.f32 %v5820_v25, %v5821_v38 }
 0xa6f   :  { %v12790_v32 = vpop.eup %9484  ;;  %v6020_v1 = vrot.slane %v6019_v20, 2  ;;  %v6027_v49 = vrot.slane %v6026_v5, 4  ;;  %9496 = vpow2.f32 %v5952_v18  ;;  %v5830_v48 = vsel %vm14960_vm3, %v12774_v0, -inf  ;;  %vm14989_vm3 = vmmov %vm14855_vm0 }
 0xa70   :  { %v12794_v51 = vpop.eup %9486  ;;  %v6014_v28 = vadd.f32 %v6013_v36, %v6012_v62  ;;  %v6033_v50 = vsel %vm14961_vm4, %v12790_v32, 0.0  ;;  %9498 = vpow2.f32 %v5954_v10  ;;  %v5823_v3 = vrot.slane %v5822_v9, 4  ;;  %v12798_v42 = vpop.f32.mrb[28].mxu1  ;;  %vm14990_vm4 = vmmov %vm14855_vm0 }
 0xa71   :  { %v6021_v13 = vadd.f32 %v6020_v1, %v6019_v20  ;;  %v6028_v38 = vadd.f32 %v6027_v49, %v6026_v5  ;;  %v6034_v25 = vsel %vm14962_vm2, %v12794_v51, 0.0  ;;  %v12804_v18 = vadd.f32 %v12721_v12, %v14963_v47  ;;  %v12806_v33 = vpop.f32.mrb[29].mxu1  ;;  %v14966_v49 = vld [vmem:[#allocation93_spill] sm:$0xff]  ;;  %vm14991_vm2 = vmmov %vm14855_vm0 }
 0xa72   :  { %9500 = vrcp.f32 %v6014_v28  ;;  %v12808_v62 = vadd.f32 %v6034_v25, %v6033_v50  ;;  %v5824_v36 = vmax.f32 %v5822_v9, %v5823_v3  ;;  %v12812_v10 = vadd.f32 %v12732_v45, %v14964_v60 }
 0xa73   :  { %v12814_v37 = vpop.eup %9488  ;;  %v6022_v20 = vrot.slane %v6021_v13, 1  ;;  %v6029_v5 = vrot.slane %v6028_v38, 2  ;;  %v5829_v1 = vsel %vm14965_vm5, %v12804_v18, -inf  ;;  %v12820_v12 = vadd.f32 %v12738_v56, %v14966_v49  ;;  %vm14992_vm5 = vmmov %vm14855_vm0 }
 0xa74   :  { %v12822_v47 = vpop.eup %9490  ;;  %v6042_v9 = vsel %vm14967_vm6, %v12814_v37, 0.0  ;;  %v5825_v28 = vrot.slane %v5824_v36, 2  ;;  %v5831_v50 = vmax.f32 %v5829_v1, %v5830_v48  ;;  %v12826_v45 = vpop.f32.mrb[30].mxu1  ;;  %v5839_v56 = vsel %vm14969_vm7, %v12812_v10, -inf  ;;  %vm14995_vm6 = vmmov %vm14855_vm0 }
 0xa75   :  { %v12828_v3 = vpop.eup %9492  ;;  %v12832_v25 = vmul.f32 %v12822_v47, %v12701_v30  ;;  %v6023_v60 = vadd.f32 %v6022_v20, %v6021_v13  ;;  %v6030_v52 = vadd.f32 %v6029_v5, %v6028_v38  ;;  %v12836_v49 = vpop.f32.mrb[31].mxu1  ;;  %v5838_v30 = vsel %vm14971_vm9, %v12820_v12, -inf  ;;  %vm14996_vm7 = vmmov %vm14855_vm0 }
 0xa76   :  { %v6043_v21 = vsel %vm14970_vm8, %v12828_v3, 0.0  ;;  %v5826_v53 = vmax.f32 %v5824_v36, %v5825_v28  ;;  %v5832_v48 = vrot.slane %v5831_v50, 4  ;;  %v5840_v20 = vmax.f32 %v5838_v30, %v5839_v56  ;;  %vm14998_vm8 = vmmov %vm14855_vm0 }
 0xa77   :  { %14968 = vst [vmem:[#allocation38_spill] sm:$0xff] %v12832_v25  ;;  %9502 = vrcp.f32 %v6023_v60  ;;  %v6031_v1 = vrot.slane %v6030_v52, 1  ;;  %v12840_v8 = vadd.f32 %v6043_v21, %v6042_v9  ;;  %vm14999_vm9 = vmmov %vm14855_vm0 }
 0xa78   :  { %v12844_v22 = vpop.eup %9494  ;;  %v5827_v13 = vrot.slane %v5826_v53, 1  ;;  %v5833_v38 = vmax.f32 %v5831_v50, %v5832_v48  ;;  %v12846_v5 = vpop.f32.mrb[32].mxu1  ;;  %v5841_v56 = vrot.slane %v5840_v20, 4 }
 0xa79   :  { %v12848_v29 = vpop.eup %9496  ;;  %v12852_v36 = vmul.f32 %v12844_v22, %v12719_v59  ;;  %v6032_v60 = vadd.f32 %v6031_v1, %v6030_v52  ;;  %v12854_v28 = vpop.f32.mrb[33].mxu1 }
 0xa7a   :  { %v12856_v21 = vpop.eup %9498  ;;  %v6051_v9 = vsel %vm14973_vm10, %v12848_v29, 0.0  ;;  %v5828_v24 = vmax.f32 %v5826_v53, %v5827_v13  ;;  %v5834_v23 = vrot.slane %v5833_v38, 2  ;;  %v5842_v53 = vmax.f32 %v5840_v20, %v5841_v56  ;;  %v14976_v13 = vld [vmem:[#allocation94_spill] sm:$0xff]  ;;  %vm15001_vm10 = vmmov %vm14855_vm0 }
 0xa7b   :  { %14972 = vst [vmem:[#allocation71_spill] sm:$0xff] %v12852_v36  ;;  %9504 = vrcp.f32 %v6032_v60  ;;  %v6052_v50 = vsel %vm14974_vm11, %v12856_v21, 0.0  ;;  %v12874_v60 = vadd.f32 %v12746_v58, %v14976_v13  ;;  %vm15002_vm11 = vmmov %vm14855_vm0 }
 0xa7c   :  { %v12862_v48 = vpop.eup %9500  ;;  %v12864_v30 = vadd.f32 %v6052_v50, %v6051_v9  ;;  %v5908_v52 = vsub.f32 %v12766_v15, %v5828_v24  ;;  %v5909_v59 = vsub.f32 %v12730_v2, %v5828_v24  ;;  %v5835_v54 = vmax.f32 %v5833_v38, %v5834_v23  ;;  %v14977_v9 = vld [vmem:[#allocation95_spill] sm:$0xff]  ;;  %v14978_v15 = vld [vmem:[#allocation96_spill] sm:$0xff] }
 0xa7d   :  { %v12870_v1 = vmul.f32 %v12862_v48, %v12734_v17  ;;  %v5843_v44 = vrot.slane %v5842_v53, 2  ;;  %v12878_v50 = vadd.f32 %v12752_v19, %v14977_v9  ;;  %v12882_v24 = vadd.f32 %v12762_v46, %v14978_v15 }
 0xa7e   :  { %v5956_v16 = vmul.f32 1.442695, %v5908_v52  ;;  %v5958_v43 = vmul.f32 1.442695, %v5909_v59  ;;  %v5836_v36 = vrot.slane %v5835_v54, 1  ;;  %v5848_v58 = vsel %vm14979_vm12, %v12874_v60, -inf  ;;  %vm15003_vm12 = vmmov %vm14855_vm0 }
 0xa7f   :  { %14975 = vst [vmem:[#allocation36_spill] sm:$0xff] %v12870_v1  ;;  %v5844_v2 = vmax.f32 %v5842_v53, %v5843_v44  ;;  %v5847_v19 = vsel %vm14981_vm13, %v12878_v50, -inf  ;;  %v5857_v44 = vsel %vm14982_vm14, %v12882_v24, -inf  ;;  %vm15004_vm13 = vmmov %vm14855_vm0 }
 0xa80   :  { %9506 = vpow2.f32 %v5956_v16  ;;  %v5837_v23 = vmax.f32 %v5835_v54, %v5836_v36  ;;  %v5849_v52 = vmax.f32 %v5847_v19, %v5848_v58  ;;  %v14983_v54 = vld [vmem:[#allocation97_spill] sm:$0xff]  ;;  %vm15005_vm14 = vmmov %vm14855_vm0 }
 0xa81   :  { %v12884_v17 = vpop.eup %9502  ;;  %9508 = vpow2.f32 %v5958_v43  ;;  %v5845_v56 = vrot.slane %v5844_v2, 1  ;;  %v12900_v16 = vadd.f32 %v12768_v14, %v14983_v54 }
 0xa82   :  { %v12890_v38 = vmul.f32 %v12884_v17, %v12754_v57  ;;  %v5910_v20 = vsub.f32 %v12804_v18, %v5837_v23  ;;  %v5911_v46 = vsub.f32 %v12774_v0, %v5837_v23  ;;  %v5850_v18 = vrot.slane %v5849_v52, 4 }
 0xa83   :  { %v5846_v59 = vmax.f32 %v5844_v2, %v5845_v56  ;;  %v5856_v0 = vsel %vm14985_vm15, %v12900_v16, -inf  ;;  %v12918_v56 = vadd.f32 %v12788_v34, %v10820_v63  ;;  %vm15006_vm15 = vmmov %vm14855_vm0 }
 0xa84   :  { %14980 = vst [vmem:[#allocation2_spill] sm:$0xff] %v12890_v38  ;;  %v5960_v57 = vmul.f32 1.442695, %v5910_v20  ;;  %v5962_v43 = vmul.f32 1.442695, %v5911_v46  ;;  %v5858_v14 = vmax.f32 %v5856_v0, %v5857_v44  ;;  %v5851_v19 = vmax.f32 %v5849_v52, %v5850_v18 }
 0xa85   :  { %v12902_v36 = vpop.eup %9504  ;;  %v5912_v23 = vsub.f32 %v12820_v12, %v5846_v59  ;;  %v5913_v58 = vsub.f32 %v12812_v10, %v5846_v59  ;;  %v12914_v20 = vadd.f32 %v12784_v39, %v10818_v31  ;;  %v12924_v10 = vadd.f32 %v12798_v42, %v10836_v35 }
 0xa86   :  { %v12906_v53 = vmul.f32 %v12902_v36, %v12770_v41  ;;  %9510 = vpow2.f32 %v5960_v57  ;;  %v5859_v41 = vrot.slane %v5858_v14, 4  ;;  %v5852_v54 = vrot.slane %v5851_v19, 2  ;;  %v14987_v57 = vld [vmem:[#allocation101_spill] sm:$0xff] }
 0xa87   :  { %9512 = vpow2.f32 %v5962_v43  ;;  %v5964_v2 = vmul.f32 1.442695, %v5912_v23  ;;  %v5966_v46 = vmul.f32 1.442695, %v5913_v58  ;;  %v5866_v12 = vsel %vm14855_vm0, %v12914_v20, -inf }
 0xa88   :  { %14984 = vst [vmem:[#allocation3_spill] sm:$0xff] %v12906_v53  ;;  %v5860_v39 = vmax.f32 %v5858_v14, %v5859_v41  ;;  %v5865_v44 = vsel %vm14986_vm1, %v12918_v56, -inf  ;;  %v12932_v43 = vadd.f32 %v12806_v33, %v14987_v57  ;;  %v5853_v18 = vmax.f32 %v5851_v19, %v5852_v54  ;;  %v14993_v19 = vld [vmem:[#allocation102_spill] sm:$0xff]  ;;  %vm15009_vm1 = vmmov %vm14855_vm0 }
 0xa89   :  { %9514 = vpow2.f32 %v5964_v2  ;;  %v5867_v42 = vmax.f32 %v5865_v44, %v5866_v12  ;;  %v5875_v58 = vsel %vm14991_vm2, %v12924_v10, -inf  ;;  %v12951_v12 = vadd.f32 %v12826_v45, %v14993_v19  ;;  %v14994_v44 = vld [vmem:[#allocation103_spill] sm:$0xff]  ;;  %vm15013_vm2 = vmmov %vm14855_vm0 }
 0xa8a   :  { %v12926_v52 = vpop.eup %9506  ;;  %9516 = vpow2.f32 %v5966_v46  ;;  %v5861_v23 = vrot.slane %v5860_v39, 2  ;;  %v5874_v14 = vsel %vm14992_vm5, %v12932_v43, -inf  ;;  %v5854_v2 = vrot.slane %v5853_v18, 1  ;;  %v12947_v46 = vld [vmem:[%s14815_s26 + $0x1] ss:$0 sm:$0xff]  ;;  %vm15014_vm5 = vmmov %vm14855_vm0 }
 0xa8b   :  { %v12934_v34 = vpop.eup %9508  ;;  %v6060_v59 = vsel %vm14989_vm3, %v12926_v52, 0.0  ;;  %v5868_v41 = vrot.slane %v5867_v42, 4  ;;  %v5876_v57 = vmax.f32 %v5874_v14, %v5875_v58  ;;  %v12955_v35 = vadd.f32 %v12836_v49, %v14994_v44  ;;  %vm15010_vm3 = vmmov %vm14855_vm0 }
 0xa8c   :  { %14988 = vst [vmem:[#allocation106_spill] sm:$0xff] %v12934_v34  ;;  %v6061_v0 = vsel %vm14990_vm4, %v12934_v34, 0.0  ;;  %v5862_v54 = vmax.f32 %v5860_v39, %v5861_v23  ;;  %v5855_v31 = vmax.f32 %v5853_v18, %v5854_v2  ;;  %v5884_v14 = vsel %vm14995_vm6, %v12951_v12, -inf  ;;  %vm15011_vm4 = vmmov %vm14855_vm0 }
 0xa8d   :  { %v6062_v33 = vadd.f32 %v6061_v0, %v6060_v59  ;;  %v5869_v59 = vmax.f32 %v5867_v42, %v5868_v41  ;;  %v5877_v0 = vrot.slane %v5876_v57, 4  ;;  %v5883_v39 = vsel %vm14996_vm7, %v12955_v35, -inf  ;;  %vm15021_vm6 = vmmov %vm14855_vm0 }
 0xa8e   :  { %v5863_v58 = vrot.slane %v5862_v54, 1  ;;  %v12965_v45 = vadd.f32 %v12947_v46, %v12854_v28  ;;  %v5914_v42 = vsub.f32 %v12878_v50, %v5855_v31  ;;  %v5915_v2 = vsub.f32 %v12874_v60, %v5855_v31  ;;  %vm15022_vm7 = vmmov %vm14855_vm0 }
 0xa8f   :  { %v6063_v63 = vrot.slane %v6062_v33, 4  ;;  %v5870_v13 = vrot.slane %v5869_v59, 2  ;;  %v5878_v44 = vmax.f32 %v5876_v57, %v5877_v0 }
 0xa90   :  { %v12957_v15 = vpop.eup %9510  ;;  %14997 = vst [vmem:[#allocation107_spill] sm:$0xff] %v12965_v45  ;;  %v5864_v9 = vmax.f32 %v5862_v54, %v5863_v58  ;;  %v5968_v28 = vmul.f32 1.442695, %v5914_v42  ;;  %v5970_v53 = vmul.f32 1.442695, %v5915_v2 }
 0xa91   :  { %v12967_v23 = vpop.eup %9512  ;;  %v6064_v49 = vadd.f32 %v6063_v63, %v6062_v33  ;;  %v6069_v18 = vsel %vm14998_vm8, %v12957_v15, 0.0  ;;  %v5871_v1 = vmax.f32 %v5869_v59, %v5870_v13  ;;  %v5879_v50 = vrot.slane %v5878_v44, 2  ;;  %vm15023_vm8 = vmmov %vm14855_vm0 }
 0xa92   :  { %v6070_v41 = vsel %vm14999_vm9, %v12967_v23, 0.0  ;;  %v5916_v63 = vsub.f32 %v12900_v16, %v5864_v9  ;;  %v5917_v33 = vsub.f32 %v12882_v24, %v5864_v9  ;;  %9518 = vpow2.f32 %v5968_v28  ;;  %vm15024_vm9 = vmmov %vm14855_vm0 }
 0xa93   :  { %v6065_v19 = vrot.slane %v6064_v49, 2  ;;  %v6071_v34 = vadd.f32 %v6070_v41, %v6069_v18  ;;  %v12975_v38 = vpop.eup %9514  ;;  %9520 = vpow2.f32 %v5970_v53  ;;  %v5872_v9 = vrot.slane %v5871_v1, 1 }
 0xa94   :  { %v12979_v25 = vpop.eup %9516  ;;  %v6078_v54 = vsel %vm15001_vm10, %v12975_v38, 0.0  ;;  %v5972_v0 = vmul.f32 1.442695, %v5916_v63  ;;  %v5974_v58 = vmul.f32 1.442695, %v5917_v33  ;;  %v5880_v13 = vmax.f32 %v5878_v44, %v5879_v50  ;;  %vm15025_vm10 = vmmov %vm14855_vm0 }
 0xa95   :  { %15000 = vst [vmem:[#allocation108_spill] sm:$0xff] %v12979_v25  ;;  %v6066_v31 = vadd.f32 %v6065_v19, %v6064_v49  ;;  %v6072_v60 = vrot.slane %v6071_v34, 4  ;;  %v6079_v57 = vsel %vm15002_vm11, %v12979_v25, 0.0  ;;  %v5885_v24 = vmax.f32 %v5883_v39, %v5884_v14  ;;  %vm15026_vm11 = vmmov %vm14855_vm0 }
 0xa96   :  { %v6080_v42 = vadd.f32 %v6079_v57, %v6078_v54  ;;  %9522 = vpow2.f32 %v5972_v0  ;;  %v6616_v19 = vrot.slane %v12965_v45, %v14816_v7  ;;  %v5873_v41 = vmax.f32 %v5871_v1, %v5872_v9 }
 0xa97   :  { %v6067_v18 = vrot.slane %v6066_v31, 1  ;;  %v6073_v16 = vadd.f32 %v6072_v60, %v6071_v34  ;;  %9524 = vpow2.f32 %v5974_v58  ;;  %v5881_v28 = vrot.slane %v5880_v13, 1 }
 0xa98   :  { %v6081_v2 = vrot.slane %v6080_v42, 4  ;;  %v5886_v25 = vrot.slane %v5885_v24, 4  ;;  %v6632_v53 = vrot.slane %v6616_v19, %v14816_v7  ;;  %v6624_v33 = vcombine.high %v6616_v19, %v6616_v19 }
 0xa99   :  { %v6068_v59 = vadd.f32 %v6067_v18, %v6066_v31  ;;  %v6074_v49 = vrot.slane %v6073_v16, 2  ;;  %v5918_v60 = vsub.f32 %v12918_v56, %v5873_v41  ;;  %v5919_v44 = vsub.f32 %v12914_v20, %v5873_v41 }
 0xa9a   :  { %v6082_v34 = vadd.f32 %v6081_v2, %v6080_v42  ;;  %v5882_v14 = vmax.f32 %v5880_v13, %v5881_v28  ;;  %v5887_v39 = vmax.f32 %v5885_v24, %v5886_v25  ;;  %v6710_v54 = vrot.slane %v6632_v53, %v14817_v26 }
 0xa9b   :  { %9526 = vrcp.f32 %v6068_v59  ;;  %v6075_v63 = vadd.f32 %v6074_v49, %v6073_v16  ;;  %v6646_v1 = vrot.slane %v6624_v33, %v14816_v7  ;;  %v5976_v57 = vmul.f32 1.442695, %v5918_v60 }
 0xa9c   :  { %v6083_v31 = vrot.slane %v6082_v34, 2  ;;  %v5978_v0 = vmul.f32 1.442695, %v5919_v44  ;;  %v5920_v58 = vsub.f32 %v12932_v43, %v5882_v14  ;;  %v5921_v18 = vsub.f32 %v12924_v10, %v5882_v14  ;;  %v12994_v16 = vpop.eup %9518  ;;  %6771 = vrot.lane.b32.xlu0 %v6710_v54, %s9797_s17 }
 0xa9d   :  { %v6076_v50 = vrot.slane %v6075_v63, 1  ;;  %v5888_v9 = vrot.slane %v5887_v39, 2  ;;  %v6714_v25 = vrot.slane %v6646_v1, %v14817_v26  ;;  %v12998_v20 = vpop.eup %9520  ;;  %v6087_v13 = vsel %vm15003_vm12, %v12994_v16, 0.0  ;;  %vm15027_vm12 = vmmov %vm14855_vm0 }
 0xa9e   :  { %v6084_v56 = vadd.f32 %v6083_v31, %v6082_v34  ;;  %9528 = vpow2.f32 %v5976_v57  ;;  %v5980_v24 = vmul.f32 1.442695, %v5920_v58  ;;  %v5982_v19 = vmul.f32 1.442695, %v5921_v18 }
 0xa9f   :  { %v6077_v42 = vadd.f32 %v6076_v50, %v6075_v63  ;;  %v6088_v10 = vsel %vm15004_vm13, %v12998_v20, 0.0  ;;  %v5889_v59 = vmax.f32 %v5887_v39, %v5888_v9  ;;  %6773 = vrot.lane.b32.xlu1 %v6714_v25, %s9797_s17  ;;  %v6654_v41 = vcombine.high %v6632_v53, %v6632_v53  ;;  %vm15028_vm13 = vmmov %vm14855_vm0 }
 0xaa0   :  { %v6085_v43 = vrot.slane %v6084_v56, 1  ;;  %v13005_v49 = vpop.eup %9522  ;;  %v6089_v2 = vadd.f32 %v6088_v10, %v6087_v13  ;;  %v6656_v28 = vcombine.high %v6646_v1, %v6646_v1  ;;  %v6609_v58 = vcombine.high %v12965_v45, %v12965_v45 }
 0xaa1   :  { %9530 = vrcp.f32 %v6077_v42  ;;  %v13007_v63 = vpop.eup %9524  ;;  %v6096_v33 = vsel %vm15005_vm14, %v13005_v49, 0.0  ;;  %v5890_v60 = vrot.slane %v5889_v59, 1  ;;  %v6718_v39 = vrot.slane %v6654_v41, %v14817_v26  ;;  %vm15029_vm14 = vmmov %vm14855_vm0 }
 0xaa2   :  { %9532 = vpow2.f32 %v5978_v0  ;;  %v6086_v34 = vadd.f32 %v6085_v43, %v6084_v56  ;;  %v6090_v44 = vrot.slane %v6089_v2, 4  ;;  %v6097_v14 = vsel %vm15006_vm15, %v13007_v63, 0.0  ;;  %vm15030_vm15 = vmmov %vm14855_vm0 }
 0xaa3   :  { %9534 = vpow2.f32 %v5980_v24  ;;  %v6098_v53 = vadd.f32 %v6097_v14, %v6096_v33  ;;  %v5891_v31 = vmax.f32 %v5889_v59, %v5890_v60  ;;  %v6722_v54 = vrot.slane %v6656_v28, %v14817_v26  ;;  %6775 = vrot.lane.b32.xlu0 %v6718_v39, %s9797_s17 }
 0xaa4   :  { %9536 = vpow2.f32 %v5982_v19  ;;  %v6091_v57 = vadd.f32 %v6090_v44, %v6089_v2  ;;  %v13023_v0 = vadd.f32 %v12846_v5, %v12947_v46  ;;  %v6045_v9 = vrot.slane %v12840_v8, 4 }
 0xaa5   :  { %v13014_v50 = vpop.eup %9526  ;;  %9538 = vrcp.f32 %v6086_v34  ;;  %v6099_v18 = vrot.slane %v6098_v53, 4  ;;  %v5922_v42 = vsub.f32 %v12955_v35, %v5891_v31  ;;  %v5923_v56 = vsub.f32 %v12951_v12, %v5891_v31  ;;  %6777 = vrot.lane.b32.xlu1 %v6722_v54, %s9797_s17 }
 0xaa6   :  { %v13019_v1 = vmul.f32 %v13014_v50, %v12926_v52  ;;  %15007 = vst [vmem:[#allocation109_spill] sm:$0xff] %v13023_v0  ;;  %v6036_v52 = vrot.slane %v12808_v62, 4  ;;  %v6092_v25 = vrot.slane %v6091_v57, 2  ;;  %v6623_v5 = vrot.slane %v6609_v58, %v14816_v7 }
 0xaa7   :  { %v6054_v46 = vrot.slane %v12864_v30, 4  ;;  %v6100_v13 = vadd.f32 %v6099_v18, %v6098_v53  ;;  %v5984_v24 = vmul.f32 1.442695, %v5922_v42  ;;  %v5986_v19 = vmul.f32 1.442695, %v5923_v56 }
 0xaa8   :  { %v13035_v43 = vpop.eup %9528  ;;  %v6093_v10 = vadd.f32 %v6092_v25, %v6091_v57  ;;  %v6639_v35 = vrot.slane %v6623_v5, %v14816_v7  ;;  %v6625_v12 = vcombine.high %v6623_v5, %v6623_v5  ;;  %v6665_v59 = vrot.slane %v13023_v0, %v14816_v7 }
 0xaa9   :  { %v6101_v41 = vrot.slane %v6100_v13, 2  ;;  %v6105_v28 = vsel %vm14855_vm0, %v13035_v43, 0.0  ;;  %9540 = vpow2.f32 %v5984_v24  ;;  %v6658_v34 = vcombine.high %v13023_v0, %v13023_v0 }
 0xaaa   :  { %v6094_v44 = vrot.slane %v6093_v10, 1  ;;  %9542 = vpow2.f32 %v5986_v19  ;;  %v6726_v14 = vrot.slane %v6639_v35, %v14817_v26  ;;  %v6653_v54 = vrot.slane %v6625_v12, %v14816_v7 }
 0xaab   :  { %v13040_v2 = vpop.eup %9530  ;;  %v6102_v53 = vadd.f32 %v6101_v41, %v6100_v13  ;;  %v6655_v57 = vcombine.high %v6639_v35, %v6639_v35  ;;  %v6681_v56 = vrot.slane %v6665_v59, %v14816_v7  ;;  %v6673_v19 = vcombine.high %v6665_v59, %v6665_v59 }
 0xaac   :  { %v13046_v33 = vpop.eup %9532  ;;  %v13050_v60 = vmul.f32 %v13040_v2, %v12957_v15  ;;  %v6095_v18 = vadd.f32 %v6094_v44, %v6093_v10  ;;  %6779 = vrot.lane.b32.xlu0 %v6726_v14, %s9797_s17  ;;  %v6730_v24 = vrot.slane %v6653_v54, %v14817_v26  ;;  %v6037_v44 = vadd.f32 %v6036_v52, %v12808_v62 }
 0xaad   :  { %v13053_v39 = vpop.eup %9534  ;;  %v6106_v31 = vsel %vm15009_vm1, %v13046_v33, 0.0  ;;  %v6103_v5 = vrot.slane %v6102_v53, 1  ;;  %v6734_v12 = vrot.slane %v6655_v57, %v14817_v26  ;;  %v6046_v14 = vadd.f32 %v6045_v9, %v12840_v8  ;;  %vm15031_vm1 = vmmov %vm14855_vm0 }
 0xaae   :  { %15008 = vst [vmem:[#allocation110_spill] sm:$0xff] %v13050_v60  ;;  %v13058_v58 = vpop.eup %9536  ;;  %v6107_v42 = vadd.f32 %v6106_v31, %v6105_v28  ;;  %v6114_v15 = vsel %vm15010_vm3, %v13053_v39, 0.0  ;;  %9544 = vrcp.f32 %v6095_v18  ;;  %6781 = vrot.lane.b32.xlu1 %v6730_v24, %s9797_s17  ;;  %v6657_v28 = vcombine.high %v6653_v54, %v6653_v54  ;;  %vm15032_vm3 = vmmov %vm14855_vm0 }
 0xaaf   :  { %v13064_v25 = vpop.eup %9538  ;;  %v6115_v13 = vsel %vm15011_vm4, %v13058_v58, 0.0  ;;  %v6104_v41 = vadd.f32 %v6103_v5, %v6102_v53  ;;  %v6672_v31 = vrot.slane %v6658_v34, %v14816_v7  ;;  %v6055_v18 = vadd.f32 %v6054_v46, %v12864_v30  ;;  %vm15033_vm4 = vmmov %vm14855_vm0 }
 0xab0   :  { %v13071_v10 = vmul.f32 %v13064_v25, %v12975_v38  ;;  %v6116_v35 = vadd.f32 %v6115_v13, %v6114_v15  ;;  %6783 = vrot.lane.b32.xlu0 %v6734_v12, %s9797_s17  ;;  %v6738_v59 = vrot.slane %v6657_v28, %v14817_v26  ;;  %v6695_v38 = vrot.slane %v6673_v19, %v14816_v7  ;;  %v8329_v12 = vld [vmem:[%s14135_s21 + $0x10] sm:$0xff] }
 0xab1   :  { %9546 = vrcp.f32 %v6104_v41  ;;  %v6742_v53 = vrot.slane %v6681_v56, %v14817_v26  ;;  %v6703_v57 = vcombine.high %v6681_v56, %v6681_v56  ;;  %v6038_v8 = vrot.slane %v6037_v44, 2  ;;  %v8330_v41 = vld [vmem:[%s14135_s21 + $0x18] sm:$0xff] }
 0xab2   :  { %15012 = vst [vmem:[#allocation111_spill] sm:$0xff] %v13071_v10  ;;  %6785 = vrot.lane.b32.xlu1 %v6738_v59, %s9797_s17  ;;  %v6047_v52 = vrot.slane %v6046_v14, 2  ;;  %v6746_v30 = vrot.slane %v6695_v38, %v14817_v26  ;;  %v6705_v46 = vcombine.high %v6695_v38, %v6695_v38  ;;  %v6674_v54 = vcombine.high %v6672_v31, %v6672_v31 }
 0xab3   :  { %v13083_v15 = vpop.eup %9540  ;;  %v6056_v56 = vrot.slane %v6055_v18, 2  ;;  %v6750_v13 = vrot.slane %v6703_v57, %v14817_v26  ;;  %v6688_v24 = vrot.slane %v6672_v31, %v14816_v7  ;;  %v6108_v19 = vrot.slane %v6107_v42, 4 }
 0xab4   :  { %v13086_v62 = vpop.eup %9542  ;;  %v6123_v9 = vsel %vm15013_vm2, %v13083_v15, 0.0  ;;  %6787 = vrot.lane.b32.xlu0 %v6742_v53, %s9797_s17  ;;  %v6039_v59 = vadd.f32 %v6038_v8, %v6037_v44  ;;  %v6048_v38 = vadd.f32 %v6047_v52, %v6046_v14  ;;  %v6117_v53 = vrot.slane %v6116_v35, 4  ;;  %vm15034_vm2 = vmmov %vm14855_vm0 }
 0xab5   :  { %v6124_v34 = vsel %vm15014_vm5, %v13086_v62, 0.0  ;;  %v6758_v0 = vrot.slane %v6688_v24, %v14817_v26  ;;  %v6704_v45 = vcombine.high %v6688_v24, %v6688_v24  ;;  %v9118_v10 = vpack.c.bf16 %v8330_v41, %v8329_v12  ;;  %vm15035_vm5 = vmmov %vm14855_vm0 }
 0xab6   :  { %v6125_v5 = vadd.f32 %v6124_v34, %v6123_v9  ;;  %6789 = vrot.lane.b32.xlu1 %v6746_v30, %s9797_s17  ;;  %v6754_v9 = vrot.slane %v6705_v46, %v14817_v26  ;;  %v6702_v34 = vrot.slane %v6674_v54, %v14816_v7  ;;  %v6057_v30 = vadd.f32 %v6056_v56, %v6055_v18 }
 0xab7   :  { %v6109_v44 = vadd.f32 %v6108_v19, %v6107_v42  ;;  %v6040_v14 = vrot.slane %v6039_v59, 1  ;;  %v6118_v8 = vadd.f32 %v6117_v53, %v6116_v35  ;;  %9119 = vmatprep.subr.bf16.mxu0 %v9118_v10  ;;  %v6049_v7 = vrot.slane %v6048_v38, 1  ;;  %9125 = vmatprep.subr.bf16.mxu1 %v9118_v10 }
 0xab8   :  { %v13103_v28 = vpop.eup %9544  ;;  %6791 = vrot.lane.b32.xlu0 %v6750_v13, %s9797_s17  ;;  %v6126_v57 = vrot.slane %v6125_v5, 4  ;;  %v6762_v52 = vrot.slane %v6702_v34, %v14817_v26  ;;  %v6706_v46 = vcombine.high %v6702_v34, %v6702_v34  ;;  %9121 = vmatpush3.bf16.msra.mxu0 %v9118_v10  ;;  %v6058_v54 = vrot.slane %v6057_v30, 1 }
 0xab9   :  { %v13108_v31 = vmul.f32 %v13103_v28, %v12994_v16  ;;  %v6766_v42 = vrot.slane %v6704_v45, %v14817_v26  ;;  %v6110_v56 = vrot.slane %v6109_v44, 2  ;;  %v6041_v13 = vadd.f32 %v6040_v14, %v6039_v59  ;;  %9126 = vmatpush3.bf16.msra.mxu1 %v9118_v10  ;;  %v8328_v10 = vld [vmem:[%s14134_s20 + $0x2] sm:$0x3] }
 0xaba   :  { %6793 = vrot.lane.b32.xlu1 %v6754_v9, %s9797_s17  ;;  %v6127_v18 = vadd.f32 %v6126_v57, %v6125_v5  ;;  %v6770_v5 = vrot.slane %v6706_v46, %v14817_v26  ;;  %v6059_v24 = vadd.f32 %v6058_v54, %v6057_v30  ;;  %v6155_v46 = vmul.f32 %v12884_v17, %v12756_v61  ;;  %v15017_v17 = vld [vmem:[#allocation71_spill] sm:$0xff] }
 0xabb   :  { %v13113_v60 = vpop.eup %9546  ;;  %v6111_v19 = vadd.f32 %v6110_v56, %v6109_v44  ;;  %9548 = vrcp.f32 %v6041_v13  ;;  %v13131_v44 = vrot.slane %v8328_v10, %v14817_v26  ;;  %v6157_v26 = vmul.f32 %v12902_v36, %v12776_v55  ;;  %v15020_v56 = vld [vmem:[#allocation3_spill] sm:$0xff] }
 0xabc   :  { %v13118_v16 = vmul.f32 %v13113_v60, %v13005_v49  ;;  %6795 = vrot.lane.b32.xlu0 %v6758_v0, %s9797_s17  ;;  %v6119_v49 = vrot.slane %v6118_v8, 2  ;;  %v6050_v0 = vadd.f32 %v6049_v7, %v6048_v38  ;;  %v6128_v35 = vrot.slane %v6127_v18, 2 }
 0xabd   :  { %v6112_v41 = vrot.slane %v6111_v19, 1  ;;  %v6151_v7 = vmul.f32 %v12844_v22, %v12723_v11  ;;  %v6182_v55 = vmul.f32 %v15017_v17, %v12333_v6  ;;  %v6188_v13 = vmul.f32 %v15020_v56, %v12333_v6 }
 0xabe   :  { %6797 = vrot.lane.b32.xlu1 %v6762_v52, %s9797_s17  ;;  %v6120_v12 = vadd.f32 %v6119_v49, %v6118_v8  ;;  %9550 = vrcp.f32 %v6050_v0  ;;  %v6129_v45 = vadd.f32 %v6128_v35, %v6127_v18  ;;  %v6149_v8 = vmul.f32 %v12822_v47, %v12709_v4 }
 0xabf   :  { %9552 = vrcp.f32 %v6059_v24  ;;  %v6113_v57 = vadd.f32 %v6112_v41, %v6111_v19  ;;  %v6153_v18 = vmul.f32 %v12862_v48, %v12740_v40  ;;  %v13140_v52 = vrot.slane %v8328_v10, %v14819_v27  ;;  %v15015_v27 = vld [vmem:[#allocation38_spill] sm:$0xff] }
 0xac0   :  { %6799 = vrot.lane.b32.xlu0 %v6766_v42, %s9797_s17  ;;  %v6121_v53 = vrot.slane %v6120_v12, 1  ;;  %v6130_v59 = vrot.slane %v6129_v45, 1  ;;  %v6180_v48 = vmul.f32 %v15015_v27, %v12333_v6  ;;  %v15016_v42 = vld [vmem:[#allocation37_spill] sm:$0xff] }
 0xac1   :  { %9554 = vrcp.f32 %v6113_v57  ;;  %v6181_v61 = vmul.f32 %v6149_v8, %v15016_v42  ;;  %v6189_v49 = vmul.f32 %v6157_v26, %v15016_v42  ;;  %v6248_v26 = vsel %vm15029_vm14, %v6188_v13, 0.0  ;;  %vm15049_vm14 = vmmov %vm14855_vm0 }
 0xac2   :  { %6801 = vrot.lane.b32.xlu1 %v6770_v5, %s9797_s17  ;;  %v6122_v9 = vadd.f32 %v6121_v53, %v6120_v12  ;;  %v6131_v38 = vadd.f32 %v6130_v59, %v6129_v45  ;;  %v6212_v45 = vsel %vm15021_vm6, %v6180_v48, 0.0  ;;  %v6221_v59 = vsel %vm15023_vm8, %v6182_v55, 0.0 }
 0xac3   :  { %v6213_v41 = vsel %vm15022_vm7, %v6181_v61, 0.0  ;;  %vm15037_vm6 = vcmask 1041409   ;;  %vm15038_vm7 = vcmask 1042434   ;;  %vm15040_vm8 = vcmask 1043459  }
 0xac4   :  { %9556 = vrcp.f32 %v6122_v9  ;;  %v6214_v53 = vadd.f32 %v6213_v41, %v6212_v45 }
 0xac5   :  { %v9549_v34 = vpop.eup %9548  ;;  %9558 = vrcp.f32 %v6131_v38 }
 0xac6   :  { %v6158_v54 = vmul.f32 %v9549_v34, %v12790_v32  ;;  %v6159_v4 = vmul.f32 %v9549_v34, %v12794_v51  ;;  %v6183_v32 = vmul.f32 %v6151_v7, %v15016_v42  ;;  %v15018_v51 = vld [vmem:[#allocation36_spill] sm:$0xff]  ;;  %v6215_v7 = vrot.slane %v6214_v53, 4 }
 0xac7   :  { %v6184_v36 = vmul.f32 %v15018_v51, %v12333_v6 }
 0xac8   :  { %v9551_v30 = vpop.eup %9550  ;;  %v6190_v0 = vmul.f32 %v6158_v54, %v12333_v6  ;;  %v6191_v35 = vmul.f32 %v6159_v4, %v15016_v42  ;;  %v6222_v57 = vsel %vm15024_vm9, %v6183_v32, 0.0  ;;  %vm15041_vm9 = vcmask 1044484  }
 0xac9   :  { %v9553_v14 = vpop.eup %9552  ;;  %v6160_v47 = vmul.f32 %v9551_v30, %v12814_v37  ;;  %v6161_v22 = vmul.f32 %v9551_v30, %v12828_v3  ;;  %v6185_v37 = vmul.f32 %v6153_v18, %v15016_v42  ;;  %v15019_v3 = vld [vmem:[#allocation2_spill] sm:$0xff]  ;;  %v6230_v9 = vsel %vm15025_vm10, %v6184_v36, 0.0 }
 0xaca   :  { %v6162_v11 = vmul.f32 %v9553_v14, %v12848_v29  ;;  %v6163_v40 = vmul.f32 %v9553_v14, %v12856_v21  ;;  %v6186_v29 = vmul.f32 %v15019_v3, %v12333_v6  ;;  %v6187_v21 = vmul.f32 %v6155_v46, %v15016_v42 }
 0xacb   :  { %v6192_v5 = vmul.f32 %v6160_v47, %v12333_v6  ;;  %v6193_v24 = vmul.f32 %v6161_v22, %v15016_v42  ;;  %v13178_v10 = vpop.eup %9554  ;;  %v6223_v38 = vadd.f32 %v6222_v57, %v6221_v59  ;;  %v6231_v34 = vsel %vm15026_vm11, %v6185_v37, 0.0 }
 0xacc   :  { %v6194_v19 = vmul.f32 %v6162_v11, %v12333_v6  ;;  %v6195_v12 = vmul.f32 %v6163_v40, %v15016_v42  ;;  %v6239_v30 = vsel %vm15027_vm12, %v6186_v29, 0.0  ;;  %v6240_v14 = vsel %vm15028_vm13, %v6187_v21, 0.0  ;;  %vm15048_vm13 = vmmov %vm14855_vm0 }
 0xacd   :  { %v6232_v18 = vadd.f32 %v6231_v34, %v6230_v9  ;;  %v6241_v46 = vadd.f32 %v6240_v14, %v6239_v30  ;;  %v6224_v4 = vrot.slane %v6223_v38, 4  ;;  %v6249_v47 = vsel %vm15030_vm15, %v6189_v49, 0.0  ;;  %vm15050_vm15 = vmmov %vm14855_vm0 }
 0xace   :  { %v13183_v8 = vpop.eup %9556  ;;  %v6257_v22 = vsel %vm14855_vm0, %v6190_v0, 0.0  ;;  %v6258_v11 = vsel %vm15031_vm1, %v6191_v35, 0.0  ;;  %v6216_v40 = vadd.f32 %v6215_v7, %v6214_v53  ;;  %v6250_v61 = vadd.f32 %v6249_v47, %v6248_v26  ;;  %vm15051_vm1 = vmmov %vm14855_vm0 }
 0xacf   :  { %v13186_v54 = vpop.eup %9558  ;;  %v6233_v27 = vrot.slane %v6232_v18, 4  ;;  %v6242_v48 = vrot.slane %v6241_v46, 4  ;;  %v6225_v17 = vadd.f32 %v6224_v4, %v6223_v38  ;;  %v6259_v55 = vadd.f32 %v6258_v11, %v6257_v22 }
 0xad0   :  { %v6266_v32 = vsel %vm15032_vm3, %v6192_v5, 0.0  ;;  %v6267_v51 = vsel %vm15033_vm4, %v6193_v24, 0.0  ;;  %v6217_v36 = vrot.slane %v6216_v40, 2  ;;  %v6251_v29 = vrot.slane %v6250_v61, 4  ;;  %vm15052_vm3 = vmmov %vm14855_vm0 }
 0xad1   :  { %v6234_v37 = vadd.f32 %v6233_v27, %v6232_v18  ;;  %v6243_v3 = vadd.f32 %v6242_v48, %v6241_v46  ;;  %v6226_v21 = vrot.slane %v6225_v17, 2  ;;  %v6260_v56 = vrot.slane %v6259_v55, 4  ;;  %vm15053_vm4 = vmmov %vm14855_vm0 }
 0xad2   :  { %v6268_v13 = vadd.f32 %v6267_v51, %v6266_v32  ;;  %v6275_v49 = vsel %vm15034_vm2, %v6194_v19, 0.0  ;;  %v6218_v0 = vadd.f32 %v6217_v36, %v6216_v40  ;;  %v6252_v41 = vadd.f32 %v6251_v29, %v6250_v61  ;;  %vm15054_vm2 = vmmov %vm14855_vm0 }
 0xad3   :  { %v6235_v35 = vrot.slane %v6234_v37, 2  ;;  %v6244_v45 = vrot.slane %v6243_v3, 2  ;;  %v6227_v53 = vadd.f32 %v6226_v21, %v6225_v17  ;;  %v6261_v59 = vadd.f32 %v6260_v56, %v6259_v55  ;;  %v15039_v21 = vld [vmem:[#allocation108_spill] sm:$0xff] }
 0xad4   :  { %v6269_v57 = vrot.slane %v6268_v13, 4  ;;  %v6276_v5 = vsel %vm15035_vm5, %v6195_v12, 0.0  ;;  %v6219_v9 = vrot.slane %v6218_v0, 1  ;;  %v6253_v34 = vrot.slane %v6252_v41, 2  ;;  %v15036_v12 = vld [vmem:[#allocation106_spill] sm:$0xff]  ;;  %vm15055_vm5 = vmmov %vm14855_vm0 }
 0xad5   :  { %v6236_v24 = vadd.f32 %v6235_v35, %v6234_v37  ;;  %v6245_v38 = vadd.f32 %v6244_v45, %v6243_v3  ;;  %v6228_v30 = vrot.slane %v6227_v53, 1  ;;  %v6262_v14 = vrot.slane %v6261_v59, 2 }
 0xad6   :  { %v6270_v7 = vadd.f32 %v6269_v57, %v6268_v13  ;;  %v6277_v18 = vadd.f32 %v6276_v5, %v6275_v49  ;;  %v6220_v46 = vadd.f32 %v6219_v9, %v6218_v0  ;;  %v6254_v4 = vadd.f32 %v6253_v34, %v6252_v41 }
 0xad7   :  { %v6237_v26 = vrot.slane %v6236_v24, 1  ;;  %v6246_v19 = vrot.slane %v6245_v38, 1  ;;  %v6229_v47 = vadd.f32 %v6228_v30, %v6227_v53  ;;  %v6263_v22 = vadd.f32 %v6262_v14, %v6261_v59 }
 0xad8   :  { %v6271_v11 = vrot.slane %v6270_v7, 2  ;;  %v6278_v40 = vrot.slane %v6277_v18, 4  ;;  %v6255_v61 = vrot.slane %v6254_v4, 1  ;;  %v6165_v17 = vmul.f32 %v13014_v50, %v15036_v12 }
 0xad9   :  { %v6238_v27 = vadd.f32 %v6237_v26, %v6236_v24  ;;  %v6247_v48 = vadd.f32 %v6246_v19, %v6245_v38  ;;  %v6264_v55 = vrot.slane %v6263_v22, 1  ;;  %v6372_v36 = vsel %vm15037_vm6, %v6229_v47, %v6220_v46  ;;  %vm15056_vm6 = vmmov %vm14855_vm0 }
 0xada   :  { %v6272_v32 = vadd.f32 %v6271_v11, %v6270_v7  ;;  %v6279_v51 = vadd.f32 %v6278_v40, %v6277_v18  ;;  %v6256_v37 = vadd.f32 %v6255_v61, %v6254_v4  ;;  %v6167_v29 = vmul.f32 %v13040_v2, %v12967_v23 }
 0xadb   :  { %v6373_v3 = vsel %vm15038_vm7, %v6238_v27, %v6372_v36  ;;  %v6169_v56 = vmul.f32 %v13064_v25, %v15039_v21  ;;  %v6265_v13 = vadd.f32 %v6264_v55, %v6263_v22  ;;  %v6171_v45 = vmul.f32 %v13103_v28, %v12998_v20  ;;  %vm15057_vm7 = vmmov %vm14855_vm0 }
 0xadc   :  { %v6273_v49 = vrot.slane %v6272_v32, 1  ;;  %v6280_v0 = vrot.slane %v6279_v51, 2  ;;  %v6374_v35 = vsel %vm15040_vm8, %v6247_v48, %v6373_v3  ;;  %v6173_v41 = vmul.f32 %v13113_v60, %v13007_v63  ;;  %vm15058_vm8 = vmmov %vm14855_vm0 }
 0xadd   :  { %v6375_v50 = vsel %vm15041_vm9, %v6256_v37, %v6374_v35  ;;  %v6174_v53 = vmul.f32 %v13178_v10, %v13035_v43  ;;  %vm15042_vm10 = vcmask 1045509   ;;  %v6175_v59 = vmul.f32 %v13178_v10, %v13046_v33  ;;  %v15043_v43 = vld [vmem:[#allocation4_spill] sm:$0xff]  ;;  %vm15059_vm9 = vmmov %vm14855_vm0 }
 0xade   :  { %v6274_v23 = vadd.f32 %v6273_v49, %v6272_v32  ;;  %v6281_v2 = vadd.f32 %v6280_v0, %v6279_v51  ;;  %v6376_v25 = vsel %vm15042_vm10, %v6265_v13, %v6375_v50  ;;  %v6176_v57 = vmul.f32 %v13183_v8, %v13053_v39  ;;  %vm15060_vm10 = vmmov %vm14855_vm0 }
 0xadf   :  { %v6177_v5 = vmul.f32 %v13183_v8, %v13058_v58  ;;  %v6178_v20 = vmul.f32 %v13186_v54, %v13083_v15  ;;  %v6179_v63 = vmul.f32 %v13186_v54, %v13086_v62  ;;  %v13224_v60 = vmul.f32 %v13131_v44, %v15043_v43  ;;  %v15045_v58 = vld [vmem:[#allocation110_spill] sm:$0xff]  ;;  %v15046_v8 = vld [vmem:[#allocation111_spill] sm:$0xff] }
 0xae0   :  { %v6282_v28 = vrot.slane %v6281_v2, 1  ;;  %vm15044_vm11 = vcmask 1046534   ;;  %v6196_v33 = vmul.f32 %v13019_v1, %v12333_v6  ;;  %v6197_v39 = vmul.f32 %v6165_v17, %v15016_v42 }
 0xae1   :  { %v6377_v9 = vsel %vm15044_vm11, %v6274_v23, %v6376_v25  ;;  %v6198_v10 = vmul.f32 %v15045_v58, %v12333_v6  ;;  %v6199_v15 = vmul.f32 %v6167_v29, %v15016_v42  ;;  %v6200_v62 = vmul.f32 %v15046_v8, %v12333_v6  ;;  %vm15061_vm11 = vmmov %vm14855_vm0 }
 0xae2   :  { %v6283_v54 = vadd.f32 %v6282_v28, %v6281_v2  ;;  %v6201_v24 = vmul.f32 %v6169_v56, %v15016_v42  ;;  %v6202_v38 = vmul.f32 %v13108_v31, %v12333_v6  ;;  %v6203_v34 = vmul.f32 %v6171_v45, %v15016_v42 }
 0xae3   :  { %v6204_v1 = vmul.f32 %v13118_v16, %v12333_v6  ;;  %v6205_v30 = vmul.f32 %v6173_v41, %v15016_v42  ;;  %v6206_v14 = vmul.f32 %v6174_v53, %v12333_v6  ;;  %v6207_v7 = vmul.f32 %v6175_v59, %v15016_v42 }
 0xae4   :  { %vm15047_vm12 = vcmask 1047559   ;;  %v6208_v46 = vmul.f32 %v6176_v57, %v12333_v6  ;;  %v6209_v26 = vmul.f32 %v6177_v5, %v15016_v42  ;;  %v6210_v31 = vmul.f32 %v6178_v20, %v12333_v6 }
 0xae5   :  { %v13245_v18 = vsel %vm15047_vm12, %v6283_v54, %v6377_v9  ;;  %v6211_v19 = vmul.f32 %v6179_v63, %v15016_v42  ;;  %v6284_v4 = vsel %vm15048_vm13, %v6196_v33, 0.0  ;;  %v6285_v16 = vsel %vm15049_vm14, %v6197_v39, 0.0  ;;  %vm15062_vm12 = vmmov %vm14855_vm0 }
 0xae6   :  { %v6293_v47 = vsel %vm15050_vm15, %v6198_v10, 0.0  ;;  %v6286_v22 = vadd.f32 %v6285_v16, %v6284_v4  ;;  %v6294_v11 = vsel %vm14855_vm0, %v6199_v15, 0.0  ;;  %v6302_v40 = vsel %vm15051_vm1, %v6200_v62, 0.0 }
 0xae7   :  { %v6303_v27 = vsel %vm15052_vm3, %v6201_v24, 0.0  ;;  %v6295_v48 = vadd.f32 %v6294_v11, %v6293_v47  ;;  %v6311_v12 = vsel %vm15053_vm4, %v6202_v38, 0.0  ;;  %v6312_v6 = vsel %vm15054_vm2, %v6203_v34, 0.0 }
 0xae8   :  { %v6304_v61 = vadd.f32 %v6303_v27, %v6302_v40  ;;  %v6287_v42 = vrot.slane %v6286_v22, 4  ;;  %v6313_v17 = vadd.f32 %v6312_v6, %v6311_v12  ;;  %v6320_v55 = vsel %vm15055_vm5, %v6204_v1, 0.0  ;;  %v15066_v6 = vld [vmem:[#allocation5_spill] sm:$0xff] }
 0xae9   :  { %v6321_v32 = vsel %vm15056_vm6, %v6205_v30, 0.0  ;;  %v6296_v51 = vrot.slane %v6295_v48, 4  ;;  %v6329_v3 = vsel %vm15057_vm7, %v6206_v14, 0.0  ;;  %v6330_v56 = vsel %vm15058_vm8, %v6207_v7, 0.0  ;;  %vm15108_vm8 = vmmov %vm15057_vm7 }
 0xaea   :  { %v6305_v36 = vrot.slane %v6304_v61, 4  ;;  %v6322_v37 = vadd.f32 %v6321_v32, %v6320_v55  ;;  %v6288_v29 = vadd.f32 %v6287_v42, %v6286_v22  ;;  %v6314_v21 = vrot.slane %v6313_v17, 4 }
 0xaeb   :  { %v6338_v13 = vsel %vm15059_vm9, %v6208_v46, 0.0  ;;  %v6297_v49 = vadd.f32 %v6296_v51, %v6295_v48  ;;  %v6331_v50 = vadd.f32 %v6330_v56, %v6329_v3  ;;  %v6339_v53 = vsel %vm15060_vm10, %v6209_v26, 0.0  ;;  %vm15109_vm10 = vmmov %vm15057_vm7 }
 0xaec   :  { %v6306_v0 = vadd.f32 %v6305_v36, %v6304_v61  ;;  %v6323_v35 = vrot.slane %v6322_v37, 4  ;;  %v6289_v45 = vrot.slane %v6288_v29, 2  ;;  %v6315_v41 = vadd.f32 %v6314_v21, %v6313_v17  ;;  %v15067_v17 = vld [vmem:[#allocation7_spill] sm:$0xff]  ;;  %v15070_v21 = vld [vmem:[#allocation8_spill] sm:$0xff] }
 0xaed   :  { %v6347_v23 = vsel %vm15061_vm11, %v6210_v31, 0.0  ;;  %v6298_v2 = vrot.slane %v6297_v49, 2  ;;  %v6332_v57 = vrot.slane %v6331_v50, 4  ;;  %v6340_v63 = vadd.f32 %v6339_v53, %v6338_v13  ;;  %v15071_v13 = vld [vmem:[#allocation10_spill] sm:$0xff]  ;;  %v15075_v53 = vld [vmem:[#allocation13_spill] sm:$0xff] }
 0xaee   :  { %v6307_v25 = vrot.slane %v6306_v0, 2  ;;  %v6324_v59 = vadd.f32 %v6323_v35, %v6322_v37  ;;  %v6290_v5 = vadd.f32 %v6289_v45, %v6288_v29  ;;  %v6316_v20 = vrot.slane %v6315_v41, 2  ;;  %v15074_v45 = vld [vmem:[#allocation11_spill] sm:$0xff] }
 0xaef   :  { %v6348_v43 = vsel %vm15062_vm12, %v6211_v19, 0.0  ;;  %v6299_v28 = vadd.f32 %v6298_v2, %v6297_v49  ;;  %v6333_v39 = vadd.f32 %v6332_v57, %v6331_v50  ;;  %v6341_v15 = vrot.slane %v6340_v63, 4  ;;  %v15063_v19 = vld [vmem:[#allocation6_spill] sm:$0xff]  ;;  %v15077_v57 = vld [vmem:[#allocation12_spill] sm:$0xff]  ;;  %vm15114_vm12 = vmmov %vm15057_vm7 }
 0xaf0   :  { %v6308_v9 = vadd.f32 %v6307_v25, %v6306_v0  ;;  %v6325_v33 = vrot.slane %v6324_v59, 2  ;;  %v6291_v58 = vrot.slane %v6290_v5, 1  ;;  %v6317_v10 = vadd.f32 %v6316_v20, %v6315_v41  ;;  %v15072_v0 = vld [vmem:[#allocation9_spill] sm:$0xff]  ;;  %v15076_v25 = vld [vmem:[#allocation15_spill] sm:$0xff]  ;;  %v15078_v20 = vld [vmem:[#allocation14_spill] sm:$0xff] }
 0xaf1   :  { %v6349_v8 = vadd.f32 %v6348_v43, %v6347_v23  ;;  %v6300_v62 = vrot.slane %v6299_v28, 1  ;;  %v6334_v38 = vrot.slane %v6333_v39, 2  ;;  %v6342_v30 = vadd.f32 %v6341_v15, %v6340_v63  ;;  %v15079_v43 = vld [vmem:[#allocation16_spill] sm:$0xff] }
 0xaf2   :  { %v6309_v54 = vrot.slane %v6308_v9, 1  ;;  %v6326_v24 = vadd.f32 %v6325_v33, %v6324_v59  ;;  %v6292_v34 = vadd.f32 %v6291_v58, %v6290_v5  ;;  %v6318_v1 = vrot.slane %v6317_v10, 1 }
 0xaf3   :  { %v6350_v14 = vrot.slane %v6349_v8, 4  ;;  %v6301_v7 = vadd.f32 %v6300_v62, %v6299_v28  ;;  %v6335_v31 = vadd.f32 %v6334_v38, %v6333_v39  ;;  %v6543_v4 = vmul.f32 %v13140_v52, %v15063_v19  ;;  %v15081_v39 = vld [vmem:[#allocation17_spill] sm:$0xff]  ;;  %v15085_v38 = vld [vmem:[#allocation23_spill] sm:$0xff] }
 0xaf4   :  { %v6310_v46 = vadd.f32 %v6309_v54, %v6308_v9  ;;  %v6327_v26 = vrot.slane %v6326_v24, 1  ;;  %v6319_v16 = vadd.f32 %v6318_v1, %v6317_v10  ;;  %v6343_v47 = vrot.slane %v6342_v30, 2  ;;  %v15080_v9 = vld [vmem:[#allocation18_spill] sm:$0xff]  ;;  %v15084_v54 = vld [vmem:[#allocation21_spill] sm:$0xff]  ;;  %v15086_v1 = vld [vmem:[#allocation20_spill] sm:$0xff] }
 0xaf5   :  { %v6351_v22 = vadd.f32 %v6350_v14, %v6349_v8  ;;  %v6336_v40 = vrot.slane %v6335_v31, 1  ;;  %vm15064_vm13 = vcmask 1041409   ;;  %vm15065_vm14 = vcmask 1042434   ;;  %v15083_v8 = vld [vmem:[#allocation19_spill] sm:$0xff]  ;;  %v15087_v14 = vld [vmem:[#allocation22_spill] sm:$0xff] }
 0xaf6   :  { %v6328_v11 = vadd.f32 %v6327_v26, %v6326_v24  ;;  %v6379_v27 = vsel %vm15064_vm13, %v6301_v7, %v6292_v34  ;;  %v6344_v48 = vadd.f32 %v6343_v47, %v6342_v30  ;;  %v6508_v42 = vmul.f32 %v13131_v44, %v15066_v6 }
 0xaf7   :  { %v6352_v61 = vrot.slane %v6351_v22, 2  ;;  %v6380_v12 = vsel %vm15065_vm14, %v6310_v46, %v6379_v27  ;;  %v6544_v55 = vmul.f32 %v13140_v52, %v15067_v17  ;;  %v6337_v32 = vadd.f32 %v6336_v40, %v6335_v31  ;;  %v15088_v46 = vld [vmem:[#allocation24_spill] sm:$0xff]  ;;  %v15089_v31 = vld [vmem:[#allocation25_spill] sm:$0xff]  ;;  %v15093_v40 = vld [vmem:[#allocation27_spill] sm:$0xff] }
 0xaf8   :  { %vm15068_vm15 = vcmask 1043459   ;;  %v6575_v36 = vadd.f32 %v6543_v4, %v13224_v60  ;;  %v6345_v37 = vrot.slane %v6344_v48, 1  ;;  %vm15069_vm0 = vcmask 1044484   ;;  %v15095_v17 = vld [vmem:[#allocation28_spill] sm:$0xff] }
 0xaf9   :  { %v6381_v51 = vsel %vm15068_vm15, %v6319_v16, %v6380_v12  ;;  %v6353_v3 = vadd.f32 %v6352_v61, %v6351_v22  ;;  %v6509_v56 = vmul.f32 %v13131_v44, %v15070_v21  ;;  %v6510_v49 = vmul.f32 %v13131_v44, %v15071_v13  ;;  %v15092_v22 = vld [vmem:[#allocation26_spill] sm:$0xff]  ;;  %v15094_v12 = vld [vmem:[#allocation29_spill] sm:$0xff]  ;;  %vm15117_vm15 = vmmov %vm15057_vm7 }
 0xafa   :  { %v6382_v29 = vsel %vm15069_vm0, %v6328_v11, %v6381_v51  ;;  %v6545_v35 = vmul.f32 %v13140_v52, %v15072_v0  ;;  %vm15073_vm1 = vcmask 1045509   ;;  %v6546_v41 = vmul.f32 %v13140_v52, %v15074_v45  ;;  %v15099_v45 = vld [vmem:[#allocation109_spill] sm:$0xff] }
 0xafb   :  { %v6383_v50 = vsel %vm15073_vm1, %v6337_v32, %v6382_v29  ;;  %v6511_v60 = vmul.f32 %v13131_v44, %v15075_v53  ;;  %v6346_v23 = vadd.f32 %v6345_v37, %v6344_v48  ;;  %v6354_v2 = vrot.slane %v6353_v3, 1  ;;  %vm15119_vm1 = vmmov %vm15057_vm7 }
 0xafc   :  { %v6512_v59 = vmul.f32 %v13131_v44, %v15076_v25  ;;  %v6547_v5 = vmul.f32 %v13140_v52, %v15077_v57  ;;  %v6548_v63 = vmul.f32 %v13140_v52, %v15078_v20  ;;  %v6513_v28 = vmul.f32 %v13131_v44, %v15079_v43 }
 0xafd   :  { %v6514_v33 = vmul.f32 %v13131_v44, %v15080_v9  ;;  %v6549_v58 = vmul.f32 %v13140_v52, %v15081_v39  ;;  %v6355_v10 = vadd.f32 %v6354_v2, %v6353_v3  ;;  %vm15082_vm3 = vcmask 1046534  }
 0xafe   :  { %v6384_v15 = vsel %vm15082_vm3, %v6346_v23, %v6383_v50  ;;  %v6550_v62 = vmul.f32 %v13140_v52, %v15083_v8  ;;  %v6515_v24 = vmul.f32 %v13131_v44, %v15084_v54  ;;  %v6516_v34 = vmul.f32 %v13131_v44, %v15085_v38  ;;  %v15105_v8 = vld [vmem:[#allocation42_spill] sm:$0xff]  ;;  %v15106_v54 = vld [vmem:[#allocation39_spill] sm:$0xff]  ;;  %vm15122_vm3 = vmmov %vm15119_vm1 }
 0xaff   :  { %v6551_v30 = vmul.f32 %v13140_v52, %v15086_v1  ;;  %v6552_v7 = vmul.f32 %v13140_v52, %v15087_v14  ;;  %v6517_v26 = vmul.f32 %v13131_v44, %v15088_v46  ;;  %v6553_v19 = vmul.f32 %v13140_v52, %v15089_v31  ;;  %v15107_v31 = vld [vmem:[#allocation41_spill] sm:$0xff] }
 0xb00   :  { %vm15090_vm4 = vcmask 1047559   ;;  %v6576_v16 = vadd.f32 %v6544_v55, %v6508_v42  ;;  %v6577_v47 = vadd.f32 %v6545_v35, %v6509_v56  ;;  %v6518_v11 = vmul.f32 %v13131_v44, %v15092_v22  ;;  %v15096_v56 = vld [vmem:[#allocation31_spill] sm:$0xff]  ;;  %v15098_v35 = vld [vmem:[#allocation107_spill] sm:$0xff] }
 0xb01   :  { %v13317_v4 = vsel %vm15090_vm4, %v6355_v10, %v6384_v15  ;;  %v6554_v27 = vmul.f32 %v13140_v52, %v15093_v40  ;;  %v6578_v48 = vadd.f32 %v6546_v41, %v6510_v49  ;;  %v6579_v61 = vadd.f32 %v6547_v5, %v6511_v60  ;;  %v15097_v49 = vld [vmem:[#allocation30_spill] sm:$0xff]  ;;  %v15100_v60 = vld [vmem:[#allocation32_spill] sm:$0xff]  ;;  %v15102_v5 = vld [vmem:[#allocation33_spill] sm:$0xff] }
 0xb02   :  { %15091 = vst [vmem:[#allocation38_spill] sm:$0xff] %v13317_v4  ;;  %v6519_v6 = vmul.f32 %v13131_v44, %v15094_v12  ;;  %v6555_v32 = vmul.f32 %v13140_v52, %v15095_v17  ;;  %v6580_v51 = vadd.f32 %v6548_v63, %v6512_v59  ;;  %v6581_v37 = vadd.f32 %v6549_v58, %v6513_v28  ;;  %v15101_v59 = vld [vmem:[#allocation34_spill] sm:$0xff]  ;;  %v15103_v63 = vld [vmem:[#allocation35_spill] sm:$0xff]  ;;  %v15104_v10 = vld [vmem:[#allocation40_spill] sm:$0xff] }
 0xb03   :  { %v6582_v3 = vadd.f32 %v6550_v62, %v6514_v33  ;;  %v13327_v29 = vadd.f32 %v6551_v30, %v6515_v24  ;;  %v13329_v55 = vadd.f32 %v6552_v7, %v6516_v34  ;;  %v13331_v21 = vadd.f32 %v6553_v19, %v6517_v26 }
 0xb04   :  { %v6520_v13 = vmul.f32 %v13131_v44, %v15096_v56  ;;  %v6556_v0 = vmul.f32 %v13140_v52, %v15097_v49  ;;  %v13339_v53 = vadd.f32 %v6554_v27, %v6518_v11  ;;  %v6521_v23 = vmul.f32 %v13131_v44, %v15100_v60  ;;  %v15111_v56 = vld [vmem:[#allocation45_spill] sm:$0xff]  ;;  %v15113_v60 = vld [vmem:[#allocation46_spill] sm:$0xff] }
 0xb05   :  { %v13343_v25 = vadd.f32 %v6555_v32, %v6519_v6  ;;  %v6522_v57 = vmul.f32 %v13131_v44, %v15101_v59  ;;  %v6557_v20 = vmul.f32 %v13140_v52, %v15102_v5  ;;  %v6558_v43 = vmul.f32 %v13140_v52, %v15103_v63  ;;  %v15110_v32 = vld [vmem:[#allocation43_spill] sm:$0xff] }
 0xb06   :  { %v13353_v58 = vadd.f32 %v6556_v0, %v6520_v13  ;;  %v6523_v15 = vmul.f32 %v13131_v44, %v15104_v10  ;;  %v6524_v62 = vmul.f32 %v13131_v44, %v15105_v8  ;;  %v6559_v24 = vmul.f32 %v13140_v52, %v15106_v54 }
 0xb07   :  { %v13361_v30 = vadd.f32 %v6557_v20, %v6521_v23  ;;  %v13363_v14 = vadd.f32 %v6558_v43, %v6522_v57  ;;  %v6560_v19 = vmul.f32 %v13140_v52, %v15107_v31  ;;  %v6526_v13 = vmul.f32 %v13131_v44, %v15111_v56  ;;  %v15115_v57 = vld [vmem:[#allocation48_spill] sm:$0xff]  ;;  %v15116_v20 = vld [vmem:[#allocation47_spill] sm:$0xff] }
 0xb08   :  { %v6562_v23 = vmul.f32 %v13140_v52, %v15113_v60  ;;  %v6527_v5 = vmul.f32 %v13131_v44, %v15115_v57  ;;  %v13387_v63 = vadd.f32 %v6559_v24, %v6523_v15  ;;  %v15120_v24 = vld [vmem:[#allocation49_spill] sm:$0xff] }
 0xb09   :  { %v13389_v43 = vadd.f32 %v6560_v19, %v6524_v62  ;;  %v15123_v19 = vld [vmem:[#allocation53_spill] sm:$0xff] }
 0xb0e   :  { %v6772_v42 = vpop.permute.xlu0 %6771 }
 0xb0f   :  { %v6819_v50 = vadd.f32 %v6772_v42, %v15098_v35  ;;  %v6820_v41 = vadd.f32 %v6772_v42, %v15099_v45  ;;  %v6525_v42 = vmul.f32 %v13131_v44, %v15110_v32 }
 0xb11   :  { %v6774_v2 = vpop.permute.xlu1 %6773  ;;  %v6851_v28 = vadd.f32 %v6819_v50, %v6575_v36  ;;  %v6852_v9 = vadd.f32 %v6820_v41, %v6576_v16  ;;  %v15112_v50 = vld [vmem:[#allocation44_spill] sm:$0xff] }
 0xb12   :  { %v6821_v33 = vadd.f32 %v6774_v2, %v15098_v35  ;;  %v6822_v39 = vadd.f32 %v6774_v2, %v15099_v45  ;;  %v6561_v41 = vmul.f32 %v13140_v52, %v15112_v50 }
 0xb13   :  { %vm6883_vm2 = vcmp.ge.f32.partialorder %v6851_v28, 0.0  ;;  %v6915_v36 = vmul.f32 0.2, %v6851_v28  ;;  %vm6884_vm5 = vcmp.ge.f32.partialorder %v6852_v9, 0.0  ;;  %v6916_v1 = vmul.f32 0.2, %v6852_v9 }
 0xb14   :  { %v6853_v38 = vadd.f32 %v6821_v33, %v6577_v47  ;;  %v6854_v34 = vadd.f32 %v6822_v39, %v6578_v48  ;;  %v13394_v33 = vadd.f32 %v6562_v23, %v6526_v13  ;;  %v15118_v39 = vld [vmem:[#allocation50_spill] sm:$0xff] }
 0xb15   :  { %v6776_v7 = vpop.permute.xlu0 %6775  ;;  %v6947_v46 = vsel %vm6883_vm2, %v6851_v28, %v6915_v36  ;;  %v6948_v11 = vsel %vm6884_vm5, %v6852_v9, %v6916_v1  ;;  %v13392_v9 = vadd.f32 %v6561_v41, %v6525_v42  ;;  %v6528_v10 = vmul.f32 %v13131_v44, %v15118_v39  ;;  %v15121_v1 = vld [vmem:[#allocation51_spill] sm:$0xff]  ;;  %vm15126_vm2 = vmmov %vm15119_vm1  ;;  %v15127_v41 = vld [vmem:[#allocation56_spill] sm:$0xff] }
 0xb16   :  { %vm6885_vm6 = vcmp.ge.f32.partialorder %v6853_v38, 0.0  ;;  %v6917_v26 = vmul.f32 0.2, %v6853_v38  ;;  %v6823_v16 = vadd.f32 %v6776_v7, %v15098_v35  ;;  %v6824_v47 = vadd.f32 %v6776_v7, %v15099_v45  ;;  %8971 = vmatprep.mubr.msk.f32.mxu0 %vm15057_vm7, %v6947_v46 }
 0xb17   :  { %v6778_v22 = vpop.permute.xlu1 %6777  ;;  %v6918_v40 = vmul.f32 0.2, %v6854_v34  ;;  %8972 = vmatmul.mubr.msk.f32.vlgmr.msra.gmra.mrb[2].mxu0 %vm15108_vm8, %v6948_v11  ;;  %vm6886_vm9 = vcmp.ge.f32.partialorder %v6854_v34, 0.0  ;;  %v6529_v7 = vmul.f32 %v13131_v44, %v15121_v1  ;;  %v6531_v60 = vmul.f32 %v13131_v44, %v15127_v41  ;;  %vm15131_vm8 = vmmov %vm15119_vm1  ;;  %v15143_v41 = vld [vmem:[#allocation61_spill] sm:$0xff] }
 0xb18   :  { %v6825_v27 = vadd.f32 %v6778_v22, %v15098_v35  ;;  %v6826_v48 = vadd.f32 %v6778_v22, %v15099_v45  ;;  %v6949_v12 = vsel %vm6885_vm6, %v6853_v38, %v6917_v26  ;;  %v6855_v6 = vadd.f32 %v6823_v16, %v6579_v61  ;;  %vm15128_vm6 = vmmov %vm15119_vm1 }
 0xb19   :  { %v6856_v17 = vadd.f32 %v6824_v47, %v6580_v51  ;;  %8974 = vmatprep.mubr.msk.f32.mxu0 %vm15109_vm10, %v6949_v12  ;;  %v6950_v2 = vsel %vm6886_vm9, %v6854_v34, %v6918_v40  ;;  %v6564_v34 = vmul.f32 %v13140_v52, %v15120_v24  ;;  %v6530_v16 = vmul.f32 %v13131_v44, %v15123_v19  ;;  %v15124_v47 = vld [vmem:[#allocation52_spill] sm:$0xff]  ;;  %v15125_v12 = vld [vmem:[#allocation54_spill] sm:$0xff] }
 0xb1a   :  { %v6857_v49 = vadd.f32 %v6825_v27, %v6581_v37  ;;  %v6858_v0 = vadd.f32 %v6826_v48, %v6582_v3  ;;  %vm6887_vm11 = vcmp.ge.f32.partialorder %v6855_v6, 0.0  ;;  %v6919_v61 = vmul.f32 0.2, %v6855_v6 }
 0xb1b   :  { %v6920_v51 = vmul.f32 0.2, %v6856_v17  ;;  %8975 = vmatmul.mubr.msk.f32.gmra.mrb[4].mxu0 %vm15114_vm12, %v6950_v2  ;;  %vm6888_vm13 = vcmp.ge.f32.partialorder %v6856_v17, 0.0  ;;  %v6563_v37 = vmul.f32 %v13140_v52, %v15116_v20  ;;  %v6565_v22 = vmul.f32 %v13140_v52, %v15124_v47  ;;  %v15130_v20 = vld [vmem:[#allocation55_spill] sm:$0xff]  ;;  %vm15135_vm12 = vmmov %vm15119_vm1 }
 0xb1c   :  { %v6921_v59 = vmul.f32 0.2, %v6857_v49  ;;  %v6951_v3 = vsel %vm6887_vm11, %v6855_v6, %v6919_v61  ;;  %vm6889_vm14 = vcmp.ge.f32.partialorder %v6857_v49, 0.0  ;;  %v6922_v8 = vmul.f32 0.2, %v6858_v0  ;;  %vm15133_vm11 = vmmov %vm15119_vm1 }
 0xb1d   :  { %8977 = vmatprep.mubr.msk.f32.mxu0 %vm15117_vm15, %v6951_v3  ;;  %v6952_v15 = vsel %vm6888_vm13, %v6856_v17, %v6920_v51  ;;  %vm6890_vm0 = vcmp.ge.f32.partialorder %v6858_v0, 0.0  ;;  %v13404_v36 = vadd.f32 %v6563_v37, %v6527_v5 }
 0xb1e   :  { %v6780_v28 = vpop.permute.xlu0 %6779  ;;  %v6953_v62 = vsel %vm6889_vm14, %v6857_v49, %v6921_v59  ;;  %v6954_v48 = vsel %vm6890_vm0, %v6858_v0, %v6922_v8  ;;  %v13425_v0 = vadd.f32 %v6564_v34, %v6528_v10  ;;  %vm15137_vm14 = vmmov %vm15119_vm1 }
 0xb1f   :  { %v6827_v54 = vadd.f32 %v6780_v28, %v15098_v35  ;;  %v6828_v38 = vadd.f32 %v6780_v28, %v15099_v45  ;;  %8978 = vmatmul.mubr.msk.f32.gmra.mrb[6].mxu0 %vm15119_vm1, %v6952_v15  ;;  %v13440_v28 = vadd.f32 %v6565_v22, %v6529_v7  ;;  %v15134_v15 = vld [vmem:[#allocation59_spill] sm:$0xff]  ;;  %v15136_v22 = vld [vmem:[#allocation60_spill] sm:$0xff]  ;;  %vm15142_vm0 = vmmov %vm15119_vm1 }
 0xb20   :  { %v6782_v31 = vpop.permute.xlu1 %6781  ;;  %8980 = vmatprep.mubr.msk.f32.mxu0 %vm15122_vm3, %v6953_v62  ;;  %v6533_v62 = vmul.f32 %v13131_v44, %v15134_v15  ;;  %vm15145_vm3 = vmmov %vm15142_vm0 }
 0xb21   :  { %v6859_v46 = vadd.f32 %v6827_v54, %v13327_v29  ;;  %v6860_v26 = vadd.f32 %v6828_v38, %v13329_v55  ;;  %v6829_v11 = vadd.f32 %v6782_v31, %v15098_v35  ;;  %v6830_v40 = vadd.f32 %v6782_v31, %v15099_v45  ;;  %v15132_v38 = vld [vmem:[#allocation57_spill] sm:$0xff] }
 0xb22   :  { %v6784_v27 = vpop.permute.xlu0 %6783  ;;  %v6566_v29 = vmul.f32 %v13140_v52, %v15125_v12  ;;  %v15140_v12 = vld [vmem:[#allocation69_spill] sm:$0xff] }
 0xb23   :  { %v6831_v55 = vadd.f32 %v6784_v27, %v15098_v35  ;;  %v6832_v6 = vadd.f32 %v6784_v27, %v15099_v45  ;;  %vm6891_vm4 = vcmp.ge.f32.partialorder %v6859_v46, 0.0  ;;  %v6923_v17 = vmul.f32 0.2, %v6859_v46  ;;  %8981 = vmatmul.mubr.msk.f32.gmra.mrb[8].mxu0 %vm15126_vm2, %v6954_v48  ;;  %v15139_v27 = vld [vmem:[#allocation68_spill] sm:$0xff]  ;;  %vm15147_vm2 = vmmov %vm15142_vm0 }
 0xb24   :  { %v6861_v32 = vadd.f32 %v6829_v11, %v13331_v21  ;;  %v6862_v42 = vadd.f32 %v6830_v40, %v13339_v53  ;;  %vm6892_vm5 = vcmp.ge.f32.partialorder %v6860_v26, 0.0  ;;  %v6924_v56 = vmul.f32 0.2, %v6860_v26  ;;  %v6786_v49 = vpop.permute.xlu1 %6785  ;;  %v15129_v53 = vld [vmem:[#allocation58_spill] sm:$0xff] }
 0xb25   :  { %v6863_v13 = vadd.f32 %v6831_v55, %v13343_v25  ;;  %v6955_v50 = vsel %vm6891_vm4, %v6859_v46, %v6923_v17  ;;  %v6864_v23 = vadd.f32 %v6832_v6, %v13353_v58  ;;  %v6833_v2 = vadd.f32 %v6786_v49, %v15098_v35  ;;  %v15141_v55 = vld [vmem:[#allocation70_spill] sm:$0xff] }
 0xb26   :  { %v6788_v21 = vpop.permute.xlu0 %6787  ;;  %8983 = vmatprep.mubr.msk.f32.mxu0 %vm15128_vm6, %v6955_v50  ;;  %v6532_v61 = vmul.f32 %v13131_v44, %v15129_v53  ;;  %vm6893_vm7 = vcmp.ge.f32.partialorder %v6861_v32, 0.0  ;;  %v6834_v25 = vadd.f32 %v6786_v49, %v15099_v45  ;;  %v6956_v59 = vsel %vm6892_vm5, %v6860_v26, %v6924_v56  ;;  %vm15149_vm6 = vmmov %vm15142_vm0 }
 0xb27   :  { %v6835_v51 = vadd.f32 %v6788_v21, %v15098_v35  ;;  %v6925_v57 = vmul.f32 0.2, %v6861_v32  ;;  %v6865_v5 = vadd.f32 %v6833_v2, %v13361_v30  ;;  %v6567_v58 = vmul.f32 %v13140_v52, %v15130_v20  ;;  %8984 = vmatmul.mubr.msk.f32.gmra.mrb[10].mxu0 %vm15131_vm8, %v6956_v59  ;;  %v15144_v2 = vld [vmem:[#allocation62_spill] sm:$0xff] }
 0xb28   :  { %vm6894_vm9 = vcmp.ge.f32.partialorder %v6862_v42, 0.0  ;;  %v6926_v37 = vmul.f32 0.2, %v6862_v42  ;;  %v6790_v3 = vpop.permute.xlu1 %6789  ;;  %vm6895_vm10 = vcmp.ge.f32.partialorder %v6863_v13, 0.0  ;;  %v6927_v10 = vmul.f32 0.2, %v6863_v13 }
 0xb29   :  { %v6957_v39 = vsel %vm6893_vm7, %v6861_v32, %v6925_v57  ;;  %v6836_v8 = vadd.f32 %v6788_v21, %v15099_v45  ;;  %v13443_v54 = vadd.f32 %v6566_v29, %v6530_v16  ;;  %v6568_v30 = vmul.f32 %v13140_v52, %v15132_v38  ;;  %v15148_v38 = vld [vmem:[#allocation63_spill] sm:$0xff] }
 0xb2a   :  { %8986 = vmatprep.mubr.msk.f32.mxu0 %vm15133_vm11, %v6957_v39  ;;  %v6866_v24 = vadd.f32 %v6834_v25, %v13363_v14  ;;  %v6867_v34 = vadd.f32 %v6835_v51, %v13387_v63  ;;  %v6958_v1 = vsel %vm6894_vm9, %v6862_v42, %v6926_v37  ;;  %v6928_v7 = vmul.f32 0.2, %v6864_v23  ;;  %v6792_v26 = vpop.permute.xlu0 %6791  ;;  %v15138_v14 = vld [vmem:[#allocation67_spill] sm:$0xff]  ;;  %v15146_v25 = vld [vmem:[#allocation64_spill] sm:$0xff]  ;;  %vm15150_vm9 = vmmov %vm15142_vm0 }
 0xb2b   :  { %v6837_v46 = vadd.f32 %v6790_v3, %v15098_v35  ;;  %8987 = vmatmul.mubr.msk.f32.gmra.mrb[12].mxu0 %vm15135_vm12, %v6958_v1  ;;  %v6959_v31 = vsel %vm6895_vm10, %v6863_v13, %v6927_v10  ;;  %vm6896_vm13 = vcmp.ge.f32.partialorder %v6864_v23, 0.0  ;;  %v6929_v19 = vmul.f32 0.2, %v6865_v5  ;;  %vm15151_vm10 = vmmov %vm15142_vm0 }
 0xb2c   :  { %v6794_v16 = vpop.permute.xlu1 %6793  ;;  %v6599_v47 = vadd.f32 %v6567_v58, %v6531_v60  ;;  %v13456_v11 = vmul.f32 %v13131_v44, %v15136_v22  ;;  %8989 = vmatprep.mubr.msk.f32.mxu0 %vm15137_vm14, %v6959_v31  ;;  %v6537_v63 = vmul.f32 %v13131_v44, %v15138_v14  ;;  %vm6897_vm15 = vcmp.ge.f32.partialorder %v6865_v5, 0.0 }
 0xb2d   :  { %v6868_v40 = vadd.f32 %v6836_v8, %v13389_v43  ;;  %v6538_v48 = vmul.f32 %v13131_v44, %v15139_v27  ;;  %v6573_v29 = vmul.f32 %v13140_v52, %v15140_v12  ;;  %v6574_v6 = vmul.f32 %v13140_v52, %v15141_v55  ;;  %v15153_v55 = vld [vmem:[#allocation66_spill] sm:$0xff] }
 0xb2e   :  { %v6838_v17 = vadd.f32 %v6790_v3, %v15099_v45  ;;  %v6839_v32 = vadd.f32 %v6792_v26, %v15098_v35  ;;  %v6960_v42 = vsel %vm6896_vm13, %v6864_v23, %v6928_v7  ;;  %v6930_v56 = vmul.f32 0.2, %v6866_v24 }
 0xb2f   :  { %v6869_v13 = vadd.f32 %v6837_v46, %v13392_v9  ;;  %8990 = vmatmul.mubr.msk.f32.gmra.mrb[14].mxu0 %vm15142_vm0, %v6960_v42  ;;  %v6961_v43 = vsel %vm6897_vm15, %v6865_v5, %v6929_v19  ;;  %vm6898_vm1 = vcmp.ge.f32.partialorder %v6866_v24, 0.0  ;;  %v6931_v49 = vmul.f32 0.2, %v6867_v34  ;;  %v6796_v9 = vpop.permute.xlu0 %6795  ;;  %vm15152_vm15 = vmmov %vm15142_vm0  ;;  %v15155_v42 = vld [vmem:[#allocation65_spill] sm:$0xff] }
 0xb30   :  { %v6600_v50 = vadd.f32 %v6568_v30, %v6532_v61  ;;  %v6569_v60 = vmul.f32 %v13140_v52, %v15143_v41  ;;  %v6570_v21 = vmul.f32 %v13140_v52, %v15144_v2  ;;  %v13476_v53 = vpop.permute.xlu1 %6797  ;;  %8992 = vmatprep.mubr.msk.f32.mxu0 %vm15145_vm3, %v6961_v43  ;;  %vm6899_vm4 = vcmp.ge.f32.partialorder %v6867_v34, 0.0 }
 0xb31   :  { %v6840_v23 = vadd.f32 %v6792_v26, %v15099_v45  ;;  %v6535_v51 = vmul.f32 %v13131_v44, %v15146_v25  ;;  %v6605_v59 = vadd.f32 %v6573_v29, %v6537_v63  ;;  %v6606_v57 = vadd.f32 %v6574_v6, %v6538_v48 }
 0xb32   :  { %v6870_v61 = vadd.f32 %v6838_v17, %v13394_v33  ;;  %v6841_v5 = vadd.f32 %v6794_v16, %v15098_v35  ;;  %v6962_v20 = vsel %vm6898_vm1, %v6866_v24, %v6930_v56  ;;  %v6932_v58 = vmul.f32 0.2, %v6868_v40  ;;  %vm15154_vm1 = vmmov %vm15142_vm0 }
 0xb33   :  { %v6871_v37 = vadd.f32 %v6839_v32, %v13404_v36  ;;  %8993 = vmatmul.mubr.msk.f32.gmra.mrb[16].mxu0 %vm15147_vm2, %v6962_v20  ;;  %v6963_v3 = vsel %vm6899_vm4, %v6867_v34, %v6931_v49  ;;  %vm6900_vm5 = vcmp.ge.f32.partialorder %v6868_v40, 0.0  ;;  %v6933_v39 = vmul.f32 0.2, %v6869_v13  ;;  %v6800_v48 = vpop.permute.xlu0 %6799  ;;  %vm15156_vm4 = vmmov %vm15142_vm0 }
 0xb34   :  { %v6842_v10 = vadd.f32 %v6794_v16, %v15099_v45  ;;  %v6843_v8 = vadd.f32 %v6796_v9, %v15098_v35  ;;  %v6571_v30 = vmul.f32 %v13140_v52, %v15148_v38  ;;  %v6802_v15 = vpop.permute.xlu1 %6801  ;;  %8995 = vmatprep.mubr.msk.f32.mxu0 %vm15149_vm6, %v6963_v3  ;;  %vm6901_vm7 = vcmp.ge.f32.partialorder %v6869_v13, 0.0  ;;  %vm15157_vm2 = vmmov %vm15142_vm0 }
 0xb35   :  { %v6872_v33 = vadd.f32 %v6840_v23, %v13425_v0  ;;  %v6601_v24 = vadd.f32 %v6569_v60, %v6533_v62  ;;  %v6849_v36 = vadd.f32 %v6802_v15, %v15098_v35  ;;  %v6850_v34 = vadd.f32 %v6802_v15, %v15099_v45  ;;  %vm15158_vm6 = vmmov %vm15142_vm0  ;;  %v15166_v15 = vld [vmem:[#allocation73_spill] sm:$0xff] }
 0xb36   :  { %v6873_v1 = vadd.f32 %v6841_v5, %v13440_v28  ;;  %v6964_v7 = vsel %vm6900_vm5, %v6868_v40, %v6932_v58  ;;  %vm6902_vm8 = vcmp.ge.f32.partialorder %v6870_v61, 0.0  ;;  %v6934_v46 = vmul.f32 0.2, %v6870_v61 }
 0xb37   :  { %v6881_v26 = vadd.f32 %v6849_v36, %v6605_v59  ;;  %v6882_v31 = vadd.f32 %v6850_v34, %v6606_v57  ;;  %8996 = vmatmul.mubr.msk.f32.gmra.mrb[18].mxu0 %vm15150_vm9, %v6964_v7  ;;  %v6965_v19 = vsel %vm6901_vm7, %v6869_v13, %v6933_v39  ;;  %v6935_v16 = vmul.f32 0.2, %v6871_v37  ;;  %v15169_v7 = vld [vmem:[#allocation74_spill] sm:$0xff] }
 0xb38   :  { %v6874_v22 = vadd.f32 %v6842_v10, %v13443_v54  ;;  %v6844_v0 = vadd.f32 %v6796_v9, %v15099_v45  ;;  %v6875_v62 = vadd.f32 %v6843_v8, %v6599_v47  ;;  %8998 = vmatprep.mubr.msk.f32.mxu0 %vm15151_vm10, %v6965_v19  ;;  %vm6903_vm11 = vcmp.ge.f32.partialorder %v6871_v37, 0.0  ;;  %vm15160_vm10 = vmmov %vm15142_vm0  ;;  %v15165_v8 = vld [vmem:[#allocation72_spill] sm:$0xff] }
 0xb39   :  { %vm6913_vm12 = vcmp.ge.f32.partialorder %v6881_v26, 0.0  ;;  %v6945_v14 = vmul.f32 0.2, %v6881_v26  ;;  %vm6914_vm13 = vcmp.ge.f32.partialorder %v6882_v31, 0.0  ;;  %v6946_v28 = vmul.f32 0.2, %v6882_v31 }
 0xb3a   :  { %v6845_v63 = vadd.f32 %v13476_v53, %v15098_v35  ;;  %v6966_v40 = vsel %vm6902_vm8, %v6870_v61, %v6934_v46  ;;  %vm6904_vm14 = vcmp.ge.f32.partialorder %v6872_v33, 0.0  ;;  %v6936_v27 = vmul.f32 0.2, %v6872_v33  ;;  %vm15159_vm8 = vmmov %vm15142_vm0 }
 0xb3b   :  { %v6977_v12 = vsel %vm6913_vm12, %v6881_v26, %v6945_v14  ;;  %v6978_v54 = vsel %vm6914_vm13, %v6882_v31, %v6946_v28  ;;  %8999 = vmatmul.mubr.msk.f32.gmra.mrb[20].mxu0 %vm15152_vm15, %v6966_v40  ;;  %v6967_v47 = vsel %vm6903_vm11, %v6871_v37, %v6935_v16  ;;  %v6937_v29 = vmul.f32 0.2, %v6873_v1  ;;  %vm15161_vm12 = vmmov %vm15142_vm0  ;;  %v15170_v31 = vld [vmem:[#allocation75_spill] sm:$0xff] }
 0xb3c   :  { %v6536_v6 = vmul.f32 %v13131_v44, %v15153_v55  ;;  %9016 = vmatprep.mubr.msk.f32.mxu1 %vm15142_vm0, %v6977_v12  ;;  %9001 = vmatprep.mubr.msk.f32.mxu0 %vm15154_vm1, %v6967_v47  ;;  %vm6905_vm3 = vcmp.ge.f32.partialorder %v6873_v1, 0.0  ;;  %v6876_v17 = vadd.f32 %v6844_v0, %v6600_v50  ;;  %v6602_v32 = vadd.f32 %v6570_v21, %v13456_v11 }
 0xb3d   :  { %v6572_v56 = vmul.f32 %v13140_v52, %v15155_v42  ;;  %v6603_v13 = vadd.f32 %v6571_v30, %v6535_v51  ;;  %9017 = vmatmul.mubr.msk.f32.vlgmr.msra.gmra.mrb[34].mxu1 %vm15156_vm4, %v6978_v54  ;;  %v6846_v43 = vadd.f32 %v13476_v53, %v15099_v45  ;;  %v6847_v49 = vadd.f32 %v6800_v48, %v15098_v35  ;;  %vm15164_vm4 = vmmov %vm15142_vm0 }
 0xb3e   :  { %v6968_v44 = vsel %vm6904_vm14, %v6872_v33, %v6936_v27  ;;  %v6938_v41 = vmul.f32 0.2, %v6874_v22  ;;  %v6877_v60 = vadd.f32 %v6845_v63, %v6601_v24  ;;  %v6969_v50 = vsel %vm6905_vm3, %v6873_v1, %v6937_v29  ;;  %vm15162_vm14 = vmmov %vm15142_vm0  ;;  %v15173_v63 = vld [vmem:[#allocation76_spill] sm:$0xff] }
 0xb3f   :  { %9002 = vmatmul.mubr.msk.f32.gmra.mrb[22].mxu0 %vm15157_vm2, %v6968_v44  ;;  %vm6906_vm5 = vcmp.ge.f32.partialorder %v6874_v22, 0.0  ;;  %v6939_v11 = vmul.f32 0.2, %v6875_v62  ;;  %vm6907_vm7 = vcmp.ge.f32.partialorder %v6875_v62, 0.0  ;;  %v6604_v52 = vadd.f32 %v6572_v56, %v6536_v6  ;;  %vm15163_vm3 = vmmov %vm15142_vm0  ;;  %v15177_v56 = vld [vmem:[#allocation78_spill] sm:$0xff] }
 0xb40   :  { %9004 = vmatprep.mubr.msk.f32.mxu0 %vm15158_vm6, %v6969_v50  ;;  %v6878_v2 = vadd.f32 %v6846_v43, %v6602_v32  ;;  %v6848_v21 = vadd.f32 %v6800_v48, %v15099_v45  ;;  %v6970_v23 = vsel %vm6906_vm5, %v6874_v22, %v6938_v41  ;;  %v6940_v53 = vmul.f32 0.2, %v6876_v17  ;;  %vm15167_vm2 = vmmov %vm15142_vm0  ;;  %v15174_v48 = vld [vmem:[#allocation77_spill] sm:$0xff] }
 0xb41   :  { %v6879_v9 = vadd.f32 %v6847_v49, %v6603_v13  ;;  %v6971_v25 = vsel %vm6907_vm7, %v6875_v62, %v6939_v11  ;;  %vm6908_vm9 = vcmp.ge.f32.partialorder %v6876_v17, 0.0  ;;  %v6941_v51 = vmul.f32 0.2, %v6877_v60  ;;  %vm15168_vm5 = vmmov %vm15142_vm0  ;;  %v15178_v49 = vld [vmem:[#allocation79_spill] sm:$0xff] }
 0xb42   :  { %vm6909_vm11 = vcmp.ge.f32.partialorder %v6877_v60, 0.0  ;;  %v6880_v59 = vadd.f32 %v6848_v21, %v6604_v52  ;;  %v6972_v57 = vsel %vm6908_vm9, %v6876_v17, %v6940_v53  ;;  %v6942_v61 = vmul.f32 0.2, %v6878_v2  ;;  %vm15171_vm6 = vmmov %vm15142_vm0 }
 0xb43   :  { %9005 = vmatmul.mubr.msk.f32.gmra.mrb[24].mxu0 %vm15159_vm8, %v6970_v23  ;;  %v6973_v5 = vsel %vm6909_vm11, %v6877_v60, %v6941_v51  ;;  %vm6910_vm13 = vcmp.ge.f32.partialorder %v6878_v2, 0.0  ;;  %v6943_v20 = vmul.f32 0.2, %v6879_v9  ;;  %vm6911_vm15 = vcmp.ge.f32.partialorder %v6879_v9, 0.0  ;;  %vm15172_vm7 = vmmov %vm15142_vm0  ;;  %v15181_v51 = vld [vmem:[#allocation80_spill] sm:$0xff] }
 0xb44   :  { %9007 = vmatprep.mubr.msk.f32.mxu0 %vm15160_vm10, %v6971_v25  ;;  %v6974_v58 = vsel %vm6910_vm13, %v6878_v2, %v6942_v61  ;;  %v6944_v37 = vmul.f32 0.2, %v6880_v59  ;;  %vm6912_vm1 = vcmp.ge.f32.partialorder %v6880_v59, 0.0  ;;  %vm15175_vm8 = vmmov %vm15142_vm0 }
 0xb45   :  { %v6975_v3 = vsel %vm6911_vm15, %v6879_v9, %v6943_v20  ;;  %vm15176_vm9 = vmmov %vm15142_vm0 }
 0xb46   :  { %v6976_v39 = vsel %vm6912_vm1, %v6880_v59, %v6944_v37  ;;  %vm15179_vm10 = vmmov %vm15142_vm0 }
 0xb47   :  { %9008 = vmatmul.mubr.msk.f32.gmra.mrb[26].mxu0 %vm15161_vm12, %v6972_v57  ;;  %vm15180_vm11 = vmmov %vm15142_vm0  ;;  %v15182_v57 = vld [vmem:[#allocation81_spill] sm:$0xff] }
 0xb48   :  { %9010 = vmatprep.mubr.msk.f32.mxu0 %vm15162_vm14, %v6973_v5  ;;  %vm15183_vm12 = vmmov %vm15142_vm0 }
 0xb49   :  { %vm15184_vm13 = vmmov %vm15142_vm0 }
 0xb4a   :  { %vm15187_vm14 = vmmov %vm15142_vm0 }
 0xb4b   :  { %9011 = vmatmul.mubr.msk.f32.gmra.mrb[28].mxu0 %vm15142_vm0, %v6974_v58  ;;  %vm15188_vm15 = vmmov %vm15142_vm0 }
 0xb4c   :  { %9013 = vmatprep.mubr.msk.f32.mxu0 %vm15163_vm3, %v6975_v3  ;;  %vm15191_vm1 = vmmov %vm15142_vm0 }
 0xb4d   :  { %vm15194_vm3 = vmmov %vm15142_vm0 }
 0xb4f   :  { %9014 = vmatmul.mubr.msk.f32.gmra.mrb[30].mxu0 %vm15164_vm4, %v6976_v39  ;;  %vm15195_vm4 = vmmov %vm15142_vm0 }
 0xbea   :  { %v8973_v10 = vpop.f32.mrb[2].mxu0 }
 0xbeb   :  { %v7301_v38 = vadd.f32 %v8973_v10, %v15165_v8  ;;  %v7141_v30 = vpop.f32.mrb[3].mxu0 }
 0xbec   :  { %v7300_v33 = vadd.f32 %v7141_v30, %v15166_v15 }
 0xbed   :  { %v7333_v24 = vsel %vm15167_vm2, %v7301_v38, -inf  ;;  %vm15196_vm2 = vmmov %vm15142_vm0 }
 0xbee   :  { %v7332_v36 = vsel %vm15168_vm5, %v7300_v33, -inf  ;;  %v8976_v34 = vpop.f32.mrb[4].mxu0  ;;  %vm15197_vm5 = vmmov %vm15142_vm0 }
 0xbef   :  { %v7334_v1 = vmax.f32 %v7332_v36, %v7333_v24  ;;  %v13530_v46 = vadd.f32 %v8976_v34, %v15169_v7  ;;  %v7151_v26 = vpop.f32.mrb[5].mxu0 }
 0xbf0   :  { %v7302_v19 = vadd.f32 %v7151_v26, %v15170_v31  ;;  %v15185_v26 = vld [vmem:[#allocation82_spill] sm:$0xff] }
 0xbf1   :  { %v7335_v16 = vrot.slane %v7334_v1, 4  ;;  %v7342_v22 = vsel %vm15171_vm6, %v13530_v46, -inf  ;;  %vm15198_vm6 = vmmov %vm15142_vm0 }
 0xbf2   :  { %v7341_v0 = vsel %vm15172_vm7, %v7302_v19, -inf  ;;  %v8979_v62 = vpop.f32.mrb[6].mxu0  ;;  %vm15199_vm7 = vmmov %vm15142_vm0 }
 0xbf3   :  { %v7336_v14 = vmax.f32 %v7334_v1, %v7335_v16  ;;  %v7343_v28 = vmax.f32 %v7341_v0, %v7342_v22  ;;  %v13537_v40 = vadd.f32 %v8979_v62, %v15173_v63  ;;  %v7161_v27 = vpop.f32.mrb[7].mxu0 }
 0xbf4   :  { %v13540_v12 = vadd.f32 %v7161_v27, %v15174_v48 }
 0xbf5   :  { %v7337_v54 = vrot.slane %v7336_v14, 2  ;;  %v7344_v47 = vrot.slane %v7343_v28, 4  ;;  %v7351_v29 = vsel %vm15175_vm8, %v13537_v40, -inf  ;;  %vm15200_vm8 = vmmov %vm15142_vm0 }
 0xbf6   :  { %v7350_v55 = vsel %vm15176_vm9, %v13540_v12, -inf  ;;  %v8982_v6 = vpop.f32.mrb[8].mxu0  ;;  %vm15202_vm9 = vmmov %vm15142_vm0 }
 0xbf7   :  { %v7338_v17 = vmax.f32 %v7336_v14, %v7337_v54  ;;  %v7345_v32 = vmax.f32 %v7343_v28, %v7344_v47  ;;  %v7352_v42 = vmax.f32 %v7350_v55, %v7351_v29  ;;  %v13547_v13 = vadd.f32 %v8982_v6, %v15177_v56  ;;  %v7171_v43 = vpop.f32.mrb[9].mxu0  ;;  %v15190_v56 = vld [vmem:[#allocation85_spill] sm:$0xff] }
 0xbf8   :  { %v13550_v44 = vadd.f32 %v7171_v43, %v15178_v49 }
 0xbf9   :  { %v7339_v41 = vrot.slane %v7338_v17, 1  ;;  %v7346_v60 = vrot.slane %v7345_v32, 2  ;;  %v7353_v50 = vrot.slane %v7352_v42, 4  ;;  %v7360_v11 = vsel %vm15179_vm10, %v13547_v13, -inf  ;;  %vm15203_vm10 = vmmov %vm15142_vm0 }
 0xbfa   :  { %v7359_v52 = vsel %vm15180_vm11, %v13550_v44, -inf  ;;  %v8985_v2 = vpop.f32.mrb[10].mxu0  ;;  %vm15204_vm11 = vmmov %vm15142_vm0 }
 0xbfb   :  { %v7340_v21 = vmax.f32 %v7338_v17, %v7339_v41  ;;  %v7347_v23 = vmax.f32 %v7345_v32, %v7346_v60  ;;  %v7354_v53 = vmax.f32 %v7352_v42, %v7353_v50  ;;  %v7361_v9 = vmax.f32 %v7359_v52, %v7360_v11  ;;  %v7181_v25 = vpop.f32.mrb[11].mxu0  ;;  %v15189_v17 = vld [vmem:[#allocation84_spill] sm:$0xff] }
 0xbfc   :  { %v13557_v59 = vadd.f32 %v8985_v2, %v15181_v51  ;;  %v13560_v61 = vadd.f32 %v7181_v25, %v15182_v57  ;;  %v15192_v25 = vld [vmem:[#allocation86_spill] sm:$0xff]  ;;  %v15193_v57 = vld [vmem:[#allocation87_spill] sm:$0xff] }
 0xbfd   :  { %v7476_v5 = vsub.f32 %v7300_v33, %v7340_v21  ;;  %v7477_v20 = vsub.f32 %v7301_v38, %v7340_v21  ;;  %v7348_v58 = vrot.slane %v7347_v23, 1  ;;  %v7355_v37 = vrot.slane %v7354_v53, 2  ;;  %v15186_v38 = vld [vmem:[#allocation83_spill] sm:$0xff] }
 0xbfe   :  { %v7362_v3 = vrot.slane %v7361_v9, 4  ;;  %v7369_v39 = vsel %vm15183_vm12, %v13557_v59, -inf  ;;  %v7368_v10 = vsel %vm15184_vm13, %v13560_v61, -inf  ;;  %v8988_v8 = vpop.f32.mrb[12].mxu0  ;;  %vm15205_vm12 = vmmov %vm15142_vm0 }
 0xbff   :  { %v7508_v30 = vmul.f32 1.442695, %v7476_v5  ;;  %v7510_v15 = vmul.f32 1.442695, %v7477_v20  ;;  %v7349_v24 = vmax.f32 %v7347_v23, %v7348_v58  ;;  %v7356_v36 = vmax.f32 %v7354_v53, %v7355_v37  ;;  %v7191_v34 = vpop.f32.mrb[13].mxu0  ;;  %vm15206_vm13 = vmmov %vm15142_vm0 }
 0xc00   :  { %v7363_v1 = vmax.f32 %v7361_v9, %v7362_v3  ;;  %v7370_v7 = vmax.f32 %v7368_v10, %v7369_v39  ;;  %v13567_v33 = vadd.f32 %v8988_v8, %v15185_v26  ;;  %v13570_v31 = vadd.f32 %v7191_v34, %v15186_v38 }
 0xc01   :  { %9560 = vpow2.f32 %v7508_v30  ;;  %v7478_v16 = vsub.f32 %v7302_v19, %v7349_v24  ;;  %v7479_v22 = vsub.f32 %v13530_v46, %v7349_v24  ;;  %v7357_v0 = vrot.slane %v7356_v36, 1 }
 0xc02   :  { %9562 = vpow2.f32 %v7510_v15  ;;  %v7364_v62 = vrot.slane %v7363_v1, 2  ;;  %v7371_v14 = vrot.slane %v7370_v7, 4  ;;  %v7378_v28 = vsel %vm15187_vm14, %v13567_v33, -inf  ;;  %v8991_v63 = vpop.f32.mrb[14].mxu0  ;;  %vm15209_vm14 = vmmov %vm15142_vm0 }
 0xc03   :  { %v7512_v27 = vmul.f32 1.442695, %v7478_v16  ;;  %v7514_v48 = vmul.f32 1.442695, %v7479_v22  ;;  %v7358_v54 = vmax.f32 %v7356_v36, %v7357_v0  ;;  %v7377_v47 = vsel %vm15188_vm15, %v13570_v31, -inf  ;;  %v7201_v29 = vpop.f32.mrb[15].mxu0  ;;  %vm15210_vm15 = vmmov %vm15142_vm0 }
 0xc04   :  { %v7365_v55 = vmax.f32 %v7363_v1, %v7364_v62  ;;  %v7372_v6 = vmax.f32 %v7370_v7, %v7371_v14  ;;  %v7379_v19 = vmax.f32 %v7377_v47, %v7378_v28  ;;  %v13578_v46 = vadd.f32 %v8991_v63, %v15189_v17 }
 0xc05   :  { %9564 = vpow2.f32 %v7512_v27  ;;  %v7480_v32 = vsub.f32 %v13540_v12, %v7358_v54  ;;  %v7481_v42 = vsub.f32 %v13537_v40, %v7358_v54  ;;  %v13583_v43 = vadd.f32 %v7201_v29, %v15190_v56 }
 0xc06   :  { %9566 = vpow2.f32 %v7514_v48  ;;  %v7366_v49 = vrot.slane %v7365_v55, 1  ;;  %v7373_v41 = vrot.slane %v7372_v6, 2  ;;  %v7380_v60 = vrot.slane %v7379_v19, 4  ;;  %v8994_v50 = vpop.f32.mrb[16].mxu0 }
 0xc07   :  { %v7516_v11 = vmul.f32 1.442695, %v7480_v32  ;;  %v7518_v52 = vmul.f32 1.442695, %v7481_v42  ;;  %v7387_v2 = vsel %vm15142_vm0, %v13578_v46, -inf  ;;  %v7386_v21 = vsel %vm15191_vm1, %v13583_v43, -inf  ;;  %vm15211_vm1 = vmmov %vm15142_vm0 }
 0xc08   :  { %v7367_v23 = vmax.f32 %v7365_v55, %v7366_v49  ;;  %v7374_v12 = vmax.f32 %v7372_v6, %v7373_v41  ;;  %v7381_v53 = vmax.f32 %v7379_v19, %v7380_v60  ;;  %v7388_v40 = vmax.f32 %v7386_v21, %v7387_v2  ;;  %v7211_v9 = vpop.f32.mrb[17].mxu0  ;;  %v15201_v41 = vld [vmem:[#allocation102_spill] sm:$0xff] }
 0xc09   :  { %9568 = vpow2.f32 %v7516_v11  ;;  %v13590_v51 = vadd.f32 %v8994_v50, %v15192_v25  ;;  %v13593_v5 = vadd.f32 %v7211_v9, %v15193_v57  ;;  %v13597_v20 = vsel %vm15194_vm3, %v13245_v18, 0.0  ;;  %vm15212_vm3 = vmmov %vm15142_vm0 }
 0xc0a   :  { %9570 = vpow2.f32 %v7518_v52  ;;  %v7482_v58 = vsub.f32 %v13550_v44, %v7367_v23  ;;  %v7483_v37 = vsub.f32 %v13547_v13, %v7367_v23  ;;  %v7375_v3 = vrot.slane %v7374_v12, 1  ;;  %v13601_v39 = vpop.f32.mrb[18].mxu0 }
 0xc0b   :  { %v13603_v10 = vpop.eup %9560  ;;  %v7382_v8 = vrot.slane %v7381_v53, 2  ;;  %v7389_v30 = vrot.slane %v7388_v40, 4  ;;  %v7396_v15 = vsel %vm15195_vm4, %v13590_v51, -inf  ;;  %v7395_v24 = vsel %vm15196_vm2, %v13593_v5, -inf  ;;  %v13609_v18 = vpop.f32.mrb[19].mxu0  ;;  %vm15213_vm4 = vmmov %vm15142_vm0 }
 0xc0c   :  { %v13611_v36 = vpop.eup %9562  ;;  %v7572_v13 = vsel %vm15197_vm5, %v13603_v10, 0.0  ;;  %v7520_v44 = vmul.f32 1.442695, %v7482_v58  ;;  %v7522_v34 = vmul.f32 1.442695, %v7483_v37  ;;  %v7376_v1 = vmax.f32 %v7374_v12, %v7375_v3  ;;  %vm15216_vm2 = vmmov %vm15142_vm0 }
 0xc0d   :  { %v7573_v7 = vsel %vm15198_vm6, %v13611_v36, 0.0  ;;  %v7383_v26 = vmax.f32 %v7381_v53, %v7382_v8  ;;  %v7390_v38 = vmax.f32 %v7388_v40, %v7389_v30  ;;  %v7397_v16 = vmax.f32 %v7395_v24, %v7396_v15  ;;  %vm15218_vm5 = vmmov %vm15142_vm0 }
 0xc0e   :  { %v7574_v22 = vadd.f32 %v7573_v7, %v7572_v13  ;;  %9572 = vpow2.f32 %v7520_v44  ;;  %v7484_v0 = vsub.f32 %v13560_v61, %v7376_v1  ;;  %v7485_v62 = vsub.f32 %v13557_v59, %v7376_v1  ;;  %v13619_v14 = vpop.f32.mrb[20].mxu0  ;;  %vm15219_vm6 = vmmov %vm15142_vm0 }
 0xc0f   :  { %v13621_v28 = vpop.eup %9564  ;;  %9574 = vpow2.f32 %v7522_v34  ;;  %v7384_v63 = vrot.slane %v7383_v26, 1  ;;  %v7391_v27 = vrot.slane %v7390_v38, 2  ;;  %v7398_v48 = vrot.slane %v7397_v16, 4  ;;  %v13623_v54 = vpop.f32.mrb[21].mxu0 }
 0xc10   :  { %v13625_v47 = vpop.eup %9566  ;;  %v7575_v29 = vrot.slane %v7574_v22, 4  ;;  %v7581_v55 = vsel %vm15199_vm7, %v13621_v28, 0.0  ;;  %v7524_v6 = vmul.f32 1.442695, %v7484_v0  ;;  %v7526_v61 = vmul.f32 1.442695, %v7485_v62  ;;  %vm15220_vm7 = vmmov %vm15142_vm0 }
 0xc11   :  { %v7582_v59 = vsel %vm15200_vm8, %v13625_v47, 0.0  ;;  %v7385_v19 = vmax.f32 %v7383_v26, %v7384_v63  ;;  %v7392_v17 = vmax.f32 %v7390_v38, %v7391_v27  ;;  %v7399_v32 = vmax.f32 %v7397_v16, %v7398_v48  ;;  %v9018_v42 = vpop.f32.mrb[34].mxu1  ;;  %vm15221_vm8 = vmmov %vm15142_vm0 }
 0xc12   :  { %v7576_v56 = vadd.f32 %v7575_v29, %v7574_v22  ;;  %v7583_v49 = vadd.f32 %v7582_v59, %v7581_v55  ;;  %9576 = vpow2.f32 %v7524_v6  ;;  %v13632_v60 = vadd.f32 %v9018_v42, %v15201_v41  ;;  %v7291_v50 = vpop.f32.mrb[35].mxu1  ;;  %v13634_v11 = vpop.f32.mrb[22].mxu0  ;;  %v15207_v59 = vld [vmem:[#allocation103_spill] sm:$0xff] }
 0xc13   :  { %v13636_v52 = vpop.eup %9568  ;;  %9578 = vpow2.f32 %v7526_v61  ;;  %v7486_v2 = vsub.f32 %v13570_v31, %v7385_v19  ;;  %v7487_v21 = vsub.f32 %v13567_v33, %v7385_v19  ;;  %v7393_v23 = vrot.slane %v7392_v17, 1  ;;  %v13640_v12 = vpop.f32.mrb[23].mxu0 }
 0xc14   :  { %v13642_v53 = vpop.eup %9570  ;;  %v7577_v40 = vrot.slane %v7576_v56, 2  ;;  %v7584_v9 = vrot.slane %v7583_v49, 4  ;;  %v7590_v25 = vsel %vm15202_vm9, %v13636_v52, 0.0  ;;  %v7400_v57 = vrot.slane %v7399_v32, 2  ;;  %vm15223_vm9 = vmmov %vm15142_vm0 }
 0xc15   :  { %v7591_v58 = vsel %vm15203_vm10, %v13642_v53, 0.0  ;;  %v7528_v37 = vmul.f32 1.442695, %v7486_v2  ;;  %v7530_v3 = vmul.f32 1.442695, %v7487_v21  ;;  %v7394_v8 = vmax.f32 %v7392_v17, %v7393_v23  ;;  %vm15224_vm10 = vmmov %vm15142_vm0 }
 0xc16   :  { %v7578_v31 = vadd.f32 %v7577_v40, %v7576_v56  ;;  %v7585_v30 = vadd.f32 %v7584_v9, %v7583_v49  ;;  %v7592_v33 = vadd.f32 %v7591_v58, %v7590_v25  ;;  %v7401_v15 = vmax.f32 %v7399_v32, %v7400_v57  ;;  %v13648_v24 = vpop.f32.mrb[24].mxu0  ;;  %v15208_v49 = vld [vmem:[#allocation88_spill] sm:$0xff] }
 0xc17   :  { %9580 = vpow2.f32 %v7528_v37  ;;  %v7488_v13 = vsub.f32 %v13583_v43, %v7394_v8  ;;  %v7489_v44 = vsub.f32 %v13578_v46, %v7394_v8  ;;  %v7468_v34 = vsel %vm15204_vm11, %v13632_v60, -inf  ;;  %v13654_v1 = vpop.f32.mrb[25].mxu0  ;;  %vm15225_vm11 = vmmov %vm15142_vm0 }
 0xc18   :  { %v13656_v7 = vpop.eup %9572  ;;  %v7579_v26 = vrot.slane %v7578_v31, 1  ;;  %v7586_v38 = vrot.slane %v7585_v30, 2  ;;  %v7593_v16 = vrot.slane %v7592_v33, 4  ;;  %9582 = vpow2.f32 %v7530_v3 }
 0xc19   :  { %v13658_v22 = vpop.eup %9574  ;;  %v7599_v0 = vsel %vm15205_vm12, %v13656_v7, 0.0  ;;  %v7532_v62 = vmul.f32 1.442695, %v7488_v13  ;;  %v7534_v43 = vmul.f32 1.442695, %v7489_v44  ;;  %v7402_v63 = vrot.slane %v7401_v15, 1  ;;  %vm15228_vm12 = vmmov %vm15142_vm0 }
 0xc1a   :  { %v7580_v46 = vadd.f32 %v7579_v26, %v7578_v31  ;;  %v7587_v27 = vadd.f32 %v7586_v38, %v7585_v30  ;;  %v7594_v48 = vadd.f32 %v7593_v16, %v7592_v33  ;;  %v7600_v29 = vsel %vm15206_vm13, %v13658_v22, 0.0  ;;  %v13664_v55 = vpop.f32.mrb[26].mxu0  ;;  %vm15229_vm13 = vmmov %vm15142_vm0 }
 0xc1b   :  { %v7601_v6 = vadd.f32 %v7600_v29, %v7599_v0  ;;  %9584 = vpow2.f32 %v7532_v62  ;;  %v7403_v61 = vmax.f32 %v7401_v15, %v7402_v63  ;;  %v13667_v19 = vadd.f32 %v7291_v50, %v15207_v59  ;;  %v13669_v17 = vpop.f32.mrb[27].mxu0 }
 0xc1c   :  { %v13671_v32 = vpop.eup %9576  ;;  %9586 = vrcp.f32 %v7580_v46  ;;  %v7588_v42 = vrot.slane %v7587_v27, 1  ;;  %v7595_v56 = vrot.slane %v7594_v48, 2  ;;  %v13675_v41 = vadd.f32 %v13601_v39, %v15208_v49  ;;  %v15214_v46 = vld [vmem:[#allocation89_spill] sm:$0xff] }
 0xc1d   :  { %v13677_v2 = vpop.eup %9578  ;;  %v7602_v21 = vrot.slane %v7601_v6, 4  ;;  %v7608_v23 = vsel %vm15209_vm14, %v13671_v32, 0.0  ;;  %9588 = vpow2.f32 %v7534_v43  ;;  %v7490_v50 = vsub.f32 %v13593_v5, %v7403_v61  ;;  %vm15231_vm14 = vmmov %vm15142_vm0 }
 0xc1e   :  { %v7589_v40 = vadd.f32 %v7588_v42, %v7587_v27  ;;  %v7596_v9 = vadd.f32 %v7595_v56, %v7594_v48  ;;  %v7609_v25 = vsel %vm15210_vm15, %v13677_v2, 0.0  ;;  %v7491_v57 = vsub.f32 %v13590_v51, %v7403_v61  ;;  %v13685_v58 = vpop.f32.mrb[28].mxu0  ;;  %v15215_v61 = vld [vmem:[#allocation90_spill] sm:$0xff]  ;;  %vm15234_vm15 = vmmov %vm15142_vm0 }
 0xc1f   :  { %v7603_v39 = vadd.f32 %v7602_v21, %v7601_v6  ;;  %v7610_v37 = vadd.f32 %v7609_v25, %v7608_v23  ;;  %v7536_v3 = vmul.f32 1.442695, %v7490_v50  ;;  %v7467_v8 = vsel %vm15142_vm0, %v13667_v19, -inf  ;;  %v13689_v31 = vpop.f32.mrb[29].mxu0  ;;  %v15217_v23 = vld [vmem:[#allocation91_spill] sm:$0xff] }
 0xc20   :  { %9590 = vrcp.f32 %v7589_v40  ;;  %v7597_v30 = vrot.slane %v7596_v9, 1  ;;  %v7538_v5 = vmul.f32 1.442695, %v7491_v57  ;;  %v7469_v33 = vmax.f32 %v7467_v8, %v7468_v34 }
 0xc21   :  { %v13691_v15 = vpop.eup %9580  ;;  %v7604_v13 = vrot.slane %v7603_v39, 2  ;;  %v7611_v44 = vrot.slane %v7610_v37, 4  ;;  %9592 = vpow2.f32 %v7536_v3  ;;  %v7405_v51 = vsel %vm15211_vm1, %v13675_v41, -inf  ;;  %vm15237_vm1 = vmmov %vm15142_vm0 }
 0xc22   :  { %v13695_v26 = vpop.eup %9582  ;;  %v7598_v38 = vadd.f32 %v7597_v30, %v7596_v9  ;;  %v7617_v16 = vsel %vm15212_vm3, %v13691_v15, 0.0  ;;  %9594 = vpow2.f32 %v7538_v5  ;;  %v7470_v0 = vrot.slane %v7469_v33, 4  ;;  %v13699_v62 = vpop.f32.mrb[30].mxu0  ;;  %vm15238_vm3 = vmmov %vm15142_vm0 }
 0xc23   :  { %v7605_v43 = vadd.f32 %v7604_v13, %v7603_v39  ;;  %v7612_v34 = vadd.f32 %v7611_v44, %v7610_v37  ;;  %v7618_v63 = vsel %vm15213_vm4, %v13695_v26, 0.0  ;;  %v13705_v27 = vadd.f32 %v13609_v18, %v15214_v46  ;;  %v13707_v48 = vpop.f32.mrb[31].mxu0  ;;  %vm15239_vm4 = vmmov %vm15142_vm0 }
 0xc24   :  { %9596 = vrcp.f32 %v7598_v38  ;;  %v7619_v29 = vadd.f32 %v7618_v63, %v7617_v16  ;;  %v7471_v6 = vmax.f32 %v7469_v33, %v7470_v0  ;;  %v13711_v59 = vadd.f32 %v13619_v14, %v15215_v61 }
 0xc25   :  { %v13713_v42 = vpop.eup %9584  ;;  %v7606_v56 = vrot.slane %v7605_v43, 1  ;;  %v7613_v49 = vrot.slane %v7612_v34, 2  ;;  %v7404_v21 = vsel %vm15216_vm2, %v13705_v27, -inf  ;;  %v13719_v18 = vadd.f32 %v13623_v54, %v15217_v23  ;;  %vm15240_vm2 = vmmov %vm15142_vm0 }
 0xc26   :  { %v13721_v50 = vpop.eup %9586  ;;  %v7620_v40 = vrot.slane %v7619_v29, 4  ;;  %v7626_v9 = vsel %vm15218_vm5, %v13713_v42, 0.0  ;;  %v7472_v25 = vrot.slane %v7471_v6, 2  ;;  %v7406_v14 = vmax.f32 %v7404_v21, %v7405_v51  ;;  %vm15243_vm5 = vmmov %vm15142_vm0 }
 0xc27   :  { %v13725_v57 = vpop.eup %9588  ;;  %v13729_v39 = vmul.f32 %v13721_v50, %v13603_v10  ;;  %v7607_v37 = vadd.f32 %v7606_v56, %v7605_v43  ;;  %v7614_v3 = vadd.f32 %v7613_v49, %v7612_v34  ;;  %v7414_v54 = vsel %vm15219_vm6, %v13711_v59, -inf  ;;  %vm15244_vm6 = vmmov %vm15142_vm0 }
 0xc28   :  { %v7621_v8 = vadd.f32 %v7620_v40, %v7619_v29  ;;  %v7627_v30 = vsel %vm15220_vm7, %v13725_v57, 0.0  ;;  %v7473_v5 = vmax.f32 %v7471_v6, %v7472_v25  ;;  %v7407_v33 = vrot.slane %v7406_v14, 4  ;;  %v15222_v6 = vld [vmem:[#allocation92_spill] sm:$0xff]  ;;  %vm15245_vm7 = vmmov %vm15142_vm0 }
 0xc29   :  { %9598 = vrcp.f32 %v7607_v37  ;;  %v7615_v13 = vrot.slane %v7614_v3, 1  ;;  %v7628_v44 = vadd.f32 %v7627_v30, %v7626_v9  ;;  %v7413_v51 = vsel %vm15221_vm8, %v13719_v18, -inf  ;;  %vm15246_vm8 = vmmov %vm15142_vm0 }
 0xc2a   :  { %v13737_v38 = vpop.eup %9590  ;;  %v7622_v10 = vrot.slane %v7621_v8, 2  ;;  %v7474_v16 = vrot.slane %v7473_v5, 1  ;;  %v7408_v0 = vmax.f32 %v7406_v14, %v7407_v33  ;;  %v7415_v43 = vmax.f32 %v7413_v51, %v7414_v54 }
 0xc2b   :  { %v13739_v34 = vpop.eup %9592  ;;  %v13743_v63 = vmul.f32 %v13737_v38, %v13621_v28  ;;  %v7616_v46 = vadd.f32 %v7615_v13, %v7614_v3  ;;  %v7629_v29 = vrot.slane %v7628_v44, 4  ;;  %v13747_v61 = vadd.f32 %v13634_v11, %v15222_v6 }
 0xc2c   :  { %v13749_v56 = vpop.eup %9594  ;;  %v7623_v49 = vadd.f32 %v7622_v10, %v7621_v8  ;;  %v7635_v21 = vsel %vm15223_vm9, %v13739_v34, 0.0  ;;  %v7475_v23 = vmax.f32 %v7473_v5, %v7474_v16  ;;  %v7409_v40 = vrot.slane %v7408_v0, 2  ;;  %vm15247_vm9 = vmmov %vm15142_vm0 }
 0xc2d   :  { %9600 = vrcp.f32 %v7616_v46  ;;  %v7630_v9 = vadd.f32 %v7629_v29, %v7628_v44  ;;  %v7636_v28 = vsel %vm15224_vm10, %v13749_v56, 0.0  ;;  %v7416_v25 = vrot.slane %v7415_v43, 4  ;;  %vm15248_vm10 = vmmov %vm15142_vm0 }
 0xc2e   :  { %v13755_v14 = vpop.eup %9596  ;;  %v7624_v37 = vrot.slane %v7623_v49, 1  ;;  %v7637_v3 = vadd.f32 %v7636_v28, %v7635_v21  ;;  %v7506_v11 = vsub.f32 %v13667_v19, %v7475_v23  ;;  %v7507_v54 = vsub.f32 %v13632_v60, %v7475_v23  ;;  %v15226_v60 = vld [vmem:[#allocation93_spill] sm:$0xff] }
 0xc2f   :  { %v13761_v8 = vmul.f32 %v13755_v14, %v13636_v52  ;;  %v7631_v30 = vrot.slane %v7630_v9, 2  ;;  %v7410_v5 = vmax.f32 %v7408_v0, %v7409_v40  ;;  %v7417_v33 = vmax.f32 %v7415_v43, %v7416_v25  ;;  %v15227_v52 = vld [vmem:[#allocation94_spill] sm:$0xff] }
 0xc30   :  { %v7625_v13 = vadd.f32 %v7624_v37, %v7623_v49  ;;  %v7638_v44 = vrot.slane %v7637_v3, 4  ;;  %v7568_v51 = vmul.f32 1.442695, %v7506_v11  ;;  %v7570_v10 = vmul.f32 1.442695, %v7507_v54 }
 0xc31   :  { %v7632_v16 = vadd.f32 %v7631_v30, %v7630_v9  ;;  %v7411_v46 = vrot.slane %v7410_v5, 1  ;;  %v7418_v29 = vrot.slane %v7417_v33, 2  ;;  %v7423_v6 = vsel %vm15225_vm11, %v13747_v61, -inf  ;;  %vm15249_vm11 = vmmov %vm15142_vm0 }
 0xc32   :  { %9602 = vrcp.f32 %v7625_v13  ;;  %v7639_v19 = vadd.f32 %v7638_v44, %v7637_v3  ;;  %v13767_v21 = vadd.f32 %v13640_v12, %v15226_v60  ;;  %v13771_v0 = vadd.f32 %v13648_v24, %v15227_v52  ;;  %v15232_v60 = vld [vmem:[#allocation96_spill] sm:$0xff] }
 0xc33   :  { %v13773_v43 = vpop.eup %9598  ;;  %v7633_v49 = vrot.slane %v7632_v16, 1  ;;  %9604 = vpow2.f32 %v7568_v51  ;;  %v7412_v23 = vmax.f32 %v7410_v5, %v7411_v46  ;;  %v7419_v40 = vmax.f32 %v7417_v33, %v7418_v29  ;;  %v15230_v5 = vld [vmem:[#allocation95_spill] sm:$0xff] }
 0xc34   :  { %v13777_v9 = vmul.f32 %v13773_v43, %v13656_v7  ;;  %v7640_v28 = vrot.slane %v7639_v19, 2  ;;  %9606 = vpow2.f32 %v7570_v10  ;;  %v7422_v12 = vsel %vm15228_vm12, %v13767_v21, -inf  ;;  %vm15250_vm12 = vmmov %vm15142_vm0 }
 0xc35   :  { %v7634_v25 = vadd.f32 %v7633_v49, %v7632_v16  ;;  %v7492_v37 = vsub.f32 %v13705_v27, %v7412_v23  ;;  %v7493_v24 = vsub.f32 %v13675_v41, %v7412_v23  ;;  %v7420_v3 = vrot.slane %v7419_v40, 1 }
 0xc36   :  { %v7641_v11 = vadd.f32 %v7640_v28, %v7639_v19  ;;  %v7424_v54 = vmax.f32 %v7422_v12, %v7423_v6  ;;  %v7432_v30 = vsel %vm15229_vm13, %v13771_v0, -inf  ;;  %v13787_v7 = vadd.f32 %v13654_v1, %v15230_v5  ;;  %vm15251_vm13 = vmmov %vm15142_vm0 }
 0xc37   :  { %v13789_v33 = vpop.eup %9600  ;;  %9608 = vrcp.f32 %v7634_v25  ;;  %v7540_v13 = vmul.f32 1.442695, %v7492_v37  ;;  %v7542_v44 = vmul.f32 1.442695, %v7493_v24  ;;  %v7421_v51 = vmax.f32 %v7419_v40, %v7420_v3  ;;  %v15233_v40 = vld [vmem:[#allocation97_spill] sm:$0xff]  ;;  %v15235_v25 = vld [vmem:[#allocation98_spill] sm:$0xff] }
 0xc38   :  { %v13793_v27 = vmul.f32 %v13789_v33, %v13671_v32  ;;  %v7642_v41 = vrot.slane %v7641_v11, 1  ;;  %v7425_v10 = vrot.slane %v7424_v54, 4  ;;  %v7431_v16 = vsel %vm15231_vm14, %v13787_v7, -inf  ;;  %vm15252_vm14 = vmmov %vm15142_vm0 }
 0xc39   :  { %9610 = vpow2.f32 %v7540_v13  ;;  %v7494_v46 = vsub.f32 %v13719_v18, %v7421_v51  ;;  %v7495_v1 = vsub.f32 %v13711_v59, %v7421_v51  ;;  %v7433_v29 = vmax.f32 %v7431_v16, %v7432_v30 }
 0xc3a   :  { %v7643_v6 = vadd.f32 %v7642_v41, %v7641_v11  ;;  %9612 = vpow2.f32 %v7542_v44  ;;  %v7426_v19 = vmax.f32 %v7424_v54, %v7425_v10  ;;  %v13801_v52 = vadd.f32 %v13664_v55, %v15232_v60  ;;  %v15242_v60 = vld [vmem:[#allocation101_spill] sm:$0xff] }
 0xc3b   :  { %v7544_v32 = vmul.f32 1.442695, %v7494_v46  ;;  %v7546_v49 = vmul.f32 1.442695, %v7495_v1  ;;  %v7434_v23 = vrot.slane %v7433_v29, 4  ;;  %v13805_v28 = vadd.f32 %v13669_v17, %v15233_v40  ;;  %v15236_v17 = vld [vmem:[#allocation99_spill] sm:$0xff] }
 0xc3c   :  { %v13807_v12 = vpop.eup %9602  ;;  %9614 = vrcp.f32 %v7643_v6  ;;  %v7427_v18 = vrot.slane %v7426_v19, 2  ;;  %v7441_v59 = vsel %vm15234_vm15, %v13801_v52, -inf  ;;  %v13813_v37 = vadd.f32 %v13685_v58, %v15235_v25  ;;  %v15241_v6 = vld [vmem:[#allocation100_spill] sm:$0xff]  ;;  %vm15253_vm15 = vmmov %vm15142_vm0 }
 0xc3d   :  { %v13815_v55 = vpop.eup %9604  ;;  %9616 = vpow2.f32 %v7544_v32  ;;  %v7435_v24 = vmax.f32 %v7433_v29, %v7434_v23  ;;  %v7440_v3 = vsel %vm15142_vm0, %v13805_v28, -inf  ;;  %v13821_v11 = vadd.f32 %v13689_v31, %v15236_v17 }
 0xc3e   :  { %v13823_v54 = vpop.eup %9606  ;;  %v7707_v30 = vsel %vm15237_vm1, %v13815_v55, 0.0  ;;  %9618 = vpow2.f32 %v7546_v49  ;;  %v7428_v5 = vmax.f32 %v7426_v19, %v7427_v18  ;;  %v7442_v58 = vmax.f32 %v7440_v3, %v7441_v59  ;;  %vm15254_vm1 = vmmov %vm15142_vm0 }
 0xc3f   :  { %v7708_v13 = vsel %vm15238_vm3, %v13823_v54, 0.0  ;;  %v7436_v44 = vrot.slane %v7435_v24, 2  ;;  %v7450_v51 = vsel %vm15239_vm4, %v13813_v37, -inf  ;;  %v7449_v41 = vsel %vm15240_vm2, %v13821_v11, -inf  ;;  %vm15255_vm3 = vmmov %vm15142_vm0 }
 0xc40   :  { %v7709_v31 = vadd.f32 %v7708_v13, %v7707_v30  ;;  %v7429_v10 = vrot.slane %v7428_v5, 1  ;;  %v7443_v16 = vrot.slane %v7442_v58, 4  ;;  %v7451_v46 = vmax.f32 %v7449_v41, %v7450_v51  ;;  %vm15256_vm4 = vmmov %vm15142_vm0 }
 0xc41   :  { %v13833_v1 = vpop.eup %9608  ;;  %v7437_v29 = vmax.f32 %v7435_v24, %v7436_v44  ;;  %v13837_v19 = vadd.f32 %v13699_v62, %v15241_v6  ;;  %v13841_v32 = vadd.f32 %v13707_v48, %v15242_v60  ;;  %v13845_v49 = vmul.f32 %v13721_v50, %v13611_v36  ;;  %vm15257_vm2 = vmmov %vm15142_vm0 }
 0xc42   :  { %v7710_v23 = vrot.slane %v7709_v31, 4  ;;  %v7430_v40 = vmax.f32 %v7428_v5, %v7429_v10  ;;  %v7444_v18 = vmax.f32 %v7442_v58, %v7443_v16  ;;  %v7452_v59 = vrot.slane %v7451_v46, 4 }
 0xc43   :  { %v13847_v25 = vpop.eup %9610  ;;  %v7438_v3 = vrot.slane %v7437_v29, 1  ;;  %v7459_v24 = vsel %vm15243_vm5, %v13837_v19, -inf  ;;  %v7458_v62 = vsel %vm15244_vm6, %v13841_v32, -inf  ;;  %v13855_v48 = vmul.f32 %v13737_v38, %v13625_v47  ;;  %vm15258_vm5 = vmmov %vm15142_vm0 }
 0xc44   :  { %v13857_v17 = vpop.eup %9612  ;;  %v7711_v36 = vadd.f32 %v7710_v23, %v7709_v31  ;;  %v7644_v50 = vsel %vm15245_vm7, %v13847_v25, 0.0  ;;  %v7496_v30 = vsub.f32 %v13767_v21, %v7430_v40  ;;  %v7497_v5 = vsub.f32 %v13747_v61, %v7430_v40  ;;  %vm15259_vm6 = vmmov %vm15142_vm0 }
 0xc45   :  { %v7645_v58 = vsel %vm15246_vm8, %v13857_v17, 0.0  ;;  %v7439_v13 = vmax.f32 %v7437_v29, %v7438_v3  ;;  %v7445_v44 = vrot.slane %v7444_v18, 2  ;;  %v7453_v51 = vmax.f32 %v7451_v46, %v7452_v59  ;;  %vm15260_vm7 = vmmov %vm15142_vm0 }
 0xc46   :  { %v13865_v41 = vpop.eup %9614  ;;  %v7712_v47 = vrot.slane %v7711_v36, 2  ;;  %v7646_v38 = vadd.f32 %v7645_v58, %v7644_v50  ;;  %v7548_v10 = vmul.f32 1.442695, %v7496_v30  ;;  %v7550_v16 = vmul.f32 1.442695, %v7497_v5  ;;  %vm15261_vm8 = vmmov %vm15142_vm0 }
 0xc47   :  { %v13867_v31 = vpop.eup %9616  ;;  %v7498_v6 = vsub.f32 %v13787_v7, %v7439_v13  ;;  %v7499_v21 = vsub.f32 %v13771_v0, %v7439_v13  ;;  %v7446_v60 = vmax.f32 %v7444_v18, %v7445_v44  ;;  %v7454_v61 = vrot.slane %v7453_v51, 2 }
 0xc48   :  { %v13871_v23 = vpop.eup %9618  ;;  %v7713_v40 = vadd.f32 %v7712_v47, %v7711_v36  ;;  %v7647_v29 = vrot.slane %v7646_v38, 4  ;;  %v7653_v46 = vsel %vm15247_vm9, %v13867_v31, 0.0  ;;  %9620 = vpow2.f32 %v7548_v10  ;;  %vm15262_vm9 = vmmov %vm15142_vm0 }
 0xc49   :  { %v7654_v59 = vsel %vm15248_vm10, %v13871_v23, 0.0  ;;  %9622 = vpow2.f32 %v7550_v16  ;;  %v7552_v3 = vmul.f32 1.442695, %v7498_v6  ;;  %v7554_v50 = vmul.f32 1.442695, %v7499_v21  ;;  %vm15263_vm10 = vmmov %vm15142_vm0 }
 0xc4a   :  { %v7714_v30 = vrot.slane %v7713_v40, 1  ;;  %v7648_v7 = vadd.f32 %v7647_v29, %v7646_v38  ;;  %v7655_v5 = vadd.f32 %v7654_v59, %v7653_v46  ;;  %v7447_v0 = vrot.slane %v7446_v60, 1 }
 0xc4b   :  { %9624 = vpow2.f32 %v7552_v3  ;;  %v7455_v18 = vmax.f32 %v7453_v51, %v7454_v61  ;;  %v7460_v58 = vmax.f32 %v7458_v62, %v7459_v24  ;;  %v13879_v36 = vmul.f32 %v13755_v14, %v13642_v53 }
 0xc4c   :  { %v7715_v13 = vadd.f32 %v7714_v30, %v7713_v40  ;;  %v7649_v44 = vrot.slane %v7648_v7, 2  ;;  %v7656_v47 = vrot.slane %v7655_v5, 4  ;;  %9626 = vpow2.f32 %v7554_v50 }
 0xc4d   :  { %v7448_v10 = vmax.f32 %v7446_v60, %v7447_v0  ;;  %v7456_v4 = vrot.slane %v7455_v18, 1  ;;  %v7461_v16 = vrot.slane %v7460_v58, 4  ;;  %v7739_v6 = vmul.f32 %v13773_v43, %v13658_v22 }
 0xc4e   :  { %9628 = vrcp.f32 %v7715_v13  ;;  %v7650_v38 = vadd.f32 %v7649_v44, %v7648_v7  ;;  %v7657_v21 = vadd.f32 %v7656_v47, %v7655_v5  ;;  %v13885_v24 = vmul.f32 %v13789_v33, %v13677_v2 }
 0xc4f   :  { %v7500_v53 = vsub.f32 %v13805_v28, %v7448_v10  ;;  %v7501_v14 = vsub.f32 %v13801_v52, %v7448_v10  ;;  %v7457_v62 = vmax.f32 %v7455_v18, %v7456_v4  ;;  %v7462_v51 = vmax.f32 %v7460_v58, %v7461_v16 }
 0xc50   :  { %v7651_v61 = vrot.slane %v7650_v38, 1  ;;  %v7658_v60 = vrot.slane %v7657_v21, 2  ;;  %v7742_v40 = vmul.f32 %v13807_v12, %v13691_v15  ;;  %v7743_v22 = vmul.f32 %v13807_v12, %v13695_v26 }
 0xc51   :  { %v7556_v43 = vmul.f32 1.442695, %v7500_v53  ;;  %v7558_v29 = vmul.f32 1.442695, %v7501_v14  ;;  %v7502_v46 = vsub.f32 %v13821_v11, %v7457_v62  ;;  %v7503_v2 = vsub.f32 %v13813_v37, %v7457_v62 }
 0xc52   :  { %v13895_v33 = vpop.eup %9620  ;;  %v7652_v28 = vadd.f32 %v7651_v61, %v7650_v38  ;;  %v7659_v52 = vadd.f32 %v7658_v60, %v7657_v21  ;;  %v7463_v4 = vrot.slane %v7462_v51, 2  ;;  %v7744_v59 = vmul.f32 %v13833_v1, %v13713_v42 }
 0xc53   :  { %v13899_v3 = vpop.eup %9622  ;;  %v7662_v15 = vsel %vm15249_vm11, %v13895_v33, 0.0  ;;  %9630 = vpow2.f32 %v7556_v43  ;;  %v7560_v26 = vmul.f32 1.442695, %v7502_v46  ;;  %v7562_v12 = vmul.f32 1.442695, %v7503_v2  ;;  %vm15264_vm11 = vmmov %vm15142_vm0 }
 0xc54   :  { %9632 = vrcp.f32 %v7652_v28  ;;  %v7660_v11 = vrot.slane %v7659_v52, 1  ;;  %v7663_v37 = vsel %vm15250_vm12, %v13899_v3, 0.0  ;;  %v7464_v50 = vmax.f32 %v7462_v51, %v7463_v4  ;;  %vm15265_vm12 = vmmov %vm15142_vm0 }
 0xc55   :  { %v13905_v30 = vpop.eup %9624  ;;  %v7664_v7 = vadd.f32 %v7663_v37, %v7662_v15  ;;  %9634 = vpow2.f32 %v7558_v29  ;;  %v7745_v42 = vmul.f32 %v13833_v1, %v13725_v57  ;;  %v7746_v5 = vmul.f32 %v13865_v41, %v13739_v34 }
 0xc56   :  { %v13911_v0 = vpop.eup %9626  ;;  %v7661_v18 = vadd.f32 %v7660_v11, %v7659_v52  ;;  %v7671_v58 = vsel %vm15251_vm13, %v13905_v30, 0.0  ;;  %9636 = vpow2.f32 %v7560_v26  ;;  %v7465_v13 = vrot.slane %v7464_v50, 1  ;;  %vm15266_vm13 = vmmov %vm15142_vm0 }
 0xc57   :  { %v7665_v44 = vrot.slane %v7664_v7, 4  ;;  %v7672_v47 = vsel %vm15252_vm14, %v13911_v0, 0.0  ;;  %9638 = vpow2.f32 %v7562_v12  ;;  %v7747_v10 = vmul.f32 %v13865_v41, %v13749_v56  ;;  %vm15267_vm14 = vmmov %vm15142_vm0 }
 0xc58   :  { %v13919_v57 = vpop.eup %9628  ;;  %9640 = vrcp.f32 %v7661_v18  ;;  %v7673_v34 = vadd.f32 %v7672_v47, %v7671_v58  ;;  %v7466_v1 = vmax.f32 %v7464_v50, %v7465_v13  ;;  %v7764_v16 = vmul.f32 %v13729_v39, %v15098_v35 }
 0xc59   :  { %v7666_v38 = vadd.f32 %v7665_v44, %v7664_v7  ;;  %v7765_v21 = vmul.f32 %v13845_v49, %v15099_v45  ;;  %v7766_v53 = vmul.f32 %v13743_v63, %v15098_v35  ;;  %v7767_v14 = vmul.f32 %v13855_v48, %v15099_v45 }
 0xc5a   :  { %v7674_v62 = vrot.slane %v7673_v34, 4  ;;  %v7504_v56 = vsub.f32 %v13841_v32, %v7466_v1  ;;  %v7505_v41 = vsub.f32 %v13837_v19, %v7466_v1  ;;  %v7768_v51 = vmul.f32 %v13761_v8, %v15098_v35 }
 0xc5b   :  { %v7667_v61 = vrot.slane %v7666_v38, 2  ;;  %v7769_v39 = vmul.f32 %v13879_v36, %v15099_v45  ;;  %v7770_v49 = vmul.f32 %v13777_v9, %v15098_v35  ;;  %v7771_v63 = vmul.f32 %v7739_v6, %v15099_v45 }
 0xc5c   :  { %v7675_v60 = vadd.f32 %v7674_v62, %v7673_v34  ;;  %v7564_v43 = vmul.f32 1.442695, %v7504_v56  ;;  %v7566_v48 = vmul.f32 1.442695, %v7505_v41  ;;  %v7772_v32 = vmul.f32 %v13793_v27, %v15098_v35 }
 0xc5d   :  { %v13940_v29 = vpop.eup %9630  ;;  %v7668_v19 = vadd.f32 %v7667_v61, %v7666_v38  ;;  %v13944_v8 = vmul.f32 %v13885_v24, %v15099_v45  ;;  %v13947_v36 = vmul.f32 %v7742_v40, %v15098_v35  ;;  %v13950_v9 = vmul.f32 %v7743_v22, %v15099_v45 }
 0xc5e   :  { %v13952_v6 = vpop.eup %9632  ;;  %v7676_v46 = vrot.slane %v7675_v60, 2  ;;  %v7680_v2 = vsel %vm15253_vm15, %v13940_v29, 0.0  ;;  %9642 = vpow2.f32 %v7564_v43  ;;  %v13957_v27 = vmul.f32 %v7744_v59, %v15098_v35 }
 0xc5f   :  { %v13959_v28 = vpop.eup %9634  ;;  %v13963_v24 = vmul.f32 %v13952_v6, %v13847_v25  ;;  %v7669_v40 = vrot.slane %v7668_v19, 1  ;;  %9644 = vpow2.f32 %v7566_v48  ;;  %v13966_v22 = vmul.f32 %v7745_v42, %v15099_v45 }
 0xc60   :  { %v13968_v52 = vpop.eup %9636  ;;  %v7677_v4 = vadd.f32 %v7676_v46, %v7675_v60  ;;  %v7681_v15 = vsel %vm15142_vm0, %v13959_v28, 0.0  ;;  %v13973_v59 = vmul.f32 %v7746_v5, %v15098_v35  ;;  %v13976_v26 = vmul.f32 %v7747_v10, %v15099_v45 }
 0xc61   :  { %v13978_v12 = vpop.eup %9638  ;;  %v7670_v25 = vadd.f32 %v7669_v40, %v7668_v19  ;;  %v7682_v11 = vadd.f32 %v7681_v15, %v7680_v2  ;;  %v7689_v37 = vsel %vm15254_vm1, %v13968_v52, 0.0  ;;  %v7796_v50 = vsel %vm15255_vm3, %v7764_v16, 0.0  ;;  %vm15268_vm1 = vmmov %vm15142_vm0 }
 0xc62   :  { %v13983_v7 = vpop.eup %9640  ;;  %v7678_v42 = vrot.slane %v7677_v4, 1  ;;  %v7690_v18 = vsel %vm15256_vm4, %v13978_v12, 0.0  ;;  %v7797_v5 = vsel %vm15257_vm2, %v7765_v21, 0.0  ;;  %v7805_v58 = vsel %vm15258_vm5, %v7766_v53, 0.0  ;;  %vm15269_vm3 = vmmov %vm15142_vm0 }
 0xc63   :  { %v13991_v13 = vmul.f32 %v13983_v7, %v13867_v31  ;;  %9646 = vrcp.f32 %v7670_v25  ;;  %v7683_v44 = vrot.slane %v7682_v11, 4  ;;  %v7691_v47 = vadd.f32 %v7690_v18, %v7689_v37  ;;  %vm15270_vm4 = vmmov %vm15142_vm0 }
 0xc64   :  { %v7679_v10 = vadd.f32 %v7678_v42, %v7677_v4  ;;  %v7798_v34 = vadd.f32 %v7797_v5, %v7796_v50  ;;  %v7806_v1 = vsel %vm15259_vm6, %v7767_v14, 0.0  ;;  %v7814_v16 = vsel %vm15260_vm7, %v7768_v51, 0.0  ;;  %vm15272_vm2 = vmmov %vm15142_vm0 }
 0xc65   :  { %v7684_v38 = vadd.f32 %v7683_v44, %v7682_v11  ;;  %v7692_v62 = vrot.slane %v7691_v47, 4  ;;  %v7807_v56 = vadd.f32 %v7806_v1, %v7805_v58  ;;  %v7815_v21 = vsel %vm15261_vm8, %v7769_v39, 0.0  ;;  %vm15273_vm5 = vmmov %vm15142_vm0 }
 0xc66   :  { %9648 = vrcp.f32 %v7679_v10  ;;  %v7799_v53 = vrot.slane %v7798_v34, 4  ;;  %v7816_v41 = vadd.f32 %v7815_v21, %v7814_v16  ;;  %v7823_v31 = vsel %vm15262_vm9, %v7770_v49, 0.0 }
 0xc67   :  { %v7685_v61 = vrot.slane %v7684_v38, 2  ;;  %v7693_v60 = vadd.f32 %v7692_v62, %v7691_v47  ;;  %v7808_v43 = vrot.slane %v7807_v56, 4  ;;  %v7824_v48 = vsel %vm15263_vm10, %v7771_v63, 0.0 }
 0xc68   :  { %v13998_v19 = vpop.eup %9642  ;;  %v7800_v14 = vadd.f32 %v7799_v53, %v7798_v34  ;;  %v7817_v46 = vrot.slane %v7816_v41, 4  ;;  %v7825_v51 = vadd.f32 %v7824_v48, %v7823_v31  ;;  %v7832_v2 = vsel %vm15264_vm11, %v7772_v32, 0.0 }
 0xc69   :  { %v14001_v40 = vpop.eup %9644  ;;  %v7686_v39 = vadd.f32 %v7685_v61, %v7684_v38  ;;  %v7694_v4 = vrot.slane %v7693_v60, 2  ;;  %v7698_v15 = vsel %vm15265_vm12, %v13998_v19, 0.0  ;;  %v7809_v49 = vadd.f32 %v7808_v43, %v7807_v56  ;;  %vm15280_vm12 = vmmov %vm15142_vm0 }
 0xc6a   :  { %v7699_v25 = vsel %vm15266_vm13, %v14001_v40, 0.0  ;;  %v7801_v11 = vrot.slane %v7800_v14, 2  ;;  %v7818_v63 = vadd.f32 %v7817_v46, %v7816_v41  ;;  %v7826_v37 = vrot.slane %v7825_v51, 4  ;;  %vm15281_vm13 = vmmov %vm15142_vm0 }
 0xc6b   :  { %v7687_v50 = vrot.slane %v7686_v39, 1  ;;  %v7695_v42 = vadd.f32 %v7694_v4, %v7693_v60  ;;  %v7700_v18 = vadd.f32 %v7699_v25, %v7698_v15  ;;  %v7810_v5 = vrot.slane %v7809_v49, 2 }
 0xc6c   :  { %v7802_v58 = vadd.f32 %v7801_v11, %v7800_v14  ;;  %v7819_v32 = vrot.slane %v7818_v63, 2  ;;  %v7827_v44 = vadd.f32 %v7826_v37, %v7825_v51  ;;  %v7833_v47 = vsel %vm15267_vm14, %v13944_v8, 0.0  ;;  %vm15282_vm14 = vmmov %vm15142_vm0 }
 0xc6d   :  { %vm8065_vm15 = vcmask 123904   ;;  %v9647_v10 = vpop.eup %9646  ;;  %v7688_v34 = vadd.f32 %v7687_v50, %v7686_v39  ;;  %v7696_v1 = vrot.slane %v7695_v42, 1  ;;  %v7701_v16 = vrot.slane %v7700_v18, 4 }
 0xc6e   :  { %v7811_v38 = vadd.f32 %v7810_v5, %v7809_v49  ;;  %v14010_v62 = vmul.f32 %v9647_v10, %v13895_v33  ;;  %v7803_v56 = vrot.slane %v7802_v58, 1  ;;  %v7820_v21 = vadd.f32 %v7819_v32, %v7818_v63 }
 0xc6f   :  { %v7828_v53 = vrot.slane %v7827_v44, 2  ;;  %9650 = vrcp.f32 %v7688_v34  ;;  %v7697_v41 = vadd.f32 %v7696_v1, %v7695_v42  ;;  %v7702_v31 = vadd.f32 %v7701_v16, %v7700_v18  ;;  %v14026_v18 = vld [vmem:[%s15271_s11] sm:$0x3] }
 0xc70   :  { %v7812_v61 = vrot.slane %v7811_v38, 1  ;;  %v9649_v60 = vpop.eup %9648  ;;  %v7804_v43 = vadd.f32 %v7803_v56, %v7802_v58  ;;  %v7821_v48 = vrot.slane %v7820_v21, 1  ;;  %v7834_v14 = vadd.f32 %v7833_v47, %v7832_v2 }
 0xc71   :  { %v7829_v8 = vadd.f32 %v7828_v53, %v7827_v44  ;;  %v14013_v46 = vmul.f32 %v9649_v60, %v13905_v30  ;;  %9652 = vrcp.f32 %v7697_v41  ;;  %v7703_v51 = vrot.slane %v7702_v31, 2 }
 0xc72   :  { %v7813_v39 = vadd.f32 %v7812_v61, %v7811_v38  ;;  %v7822_v33 = vadd.f32 %v7821_v48, %v7820_v21  ;;  %v7835_v15 = vrot.slane %v7834_v14, 4  ;;  %v7841_v49 = vsel %vm15142_vm0, %v13947_v36, 0.0 }
 0xc73   :  { %v7830_v4 = vrot.slane %v7829_v8, 1  ;;  %v7704_v25 = vadd.f32 %v7703_v51, %v7702_v31  ;;  %v7842_v11 = vsel %vm15268_vm1, %v13950_v9, 0.0  ;;  %v7850_v63 = vsel %vm15269_vm3, %v13957_v27, 0.0  ;;  %vm15284_vm1 = vmmov %vm15142_vm0 }
 0xc74   :  { %v7851_v30 = vsel %vm15270_vm4, %v13966_v22, 0.0  ;;  %v7836_v37 = vadd.f32 %v7835_v15, %v7834_v14  ;;  %v7843_v50 = vadd.f32 %v7842_v11, %v7841_v49  ;;  %v7859_v5 = vsel %vm15272_vm2, %v13973_v59, 0.0  ;;  %vm15285_vm3 = vmmov %vm15142_vm0 }
 0xc75   :  { %v7831_v2 = vadd.f32 %v7830_v4, %v7829_v8  ;;  %v7852_v42 = vadd.f32 %v7851_v30, %v7850_v63  ;;  %v7705_v36 = vrot.slane %v7704_v25, 1  ;;  %v7860_v9 = vsel %vm15273_vm5, %v13976_v26, 0.0  ;;  %vm15286_vm4 = vmmov %vm15142_vm0 }
 0xc76   :  { %vm15274_vm6 = vcmask 1041409   ;;  %v7837_v58 = vrot.slane %v7836_v37, 2  ;;  %v7844_v22 = vrot.slane %v7843_v50, 4  ;;  %v7861_v44 = vadd.f32 %v7860_v9, %v7859_v5  ;;  %vm15287_vm2 = vmmov %vm15142_vm0 }
 0xc77   :  { %v7956_v27 = vsel %vm15274_vm6, %v7813_v39, %v7804_v43  ;;  %v7853_v32 = vrot.slane %v7852_v42, 4  ;;  %v7706_v47 = vadd.f32 %v7705_v36, %v7704_v25  ;;  %vm15275_vm7 = vcmask 1042434   ;;  %vm15288_vm5 = vmmov %vm15142_vm0 }
 0xc78   :  { %v7957_v34 = vsel %vm15275_vm7, %v7822_v33, %v7956_v27  ;;  %v14036_v1 = vsel %vm8065_vm15, %v14026_v18, 0.0  ;;  %v7749_v16 = vmul.f32 %v13952_v6, %v13857_v17  ;;  %v7838_v59 = vadd.f32 %v7837_v58, %v7836_v37  ;;  %vm15289_vm6 = vmmov %vm15142_vm0 }
 0xc79   :  { %v7845_v38 = vadd.f32 %v7844_v22, %v7843_v50  ;;  %v7854_v56 = vadd.f32 %v7853_v32, %v7852_v42  ;;  %v7862_v26 = vrot.slane %v7861_v44, 4  ;;  %v9651_v21 = vpop.eup %9650  ;;  %9654 = vrcp.f32 %v7706_v47  ;;  %vm15290_vm7 = vmmov %vm15142_vm0 }
 0xc7a   :  { %vm15276_vm8 = vcmask 1043459   ;;  %v7751_v41 = vmul.f32 %v13983_v7, %v13871_v23  ;;  %v7753_v31 = vmul.f32 %v9647_v10, %v13899_v3  ;;  %v7756_v61 = vmul.f32 %v9651_v21, %v13940_v29 }
 0xc7b   :  { %v7958_v53 = vsel %vm15276_vm8, %v7831_v2, %v7957_v34  ;;  %v7839_v43 = vrot.slane %v7838_v59, 1  ;;  %v7846_v48 = vrot.slane %v7845_v38, 2  ;;  %v7855_v8 = vrot.slane %v7854_v56, 2  ;;  %v9653_v14 = vpop.eup %9652  ;;  %vm15291_vm8 = vmmov %vm15142_vm0 }
 0xc7c   :  { %v7863_v17 = vadd.f32 %v7862_v26, %v7861_v44  ;;  %v7755_v6 = vmul.f32 %v9649_v60, %v13911_v0  ;;  %v7757_v51 = vmul.f32 %v9651_v21, %v13959_v28  ;;  %v7762_v39 = vmul.f32 %v13919_v57, %v13815_v55 }
 0xc7d   :  { %v7840_v33 = vadd.f32 %v7839_v43, %v7838_v59  ;;  %v7847_v4 = vadd.f32 %v7846_v48, %v7845_v38  ;;  %v7856_v15 = vadd.f32 %v7855_v8, %v7854_v56  ;;  %v7758_v23 = vmul.f32 %v9653_v14, %v13968_v52 }
 0xc7e   :  { %v7864_v3 = vrot.slane %v7863_v17, 2  ;;  %v7759_v29 = vmul.f32 %v9653_v14, %v13978_v12  ;;  %v7763_v7 = vmul.f32 %v13919_v57, %v13823_v54  ;;  %v7780_v10 = vmul.f32 %v13963_v24, %v15098_v35 }
 0xc7f   :  { %v7848_v0 = vrot.slane %v7847_v4, 1  ;;  %v7857_v60 = vrot.slane %v7856_v15, 1  ;;  %vm15277_vm9 = vcmask 1044484   ;;  %v7781_v55 = vmul.f32 %v7749_v16, %v15099_v45 }
 0xc80   :  { %v7959_v28 = vsel %vm15277_vm9, %v7840_v33, %v7958_v53  ;;  %v7865_v49 = vadd.f32 %v7864_v3, %v7863_v17  ;;  %v7782_v25 = vmul.f32 %v13991_v13, %v15098_v35  ;;  %v7783_v52 = vmul.f32 %v7751_v41, %v15099_v45  ;;  %vm15292_vm9 = vmmov %vm15142_vm0 }
 0xc81   :  { %v7784_v12 = vmul.f32 %v14010_v62, %v15098_v35  ;;  %v7849_v11 = vadd.f32 %v7848_v0, %v7847_v4  ;;  %v7858_v54 = vadd.f32 %v7857_v60, %v7856_v15  ;;  %v7785_v57 = vmul.f32 %v7753_v31, %v15099_v45 }
 0xc82   :  { %v7786_v24 = vmul.f32 %v14013_v46, %v15098_v35  ;;  %v7866_v63 = vrot.slane %v7865_v49, 1  ;;  %v7787_v30 = vmul.f32 %v7755_v6, %v15099_v45  ;;  %v7788_v2 = vmul.f32 %v7756_v61, %v15098_v35 }
 0xc83   :  { %v7789_v37 = vmul.f32 %v7757_v51, %v15099_v45  ;;  %vm15278_vm10 = vcmask 1045509   ;;  %v7790_v50 = vmul.f32 %v7758_v23, %v15098_v35  ;;  %v7791_v62 = vmul.f32 %v7759_v29, %v15099_v45  ;;  %v9655_v36 = vpop.eup %9654 }
 0xc84   :  { %v7960_v13 = vsel %vm15278_vm10, %v7849_v11, %v7959_v28  ;;  %v7794_v42 = vmul.f32 %v7762_v39, %v15098_v35  ;;  %v7867_v5 = vadd.f32 %v7866_v63, %v7865_v49  ;;  %vm15279_vm11 = vcmask 1046534   ;;  %vm15293_vm10 = vmmov %vm15142_vm0 }
 0xc85   :  { %v7961_v9 = vsel %vm15279_vm11, %v7858_v54, %v7960_v13  ;;  %v7795_v46 = vmul.f32 %v7763_v7, %v15099_v45  ;;  %v7868_v27 = vsel %vm15280_vm12, %v7780_v10, 0.0  ;;  %v7760_v58 = vmul.f32 %v9655_v36, %v13998_v19  ;;  %vm15294_vm11 = vmmov %vm15142_vm0 }
 0xc86   :  { %v7761_v22 = vmul.f32 %v9655_v36, %v14001_v40  ;;  %v7869_v32 = vsel %vm15281_vm13, %v7781_v55, 0.0  ;;  %v7877_v44 = vsel %vm15282_vm14, %v7782_v25, 0.0  ;;  %vm15283_vm15 = vcmask 1047559   ;;  %vm15295_vm12 = vmmov %vm15142_vm0 }
 0xc87   :  { %v7962_v47 = vsel %vm15283_vm15, %v7867_v5, %v7961_v9  ;;  %v7870_v34 = vadd.f32 %v7869_v32, %v7868_v27  ;;  %v7878_v16 = vsel %vm15142_vm0, %v7783_v52, 0.0  ;;  %v7886_v59 = vsel %vm15284_vm1, %v7784_v12, 0.0  ;;  %vm15296_vm13 = vmmov %vm15142_vm0 }
 0xc88   :  { %v7972_v38 = vsel %vm15285_vm3, %v7962_v47, 0.0  ;;  %v7792_v56 = vmul.f32 %v7760_v58, %v15098_v35  ;;  %v7793_v26 = vmul.f32 %v7761_v22, %v15099_v45  ;;  %v7879_v19 = vadd.f32 %v7878_v16, %v7877_v44 }
 0xc89   :  { %7973 = vadd.xlane.f32.xlu0 %v7972_v38  ;;  %v7871_v40 = vrot.slane %v7870_v34, 4  ;;  %v7887_v21 = vsel %vm15286_vm4, %v7785_v57, 0.0  ;;  %v7895_v53 = vsel %vm15287_vm2, %v7786_v24, 0.0  ;;  %v7896_v41 = vsel %vm15288_vm5, %v7787_v30, 0.0 }
 0xc8a   :  { %v7880_v31 = vrot.slane %v7879_v19, 4  ;;  %v7888_v61 = vadd.f32 %v7887_v21, %v7886_v59  ;;  %v7897_v43 = vadd.f32 %v7896_v41, %v7895_v53  ;;  %v7904_v48 = vsel %vm15289_vm6, %v7788_v2, 0.0  ;;  %vm15305_vm6 = vmmov %vm15288_vm5 }
 0xc8b   :  { %v7872_v8 = vadd.f32 %v7871_v40, %v7870_v34  ;;  %v7905_v14 = vsel %vm15290_vm7, %v7789_v37, 0.0  ;;  %v7913_v35 = vsel %vm15291_vm8, %v7790_v50, 0.0  ;;  %v7914_v45 = vsel %vm15292_vm9, %v7791_v62, 0.0  ;;  %vm15306_vm9 = vmmov %vm15288_vm5 }
 0xc8c   :  { %v7881_v17 = vadd.f32 %v7880_v31, %v7879_v19  ;;  %v7889_v6 = vrot.slane %v7888_v61, 4  ;;  %v7898_v51 = vrot.slane %v7897_v43, 4  ;;  %v7906_v39 = vadd.f32 %v7905_v14, %v7904_v48 }
 0xc8d   :  { %8067 = vadd.xlane.f32.xlu0 %v14036_v1  ;;  %v7873_v33 = vrot.slane %v7872_v8, 2  ;;  %v7915_v4 = vadd.f32 %v7914_v45, %v7913_v35  ;;  %v7922_v15 = vsel %vm15293_vm10, %v7792_v56, 0.0  ;;  %v7923_v23 = vsel %vm15294_vm11, %v7793_v26, 0.0  ;;  %v15304_v35 = vld [vmem:[#allocation38_spill] sm:$0xff] }
 0xc8e   :  { %v7882_v3 = vrot.slane %v7881_v17, 2  ;;  %v7890_v29 = vadd.f32 %v7889_v6, %v7888_v61  ;;  %v7899_v7 = vadd.f32 %v7898_v51, %v7897_v43  ;;  %v7907_v10 = vrot.slane %v7906_v39, 4 }
 0xc8f   :  { %v7874_v0 = vadd.f32 %v7873_v33, %v7872_v8  ;;  %v7916_v60 = vrot.slane %v7915_v4, 4  ;;  %v7924_v28 = vadd.f32 %v7923_v23, %v7922_v15  ;;  %v7931_v55 = vsel %vm15295_vm12, %v7794_v42, 0.0  ;;  %v8318_v33 = vld [vmem:[%s14136_s22] ss:$0 sm:$0xff] }
 0xc90   :  { %v7883_v49 = vadd.f32 %v7882_v3, %v7881_v17  ;;  %v7891_v25 = vrot.slane %v7890_v29, 2  ;;  %v7900_v52 = vrot.slane %v7899_v7, 2  ;;  %v7908_v12 = vadd.f32 %v7907_v10, %v7906_v39 }
 0xc91   :  { %6389 = vadd.xlane.f32.xlu0 %v13597_v20  ;;  %v7875_v1 = vrot.slane %v7874_v0, 1  ;;  %v7917_v11 = vadd.f32 %v7916_v60, %v7915_v4  ;;  %v7925_v54 = vrot.slane %v7924_v28, 4  ;;  %v7932_v57 = vsel %vm15296_vm13, %v7795_v46, 0.0 }
 0xc92   :  { %v7884_v24 = vrot.slane %v7883_v49, 1  ;;  %v7892_v63 = vadd.f32 %v7891_v25, %v7890_v29  ;;  %v7901_v30 = vadd.f32 %v7900_v52, %v7899_v7  ;;  %v7909_v2 = vrot.slane %v7908_v12, 2  ;;  %v8367_v29 = vld [vmem:[%s14136_s22 + $0x1] ss:$0 sm:$0xff] }
 0xc93   :  { %v7876_v37 = vadd.f32 %v7875_v1, %v7874_v0  ;;  %v7918_v13 = vrot.slane %v7917_v11, 2  ;;  %v7926_v50 = vadd.f32 %v7925_v54, %v7924_v28  ;;  %v7933_v62 = vadd.f32 %v7932_v57, %v7931_v55 }
 0xc94   :  { %v7885_v42 = vadd.f32 %v7884_v24, %v7883_v49  ;;  %v7893_v36 = vrot.slane %v7892_v63, 1  ;;  %v7902_v5 = vrot.slane %v7901_v30, 1  ;;  %v7910_v9 = vadd.f32 %v7909_v2, %v7908_v12 }
 0xc95   :  { %v7919_v27 = vadd.f32 %v7918_v13, %v7917_v11  ;;  %v7927_v58 = vrot.slane %v7926_v50, 2  ;;  %v7934_v20 = vrot.slane %v7933_v62, 4  ;;  %vm15297_vm14 = vcmask 1041409  }
 0xc96   :  { %v7894_v22 = vadd.f32 %v7893_v36, %v7892_v63  ;;  %v7903_v32 = vadd.f32 %v7902_v5, %v7901_v30  ;;  %v7911_v44 = vrot.slane %v7910_v9, 1  ;;  %v7963_v46 = vsel %vm15297_vm14, %v7885_v42, %v7876_v37 }
 0xc97   :  { %v7920_v47 = vrot.slane %v7919_v27, 1  ;;  %v7928_v34 = vadd.f32 %v7927_v58, %v7926_v50  ;;  %v7935_v16 = vadd.f32 %v7934_v20, %v7933_v62  ;;  %vm15298_vm15 = vcmask 1042434  }
 0xc98   :  { %v7912_v59 = vadd.f32 %v7911_v44, %v7910_v9  ;;  %v7964_v38 = vsel %vm15298_vm15, %v7894_v22, %v7963_v46  ;;  %vm15299_vm0 = vcmask 1043459   ;;  %vm15300_vm1 = vcmask 1044484  }
 0xc99   :  { %v7921_v56 = vadd.f32 %v7920_v47, %v7919_v27  ;;  %v7929_v26 = vrot.slane %v7928_v34, 1  ;;  %v7936_v19 = vrot.slane %v7935_v16, 2  ;;  %v7965_v40 = vsel %vm15299_vm0, %v7903_v32, %v7964_v38 }
 0xc9a   :  { %v7966_v21 = vsel %vm15300_vm1, %v7912_v59, %v7965_v40  ;;  %vm15301_vm3 = vcmask 1045509   ;;  %vm15302_vm4 = vcmask 1046534   ;;  %vm15303_vm2 = vcmask 1047559  }
 0xc9b   :  { %v7930_v53 = vadd.f32 %v7929_v26, %v7928_v34  ;;  %v7937_v41 = vadd.f32 %v7936_v19, %v7935_v16  ;;  %v7967_v31 = vsel %vm15301_vm3, %v7921_v56, %v7966_v21  ;;  %v6391_v45 = vsel %vm15305_vm6, %v15304_v35, 0.0 }
 0xc9c   :  { %v9798_v17 = vmov 0.0|0.0   ;;  %vm9799_vm7 = vmmov 0   ;;  %v9800_v6 = vmov 0.0   ;;  %vm7988_vm8 = vcmask 7168  }
 0xc9d   :  { %v7938_v61 = vrot.slane %v7937_v41, 1  ;;  %v7968_v43 = vsel %vm15302_vm4, %v7930_v53, %v7967_v31  ;;  %9122 = vmatprep.subr.bf16.mxu1 %v9798_v17  ;;  %9023 = vmatprep.mubr.msk.f32.mxu1 %vm9799_vm7, %v9800_v6  ;;  %vm8071_vm10 = vcmask 1024  }
 0xc9f   :  { %v7939_v48 = vadd.f32 %v7938_v61, %v7937_v41 }
 0xca1   :  { %v7969_v8 = vsel %vm15303_vm2, %v7939_v48, %v7968_v43 }
 0xca2   :  { %v7975_v14 = vsel %vm15288_vm5, %v7969_v8, 0.0 }
 0xca3   :  { %7976 = vadd.xlane.f32.xlu1 %v7975_v14 }
 0xca7   :  { %6392 = vadd.xlane.f32.xlu1 %v6391_v45 }
 0xd16   :  { %v7974_v51 = vpop.xlane.xlu0 %7973 }
 0xd17   :  { %v7978_v3 = vmul.f32 0.0625, %v7974_v51 }
 0xd19   :  { %v7986_v0 = vadd.f32 %v8367_v29, %v7978_v3 }
 0xd1a   :  { %v8068_v39 = vpop.xlane.xlu0 %8067 }
 0xd1b   :  { %9656 = vrcp.f32 %v8068_v39 }
 0xd1e   :  { %v6390_v4 = vpop.xlane.xlu0 %6389 }
 0xd1f   :  { %v6394_v15 = vmul.f32 0.0625, %v6390_v4 }
 0xd21   :  { %v6402_v23 = vadd.f32 %v8318_v33, %v6394_v15 }
 0xd23   :  { %7989 = vst.msk [vmem:[%s14137_s23] sm:$0xff] %vm7988_vm8, %v6402_v23 }
 0xd25   :  { %v9657_v52 = vpop.eup %9656 }
 0xd30   :  { %v7977_v7 = vpop.xlane.xlu1 %7976 }
 0xd31   :  { %v7979_v10 = vmul.f32 0.0625, %v7977_v7 }
 0xd33   :  { %v7987_v60 = vadd.f32 %v8367_v29, %v7979_v10 }
 0xd34   :  { %v6393_v28 = vpop.xlane.xlu1 %6392 }
 0xd35   :  { %v9123_v55 = vpack.c.bf16 %v7987_v60, %v7986_v0  ;;  %v6395_v49 = vmul.f32 0.0625, %v6393_v28 }
 0xd37   :  { %v6403_v25 = vadd.f32 %v8318_v33, %v6395_v49  ;;  %9124 = vmatpush3.bf16.msra.mxu1 %v9123_v55 }
 0xd39   :  { %7990 = vst.msk [vmem:[%s14137_s23 + $0x8] sm:$0xff] %vm7988_vm8, %v6403_v25 }
 0xd3a   :  { %9024 = vmatmul.mubr.msk.f32.vlgmr.msra.gmra.mrb[36].mxu1 %vm15306_vm9, %v14026_v18 }
 0xe0d   :  { %v8061_v12 = vpop.f32.mrb[36].mxu1 }
 0xe0e   :  { %v8070_v1 = vmul.f32 %v9657_v52, %v8061_v12  ;;  %v9025_v11 = vpop.f32.mrb[37].mxu1 }
 0xe10   :  { %8072 = vst.msk [vmem:[%s14138_s24] sm:$0x3] %vm8071_vm10, %v8070_v1 }

</bundles_post_ra>
